<compile_context>
chip_gen: v7x
topology: tpu7x:2x2x1
jax: 0.10.0
libtpu: 0.0.40
codegen_flags: <defaults>
</compile_context>

<pallas_src>
import functools

import jax
import jax.numpy as jnp
from jax import lax
from jax.experimental import pallas as pl
from jax.experimental.pallas import tpu as pltpu

NPAD = 128  # lane-dense channel/column width for every kernel operand/output


# ----------------------------- fused Pallas kernel -----------------------------

def _fused_yolo_kernel(x_ref, wtap_ref, cshift_ref, whead_ref, hbias_ref, dec_ref, o_ref,
                       *, batch, hp, pw, leaky):
    """Fully fused AdaptiveYOLO forward, whole batch, one grid step.

    x_ref     : (B, 4, flat_pad, Cin) f32  parity-phase-decomposed padded NHWC input
                (phase = 2*row_parity + col_parity, each phase's spatial grid flattened)
    wtap_ref  : (9, Cin, 128) bf16  3x3 conv weights per tap, BN scale folded, Cout padded
    cshift_ref: (1, 128)      f32   folded BN shift (or conv bias)
    whead_ref : (128, 128)    bf16  packed 1x1 head weights for all active branches
    hbias_ref : (1, 128)      f32   packed head bias
    dec_ref   : (4, 128)      f32   rows = [col_mul, wh_mask, is_x, is_y]
    o_ref     : (B, hp*pw, 128) f32 decoded detections on the (hp x pw) "wide" pooled grid
                                    (column pw-1 of each row is a seam column, dropped outside)
    """
    mo = hp * pw
    mul = dec_ref[0:1, :]
    whm = dec_ref[1:2, :]
    isx = dec_ref[2:3, :]
    isy = dec_ref[3:4, :]
    cshift = cshift_ref[...]
    hbias = hbias_ref[...]
    whead = whead_ref[...]
    wtap = [wtap_ref[t] for t in range(9)]            # 9 x (Cin, 128) bf16, resident

    # grid_x / grid_y decode offsets generated in-kernel (no HBM side input).
    # Float divide with a +0.5 guard instead of integer //, pure VPU and robust.
    r = lax.broadcasted_iota(jnp.int32, (mo, NPAD), 0).astype(jnp.float32)
    gy = jnp.floor((r + 0.5) * (1.0 / pw))
    gx = r - gy * float(pw)
    add = gx * isx + gy * isy                          # hoisted: same for every batch element

    for b in range(batch):
        pooled = None
        # 2x2/s2 maxpool: compute the conv at pooled resolution once per pool phase (py, px)
        # and take the elementwise max of the 4 results (pure VPU).
        for py in range(2):
            for px in range(2):
                acc = None
                for dy in range(3):
                    for dx in range(3):
                        u, v = py + dy, px + dx
                        phase = (u % 2) * 2 + (v % 2)
                        off = (u // 2) * pw + (v // 2)
                        patch = x_ref[b, phase, off:off + mo, :].astype(jnp.bfloat16)
                        d = jnp.dot(patch, wtap[dy * 3 + dx],
                                    preferred_element_type=jnp.float32)
                        acc = d if acc is None else acc + d
                y = acc + cshift
                if leaky:
                    y = jnp.where(y > 0.0, y, 0.1 * y)            # LeakyReLU(0.1)
                pooled = y if pooled is None else jnp.maximum(pooled, y)

        # 1x1 head conv (all active branches packed along the 128 output lanes) + YOLO decode.
        p = jnp.dot(pooled.astype(jnp.bfloat16), whead,
                    preferred_element_type=jnp.float32) + hbias
        e = jnp.exp(p)                                            # one exp per element
        sig = e * pl.reciprocal(1.0 + e, approx=True)             # sigmoid from the same exp
        xy_conf_cls = (sig + add) * mul                           # (sigmoid+grid)*stride; conf/cls *1
        wh = e * mul                                              # exp(t) * anchor
        o_ref[b] = jnp.where(whm > 0.0, wh, xy_conf_cls)


# ----------------------------- small XLA helpers -----------------------------

def remap_classes(layer, mode_classes, num_all_classes):
    """Scatter per-mode class scores into the full-class detection tensor (tiny, XLA)."""
    B, M, _ = layer.shape
    full = jnp.zeros((B, M, num_all_classes + 5), jnp.float32)
    full = full.at[:, :, 0:5].set(layer[:, :, 0:5])
    new_indices = jnp.array([5 + k for k in mode_classes], jnp.int32)
    full = full.at[:, :, new_indices].set(layer[:, :, 5:])
    return full


# ----------------------------- model definition -----------------------------

HYPERPARAMS = {'channels': 4, 'height': 16}

MODULE_DEFS = [
    {'type': 'convolutional', 'batch_normalize': 1, 'filters': 8, 'size': 3,
     'stride': 1, 'pad': 1, 'activation': 'leaky'},
    {'type': 'maxpool', 'size': 2, 'stride': 2},
    {'type': 'branch'},                                                # mode 0 branch
    {'type': 'convolutional', 'batch_normalize': 0, 'filters': 21, 'size': 1,
     'stride': 1, 'pad': 0, 'activation': 'linear'},
    {'type': 'yolo', 'mask': [0, 1, 2],
     'anchors': [(2, 3), (4, 5), (6, 8)], 'classes': 2},
    {'type': 'branch'},                                                # mode 1 branch
    {'type': 'convolutional', 'batch_normalize': 0, 'filters': 21, 'size': 1,
     'stride': 1, 'pad': 0, 'activation': 'linear'},
    {'type': 'yolo', 'mask': [0, 1, 2],
     'anchors': [(3, 4), (5, 6), (7, 9)], 'classes': 2},
]


def init_params(module_defs, in_channels, key):
    """Deterministic parameter init mirroring create_modules channel bookkeeping."""
    params = {}
    output_filters = [in_channels]
    split_idx = -1
    new_branch = False
    filters = in_channels
    for i, mdef in enumerate(module_defs):
        if mdef['type'] == 'convolutional':
            filters = mdef['filters']
            k = mdef['size']
            if new_branch:
                cin = output_filters[split_idx]
                new_branch = False
            else:
                cin = output_filters[-1]
            key, k1, k2, k3, k4, k5 = jax.random.split(key, 6)
            w = 0.1 * jax.random.normal(k1, (filters, cin, k, k), jnp.float32)
            if mdef['batch_normalize']:
                gamma = 1.0 + 0.1 * jax.random.normal(k2, (filters,), jnp.float32)
                beta = 0.1 * jax.random.normal(k3, (filters,), jnp.float32)
                rmean = 0.1 * jax.random.normal(k4, (filters,), jnp.float32)
                rvar = jnp.abs(jax.random.normal(k5, (filters,), jnp.float32)) + 0.5
                scale = gamma / jnp.sqrt(rvar + 1e-5)        # folded BN (inference)
                shift = beta - rmean * scale
            else:
                bias = 0.1 * jax.random.normal(k2, (filters,), jnp.float32)
                scale = jnp.ones((filters,), jnp.float32)
                shift = bias
            params[i] = {'w': w, 'scale': scale, 'shift': shift}
        elif mdef['type'] == 'branch':
            if split_idx == -1:
                split_idx = i
            new_branch = True
        output_filters.append(filters)
    return params


def prepare_kernel_params(module_defs, params):
    """One-time prep: fold BN scale into weights, build per-tap conv matrices (Cin, 128) bf16,
    and per-branch 1x1 head matrices (packed into the 128-wide head at call time)."""
    assert module_defs[0]['type'] == 'convolutional' and module_defs[0]['size'] == 3
    assert (module_defs[1]['type'] == 'maxpool' and module_defs[1]['size'] == 2
            and module_defs[1]['stride'] == 2)

    p0 = params[0]
    cout0, cin0, kh, kw = p0['w'].shape
    assert kh == 3 and kw == 3 and cout0 <= NPAD
    w = p0['w'] * p0['scale'][:, None, None, None]               # fold BN scale (per out-channel)
    wtap = jnp.transpose(w, (2, 3, 1, 0)).reshape(kh * kw, cin0, cout0)   # tap t = dy*3 + dx
    wtap = jnp.pad(wtap, ((0, 0), (0, 0), (0, NPAD - cout0))).astype(jnp.bfloat16)
    cshift = jnp.pad(p0['shift'].reshape(1, -1),
                     ((0, 0), (0, NPAD - cout0))).astype(jnp.float32)
    backbone = {'wtap': wtap, 'cshift': cshift,
                'leaky': module_defs[0]['activation'] == 'leaky'}

    branches = []
    branch_id = -1
    i = 2
    while i < len(module_defs):
        if module_defs[i]['type'] == 'branch':
            branch_id += 1
            conv_def, yolo_def = module_defs[i + 1], module_defs[i + 2]
            assert conv_def['type'] == 'convolutional' and conv_def['size'] == 1
            assert yolo_def['type'] == 'yolo'
            ph = params[i + 1]
            cout, cin = ph['w'].shape[0], ph['w'].shape[1]
            assert cin <= NPAD and cout <= NPAD
            wmat = jnp.transpose(ph['w'], (2, 3, 1, 0)).reshape(cin, cout) * ph['scale'][None, :]
            branches.append({'branch_id': branch_id, 'wmat': wmat, 'bias': ph['shift'],
                             'anchors': [yolo_def['anchors'][m] for m in yolo_def['mask']],
                             'num_classes': yolo_def['classes']})
            i += 3
        else:
            i += 1
    return {'backbone': backbone, 'branches': branches}


# ----------------------------- forward pass -----------------------------

def adaptive_yolo_forward(x_nchw, kparams, modes, mode_classes_list, num_all_classes):
    B, C, H, W = x_nchw.shape
    img_dim = H
    bb = kparams['backbone']
    assert C == bb['wtap'].shape[1] and H % 2 == 0 and W % 2 == 0

    hp, wp = H // 2, W // 2          # pooled grid
    pw = wp + 1                      # "wide" pooled width = parity-phase width (incl. seam col)
    ph_h = H // 2 + 1                # parity-phase height
    mo = hp * pw
    flat = ph_h * pw
    flat_pad = ((flat + 1 + 7) // 8) * 8      # max tap offset + mo needs flat+1 rows

    # 1x-size layout prep (NO 9x im2col expansion): pad NHWC, split into the 4 (row, col)
    # parity phases, flatten each phase's spatial grid, zero-pad rows to a sublane multiple.
    x = jnp.transpose(x_nchw, (0, 2, 3, 1)).astype(jnp.float32)            # NCHW -> NHWC
    xpad = jnp.pad(x, ((0, 0), (1, 1), (1, 1), (0, 0)))                    # (B, H+2, W+2, C)
    xph = xpad.reshape(B, ph_h, 2, pw, 2, C).transpose(0, 2, 4, 1, 3, 5)   # (B, 2, 2, ph_h, pw, C)
    xflat = xph.reshape(B, 4, flat, C)
    xflat = jnp.pad(xflat, ((0, 0), (0, 0), (0, flat_pad - flat), (0, 0)))

    # Pack all active branches' 1x1 heads into one 128-wide matmul + build decode constants.
    active = [br for br in kparams['branches'] if br['branch_id'] in modes]
    assert active, "no active branch for the requested modes"
    stride = float(img_dim) / float(hp)

    offs, total = [], 0
    for br in active:
        offs.append(total)
        total += len(br['anchors']) * (5 + br['num_classes'])
    # TODO(synk): if packed head columns ever exceed 128, split into multiple column tiles.
    assert total <= NPAD

    whead = jnp.zeros((NPAD, NPAD), jnp.float32)
    hbias = jnp.zeros((1, NPAD), jnp.float32)
    mul = [1.0] * NPAD
    whm = [0.0] * NPAD
    isx = [0.0] * NPAD
    isy = [0.0] * NPAD
    for j, br in enumerate(active):
        nA, F = len(br['anchors']), 5 + br['num_classes']
        ci, co = br['wmat'].shape
        whead = whead.at[:ci, offs[j]:offs[j] + co].set(br['wmat'])
        hbias = hbias.at[0, offs[j]:offs[j] + co].set(br['bias'])
        for cl in range(nA * F):
            a, f = divmod(cl, F)
            c = offs[j] + cl
            if f == 0:
                mul[c] = stride; isx[c] = 1.0
            elif f == 1:
                mul[c] = stride; isy[c] = 1.0
            elif f == 2:
                mul[c] = float(br['anchors'][a][0]); whm[c] = 1.0
            elif f == 3:
                mul[c] = float(br['anchors'][a][1]); whm[c] = 1.0
    whead = whead.astype(jnp.bfloat16)
    dec = jnp.asarray([mul, whm, isx, isy], jnp.float32)

    kern = functools.partial(_fused_yolo_kernel, batch=B, hp=hp, pw=pw, leaky=bb['leaky'])
    out = pl.pallas_call(
        kern,
        out_shape=jax.ShapeDtypeStruct((B, mo, NPAD), jnp.float32),
        grid=(1,),                    # whole problem in one grid step (per-step overhead paid once)
        in_specs=[
            pl.BlockSpec((B, 4, flat_pad, C), lambda i: (0, 0, 0, 0)),  # phase-decomposed input
            pl.BlockSpec((9, C, NPAD), lambda i: (0, 0, 0)),            # conv tap weights
            pl.BlockSpec((1, NPAD), lambda i: (0, 0)),                  # folded BN shift
            pl.BlockSpec((NPAD, NPAD), lambda i: (0, 0)),               # packed head weights
            pl.BlockSpec((1, NPAD), lambda i: (0, 0)),                  # packed head bias
            pl.BlockSpec((4, NPAD), lambda i: (0, 0)),                  # decode column constants
        ],
        out_specs=pl.BlockSpec((B, mo, NPAD), lambda i: (0, 0, 0)),
        compiler_params=pltpu.CompilerParams(dimension_semantics=("arbitrary",)),
        cost_estimate=pl.CostEstimate(
            flops=2 * B * 4 * mo * 9 * C * NPAD + 2 * B * mo * NPAD * NPAD,
            transcendentals=2 * B * mo * NPAD,
            bytes_accessed=(xflat.size * 4 + bb['wtap'].size * 2 + NPAD * 4
                            + NPAD * NPAD * 2 + NPAD * 4 + 4 * NPAD * 4
                            + B * mo * NPAD * 4)),
    )(xflat, bb['wtap'], bb['cshift'], whead, hbias, dec)

    # Tiny XLA epilogue: drop the seam column, split per branch, reorder to (B, A*H*W, 5+nc),
    # and scatter per-mode class scores into the full-class detection tensor.
    outw = out.reshape(B, hp, pw, NPAD)[:, :, :wp, :]
    yolo_outputs = []
    for j, br in enumerate(active):
        nA, F = len(br['anchors']), 5 + br['num_classes']
        det = outw[..., offs[j]:offs[j] + nA * F]
        det = det.reshape(B, hp, wp, nA, F).transpose(0, 3, 1, 2, 4).reshape(B, nA * hp * wp, F)
        # TODO(synk): chunk j is paired with modes[j]; verify against the reference if a branch
        #             ever owns more than one yolo layer.
        det = remap_classes(det, mode_classes_list[modes[j]], num_all_classes)
        yolo_outputs.append(det)
    return jnp.concatenate(yolo_outputs, axis=1)


# ----------------------------- main -----------------------------

if __name__ == "__main__":
    key = jax.random.PRNGKey(0)
    kx, kp = jax.random.split(key)

    B, C, H, W = 2, HYPERPARAMS['channels'], HYPERPARAMS['height'], HYPERPARAMS['height']
    x = jax.random.normal(kx, (B, C, H, W), jnp.float32)          # NCHW like PyTorch

    raw_params = init_params(MODULE_DEFS, C, kp)
    kparams = prepare_kernel_params(MODULE_DEFS, raw_params)

    modes = [0]
    mode_classes_list = [[0, 1], [2, 3]]
    num_all_classes = 4

    out = adaptive_yolo_forward(x, kparams, modes, mode_classes_list, num_all_classes)
    out = jax.block_until_ready(out)

    # one active branch -> 3 anchors * 8*8 grid detections, padded to num_all_classes+5
    assert out.shape == (B, 3 * 8 * 8, num_all_classes + 5), out.shape
    assert bool(jnp.all(jnp.isfinite(out)))
    print("KERNEL_OK")
</pallas_src>

<mosaic_0001>
module attributes {stable_mosaic.version = 11 : i64} {
  func.func @_fused_yolo_kernel(%arg0: i32, %arg1: memref<2x4x88x4xf32, #tpu.memory_space<vmem>>, %arg2: memref<9x4x128xbf16, #tpu.memory_space<vmem>>, %arg3: memref<1x128xf32, #tpu.memory_space<vmem>>, %arg4: memref<128x128xbf16, #tpu.memory_space<vmem>>, %arg5: memref<1x128xf32, #tpu.memory_space<vmem>>, %arg6: memref<4x128xf32, #tpu.memory_space<vmem>>, %arg7: memref<2x72x128xf32, #tpu.memory_space<vmem>>) attributes {dimension_semantics = [#tpu.dimension_semantics<arbitrary>], iteration_bounds = array<i64: 1>, scalar_prefetch = 0 : i64, scratch_operands = 0 : i64, tpu.core_type = #tpu.core_type<tc>, window_params = [{pipeline_mode = #tpu.pipeline_mode<synchronous>, transform_indices = @transform_0, window_bounds = array<i64: 2, 4, 88, 4>}, {pipeline_mode = #tpu.pipeline_mode<synchronous>, transform_indices = @transform_1, window_bounds = array<i64: 9, 4, 128>}, {pipeline_mode = #tpu.pipeline_mode<synchronous>, transform_indices = @transform_2, window_bounds = array<i64: 1, 128>}, {pipeline_mode = #tpu.pipeline_mode<synchronous>, transform_indices = @transform_3, window_bounds = array<i64: 128, 128>}, {pipeline_mode = #tpu.pipeline_mode<synchronous>, transform_indices = @transform_4, window_bounds = array<i64: 1, 128>}, {pipeline_mode = #tpu.pipeline_mode<synchronous>, transform_indices = @transform_5, window_bounds = array<i64: 4, 128>}, {pipeline_mode = #tpu.pipeline_mode<synchronous>, transform_indices = @transform_6, window_bounds = array<i64: 2, 72, 128>}]} {
    %c0 = arith.constant 0 : index
    %c0_0 = arith.constant 0 : index
    %0 = vector.load %arg6[%c0, %c0_0] : memref<4x128xf32, #tpu.memory_space<vmem>>, vector<1x128xf32>
    %c1 = arith.constant 1 : index
    %c0_1 = arith.constant 0 : index
    %1 = vector.load %arg6[%c1, %c0_1] : memref<4x128xf32, #tpu.memory_space<vmem>>, vector<1x128xf32>
    %c2 = arith.constant 2 : index
    %c0_2 = arith.constant 0 : index
    %2 = vector.load %arg6[%c2, %c0_2] : memref<4x128xf32, #tpu.memory_space<vmem>>, vector<1x128xf32>
    %c3 = arith.constant 3 : index
    %c0_3 = arith.constant 0 : index
    %3 = vector.load %arg6[%c3, %c0_3] : memref<4x128xf32, #tpu.memory_space<vmem>>, vector<1x128xf32>
    %c0_4 = arith.constant 0 : index
    %c0_5 = arith.constant 0 : index
    %4 = vector.load %arg3[%c0_4, %c0_5] : memref<1x128xf32, #tpu.memory_space<vmem>>, vector<1x128xf32>
    %c0_6 = arith.constant 0 : index
    %c0_7 = arith.constant 0 : index
    %5 = vector.load %arg5[%c0_6, %c0_7] : memref<1x128xf32, #tpu.memory_space<vmem>>, vector<1x128xf32>
    %c0_8 = arith.constant 0 : index
    %c0_9 = arith.constant 0 : index
    %6 = vector.load %arg4[%c0_8, %c0_9] : memref<128x128xbf16, #tpu.memory_space<vmem>>, vector<128x128xbf16>
    %c0_10 = arith.constant 0 : index
    %c0_11 = arith.constant 0 : index
    %c0_12 = arith.constant 0 : index
    %7 = vector.load %arg2[%c0_10, %c0_11, %c0_12] : memref<9x4x128xbf16, #tpu.memory_space<vmem>>, vector<1x4x128xbf16>
    %8 = vector.shape_cast %7 : vector<1x4x128xbf16> to vector<4x128xbf16>
    %c1_13 = arith.constant 1 : index
    %c0_14 = arith.constant 0 : index
    %c0_15 = arith.constant 0 : index
    %9 = vector.load %arg2[%c1_13, %c0_14, %c0_15] : memref<9x4x128xbf16, #tpu.memory_space<vmem>>, vector<1x4x128xbf16>
    %10 = vector.shape_cast %9 : vector<1x4x128xbf16> to vector<4x128xbf16>
    %c2_16 = arith.constant 2 : index
    %c0_17 = arith.constant 0 : index
    %c0_18 = arith.constant 0 : index
    %11 = vector.load %arg2[%c2_16, %c0_17, %c0_18] : memref<9x4x128xbf16, #tpu.memory_space<vmem>>, vector<1x4x128xbf16>
    %12 = vector.shape_cast %11 : vector<1x4x128xbf16> to vector<4x128xbf16>
    %c3_19 = arith.constant 3 : index
    %c0_20 = arith.constant 0 : index
    %c0_21 = arith.constant 0 : index
    %13 = vector.load %arg2[%c3_19, %c0_20, %c0_21] : memref<9x4x128xbf16, #tpu.memory_space<vmem>>, vector<1x4x128xbf16>
    %14 = vector.shape_cast %13 : vector<1x4x128xbf16> to vector<4x128xbf16>
    %c4 = arith.constant 4 : index
    %c0_22 = arith.constant 0 : index
    %c0_23 = arith.constant 0 : index
    %15 = vector.load %arg2[%c4, %c0_22, %c0_23] : memref<9x4x128xbf16, #tpu.memory_space<vmem>>, vector<1x4x128xbf16>
    %16 = vector.shape_cast %15 : vector<1x4x128xbf16> to vector<4x128xbf16>
    %c5 = arith.constant 5 : index
    %c0_24 = arith.constant 0 : index
    %c0_25 = arith.constant 0 : index
    %17 = vector.load %arg2[%c5, %c0_24, %c0_25] : memref<9x4x128xbf16, #tpu.memory_space<vmem>>, vector<1x4x128xbf16>
    %18 = vector.shape_cast %17 : vector<1x4x128xbf16> to vector<4x128xbf16>
    %c6 = arith.constant 6 : index
    %c0_26 = arith.constant 0 : index
    %c0_27 = arith.constant 0 : index
    %19 = vector.load %arg2[%c6, %c0_26, %c0_27] : memref<9x4x128xbf16, #tpu.memory_space<vmem>>, vector<1x4x128xbf16>
    %20 = vector.shape_cast %19 : vector<1x4x128xbf16> to vector<4x128xbf16>
    %c7 = arith.constant 7 : index
    %c0_28 = arith.constant 0 : index
    %c0_29 = arith.constant 0 : index
    %21 = vector.load %arg2[%c7, %c0_28, %c0_29] : memref<9x4x128xbf16, #tpu.memory_space<vmem>>, vector<1x4x128xbf16>
    %22 = vector.shape_cast %21 : vector<1x4x128xbf16> to vector<4x128xbf16>
    %c8 = arith.constant 8 : index
    %c0_30 = arith.constant 0 : index
    %c0_31 = arith.constant 0 : index
    %23 = vector.load %arg2[%c8, %c0_30, %c0_31] : memref<9x4x128xbf16, #tpu.memory_space<vmem>>, vector<1x4x128xbf16>
    %24 = vector.shape_cast %23 : vector<1x4x128xbf16> to vector<4x128xbf16>
    %25 = tpu.iota {dimensions = array<i32: 0>} : vector<72x128xi32>
    %26 = arith.sitofp %25 : vector<72x128xi32> to vector<72x128xf32>
    %cst = arith.constant 5.000000e-01 : f32
    %27 = vector.broadcast %cst : f32 to vector<72x128xf32>
    %28 = arith.addf %26, %27 : vector<72x128xf32>
    %cst_32 = arith.constant 0.111111112 : f32
    %29 = vector.broadcast %cst_32 : f32 to vector<72x128xf32>
    %30 = arith.mulf %28, %29 : vector<72x128xf32>
    %31 = math.floor %30 : vector<72x128xf32>
    %cst_33 = arith.constant 9.000000e+00 : f32
    %32 = vector.broadcast %cst_33 : f32 to vector<72x128xf32>
    %33 = arith.mulf %31, %32 : vector<72x128xf32>
    %34 = arith.subf %26, %33 : vector<72x128xf32>
    %35 = vector.broadcast %2 : vector<1x128xf32> to vector<72x128xf32>
    %36 = arith.mulf %34, %35 : vector<72x128xf32>
    %37 = vector.broadcast %3 : vector<1x128xf32> to vector<72x128xf32>
    %38 = arith.mulf %31, %37 : vector<72x128xf32>
    %39 = arith.addf %36, %38 : vector<72x128xf32>
    %c0_34 = arith.constant 0 : index
    %c0_35 = arith.constant 0 : index
    %c0_36 = arith.constant 0 : index
    %c0_37 = arith.constant 0 : index
    %40 = vector.load %arg1[%c0_34, %c0_35, %c0_36, %c0_37] : memref<2x4x88x4xf32, #tpu.memory_space<vmem>>, vector<1x1x72x4xf32>
    %41 = vector.shape_cast %40 : vector<1x1x72x4xf32> to vector<72x4xf32>
    %42 = arith.truncf %41 : vector<72x4xf32> to vector<72x4xbf16>
    %cst_38 = arith.constant dense<0.000000e+00> : vector<72x128xf32>
    %43 = tpu.matmul %42, %8, %cst_38 {dimension_numbers = #tpu.dot_dimension_numbers<[1], [0], [0], [1], [0, 0, 1, 1], [], []>} : vector<72x4xbf16>, vector<4x128xbf16>, vector<72x128xf32> -> vector<72x128xf32>
    %c0_39 = arith.constant 0 : index
    %c1_40 = arith.constant 1 : index
    %c0_41 = arith.constant 0 : index
    %c0_42 = arith.constant 0 : index
    %44 = vector.load %arg1[%c0_39, %c1_40, %c0_41, %c0_42] : memref<2x4x88x4xf32, #tpu.memory_space<vmem>>, vector<1x1x72x4xf32>
    %45 = vector.shape_cast %44 : vector<1x1x72x4xf32> to vector<72x4xf32>
    %46 = arith.truncf %45 : vector<72x4xf32> to vector<72x4xbf16>
    %cst_43 = arith.constant dense<0.000000e+00> : vector<72x128xf32>
    %47 = tpu.matmul %46, %10, %cst_43 {dimension_numbers = #tpu.dot_dimension_numbers<[1], [0], [0], [1], [0, 0, 1, 1], [], []>} : vector<72x4xbf16>, vector<4x128xbf16>, vector<72x128xf32> -> vector<72x128xf32>
    %48 = arith.addf %43, %47 : vector<72x128xf32>
    %c0_44 = arith.constant 0 : index
    %c0_45 = arith.constant 0 : index
    %c1_46 = arith.constant 1 : index
    %c0_47 = arith.constant 0 : index
    %49 = vector.load %arg1[%c0_44, %c0_45, %c1_46, %c0_47] : memref<2x4x88x4xf32, #tpu.memory_space<vmem>>, vector<1x1x72x4xf32>
    %50 = vector.shape_cast %49 : vector<1x1x72x4xf32> to vector<72x4xf32>
    %51 = arith.truncf %50 : vector<72x4xf32> to vector<72x4xbf16>
    %cst_48 = arith.constant dense<0.000000e+00> : vector<72x128xf32>
    %52 = tpu.matmul %51, %12, %cst_48 {dimension_numbers = #tpu.dot_dimension_numbers<[1], [0], [0], [1], [0, 0, 1, 1], [], []>} : vector<72x4xbf16>, vector<4x128xbf16>, vector<72x128xf32> -> vector<72x128xf32>
    %53 = arith.addf %48, %52 : vector<72x128xf32>
    %c0_49 = arith.constant 0 : index
    %c2_50 = arith.constant 2 : index
    %c0_51 = arith.constant 0 : index
    %c0_52 = arith.constant 0 : index
    %54 = vector.load %arg1[%c0_49, %c2_50, %c0_51, %c0_52] : memref<2x4x88x4xf32, #tpu.memory_space<vmem>>, vector<1x1x72x4xf32>
    %55 = vector.shape_cast %54 : vector<1x1x72x4xf32> to vector<72x4xf32>
    %56 = arith.truncf %55 : vector<72x4xf32> to vector<72x4xbf16>
    %cst_53 = arith.constant dense<0.000000e+00> : vector<72x128xf32>
    %57 = tpu.matmul %56, %14, %cst_53 {dimension_numbers = #tpu.dot_dimension_numbers<[1], [0], [0], [1], [0, 0, 1, 1], [], []>} : vector<72x4xbf16>, vector<4x128xbf16>, vector<72x128xf32> -> vector<72x128xf32>
    %58 = arith.addf %53, %57 : vector<72x128xf32>
    %c0_54 = arith.constant 0 : index
    %c3_55 = arith.constant 3 : index
    %c0_56 = arith.constant 0 : index
    %c0_57 = arith.constant 0 : index
    %59 = vector.load %arg1[%c0_54, %c3_55, %c0_56, %c0_57] : memref<2x4x88x4xf32, #tpu.memory_space<vmem>>, vector<1x1x72x4xf32>
    %60 = vector.shape_cast %59 : vector<1x1x72x4xf32> to vector<72x4xf32>
    %61 = arith.truncf %60 : vector<72x4xf32> to vector<72x4xbf16>
    %cst_58 = arith.constant dense<0.000000e+00> : vector<72x128xf32>
    %62 = tpu.matmul %61, %16, %cst_58 {dimension_numbers = #tpu.dot_dimension_numbers<[1], [0], [0], [1], [0, 0, 1, 1], [], []>} : vector<72x4xbf16>, vector<4x128xbf16>, vector<72x128xf32> -> vector<72x128xf32>
    %63 = arith.addf %58, %62 : vector<72x128xf32>
    %c0_59 = arith.constant 0 : index
    %c2_60 = arith.constant 2 : index
    %c1_61 = arith.constant 1 : index
    %c0_62 = arith.constant 0 : index
    %64 = vector.load %arg1[%c0_59, %c2_60, %c1_61, %c0_62] : memref<2x4x88x4xf32, #tpu.memory_space<vmem>>, vector<1x1x72x4xf32>
    %65 = vector.shape_cast %64 : vector<1x1x72x4xf32> to vector<72x4xf32>
    %66 = arith.truncf %65 : vector<72x4xf32> to vector<72x4xbf16>
    %cst_63 = arith.constant dense<0.000000e+00> : vector<72x128xf32>
    %67 = tpu.matmul %66, %18, %cst_63 {dimension_numbers = #tpu.dot_dimension_numbers<[1], [0], [0], [1], [0, 0, 1, 1], [], []>} : vector<72x4xbf16>, vector<4x128xbf16>, vector<72x128xf32> -> vector<72x128xf32>
    %68 = arith.addf %63, %67 : vector<72x128xf32>
    %c0_64 = arith.constant 0 : index
    %c0_65 = arith.constant 0 : index
    %c9 = arith.constant 9 : index
    %c0_66 = arith.constant 0 : index
    %69 = vector.load %arg1[%c0_64, %c0_65, %c9, %c0_66] : memref<2x4x88x4xf32, #tpu.memory_space<vmem>>, vector<1x1x72x4xf32>
    %70 = vector.shape_cast %69 : vector<1x1x72x4xf32> to vector<72x4xf32>
    %71 = arith.truncf %70 : vector<72x4xf32> to vector<72x4xbf16>
    %cst_67 = arith.constant dense<0.000000e+00> : vector<72x128xf32>
    %72 = tpu.matmul %71, %20, %cst_67 {dimension_numbers = #tpu.dot_dimension_numbers<[1], [0], [0], [1], [0, 0, 1, 1], [], []>} : vector<72x4xbf16>, vector<4x128xbf16>, vector<72x128xf32> -> vector<72x128xf32>
    %73 = arith.addf %68, %72 : vector<72x128xf32>
    %c0_68 = arith.constant 0 : index
    %c1_69 = arith.constant 1 : index
    %c9_70 = arith.constant 9 : index
    %c0_71 = arith.constant 0 : index
    %74 = vector.load %arg1[%c0_68, %c1_69, %c9_70, %c0_71] : memref<2x4x88x4xf32, #tpu.memory_space<vmem>>, vector<1x1x72x4xf32>
    %75 = vector.shape_cast %74 : vector<1x1x72x4xf32> to vector<72x4xf32>
    %76 = arith.truncf %75 : vector<72x4xf32> to vector<72x4xbf16>
    %cst_72 = arith.constant dense<0.000000e+00> : vector<72x128xf32>
    %77 = tpu.matmul %76, %22, %cst_72 {dimension_numbers = #tpu.dot_dimension_numbers<[1], [0], [0], [1], [0, 0, 1, 1], [], []>} : vector<72x4xbf16>, vector<4x128xbf16>, vector<72x128xf32> -> vector<72x128xf32>
    %78 = arith.addf %73, %77 : vector<72x128xf32>
    %c0_73 = arith.constant 0 : index
    %c0_74 = arith.constant 0 : index
    %c10 = arith.constant 10 : index
    %c0_75 = arith.constant 0 : index
    %79 = vector.load %arg1[%c0_73, %c0_74, %c10, %c0_75] : memref<2x4x88x4xf32, #tpu.memory_space<vmem>>, vector<1x1x72x4xf32>
    %80 = vector.shape_cast %79 : vector<1x1x72x4xf32> to vector<72x4xf32>
    %81 = arith.truncf %80 : vector<72x4xf32> to vector<72x4xbf16>
    %cst_76 = arith.constant dense<0.000000e+00> : vector<72x128xf32>
    %82 = tpu.matmul %81, %24, %cst_76 {dimension_numbers = #tpu.dot_dimension_numbers<[1], [0], [0], [1], [0, 0, 1, 1], [], []>} : vector<72x4xbf16>, vector<4x128xbf16>, vector<72x128xf32> -> vector<72x128xf32>
    %83 = arith.addf %78, %82 : vector<72x128xf32>
    %84 = vector.broadcast %4 : vector<1x128xf32> to vector<72x128xf32>
    %85 = arith.addf %83, %84 : vector<72x128xf32>
    %cst_77 = arith.constant 0.000000e+00 : f32
    %86 = vector.broadcast %cst_77 : f32 to vector<72x128xf32>
    %87 = arith.cmpf ogt, %85, %86 : vector<72x128xf32>
    %cst_78 = arith.constant 1.000000e-01 : f32
    %88 = vector.broadcast %cst_78 : f32 to vector<72x128xf32>
    %89 = arith.mulf %88, %85 : vector<72x128xf32>
    %90 = arith.select %87, %85, %89 : vector<72x128xi1>, vector<72x128xf32>
    %c0_79 = arith.constant 0 : index
    %c1_80 = arith.constant 1 : index
    %c0_81 = arith.constant 0 : index
    %c0_82 = arith.constant 0 : index
    %91 = vector.load %arg1[%c0_79, %c1_80, %c0_81, %c0_82] : memref<2x4x88x4xf32, #tpu.memory_space<vmem>>, vector<1x1x72x4xf32>
    %92 = vector.shape_cast %91 : vector<1x1x72x4xf32> to vector<72x4xf32>
    %93 = arith.truncf %92 : vector<72x4xf32> to vector<72x4xbf16>
    %cst_83 = arith.constant dense<0.000000e+00> : vector<72x128xf32>
    %94 = tpu.matmul %93, %8, %cst_83 {dimension_numbers = #tpu.dot_dimension_numbers<[1], [0], [0], [1], [0, 0, 1, 1], [], []>} : vector<72x4xbf16>, vector<4x128xbf16>, vector<72x128xf32> -> vector<72x128xf32>
    %c0_84 = arith.constant 0 : index
    %c0_85 = arith.constant 0 : index
    %c1_86 = arith.constant 1 : index
    %c0_87 = arith.constant 0 : index
    %95 = vector.load %arg1[%c0_84, %c0_85, %c1_86, %c0_87] : memref<2x4x88x4xf32, #tpu.memory_space<vmem>>, vector<1x1x72x4xf32>
    %96 = vector.shape_cast %95 : vector<1x1x72x4xf32> to vector<72x4xf32>
    %97 = arith.truncf %96 : vector<72x4xf32> to vector<72x4xbf16>
    %cst_88 = arith.constant dense<0.000000e+00> : vector<72x128xf32>
    %98 = tpu.matmul %97, %10, %cst_88 {dimension_numbers = #tpu.dot_dimension_numbers<[1], [0], [0], [1], [0, 0, 1, 1], [], []>} : vector<72x4xbf16>, vector<4x128xbf16>, vector<72x128xf32> -> vector<72x128xf32>
    %99 = arith.addf %94, %98 : vector<72x128xf32>
    %c0_89 = arith.constant 0 : index
    %c1_90 = arith.constant 1 : index
    %c1_91 = arith.constant 1 : index
    %c0_92 = arith.constant 0 : index
    %100 = vector.load %arg1[%c0_89, %c1_90, %c1_91, %c0_92] : memref<2x4x88x4xf32, #tpu.memory_space<vmem>>, vector<1x1x72x4xf32>
    %101 = vector.shape_cast %100 : vector<1x1x72x4xf32> to vector<72x4xf32>
    %102 = arith.truncf %101 : vector<72x4xf32> to vector<72x4xbf16>
    %cst_93 = arith.constant dense<0.000000e+00> : vector<72x128xf32>
    %103 = tpu.matmul %102, %12, %cst_93 {dimension_numbers = #tpu.dot_dimension_numbers<[1], [0], [0], [1], [0, 0, 1, 1], [], []>} : vector<72x4xbf16>, vector<4x128xbf16>, vector<72x128xf32> -> vector<72x128xf32>
    %104 = arith.addf %99, %103 : vector<72x128xf32>
    %c0_94 = arith.constant 0 : index
    %c3_95 = arith.constant 3 : index
    %c0_96 = arith.constant 0 : index
    %c0_97 = arith.constant 0 : index
    %105 = vector.load %arg1[%c0_94, %c3_95, %c0_96, %c0_97] : memref<2x4x88x4xf32, #tpu.memory_space<vmem>>, vector<1x1x72x4xf32>
    %106 = vector.shape_cast %105 : vector<1x1x72x4xf32> to vector<72x4xf32>
    %107 = arith.truncf %106 : vector<72x4xf32> to vector<72x4xbf16>
    %cst_98 = arith.constant dense<0.000000e+00> : vector<72x128xf32>
    %108 = tpu.matmul %107, %14, %cst_98 {dimension_numbers = #tpu.dot_dimension_numbers<[1], [0], [0], [1], [0, 0, 1, 1], [], []>} : vector<72x4xbf16>, vector<4x128xbf16>, vector<72x128xf32> -> vector<72x128xf32>
    %109 = arith.addf %104, %108 : vector<72x128xf32>
    %c0_99 = arith.constant 0 : index
    %c2_100 = arith.constant 2 : index
    %c1_101 = arith.constant 1 : index
    %c0_102 = arith.constant 0 : index
    %110 = vector.load %arg1[%c0_99, %c2_100, %c1_101, %c0_102] : memref<2x4x88x4xf32, #tpu.memory_space<vmem>>, vector<1x1x72x4xf32>
    %111 = vector.shape_cast %110 : vector<1x1x72x4xf32> to vector<72x4xf32>
    %112 = arith.truncf %111 : vector<72x4xf32> to vector<72x4xbf16>
    %cst_103 = arith.constant dense<0.000000e+00> : vector<72x128xf32>
    %113 = tpu.matmul %112, %16, %cst_103 {dimension_numbers = #tpu.dot_dimension_numbers<[1], [0], [0], [1], [0, 0, 1, 1], [], []>} : vector<72x4xbf16>, vector<4x128xbf16>, vector<72x128xf32> -> vector<72x128xf32>
    %114 = arith.addf %109, %113 : vector<72x128xf32>
    %c0_104 = arith.constant 0 : index
    %c3_105 = arith.constant 3 : index
    %c1_106 = arith.constant 1 : index
    %c0_107 = arith.constant 0 : index
    %115 = vector.load %arg1[%c0_104, %c3_105, %c1_106, %c0_107] : memref<2x4x88x4xf32, #tpu.memory_space<vmem>>, vector<1x1x72x4xf32>
    %116 = vector.shape_cast %115 : vector<1x1x72x4xf32> to vector<72x4xf32>
    %117 = arith.truncf %116 : vector<72x4xf32> to vector<72x4xbf16>
    %cst_108 = arith.constant dense<0.000000e+00> : vector<72x128xf32>
    %118 = tpu.matmul %117, %18, %cst_108 {dimension_numbers = #tpu.dot_dimension_numbers<[1], [0], [0], [1], [0, 0, 1, 1], [], []>} : vector<72x4xbf16>, vector<4x128xbf16>, vector<72x128xf32> -> vector<72x128xf32>
    %119 = arith.addf %114, %118 : vector<72x128xf32>
    %c0_109 = arith.constant 0 : index
    %c1_110 = arith.constant 1 : index
    %c9_111 = arith.constant 9 : index
    %c0_112 = arith.constant 0 : index
    %120 = vector.load %arg1[%c0_109, %c1_110, %c9_111, %c0_112] : memref<2x4x88x4xf32, #tpu.memory_space<vmem>>, vector<1x1x72x4xf32>
    %121 = vector.shape_cast %120 : vector<1x1x72x4xf32> to vector<72x4xf32>
    %122 = arith.truncf %121 : vector<72x4xf32> to vector<72x4xbf16>
    %cst_113 = arith.constant dense<0.000000e+00> : vector<72x128xf32>
    %123 = tpu.matmul %122, %20, %cst_113 {dimension_numbers = #tpu.dot_dimension_numbers<[1], [0], [0], [1], [0, 0, 1, 1], [], []>} : vector<72x4xbf16>, vector<4x128xbf16>, vector<72x128xf32> -> vector<72x128xf32>
    %124 = arith.addf %119, %123 : vector<72x128xf32>
    %c0_114 = arith.constant 0 : index
    %c0_115 = arith.constant 0 : index
    %c10_116 = arith.constant 10 : index
    %c0_117 = arith.constant 0 : index
    %125 = vector.load %arg1[%c0_114, %c0_115, %c10_116, %c0_117] : memref<2x4x88x4xf32, #tpu.memory_space<vmem>>, vector<1x1x72x4xf32>
    %126 = vector.shape_cast %125 : vector<1x1x72x4xf32> to vector<72x4xf32>
    %127 = arith.truncf %126 : vector<72x4xf32> to vector<72x4xbf16>
    %cst_118 = arith.constant dense<0.000000e+00> : vector<72x128xf32>
    %128 = tpu.matmul %127, %22, %cst_118 {dimension_numbers = #tpu.dot_dimension_numbers<[1], [0], [0], [1], [0, 0, 1, 1], [], []>} : vector<72x4xbf16>, vector<4x128xbf16>, vector<72x128xf32> -> vector<72x128xf32>
    %129 = arith.addf %124, %128 : vector<72x128xf32>
    %c0_119 = arith.constant 0 : index
    %c1_120 = arith.constant 1 : index
    %c10_121 = arith.constant 10 : index
    %c0_122 = arith.constant 0 : index
    %130 = vector.load %arg1[%c0_119, %c1_120, %c10_121, %c0_122] : memref<2x4x88x4xf32, #tpu.memory_space<vmem>>, vector<1x1x72x4xf32>
    %131 = vector.shape_cast %130 : vector<1x1x72x4xf32> to vector<72x4xf32>
    %132 = arith.truncf %131 : vector<72x4xf32> to vector<72x4xbf16>
    %cst_123 = arith.constant dense<0.000000e+00> : vector<72x128xf32>
    %133 = tpu.matmul %132, %24, %cst_123 {dimension_numbers = #tpu.dot_dimension_numbers<[1], [0], [0], [1], [0, 0, 1, 1], [], []>} : vector<72x4xbf16>, vector<4x128xbf16>, vector<72x128xf32> -> vector<72x128xf32>
    %134 = arith.addf %129, %133 : vector<72x128xf32>
    %135 = vector.broadcast %4 : vector<1x128xf32> to vector<72x128xf32>
    %136 = arith.addf %134, %135 : vector<72x128xf32>
    %cst_124 = arith.constant 0.000000e+00 : f32
    %137 = vector.broadcast %cst_124 : f32 to vector<72x128xf32>
    %138 = arith.cmpf ogt, %136, %137 : vector<72x128xf32>
    %cst_125 = arith.constant 1.000000e-01 : f32
    %139 = vector.broadcast %cst_125 : f32 to vector<72x128xf32>
    %140 = arith.mulf %139, %136 : vector<72x128xf32>
    %141 = arith.select %138, %136, %140 : vector<72x128xi1>, vector<72x128xf32>
    %142 = arith.maximumf %90, %141 : vector<72x128xf32>
    %c0_126 = arith.constant 0 : index
    %c2_127 = arith.constant 2 : index
    %c0_128 = arith.constant 0 : index
    %c0_129 = arith.constant 0 : index
    %143 = vector.load %arg1[%c0_126, %c2_127, %c0_128, %c0_129] : memref<2x4x88x4xf32, #tpu.memory_space<vmem>>, vector<1x1x72x4xf32>
    %144 = vector.shape_cast %143 : vector<1x1x72x4xf32> to vector<72x4xf32>
    %145 = arith.truncf %144 : vector<72x4xf32> to vector<72x4xbf16>
    %cst_130 = arith.constant dense<0.000000e+00> : vector<72x128xf32>
    %146 = tpu.matmul %145, %8, %cst_130 {dimension_numbers = #tpu.dot_dimension_numbers<[1], [0], [0], [1], [0, 0, 1, 1], [], []>} : vector<72x4xbf16>, vector<4x128xbf16>, vector<72x128xf32> -> vector<72x128xf32>
    %c0_131 = arith.constant 0 : index
    %c3_132 = arith.constant 3 : index
    %c0_133 = arith.constant 0 : index
    %c0_134 = arith.constant 0 : index
    %147 = vector.load %arg1[%c0_131, %c3_132, %c0_133, %c0_134] : memref<2x4x88x4xf32, #tpu.memory_space<vmem>>, vector<1x1x72x4xf32>
    %148 = vector.shape_cast %147 : vector<1x1x72x4xf32> to vector<72x4xf32>
    %149 = arith.truncf %148 : vector<72x4xf32> to vector<72x4xbf16>
    %cst_135 = arith.constant dense<0.000000e+00> : vector<72x128xf32>
    %150 = tpu.matmul %149, %10, %cst_135 {dimension_numbers = #tpu.dot_dimension_numbers<[1], [0], [0], [1], [0, 0, 1, 1], [], []>} : vector<72x4xbf16>, vector<4x128xbf16>, vector<72x128xf32> -> vector<72x128xf32>
    %151 = arith.addf %146, %150 : vector<72x128xf32>
    %c0_136 = arith.constant 0 : index
    %c2_137 = arith.constant 2 : index
    %c1_138 = arith.constant 1 : index
    %c0_139 = arith.constant 0 : index
    %152 = vector.load %arg1[%c0_136, %c2_137, %c1_138, %c0_139] : memref<2x4x88x4xf32, #tpu.memory_space<vmem>>, vector<1x1x72x4xf32>
    %153 = vector.shape_cast %152 : vector<1x1x72x4xf32> to vector<72x4xf32>
    %154 = arith.truncf %153 : vector<72x4xf32> to vector<72x4xbf16>
    %cst_140 = arith.constant dense<0.000000e+00> : vector<72x128xf32>
    %155 = tpu.matmul %154, %12, %cst_140 {dimension_numbers = #tpu.dot_dimension_numbers<[1], [0], [0], [1], [0, 0, 1, 1], [], []>} : vector<72x4xbf16>, vector<4x128xbf16>, vector<72x128xf32> -> vector<72x128xf32>
    %156 = arith.addf %151, %155 : vector<72x128xf32>
    %c0_141 = arith.constant 0 : index
    %c0_142 = arith.constant 0 : index
    %c9_143 = arith.constant 9 : index
    %c0_144 = arith.constant 0 : index
    %157 = vector.load %arg1[%c0_141, %c0_142, %c9_143, %c0_144] : memref<2x4x88x4xf32, #tpu.memory_space<vmem>>, vector<1x1x72x4xf32>
    %158 = vector.shape_cast %157 : vector<1x1x72x4xf32> to vector<72x4xf32>
    %159 = arith.truncf %158 : vector<72x4xf32> to vector<72x4xbf16>
    %cst_145 = arith.constant dense<0.000000e+00> : vector<72x128xf32>
    %160 = tpu.matmul %159, %14, %cst_145 {dimension_numbers = #tpu.dot_dimension_numbers<[1], [0], [0], [1], [0, 0, 1, 1], [], []>} : vector<72x4xbf16>, vector<4x128xbf16>, vector<72x128xf32> -> vector<72x128xf32>
    %161 = arith.addf %156, %160 : vector<72x128xf32>
    %c0_146 = arith.constant 0 : index
    %c1_147 = arith.constant 1 : index
    %c9_148 = arith.constant 9 : index
    %c0_149 = arith.constant 0 : index
    %162 = vector.load %arg1[%c0_146, %c1_147, %c9_148, %c0_149] : memref<2x4x88x4xf32, #tpu.memory_space<vmem>>, vector<1x1x72x4xf32>
    %163 = vector.shape_cast %162 : vector<1x1x72x4xf32> to vector<72x4xf32>
    %164 = arith.truncf %163 : vector<72x4xf32> to vector<72x4xbf16>
    %cst_150 = arith.constant dense<0.000000e+00> : vector<72x128xf32>
    %165 = tpu.matmul %164, %16, %cst_150 {dimension_numbers = #tpu.dot_dimension_numbers<[1], [0], [0], [1], [0, 0, 1, 1], [], []>} : vector<72x4xbf16>, vector<4x128xbf16>, vector<72x128xf32> -> vector<72x128xf32>
    %166 = arith.addf %161, %165 : vector<72x128xf32>
    %c0_151 = arith.constant 0 : index
    %c0_152 = arith.constant 0 : index
    %c10_153 = arith.constant 10 : index
    %c0_154 = arith.constant 0 : index
    %167 = vector.load %arg1[%c0_151, %c0_152, %c10_153, %c0_154] : memref<2x4x88x4xf32, #tpu.memory_space<vmem>>, vector<1x1x72x4xf32>
    %168 = vector.shape_cast %167 : vector<1x1x72x4xf32> to vector<72x4xf32>
    %169 = arith.truncf %168 : vector<72x4xf32> to vector<72x4xbf16>
    %cst_155 = arith.constant dense<0.000000e+00> : vector<72x128xf32>
    %170 = tpu.matmul %169, %18, %cst_155 {dimension_numbers = #tpu.dot_dimension_numbers<[1], [0], [0], [1], [0, 0, 1, 1], [], []>} : vector<72x4xbf16>, vector<4x128xbf16>, vector<72x128xf32> -> vector<72x128xf32>
    %171 = arith.addf %166, %170 : vector<72x128xf32>
    %c0_156 = arith.constant 0 : index
    %c2_157 = arith.constant 2 : index
    %c9_158 = arith.constant 9 : index
    %c0_159 = arith.constant 0 : index
    %172 = vector.load %arg1[%c0_156, %c2_157, %c9_158, %c0_159] : memref<2x4x88x4xf32, #tpu.memory_space<vmem>>, vector<1x1x72x4xf32>
    %173 = vector.shape_cast %172 : vector<1x1x72x4xf32> to vector<72x4xf32>
    %174 = arith.truncf %173 : vector<72x4xf32> to vector<72x4xbf16>
    %cst_160 = arith.constant dense<0.000000e+00> : vector<72x128xf32>
    %175 = tpu.matmul %174, %20, %cst_160 {dimension_numbers = #tpu.dot_dimension_numbers<[1], [0], [0], [1], [0, 0, 1, 1], [], []>} : vector<72x4xbf16>, vector<4x128xbf16>, vector<72x128xf32> -> vector<72x128xf32>
    %176 = arith.addf %171, %175 : vector<72x128xf32>
    %c0_161 = arith.constant 0 : index
    %c3_162 = arith.constant 3 : index
    %c9_163 = arith.constant 9 : index
    %c0_164 = arith.constant 0 : index
    %177 = vector.load %arg1[%c0_161, %c3_162, %c9_163, %c0_164] : memref<2x4x88x4xf32, #tpu.memory_space<vmem>>, vector<1x1x72x4xf32>
    %178 = vector.shape_cast %177 : vector<1x1x72x4xf32> to vector<72x4xf32>
    %179 = arith.truncf %178 : vector<72x4xf32> to vector<72x4xbf16>
    %cst_165 = arith.constant dense<0.000000e+00> : vector<72x128xf32>
    %180 = tpu.matmul %179, %22, %cst_165 {dimension_numbers = #tpu.dot_dimension_numbers<[1], [0], [0], [1], [0, 0, 1, 1], [], []>} : vector<72x4xbf16>, vector<4x128xbf16>, vector<72x128xf32> -> vector<72x128xf32>
    %181 = arith.addf %176, %180 : vector<72x128xf32>
    %c0_166 = arith.constant 0 : index
    %c2_167 = arith.constant 2 : index
    %c10_168 = arith.constant 10 : index
    %c0_169 = arith.constant 0 : index
    %182 = vector.load %arg1[%c0_166, %c2_167, %c10_168, %c0_169] : memref<2x4x88x4xf32, #tpu.memory_space<vmem>>, vector<1x1x72x4xf32>
    %183 = vector.shape_cast %182 : vector<1x1x72x4xf32> to vector<72x4xf32>
    %184 = arith.truncf %183 : vector<72x4xf32> to vector<72x4xbf16>
    %cst_170 = arith.constant dense<0.000000e+00> : vector<72x128xf32>
    %185 = tpu.matmul %184, %24, %cst_170 {dimension_numbers = #tpu.dot_dimension_numbers<[1], [0], [0], [1], [0, 0, 1, 1], [], []>} : vector<72x4xbf16>, vector<4x128xbf16>, vector<72x128xf32> -> vector<72x128xf32>
    %186 = arith.addf %181, %185 : vector<72x128xf32>
    %187 = vector.broadcast %4 : vector<1x128xf32> to vector<72x128xf32>
    %188 = arith.addf %186, %187 : vector<72x128xf32>
    %cst_171 = arith.constant 0.000000e+00 : f32
    %189 = vector.broadcast %cst_171 : f32 to vector<72x128xf32>
    %190 = arith.cmpf ogt, %188, %189 : vector<72x128xf32>
    %cst_172 = arith.constant 1.000000e-01 : f32
    %191 = vector.broadcast %cst_172 : f32 to vector<72x128xf32>
    %192 = arith.mulf %191, %188 : vector<72x128xf32>
    %193 = arith.select %190, %188, %192 : vector<72x128xi1>, vector<72x128xf32>
    %194 = arith.maximumf %142, %193 : vector<72x128xf32>
    %c0_173 = arith.constant 0 : index
    %c3_174 = arith.constant 3 : index
    %c0_175 = arith.constant 0 : index
    %c0_176 = arith.constant 0 : index
    %195 = vector.load %arg1[%c0_173, %c3_174, %c0_175, %c0_176] : memref<2x4x88x4xf32, #tpu.memory_space<vmem>>, vector<1x1x72x4xf32>
    %196 = vector.shape_cast %195 : vector<1x1x72x4xf32> to vector<72x4xf32>
    %197 = arith.truncf %196 : vector<72x4xf32> to vector<72x4xbf16>
    %cst_177 = arith.constant dense<0.000000e+00> : vector<72x128xf32>
    %198 = tpu.matmul %197, %8, %cst_177 {dimension_numbers = #tpu.dot_dimension_numbers<[1], [0], [0], [1], [0, 0, 1, 1], [], []>} : vector<72x4xbf16>, vector<4x128xbf16>, vector<72x128xf32> -> vector<72x128xf32>
    %c0_178 = arith.constant 0 : index
    %c2_179 = arith.constant 2 : index
    %c1_180 = arith.constant 1 : index
    %c0_181 = arith.constant 0 : index
    %199 = vector.load %arg1[%c0_178, %c2_179, %c1_180, %c0_181] : memref<2x4x88x4xf32, #tpu.memory_space<vmem>>, vector<1x1x72x4xf32>
    %200 = vector.shape_cast %199 : vector<1x1x72x4xf32> to vector<72x4xf32>
    %201 = arith.truncf %200 : vector<72x4xf32> to vector<72x4xbf16>
    %cst_182 = arith.constant dense<0.000000e+00> : vector<72x128xf32>
    %202 = tpu.matmul %201, %10, %cst_182 {dimension_numbers = #tpu.dot_dimension_numbers<[1], [0], [0], [1], [0, 0, 1, 1], [], []>} : vector<72x4xbf16>, vector<4x128xbf16>, vector<72x128xf32> -> vector<72x128xf32>
    %203 = arith.addf %198, %202 : vector<72x128xf32>
    %c0_183 = arith.constant 0 : index
    %c3_184 = arith.constant 3 : index
    %c1_185 = arith.constant 1 : index
    %c0_186 = arith.constant 0 : index
    %204 = vector.load %arg1[%c0_183, %c3_184, %c1_185, %c0_186] : memref<2x4x88x4xf32, #tpu.memory_space<vmem>>, vector<1x1x72x4xf32>
    %205 = vector.shape_cast %204 : vector<1x1x72x4xf32> to vector<72x4xf32>
    %206 = arith.truncf %205 : vector<72x4xf32> to vector<72x4xbf16>
    %cst_187 = arith.constant dense<0.000000e+00> : vector<72x128xf32>
    %207 = tpu.matmul %206, %12, %cst_187 {dimension_numbers = #tpu.dot_dimension_numbers<[1], [0], [0], [1], [0, 0, 1, 1], [], []>} : vector<72x4xbf16>, vector<4x128xbf16>, vector<72x128xf32> -> vector<72x128xf32>
    %208 = arith.addf %203, %207 : vector<72x128xf32>
    %c0_188 = arith.constant 0 : index
    %c1_189 = arith.constant 1 : index
    %c9_190 = arith.constant 9 : index
    %c0_191 = arith.constant 0 : index
    %209 = vector.load %arg1[%c0_188, %c1_189, %c9_190, %c0_191] : memref<2x4x88x4xf32, #tpu.memory_space<vmem>>, vector<1x1x72x4xf32>
    %210 = vector.shape_cast %209 : vector<1x1x72x4xf32> to vector<72x4xf32>
    %211 = arith.truncf %210 : vector<72x4xf32> to vector<72x4xbf16>
    %cst_192 = arith.constant dense<0.000000e+00> : vector<72x128xf32>
    %212 = tpu.matmul %211, %14, %cst_192 {dimension_numbers = #tpu.dot_dimension_numbers<[1], [0], [0], [1], [0, 0, 1, 1], [], []>} : vector<72x4xbf16>, vector<4x128xbf16>, vector<72x128xf32> -> vector<72x128xf32>
    %213 = arith.addf %208, %212 : vector<72x128xf32>
    %c0_193 = arith.constant 0 : index
    %c0_194 = arith.constant 0 : index
    %c10_195 = arith.constant 10 : index
    %c0_196 = arith.constant 0 : index
    %214 = vector.load %arg1[%c0_193, %c0_194, %c10_195, %c0_196] : memref<2x4x88x4xf32, #tpu.memory_space<vmem>>, vector<1x1x72x4xf32>
    %215 = vector.shape_cast %214 : vector<1x1x72x4xf32> to vector<72x4xf32>
    %216 = arith.truncf %215 : vector<72x4xf32> to vector<72x4xbf16>
    %cst_197 = arith.constant dense<0.000000e+00> : vector<72x128xf32>
    %217 = tpu.matmul %216, %16, %cst_197 {dimension_numbers = #tpu.dot_dimension_numbers<[1], [0], [0], [1], [0, 0, 1, 1], [], []>} : vector<72x4xbf16>, vector<4x128xbf16>, vector<72x128xf32> -> vector<72x128xf32>
    %218 = arith.addf %213, %217 : vector<72x128xf32>
    %c0_198 = arith.constant 0 : index
    %c1_199 = arith.constant 1 : index
    %c10_200 = arith.constant 10 : index
    %c0_201 = arith.constant 0 : index
    %219 = vector.load %arg1[%c0_198, %c1_199, %c10_200, %c0_201] : memref<2x4x88x4xf32, #tpu.memory_space<vmem>>, vector<1x1x72x4xf32>
    %220 = vector.shape_cast %219 : vector<1x1x72x4xf32> to vector<72x4xf32>
    %221 = arith.truncf %220 : vector<72x4xf32> to vector<72x4xbf16>
    %cst_202 = arith.constant dense<0.000000e+00> : vector<72x128xf32>
    %222 = tpu.matmul %221, %18, %cst_202 {dimension_numbers = #tpu.dot_dimension_numbers<[1], [0], [0], [1], [0, 0, 1, 1], [], []>} : vector<72x4xbf16>, vector<4x128xbf16>, vector<72x128xf32> -> vector<72x128xf32>
    %223 = arith.addf %218, %222 : vector<72x128xf32>
    %c0_203 = arith.constant 0 : index
    %c3_204 = arith.constant 3 : index
    %c9_205 = arith.constant 9 : index
    %c0_206 = arith.constant 0 : index
    %224 = vector.load %arg1[%c0_203, %c3_204, %c9_205, %c0_206] : memref<2x4x88x4xf32, #tpu.memory_space<vmem>>, vector<1x1x72x4xf32>
    %225 = vector.shape_cast %224 : vector<1x1x72x4xf32> to vector<72x4xf32>
    %226 = arith.truncf %225 : vector<72x4xf32> to vector<72x4xbf16>
    %cst_207 = arith.constant dense<0.000000e+00> : vector<72x128xf32>
    %227 = tpu.matmul %226, %20, %cst_207 {dimension_numbers = #tpu.dot_dimension_numbers<[1], [0], [0], [1], [0, 0, 1, 1], [], []>} : vector<72x4xbf16>, vector<4x128xbf16>, vector<72x128xf32> -> vector<72x128xf32>
    %228 = arith.addf %223, %227 : vector<72x128xf32>
    %c0_208 = arith.constant 0 : index
    %c2_209 = arith.constant 2 : index
    %c10_210 = arith.constant 10 : index
    %c0_211 = arith.constant 0 : index
    %229 = vector.load %arg1[%c0_208, %c2_209, %c10_210, %c0_211] : memref<2x4x88x4xf32, #tpu.memory_space<vmem>>, vector<1x1x72x4xf32>
    %230 = vector.shape_cast %229 : vector<1x1x72x4xf32> to vector<72x4xf32>
    %231 = arith.truncf %230 : vector<72x4xf32> to vector<72x4xbf16>
    %cst_212 = arith.constant dense<0.000000e+00> : vector<72x128xf32>
    %232 = tpu.matmul %231, %22, %cst_212 {dimension_numbers = #tpu.dot_dimension_numbers<[1], [0], [0], [1], [0, 0, 1, 1], [], []>} : vector<72x4xbf16>, vector<4x128xbf16>, vector<72x128xf32> -> vector<72x128xf32>
    %233 = arith.addf %228, %232 : vector<72x128xf32>
    %c0_213 = arith.constant 0 : index
    %c3_214 = arith.constant 3 : index
    %c10_215 = arith.constant 10 : index
    %c0_216 = arith.constant 0 : index
    %234 = vector.load %arg1[%c0_213, %c3_214, %c10_215, %c0_216] : memref<2x4x88x4xf32, #tpu.memory_space<vmem>>, vector<1x1x72x4xf32>
    %235 = vector.shape_cast %234 : vector<1x1x72x4xf32> to vector<72x4xf32>
    %236 = arith.truncf %235 : vector<72x4xf32> to vector<72x4xbf16>
    %cst_217 = arith.constant dense<0.000000e+00> : vector<72x128xf32>
    %237 = tpu.matmul %236, %24, %cst_217 {dimension_numbers = #tpu.dot_dimension_numbers<[1], [0], [0], [1], [0, 0, 1, 1], [], []>} : vector<72x4xbf16>, vector<4x128xbf16>, vector<72x128xf32> -> vector<72x128xf32>
    %238 = arith.addf %233, %237 : vector<72x128xf32>
    %239 = vector.broadcast %4 : vector<1x128xf32> to vector<72x128xf32>
    %240 = arith.addf %238, %239 : vector<72x128xf32>
    %cst_218 = arith.constant 0.000000e+00 : f32
    %241 = vector.broadcast %cst_218 : f32 to vector<72x128xf32>
    %242 = arith.cmpf ogt, %240, %241 : vector<72x128xf32>
    %cst_219 = arith.constant 1.000000e-01 : f32
    %243 = vector.broadcast %cst_219 : f32 to vector<72x128xf32>
    %244 = arith.mulf %243, %240 : vector<72x128xf32>
    %245 = arith.select %242, %240, %244 : vector<72x128xi1>, vector<72x128xf32>
    %246 = arith.maximumf %194, %245 : vector<72x128xf32>
    %247 = arith.truncf %246 : vector<72x128xf32> to vector<72x128xbf16>
    %cst_220 = arith.constant dense<0.000000e+00> : vector<72x128xf32>
    %248 = tpu.matmul %247, %6, %cst_220 {dimension_numbers = #tpu.dot_dimension_numbers<[1], [0], [0], [1], [0, 0, 1, 1], [], []>} : vector<72x128xbf16>, vector<128x128xbf16>, vector<72x128xf32> -> vector<72x128xf32>
    %249 = vector.broadcast %5 : vector<1x128xf32> to vector<72x128xf32>
    %250 = arith.addf %248, %249 : vector<72x128xf32>
    %251 = math.exp %250 : vector<72x128xf32>
    %cst_221 = arith.constant 1.000000e+00 : f32
    %252 = vector.broadcast %cst_221 : f32 to vector<72x128xf32>
    %253 = arith.addf %252, %251 : vector<72x128xf32>
    %254 = tpu.reciprocal %253 {approx = true} : vector<72x128xf32> -> vector<72x128xf32>
    %255 = arith.mulf %251, %254 : vector<72x128xf32>
    %256 = arith.addf %255, %39 : vector<72x128xf32>
    %257 = vector.broadcast %0 : vector<1x128xf32> to vector<72x128xf32>
    %258 = arith.mulf %256, %257 : vector<72x128xf32>
    %259 = vector.broadcast %0 : vector<1x128xf32> to vector<72x128xf32>
    %260 = arith.mulf %251, %259 : vector<72x128xf32>
    %cst_222 = arith.constant 0.000000e+00 : f32
    %261 = vector.broadcast %cst_222 : f32 to vector<1x128xf32>
    %262 = arith.cmpf ogt, %1, %261 : vector<1x128xf32>
    %263 = vector.shape_cast %262 : vector<1x128xi1> to vector<1x128xi1>
    %264 = vector.broadcast %263 : vector<1x128xi1> to vector<72x128xi1>
    %265 = arith.select %264, %260, %258 : vector<72x128xi1>, vector<72x128xf32>
    %c0_223 = arith.constant 0 : index
    %c0_224 = arith.constant 0 : index
    %c0_225 = arith.constant 0 : index
    %266 = vector.load %arg7[%c0_223, %c0_224, %c0_225] : memref<2x72x128xf32, #tpu.memory_space<vmem>>, vector<1x72x128xf32>
    %267 = vector.shape_cast %266 : vector<1x72x128xf32> to vector<72x128xf32>
    %268 = vector.shape_cast %265 : vector<72x128xf32> to vector<1x72x128xf32>
    tpu.vector_store %arg7[%c0_223, %c0_224, %c0_225], %268 {strides = array<i32>} : memref<2x72x128xf32, #tpu.memory_space<vmem>>, vector<1x72x128xf32>,
    %c1_226 = arith.constant 1 : index
    %c0_227 = arith.constant 0 : index
    %c0_228 = arith.constant 0 : index
    %c0_229 = arith.constant 0 : index
    %269 = vector.load %arg1[%c1_226, %c0_227, %c0_228, %c0_229] : memref<2x4x88x4xf32, #tpu.memory_space<vmem>>, vector<1x1x72x4xf32>
    %270 = vector.shape_cast %269 : vector<1x1x72x4xf32> to vector<72x4xf32>
    %271 = arith.truncf %270 : vector<72x4xf32> to vector<72x4xbf16>
    %cst_230 = arith.constant dense<0.000000e+00> : vector<72x128xf32>
    %272 = tpu.matmul %271, %8, %cst_230 {dimension_numbers = #tpu.dot_dimension_numbers<[1], [0], [0], [1], [0, 0, 1, 1], [], []>} : vector<72x4xbf16>, vector<4x128xbf16>, vector<72x128xf32> -> vector<72x128xf32>
    %c1_231 = arith.constant 1 : index
    %c1_232 = arith.constant 1 : index
    %c0_233 = arith.constant 0 : index
    %c0_234 = arith.constant 0 : index
    %273 = vector.load %arg1[%c1_231, %c1_232, %c0_233, %c0_234] : memref<2x4x88x4xf32, #tpu.memory_space<vmem>>, vector<1x1x72x4xf32>
    %274 = vector.shape_cast %273 : vector<1x1x72x4xf32> to vector<72x4xf32>
    %275 = arith.truncf %274 : vector<72x4xf32> to vector<72x4xbf16>
    %cst_235 = arith.constant dense<0.000000e+00> : vector<72x128xf32>
    %276 = tpu.matmul %275, %10, %cst_235 {dimension_numbers = #tpu.dot_dimension_numbers<[1], [0], [0], [1], [0, 0, 1, 1], [], []>} : vector<72x4xbf16>, vector<4x128xbf16>, vector<72x128xf32> -> vector<72x128xf32>
    %277 = arith.addf %272, %276 : vector<72x128xf32>
    %c1_236 = arith.constant 1 : index
    %c0_237 = arith.constant 0 : index
    %c1_238 = arith.constant 1 : index
    %c0_239 = arith.constant 0 : index
    %278 = vector.load %arg1[%c1_236, %c0_237, %c1_238, %c0_239] : memref<2x4x88x4xf32, #tpu.memory_space<vmem>>, vector<1x1x72x4xf32>
    %279 = vector.shape_cast %278 : vector<1x1x72x4xf32> to vector<72x4xf32>
    %280 = arith.truncf %279 : vector<72x4xf32> to vector<72x4xbf16>
    %cst_240 = arith.constant dense<0.000000e+00> : vector<72x128xf32>
    %281 = tpu.matmul %280, %12, %cst_240 {dimension_numbers = #tpu.dot_dimension_numbers<[1], [0], [0], [1], [0, 0, 1, 1], [], []>} : vector<72x4xbf16>, vector<4x128xbf16>, vector<72x128xf32> -> vector<72x128xf32>
    %282 = arith.addf %277, %281 : vector<72x128xf32>
    %c1_241 = arith.constant 1 : index
    %c2_242 = arith.constant 2 : index
    %c0_243 = arith.constant 0 : index
    %c0_244 = arith.constant 0 : index
    %283 = vector.load %arg1[%c1_241, %c2_242, %c0_243, %c0_244] : memref<2x4x88x4xf32, #tpu.memory_space<vmem>>, vector<1x1x72x4xf32>
    %284 = vector.shape_cast %283 : vector<1x1x72x4xf32> to vector<72x4xf32>
    %285 = arith.truncf %284 : vector<72x4xf32> to vector<72x4xbf16>
    %cst_245 = arith.constant dense<0.000000e+00> : vector<72x128xf32>
    %286 = tpu.matmul %285, %14, %cst_245 {dimension_numbers = #tpu.dot_dimension_numbers<[1], [0], [0], [1], [0, 0, 1, 1], [], []>} : vector<72x4xbf16>, vector<4x128xbf16>, vector<72x128xf32> -> vector<72x128xf32>
    %287 = arith.addf %282, %286 : vector<72x128xf32>
    %c1_246 = arith.constant 1 : index
    %c3_247 = arith.constant 3 : index
    %c0_248 = arith.constant 0 : index
    %c0_249 = arith.constant 0 : index
    %288 = vector.load %arg1[%c1_246, %c3_247, %c0_248, %c0_249] : memref<2x4x88x4xf32, #tpu.memory_space<vmem>>, vector<1x1x72x4xf32>
    %289 = vector.shape_cast %288 : vector<1x1x72x4xf32> to vector<72x4xf32>
    %290 = arith.truncf %289 : vector<72x4xf32> to vector<72x4xbf16>
    %cst_250 = arith.constant dense<0.000000e+00> : vector<72x128xf32>
    %291 = tpu.matmul %290, %16, %cst_250 {dimension_numbers = #tpu.dot_dimension_numbers<[1], [0], [0], [1], [0, 0, 1, 1], [], []>} : vector<72x4xbf16>, vector<4x128xbf16>, vector<72x128xf32> -> vector<72x128xf32>
    %292 = arith.addf %287, %291 : vector<72x128xf32>
    %c1_251 = arith.constant 1 : index
    %c2_252 = arith.constant 2 : index
    %c1_253 = arith.constant 1 : index
    %c0_254 = arith.constant 0 : index
    %293 = vector.load %arg1[%c1_251, %c2_252, %c1_253, %c0_254] : memref<2x4x88x4xf32, #tpu.memory_space<vmem>>, vector<1x1x72x4xf32>
    %294 = vector.shape_cast %293 : vector<1x1x72x4xf32> to vector<72x4xf32>
    %295 = arith.truncf %294 : vector<72x4xf32> to vector<72x4xbf16>
    %cst_255 = arith.constant dense<0.000000e+00> : vector<72x128xf32>
    %296 = tpu.matmul %295, %18, %cst_255 {dimension_numbers = #tpu.dot_dimension_numbers<[1], [0], [0], [1], [0, 0, 1, 1], [], []>} : vector<72x4xbf16>, vector<4x128xbf16>, vector<72x128xf32> -> vector<72x128xf32>
    %297 = arith.addf %292, %296 : vector<72x128xf32>
    %c1_256 = arith.constant 1 : index
    %c0_257 = arith.constant 0 : index
    %c9_258 = arith.constant 9 : index
    %c0_259 = arith.constant 0 : index
    %298 = vector.load %arg1[%c1_256, %c0_257, %c9_258, %c0_259] : memref<2x4x88x4xf32, #tpu.memory_space<vmem>>, vector<1x1x72x4xf32>
    %299 = vector.shape_cast %298 : vector<1x1x72x4xf32> to vector<72x4xf32>
    %300 = arith.truncf %299 : vector<72x4xf32> to vector<72x4xbf16>
    %cst_260 = arith.constant dense<0.000000e+00> : vector<72x128xf32>
    %301 = tpu.matmul %300, %20, %cst_260 {dimension_numbers = #tpu.dot_dimension_numbers<[1], [0], [0], [1], [0, 0, 1, 1], [], []>} : vector<72x4xbf16>, vector<4x128xbf16>, vector<72x128xf32> -> vector<72x128xf32>
    %302 = arith.addf %297, %301 : vector<72x128xf32>
    %c1_261 = arith.constant 1 : index
    %c1_262 = arith.constant 1 : index
    %c9_263 = arith.constant 9 : index
    %c0_264 = arith.constant 0 : index
    %303 = vector.load %arg1[%c1_261, %c1_262, %c9_263, %c0_264] : memref<2x4x88x4xf32, #tpu.memory_space<vmem>>, vector<1x1x72x4xf32>
    %304 = vector.shape_cast %303 : vector<1x1x72x4xf32> to vector<72x4xf32>
    %305 = arith.truncf %304 : vector<72x4xf32> to vector<72x4xbf16>
    %cst_265 = arith.constant dense<0.000000e+00> : vector<72x128xf32>
    %306 = tpu.matmul %305, %22, %cst_265 {dimension_numbers = #tpu.dot_dimension_numbers<[1], [0], [0], [1], [0, 0, 1, 1], [], []>} : vector<72x4xbf16>, vector<4x128xbf16>, vector<72x128xf32> -> vector<72x128xf32>
    %307 = arith.addf %302, %306 : vector<72x128xf32>
    %c1_266 = arith.constant 1 : index
    %c0_267 = arith.constant 0 : index
    %c10_268 = arith.constant 10 : index
    %c0_269 = arith.constant 0 : index
    %308 = vector.load %arg1[%c1_266, %c0_267, %c10_268, %c0_269] : memref<2x4x88x4xf32, #tpu.memory_space<vmem>>, vector<1x1x72x4xf32>
    %309 = vector.shape_cast %308 : vector<1x1x72x4xf32> to vector<72x4xf32>
    %310 = arith.truncf %309 : vector<72x4xf32> to vector<72x4xbf16>
    %cst_270 = arith.constant dense<0.000000e+00> : vector<72x128xf32>
    %311 = tpu.matmul %310, %24, %cst_270 {dimension_numbers = #tpu.dot_dimension_numbers<[1], [0], [0], [1], [0, 0, 1, 1], [], []>} : vector<72x4xbf16>, vector<4x128xbf16>, vector<72x128xf32> -> vector<72x128xf32>
    %312 = arith.addf %307, %311 : vector<72x128xf32>
    %313 = vector.broadcast %4 : vector<1x128xf32> to vector<72x128xf32>
    %314 = arith.addf %312, %313 : vector<72x128xf32>
    %cst_271 = arith.constant 0.000000e+00 : f32
    %315 = vector.broadcast %cst_271 : f32 to vector<72x128xf32>
    %316 = arith.cmpf ogt, %314, %315 : vector<72x128xf32>
    %cst_272 = arith.constant 1.000000e-01 : f32
    %317 = vector.broadcast %cst_272 : f32 to vector<72x128xf32>
    %318 = arith.mulf %317, %314 : vector<72x128xf32>
    %319 = arith.select %316, %314, %318 : vector<72x128xi1>, vector<72x128xf32>
    %c1_273 = arith.constant 1 : index
    %c1_274 = arith.constant 1 : index
    %c0_275 = arith.constant 0 : index
    %c0_276 = arith.constant 0 : index
    %320 = vector.load %arg1[%c1_273, %c1_274, %c0_275, %c0_276] : memref<2x4x88x4xf32, #tpu.memory_space<vmem>>, vector<1x1x72x4xf32>
    %321 = vector.shape_cast %320 : vector<1x1x72x4xf32> to vector<72x4xf32>
    %322 = arith.truncf %321 : vector<72x4xf32> to vector<72x4xbf16>
    %cst_277 = arith.constant dense<0.000000e+00> : vector<72x128xf32>
    %323 = tpu.matmul %322, %8, %cst_277 {dimension_numbers = #tpu.dot_dimension_numbers<[1], [0], [0], [1], [0, 0, 1, 1], [], []>} : vector<72x4xbf16>, vector<4x128xbf16>, vector<72x128xf32> -> vector<72x128xf32>
    %c1_278 = arith.constant 1 : index
    %c0_279 = arith.constant 0 : index
    %c1_280 = arith.constant 1 : index
    %c0_281 = arith.constant 0 : index
    %324 = vector.load %arg1[%c1_278, %c0_279, %c1_280, %c0_281] : memref<2x4x88x4xf32, #tpu.memory_space<vmem>>, vector<1x1x72x4xf32>
    %325 = vector.shape_cast %324 : vector<1x1x72x4xf32> to vector<72x4xf32>
    %326 = arith.truncf %325 : vector<72x4xf32> to vector<72x4xbf16>
    %cst_282 = arith.constant dense<0.000000e+00> : vector<72x128xf32>
    %327 = tpu.matmul %326, %10, %cst_282 {dimension_numbers = #tpu.dot_dimension_numbers<[1], [0], [0], [1], [0, 0, 1, 1], [], []>} : vector<72x4xbf16>, vector<4x128xbf16>, vector<72x128xf32> -> vector<72x128xf32>
    %328 = arith.addf %323, %327 : vector<72x128xf32>
    %c1_283 = arith.constant 1 : index
    %c1_284 = arith.constant 1 : index
    %c1_285 = arith.constant 1 : index
    %c0_286 = arith.constant 0 : index
    %329 = vector.load %arg1[%c1_283, %c1_284, %c1_285, %c0_286] : memref<2x4x88x4xf32, #tpu.memory_space<vmem>>, vector<1x1x72x4xf32>
    %330 = vector.shape_cast %329 : vector<1x1x72x4xf32> to vector<72x4xf32>
    %331 = arith.truncf %330 : vector<72x4xf32> to vector<72x4xbf16>
    %cst_287 = arith.constant dense<0.000000e+00> : vector<72x128xf32>
    %332 = tpu.matmul %331, %12, %cst_287 {dimension_numbers = #tpu.dot_dimension_numbers<[1], [0], [0], [1], [0, 0, 1, 1], [], []>} : vector<72x4xbf16>, vector<4x128xbf16>, vector<72x128xf32> -> vector<72x128xf32>
    %333 = arith.addf %328, %332 : vector<72x128xf32>
    %c1_288 = arith.constant 1 : index
    %c3_289 = arith.constant 3 : index
    %c0_290 = arith.constant 0 : index
    %c0_291 = arith.constant 0 : index
    %334 = vector.load %arg1[%c1_288, %c3_289, %c0_290, %c0_291] : memref<2x4x88x4xf32, #tpu.memory_space<vmem>>, vector<1x1x72x4xf32>
    %335 = vector.shape_cast %334 : vector<1x1x72x4xf32> to vector<72x4xf32>
    %336 = arith.truncf %335 : vector<72x4xf32> to vector<72x4xbf16>
    %cst_292 = arith.constant dense<0.000000e+00> : vector<72x128xf32>
    %337 = tpu.matmul %336, %14, %cst_292 {dimension_numbers = #tpu.dot_dimension_numbers<[1], [0], [0], [1], [0, 0, 1, 1], [], []>} : vector<72x4xbf16>, vector<4x128xbf16>, vector<72x128xf32> -> vector<72x128xf32>
    %338 = arith.addf %333, %337 : vector<72x128xf32>
    %c1_293 = arith.constant 1 : index
    %c2_294 = arith.constant 2 : index
    %c1_295 = arith.constant 1 : index
    %c0_296 = arith.constant 0 : index
    %339 = vector.load %arg1[%c1_293, %c2_294, %c1_295, %c0_296] : memref<2x4x88x4xf32, #tpu.memory_space<vmem>>, vector<1x1x72x4xf32>
    %340 = vector.shape_cast %339 : vector<1x1x72x4xf32> to vector<72x4xf32>
    %341 = arith.truncf %340 : vector<72x4xf32> to vector<72x4xbf16>
    %cst_297 = arith.constant dense<0.000000e+00> : vector<72x128xf32>
    %342 = tpu.matmul %341, %16, %cst_297 {dimension_numbers = #tpu.dot_dimension_numbers<[1], [0], [0], [1], [0, 0, 1, 1], [], []>} : vector<72x4xbf16>, vector<4x128xbf16>, vector<72x128xf32> -> vector<72x128xf32>
    %343 = arith.addf %338, %342 : vector<72x128xf32>
    %c1_298 = arith.constant 1 : index
    %c3_299 = arith.constant 3 : index
    %c1_300 = arith.constant 1 : index
    %c0_301 = arith.constant 0 : index
    %344 = vector.load %arg1[%c1_298, %c3_299, %c1_300, %c0_301] : memref<2x4x88x4xf32, #tpu.memory_space<vmem>>, vector<1x1x72x4xf32>
    %345 = vector.shape_cast %344 : vector<1x1x72x4xf32> to vector<72x4xf32>
    %346 = arith.truncf %345 : vector<72x4xf32> to vector<72x4xbf16>
    %cst_302 = arith.constant dense<0.000000e+00> : vector<72x128xf32>
    %347 = tpu.matmul %346, %18, %cst_302 {dimension_numbers = #tpu.dot_dimension_numbers<[1], [0], [0], [1], [0, 0, 1, 1], [], []>} : vector<72x4xbf16>, vector<4x128xbf16>, vector<72x128xf32> -> vector<72x128xf32>
    %348 = arith.addf %343, %347 : vector<72x128xf32>
    %c1_303 = arith.constant 1 : index
    %c1_304 = arith.constant 1 : index
    %c9_305 = arith.constant 9 : index
    %c0_306 = arith.constant 0 : index
    %349 = vector.load %arg1[%c1_303, %c1_304, %c9_305, %c0_306] : memref<2x4x88x4xf32, #tpu.memory_space<vmem>>, vector<1x1x72x4xf32>
    %350 = vector.shape_cast %349 : vector<1x1x72x4xf32> to vector<72x4xf32>
    %351 = arith.truncf %350 : vector<72x4xf32> to vector<72x4xbf16>
    %cst_307 = arith.constant dense<0.000000e+00> : vector<72x128xf32>
    %352 = tpu.matmul %351, %20, %cst_307 {dimension_numbers = #tpu.dot_dimension_numbers<[1], [0], [0], [1], [0, 0, 1, 1], [], []>} : vector<72x4xbf16>, vector<4x128xbf16>, vector<72x128xf32> -> vector<72x128xf32>
    %353 = arith.addf %348, %352 : vector<72x128xf32>
    %c1_308 = arith.constant 1 : index
    %c0_309 = arith.constant 0 : index
    %c10_310 = arith.constant 10 : index
    %c0_311 = arith.constant 0 : index
    %354 = vector.load %arg1[%c1_308, %c0_309, %c10_310, %c0_311] : memref<2x4x88x4xf32, #tpu.memory_space<vmem>>, vector<1x1x72x4xf32>
    %355 = vector.shape_cast %354 : vector<1x1x72x4xf32> to vector<72x4xf32>
    %356 = arith.truncf %355 : vector<72x4xf32> to vector<72x4xbf16>
    %cst_312 = arith.constant dense<0.000000e+00> : vector<72x128xf32>
    %357 = tpu.matmul %356, %22, %cst_312 {dimension_numbers = #tpu.dot_dimension_numbers<[1], [0], [0], [1], [0, 0, 1, 1], [], []>} : vector<72x4xbf16>, vector<4x128xbf16>, vector<72x128xf32> -> vector<72x128xf32>
    %358 = arith.addf %353, %357 : vector<72x128xf32>
    %c1_313 = arith.constant 1 : index
    %c1_314 = arith.constant 1 : index
    %c10_315 = arith.constant 10 : index
    %c0_316 = arith.constant 0 : index
    %359 = vector.load %arg1[%c1_313, %c1_314, %c10_315, %c0_316] : memref<2x4x88x4xf32, #tpu.memory_space<vmem>>, vector<1x1x72x4xf32>
    %360 = vector.shape_cast %359 : vector<1x1x72x4xf32> to vector<72x4xf32>
    %361 = arith.truncf %360 : vector<72x4xf32> to vector<72x4xbf16>
    %cst_317 = arith.constant dense<0.000000e+00> : vector<72x128xf32>
    %362 = tpu.matmul %361, %24, %cst_317 {dimension_numbers = #tpu.dot_dimension_numbers<[1], [0], [0], [1], [0, 0, 1, 1], [], []>} : vector<72x4xbf16>, vector<4x128xbf16>, vector<72x128xf32> -> vector<72x128xf32>
    %363 = arith.addf %358, %362 : vector<72x128xf32>
    %364 = vector.broadcast %4 : vector<1x128xf32> to vector<72x128xf32>
    %365 = arith.addf %363, %364 : vector<72x128xf32>
    %cst_318 = arith.constant 0.000000e+00 : f32
    %366 = vector.broadcast %cst_318 : f32 to vector<72x128xf32>
    %367 = arith.cmpf ogt, %365, %366 : vector<72x128xf32>
    %cst_319 = arith.constant 1.000000e-01 : f32
    %368 = vector.broadcast %cst_319 : f32 to vector<72x128xf32>
    %369 = arith.mulf %368, %365 : vector<72x128xf32>
    %370 = arith.select %367, %365, %369 : vector<72x128xi1>, vector<72x128xf32>
    %371 = arith.maximumf %319, %370 : vector<72x128xf32>
    %c1_320 = arith.constant 1 : index
    %c2_321 = arith.constant 2 : index
    %c0_322 = arith.constant 0 : index
    %c0_323 = arith.constant 0 : index
    %372 = vector.load %arg1[%c1_320, %c2_321, %c0_322, %c0_323] : memref<2x4x88x4xf32, #tpu.memory_space<vmem>>, vector<1x1x72x4xf32>
    %373 = vector.shape_cast %372 : vector<1x1x72x4xf32> to vector<72x4xf32>
    %374 = arith.truncf %373 : vector<72x4xf32> to vector<72x4xbf16>
    %cst_324 = arith.constant dense<0.000000e+00> : vector<72x128xf32>
    %375 = tpu.matmul %374, %8, %cst_324 {dimension_numbers = #tpu.dot_dimension_numbers<[1], [0], [0], [1], [0, 0, 1, 1], [], []>} : vector<72x4xbf16>, vector<4x128xbf16>, vector<72x128xf32> -> vector<72x128xf32>
    %c1_325 = arith.constant 1 : index
    %c3_326 = arith.constant 3 : index
    %c0_327 = arith.constant 0 : index
    %c0_328 = arith.constant 0 : index
    %376 = vector.load %arg1[%c1_325, %c3_326, %c0_327, %c0_328] : memref<2x4x88x4xf32, #tpu.memory_space<vmem>>, vector<1x1x72x4xf32>
    %377 = vector.shape_cast %376 : vector<1x1x72x4xf32> to vector<72x4xf32>
    %378 = arith.truncf %377 : vector<72x4xf32> to vector<72x4xbf16>
    %cst_329 = arith.constant dense<0.000000e+00> : vector<72x128xf32>
    %379 = tpu.matmul %378, %10, %cst_329 {dimension_numbers = #tpu.dot_dimension_numbers<[1], [0], [0], [1], [0, 0, 1, 1], [], []>} : vector<72x4xbf16>, vector<4x128xbf16>, vector<72x128xf32> -> vector<72x128xf32>
    %380 = arith.addf %375, %379 : vector<72x128xf32>
    %c1_330 = arith.constant 1 : index
    %c2_331 = arith.constant 2 : index
    %c1_332 = arith.constant 1 : index
    %c0_333 = arith.constant 0 : index
    %381 = vector.load %arg1[%c1_330, %c2_331, %c1_332, %c0_333] : memref<2x4x88x4xf32, #tpu.memory_space<vmem>>, vector<1x1x72x4xf32>
    %382 = vector.shape_cast %381 : vector<1x1x72x4xf32> to vector<72x4xf32>
    %383 = arith.truncf %382 : vector<72x4xf32> to vector<72x4xbf16>
    %cst_334 = arith.constant dense<0.000000e+00> : vector<72x128xf32>
    %384 = tpu.matmul %383, %12, %cst_334 {dimension_numbers = #tpu.dot_dimension_numbers<[1], [0], [0], [1], [0, 0, 1, 1], [], []>} : vector<72x4xbf16>, vector<4x128xbf16>, vector<72x128xf32> -> vector<72x128xf32>
    %385 = arith.addf %380, %384 : vector<72x128xf32>
    %c1_335 = arith.constant 1 : index
    %c0_336 = arith.constant 0 : index
    %c9_337 = arith.constant 9 : index
    %c0_338 = arith.constant 0 : index
    %386 = vector.load %arg1[%c1_335, %c0_336, %c9_337, %c0_338] : memref<2x4x88x4xf32, #tpu.memory_space<vmem>>, vector<1x1x72x4xf32>
    %387 = vector.shape_cast %386 : vector<1x1x72x4xf32> to vector<72x4xf32>
    %388 = arith.truncf %387 : vector<72x4xf32> to vector<72x4xbf16>
    %cst_339 = arith.constant dense<0.000000e+00> : vector<72x128xf32>
    %389 = tpu.matmul %388, %14, %cst_339 {dimension_numbers = #tpu.dot_dimension_numbers<[1], [0], [0], [1], [0, 0, 1, 1], [], []>} : vector<72x4xbf16>, vector<4x128xbf16>, vector<72x128xf32> -> vector<72x128xf32>
    %390 = arith.addf %385, %389 : vector<72x128xf32>
    %c1_340 = arith.constant 1 : index
    %c1_341 = arith.constant 1 : index
    %c9_342 = arith.constant 9 : index
    %c0_343 = arith.constant 0 : index
    %391 = vector.load %arg1[%c1_340, %c1_341, %c9_342, %c0_343] : memref<2x4x88x4xf32, #tpu.memory_space<vmem>>, vector<1x1x72x4xf32>
    %392 = vector.shape_cast %391 : vector<1x1x72x4xf32> to vector<72x4xf32>
    %393 = arith.truncf %392 : vector<72x4xf32> to vector<72x4xbf16>
    %cst_344 = arith.constant dense<0.000000e+00> : vector<72x128xf32>
    %394 = tpu.matmul %393, %16, %cst_344 {dimension_numbers = #tpu.dot_dimension_numbers<[1], [0], [0], [1], [0, 0, 1, 1], [], []>} : vector<72x4xbf16>, vector<4x128xbf16>, vector<72x128xf32> -> vector<72x128xf32>
    %395 = arith.addf %390, %394 : vector<72x128xf32>
    %c1_345 = arith.constant 1 : index
    %c0_346 = arith.constant 0 : index
    %c10_347 = arith.constant 10 : index
    %c0_348 = arith.constant 0 : index
    %396 = vector.load %arg1[%c1_345, %c0_346, %c10_347, %c0_348] : memref<2x4x88x4xf32, #tpu.memory_space<vmem>>, vector<1x1x72x4xf32>
    %397 = vector.shape_cast %396 : vector<1x1x72x4xf32> to vector<72x4xf32>
    %398 = arith.truncf %397 : vector<72x4xf32> to vector<72x4xbf16>
    %cst_349 = arith.constant dense<0.000000e+00> : vector<72x128xf32>
    %399 = tpu.matmul %398, %18, %cst_349 {dimension_numbers = #tpu.dot_dimension_numbers<[1], [0], [0], [1], [0, 0, 1, 1], [], []>} : vector<72x4xbf16>, vector<4x128xbf16>, vector<72x128xf32> -> vector<72x128xf32>
    %400 = arith.addf %395, %399 : vector<72x128xf32>
    %c1_350 = arith.constant 1 : index
    %c2_351 = arith.constant 2 : index
    %c9_352 = arith.constant 9 : index
    %c0_353 = arith.constant 0 : index
    %401 = vector.load %arg1[%c1_350, %c2_351, %c9_352, %c0_353] : memref<2x4x88x4xf32, #tpu.memory_space<vmem>>, vector<1x1x72x4xf32>
    %402 = vector.shape_cast %401 : vector<1x1x72x4xf32> to vector<72x4xf32>
    %403 = arith.truncf %402 : vector<72x4xf32> to vector<72x4xbf16>
    %cst_354 = arith.constant dense<0.000000e+00> : vector<72x128xf32>
    %404 = tpu.matmul %403, %20, %cst_354 {dimension_numbers = #tpu.dot_dimension_numbers<[1], [0], [0], [1], [0, 0, 1, 1], [], []>} : vector<72x4xbf16>, vector<4x128xbf16>, vector<72x128xf32> -> vector<72x128xf32>
    %405 = arith.addf %400, %404 : vector<72x128xf32>
    %c1_355 = arith.constant 1 : index
    %c3_356 = arith.constant 3 : index
    %c9_357 = arith.constant 9 : index
    %c0_358 = arith.constant 0 : index
    %406 = vector.load %arg1[%c1_355, %c3_356, %c9_357, %c0_358] : memref<2x4x88x4xf32, #tpu.memory_space<vmem>>, vector<1x1x72x4xf32>
    %407 = vector.shape_cast %406 : vector<1x1x72x4xf32> to vector<72x4xf32>
    %408 = arith.truncf %407 : vector<72x4xf32> to vector<72x4xbf16>
    %cst_359 = arith.constant dense<0.000000e+00> : vector<72x128xf32>
    %409 = tpu.matmul %408, %22, %cst_359 {dimension_numbers = #tpu.dot_dimension_numbers<[1], [0], [0], [1], [0, 0, 1, 1], [], []>} : vector<72x4xbf16>, vector<4x128xbf16>, vector<72x128xf32> -> vector<72x128xf32>
    %410 = arith.addf %405, %409 : vector<72x128xf32>
    %c1_360 = arith.constant 1 : index
    %c2_361 = arith.constant 2 : index
    %c10_362 = arith.constant 10 : index
    %c0_363 = arith.constant 0 : index
    %411 = vector.load %arg1[%c1_360, %c2_361, %c10_362, %c0_363] : memref<2x4x88x4xf32, #tpu.memory_space<vmem>>, vector<1x1x72x4xf32>
    %412 = vector.shape_cast %411 : vector<1x1x72x4xf32> to vector<72x4xf32>
    %413 = arith.truncf %412 : vector<72x4xf32> to vector<72x4xbf16>
    %cst_364 = arith.constant dense<0.000000e+00> : vector<72x128xf32>
    %414 = tpu.matmul %413, %24, %cst_364 {dimension_numbers = #tpu.dot_dimension_numbers<[1], [0], [0], [1], [0, 0, 1, 1], [], []>} : vector<72x4xbf16>, vector<4x128xbf16>, vector<72x128xf32> -> vector<72x128xf32>
    %415 = arith.addf %410, %414 : vector<72x128xf32>
    %416 = vector.broadcast %4 : vector<1x128xf32> to vector<72x128xf32>
    %417 = arith.addf %415, %416 : vector<72x128xf32>
    %cst_365 = arith.constant 0.000000e+00 : f32
    %418 = vector.broadcast %cst_365 : f32 to vector<72x128xf32>
    %419 = arith.cmpf ogt, %417, %418 : vector<72x128xf32>
    %cst_366 = arith.constant 1.000000e-01 : f32
    %420 = vector.broadcast %cst_366 : f32 to vector<72x128xf32>
    %421 = arith.mulf %420, %417 : vector<72x128xf32>
    %422 = arith.select %419, %417, %421 : vector<72x128xi1>, vector<72x128xf32>
    %423 = arith.maximumf %371, %422 : vector<72x128xf32>
    %c1_367 = arith.constant 1 : index
    %c3_368 = arith.constant 3 : index
    %c0_369 = arith.constant 0 : index
    %c0_370 = arith.constant 0 : index
    %424 = vector.load %arg1[%c1_367, %c3_368, %c0_369, %c0_370] : memref<2x4x88x4xf32, #tpu.memory_space<vmem>>, vector<1x1x72x4xf32>
    %425 = vector.shape_cast %424 : vector<1x1x72x4xf32> to vector<72x4xf32>
    %426 = arith.truncf %425 : vector<72x4xf32> to vector<72x4xbf16>
    %cst_371 = arith.constant dense<0.000000e+00> : vector<72x128xf32>
    %427 = tpu.matmul %426, %8, %cst_371 {dimension_numbers = #tpu.dot_dimension_numbers<[1], [0], [0], [1], [0, 0, 1, 1], [], []>} : vector<72x4xbf16>, vector<4x128xbf16>, vector<72x128xf32> -> vector<72x128xf32>
    %c1_372 = arith.constant 1 : index
    %c2_373 = arith.constant 2 : index
    %c1_374 = arith.constant 1 : index
    %c0_375 = arith.constant 0 : index
    %428 = vector.load %arg1[%c1_372, %c2_373, %c1_374, %c0_375] : memref<2x4x88x4xf32, #tpu.memory_space<vmem>>, vector<1x1x72x4xf32>
    %429 = vector.shape_cast %428 : vector<1x1x72x4xf32> to vector<72x4xf32>
    %430 = arith.truncf %429 : vector<72x4xf32> to vector<72x4xbf16>
    %cst_376 = arith.constant dense<0.000000e+00> : vector<72x128xf32>
    %431 = tpu.matmul %430, %10, %cst_376 {dimension_numbers = #tpu.dot_dimension_numbers<[1], [0], [0], [1], [0, 0, 1, 1], [], []>} : vector<72x4xbf16>, vector<4x128xbf16>, vector<72x128xf32> -> vector<72x128xf32>
    %432 = arith.addf %427, %431 : vector<72x128xf32>
    %c1_377 = arith.constant 1 : index
    %c3_378 = arith.constant 3 : index
    %c1_379 = arith.constant 1 : index
    %c0_380 = arith.constant 0 : index
    %433 = vector.load %arg1[%c1_377, %c3_378, %c1_379, %c0_380] : memref<2x4x88x4xf32, #tpu.memory_space<vmem>>, vector<1x1x72x4xf32>
    %434 = vector.shape_cast %433 : vector<1x1x72x4xf32> to vector<72x4xf32>
    %435 = arith.truncf %434 : vector<72x4xf32> to vector<72x4xbf16>
    %cst_381 = arith.constant dense<0.000000e+00> : vector<72x128xf32>
    %436 = tpu.matmul %435, %12, %cst_381 {dimension_numbers = #tpu.dot_dimension_numbers<[1], [0], [0], [1], [0, 0, 1, 1], [], []>} : vector<72x4xbf16>, vector<4x128xbf16>, vector<72x128xf32> -> vector<72x128xf32>
    %437 = arith.addf %432, %436 : vector<72x128xf32>
    %c1_382 = arith.constant 1 : index
    %c1_383 = arith.constant 1 : index
    %c9_384 = arith.constant 9 : index
    %c0_385 = arith.constant 0 : index
    %438 = vector.load %arg1[%c1_382, %c1_383, %c9_384, %c0_385] : memref<2x4x88x4xf32, #tpu.memory_space<vmem>>, vector<1x1x72x4xf32>
    %439 = vector.shape_cast %438 : vector<1x1x72x4xf32> to vector<72x4xf32>
    %440 = arith.truncf %439 : vector<72x4xf32> to vector<72x4xbf16>
    %cst_386 = arith.constant dense<0.000000e+00> : vector<72x128xf32>
    %441 = tpu.matmul %440, %14, %cst_386 {dimension_numbers = #tpu.dot_dimension_numbers<[1], [0], [0], [1], [0, 0, 1, 1], [], []>} : vector<72x4xbf16>, vector<4x128xbf16>, vector<72x128xf32> -> vector<72x128xf32>
    %442 = arith.addf %437, %441 : vector<72x128xf32>
    %c1_387 = arith.constant 1 : index
    %c0_388 = arith.constant 0 : index
    %c10_389 = arith.constant 10 : index
    %c0_390 = arith.constant 0 : index
    %443 = vector.load %arg1[%c1_387, %c0_388, %c10_389, %c0_390] : memref<2x4x88x4xf32, #tpu.memory_space<vmem>>, vector<1x1x72x4xf32>
    %444 = vector.shape_cast %443 : vector<1x1x72x4xf32> to vector<72x4xf32>
    %445 = arith.truncf %444 : vector<72x4xf32> to vector<72x4xbf16>
    %cst_391 = arith.constant dense<0.000000e+00> : vector<72x128xf32>
    %446 = tpu.matmul %445, %16, %cst_391 {dimension_numbers = #tpu.dot_dimension_numbers<[1], [0], [0], [1], [0, 0, 1, 1], [], []>} : vector<72x4xbf16>, vector<4x128xbf16>, vector<72x128xf32> -> vector<72x128xf32>
    %447 = arith.addf %442, %446 : vector<72x128xf32>
    %c1_392 = arith.constant 1 : index
    %c1_393 = arith.constant 1 : index
    %c10_394 = arith.constant 10 : index
    %c0_395 = arith.constant 0 : index
    %448 = vector.load %arg1[%c1_392, %c1_393, %c10_394, %c0_395] : memref<2x4x88x4xf32, #tpu.memory_space<vmem>>, vector<1x1x72x4xf32>
    %449 = vector.shape_cast %448 : vector<1x1x72x4xf32> to vector<72x4xf32>
    %450 = arith.truncf %449 : vector<72x4xf32> to vector<72x4xbf16>
    %cst_396 = arith.constant dense<0.000000e+00> : vector<72x128xf32>
    %451 = tpu.matmul %450, %18, %cst_396 {dimension_numbers = #tpu.dot_dimension_numbers<[1], [0], [0], [1], [0, 0, 1, 1], [], []>} : vector<72x4xbf16>, vector<4x128xbf16>, vector<72x128xf32> -> vector<72x128xf32>
    %452 = arith.addf %447, %451 : vector<72x128xf32>
    %c1_397 = arith.constant 1 : index
    %c3_398 = arith.constant 3 : index
    %c9_399 = arith.constant 9 : index
    %c0_400 = arith.constant 0 : index
    %453 = vector.load %arg1[%c1_397, %c3_398, %c9_399, %c0_400] : memref<2x4x88x4xf32, #tpu.memory_space<vmem>>, vector<1x1x72x4xf32>
    %454 = vector.shape_cast %453 : vector<1x1x72x4xf32> to vector<72x4xf32>
    %455 = arith.truncf %454 : vector<72x4xf32> to vector<72x4xbf16>
    %cst_401 = arith.constant dense<0.000000e+00> : vector<72x128xf32>
    %456 = tpu.matmul %455, %20, %cst_401 {dimension_numbers = #tpu.dot_dimension_numbers<[1], [0], [0], [1], [0, 0, 1, 1], [], []>} : vector<72x4xbf16>, vector<4x128xbf16>, vector<72x128xf32> -> vector<72x128xf32>
    %457 = arith.addf %452, %456 : vector<72x128xf32>
    %c1_402 = arith.constant 1 : index
    %c2_403 = arith.constant 2 : index
    %c10_404 = arith.constant 10 : index
    %c0_405 = arith.constant 0 : index
    %458 = vector.load %arg1[%c1_402, %c2_403, %c10_404, %c0_405] : memref<2x4x88x4xf32, #tpu.memory_space<vmem>>, vector<1x1x72x4xf32>
    %459 = vector.shape_cast %458 : vector<1x1x72x4xf32> to vector<72x4xf32>
    %460 = arith.truncf %459 : vector<72x4xf32> to vector<72x4xbf16>
    %cst_406 = arith.constant dense<0.000000e+00> : vector<72x128xf32>
    %461 = tpu.matmul %460, %22, %cst_406 {dimension_numbers = #tpu.dot_dimension_numbers<[1], [0], [0], [1], [0, 0, 1, 1], [], []>} : vector<72x4xbf16>, vector<4x128xbf16>, vector<72x128xf32> -> vector<72x128xf32>
    %462 = arith.addf %457, %461 : vector<72x128xf32>
    %c1_407 = arith.constant 1 : index
    %c3_408 = arith.constant 3 : index
    %c10_409 = arith.constant 10 : index
    %c0_410 = arith.constant 0 : index
    %463 = vector.load %arg1[%c1_407, %c3_408, %c10_409, %c0_410] : memref<2x4x88x4xf32, #tpu.memory_space<vmem>>, vector<1x1x72x4xf32>
    %464 = vector.shape_cast %463 : vector<1x1x72x4xf32> to vector<72x4xf32>
    %465 = arith.truncf %464 : vector<72x4xf32> to vector<72x4xbf16>
    %cst_411 = arith.constant dense<0.000000e+00> : vector<72x128xf32>
    %466 = tpu.matmul %465, %24, %cst_411 {dimension_numbers = #tpu.dot_dimension_numbers<[1], [0], [0], [1], [0, 0, 1, 1], [], []>} : vector<72x4xbf16>, vector<4x128xbf16>, vector<72x128xf32> -> vector<72x128xf32>
    %467 = arith.addf %462, %466 : vector<72x128xf32>
    %468 = vector.broadcast %4 : vector<1x128xf32> to vector<72x128xf32>
    %469 = arith.addf %467, %468 : vector<72x128xf32>
    %cst_412 = arith.constant 0.000000e+00 : f32
    %470 = vector.broadcast %cst_412 : f32 to vector<72x128xf32>
    %471 = arith.cmpf ogt, %469, %470 : vector<72x128xf32>
    %cst_413 = arith.constant 1.000000e-01 : f32
    %472 = vector.broadcast %cst_413 : f32 to vector<72x128xf32>
    %473 = arith.mulf %472, %469 : vector<72x128xf32>
    %474 = arith.select %471, %469, %473 : vector<72x128xi1>, vector<72x128xf32>
    %475 = arith.maximumf %423, %474 : vector<72x128xf32>
    %476 = arith.truncf %475 : vector<72x128xf32> to vector<72x128xbf16>
    %cst_414 = arith.constant dense<0.000000e+00> : vector<72x128xf32>
    %477 = tpu.matmul %476, %6, %cst_414 {dimension_numbers = #tpu.dot_dimension_numbers<[1], [0], [0], [1], [0, 0, 1, 1], [], []>} : vector<72x128xbf16>, vector<128x128xbf16>, vector<72x128xf32> -> vector<72x128xf32>
    %478 = vector.broadcast %5 : vector<1x128xf32> to vector<72x128xf32>
    %479 = arith.addf %477, %478 : vector<72x128xf32>
    %480 = math.exp %479 : vector<72x128xf32>
    %cst_415 = arith.constant 1.000000e+00 : f32
    %481 = vector.broadcast %cst_415 : f32 to vector<72x128xf32>
    %482 = arith.addf %481, %480 : vector<72x128xf32>
    %483 = tpu.reciprocal %482 {approx = true} : vector<72x128xf32> -> vector<72x128xf32>
    %484 = arith.mulf %480, %483 : vector<72x128xf32>
    %485 = arith.addf %484, %39 : vector<72x128xf32>
    %486 = vector.broadcast %0 : vector<1x128xf32> to vector<72x128xf32>
    %487 = arith.mulf %485, %486 : vector<72x128xf32>
    %488 = vector.broadcast %0 : vector<1x128xf32> to vector<72x128xf32>
    %489 = arith.mulf %480, %488 : vector<72x128xf32>
    %cst_416 = arith.constant 0.000000e+00 : f32
    %490 = vector.broadcast %cst_416 : f32 to vector<1x128xf32>
    %491 = arith.cmpf ogt, %1, %490 : vector<1x128xf32>
    %492 = vector.shape_cast %491 : vector<1x128xi1> to vector<1x128xi1>
    %493 = vector.broadcast %492 : vector<1x128xi1> to vector<72x128xi1>
    %494 = arith.select %493, %489, %487 : vector<72x128xi1>, vector<72x128xf32>
    %c1_417 = arith.constant 1 : index
    %c0_418 = arith.constant 0 : index
    %c0_419 = arith.constant 0 : index
    %495 = vector.load %arg7[%c1_417, %c0_418, %c0_419] : memref<2x72x128xf32, #tpu.memory_space<vmem>>, vector<1x72x128xf32>
    %496 = vector.shape_cast %495 : vector<1x72x128xf32> to vector<72x128xf32>
    %497 = vector.shape_cast %494 : vector<72x128xf32> to vector<1x72x128xf32>
    tpu.vector_store %arg7[%c1_417, %c0_418, %c0_419], %497 {strides = array<i32>} : memref<2x72x128xf32, #tpu.memory_space<vmem>>, vector<1x72x128xf32>,
    return
  }
  func.func @transform_0(%arg0: i32) -> (i32, i32, i32, i32) {
    %c0_i32 = arith.constant 0 : i32
    %c0_i32_0 = arith.constant 0 : i32
    %c0_i32_1 = arith.constant 0 : i32
    %c0_i32_2 = arith.constant 0 : i32
    %c0_i32_3 = arith.constant 0 : i32
    return %c0_i32, %c0_i32_0, %c0_i32_1, %c0_i32_2 : i32, i32, i32, i32
  }
  func.func @transform_1(%arg0: i32) -> (i32, i32, i32) {
    %c0_i32 = arith.constant 0 : i32
    %c0_i32_0 = arith.constant 0 : i32
    %c0_i32_1 = arith.constant 0 : i32
    %c0_i32_2 = arith.constant 0 : i32
    return %c0_i32, %c0_i32_0, %c0_i32_1 : i32, i32, i32
  }
  func.func @transform_2(%arg0: i32) -> (i32, i32) {
    %c0_i32 = arith.constant 0 : i32
    %c0_i32_0 = arith.constant 0 : i32
    %c0_i32_1 = arith.constant 0 : i32
    return %c0_i32, %c0_i32_0 : i32, i32
  }
  func.func @transform_3(%arg0: i32) -> (i32, i32) {
    %c0_i32 = arith.constant 0 : i32
    %c0_i32_0 = arith.constant 0 : i32
    %c0_i32_1 = arith.constant 0 : i32
    return %c0_i32, %c0_i32_0 : i32, i32
  }
  func.func @transform_4(%arg0: i32) -> (i32, i32) {
    %c0_i32 = arith.constant 0 : i32
    %c0_i32_0 = arith.constant 0 : i32
    %c0_i32_1 = arith.constant 0 : i32
    return %c0_i32, %c0_i32_0 : i32, i32
  }
  func.func @transform_5(%arg0: i32) -> (i32, i32) {
    %c0_i32 = arith.constant 0 : i32
    %c0_i32_0 = arith.constant 0 : i32
    %c0_i32_1 = arith.constant 0 : i32
    return %c0_i32, %c0_i32_0 : i32, i32
  }
  func.func @transform_6(%arg0: i32) -> (i32, i32, i32) {
    %c0_i32 = arith.constant 0 : i32
    %c0_i32_0 = arith.constant 0 : i32
    %c0_i32_1 = arith.constant 0 : i32
    %c0_i32_2 = arith.constant 0 : i32
    return %c0_i32, %c0_i32_0, %c0_i32_1 : i32, i32, i32
  }
}

</mosaic_0001>

<bundles_post_ra>
// kernel: tpu_custom_call.1
= control target key start
LH: loop header
LB: loop body
LE: loop exit
PB: predicated region body
PF: predicated region fallthrough
CT: control target
= control target key end

     0   :  { %vm208_vm0 = vcmask 1041408   ;;  %v15247_v2 = vmov 0.0   ;;  %vm192_vm1 = vcmask 31744   ;;  %vm10450_vm2 = vmmov 0   ;;  %s15240_s0 = inlined_call_operand.vmem [shape: f32[2,4,88,4], index: 0, kind: input, shape index: {}]   ;;  %s15241_s1 = inlined_call_operand.vmem [shape: bf16[9,4,128], index: 1, kind: input, shape index: {}]   ;;  %s15242_s2 = inlined_call_operand.vmem [shape: f32[1,128], index: 2, kind: input, shape index: {}]   ;;  %s15243_s3 = inlined_call_operand.vmem [shape: bf16[128,128], index: 3, kind: input, shape index: {}]   ;;  %s15244_s4 = inlined_call_operand.vmem [shape: f32[1,128], index: 4, kind: input, shape index: {}]   ;;  %s15245_s5 = inlined_call_operand.vmem [shape: f32[4,128], index: 5, kind: input, shape index: {}]   ;;  %s15246_s6 = inlined_call_operand.hbm [shape: f32[2,72,128], index: 6, kind: output, shape index: {}]  }
   0x1   :  { %v7579_v0 = vld [vmem:[%s15241_s1 + $0x2] sm:$0x3]  ;;  %v47_v1 = vld [vmem:[%s15241_s1] sm:$0x3]  ;;  %8670 = vmatprep.subr.bf16.mxu0 %v15247_v2  ;;  %8692 = vmatprep.subr.bf16.mxu1 %v15247_v2  ;;  %v7589_v5 = vld [vmem:[%s15240_s0 + $0x58] sm:$0xff] }
   0x2   :  { %v10499_v3 = vsel %vm208_vm0, %v7579_v0, 0  ;;  %v10502_v4 = vsel %vm208_vm0, %v47_v1, 0  ;;  %v7590_v6 = vld [vmem:[%s15240_s0 + $0x60] sm:$0xff]  ;;  %v164_v9 = vld [vmem:[%s15240_s0 + $0x8] sm:$0xff]  ;;  %8672 = vmatprep.mubr.msk.bf16.mxu0 %vm10450_vm2, %v15247_v2  ;;  %8694 = vmatprep.mubr.msk.bf16.mxu1 %vm10450_vm2, %v15247_v2  ;;  %v7592_v16 = vld [vmem:[%s15240_s0 + $0x70] sm:$0xff] }
   0x3   :  { %15379 = vst [vmem:[#allocation5_spill] sm:$0xff] %v10499_v3  ;;  %15380 = vst [vmem:[#allocation6_spill] sm:$0xff] %v10502_v4  ;;  %8671 = vmatpush3.bf16.msra.mxu0 %v10499_v3  ;;  %8693 = vmatpush3.bf16.msra.mxu1 %v10502_v4  ;;  %v10512_v7 = vpack.c.bf16 %v7590_v6, %v7589_v5  ;;  %v163_v8 = vld [vmem:[%s15240_s0] sm:$0xff]  ;;  %v7591_v15 = vld [vmem:[%s15240_s0 + $0x68] sm:$0xff] }
   0x4   :  { %v7580_v10 = vld [vmem:[%s15241_s1 + $0x4] sm:$0x3]  ;;  %v172_v11 = vpack.c.bf16 %v164_v9, %v163_v8  ;;  %v7581_v13 = vld [vmem:[%s15241_s1 + $0x6] sm:$0x3]  ;;  %8714 = vmatprep.subr.bf16.mxu0 %v15247_v2  ;;  %8736 = vmatprep.subr.bf16.mxu1 %v15247_v2  ;;  %v165_v17 = vld [vmem:[%s15240_s0 + $0x10] sm:$0xff]  ;;  %v10561_v19 = vpack.c.bf16 %v7592_v16, %v7591_v15 }
   0x5   :  { %v10528_v12 = vsel %vm208_vm0, %v7580_v10, 0  ;;  %v10536_v14 = vsel %vm208_vm0, %v7581_v13, 0  ;;  %v166_v18 = vld [vmem:[%s15240_s0 + $0x18] sm:$0xff]  ;;  %v375_v21 = vld [vmem:[%s15240_s0 + $0x9] sm:$0xff]  ;;  %v10577_v24 = vld [vmem:[%s15240_s0 + $0x21] sm:$0xff] }
   0x6   :  { %15381 = vst [vmem:[#allocation7_spill] sm:$0xff] %v10528_v12  ;;  %15382 = vst [vmem:[#allocation8_spill] sm:$0xff] %v10536_v14  ;;  %8673 = vmatmul.mubr.msk.bf16.vlgmr.msra.gmra.mrb[0].mxu0 %vm192_vm1, %v10512_v7  ;;  %8695 = vmatmul.mubr.msk.bf16.vlgmr.msra.gmra.mrb[0].mxu1 %vm192_vm1, %v172_v11  ;;  %v173_v20 = vpack.c.bf16 %v166_v18, %v165_v17  ;;  %v10569_v22 = vld [vmem:[%s15240_s0 + $0x11] sm:$0xff]  ;;  %v377_v23 = vld [vmem:[%s15240_s0 + $0x19] sm:$0xff] }
   0x7   :  { %8715 = vmatpush3.bf16.msra.mxu0 %v10528_v12  ;;  %8737 = vmatpush3.bf16.msra.mxu1 %v10536_v14  ;;  %v10580_v25 = vpack.c.bf16 %v10569_v22, %v375_v21  ;;  %v10585_v26 = vld [vmem:[%s15240_s0 + $0x29] sm:$0xff]  ;;  %v10590_v27 = vld [vmem:[%s15240_s0 + $0x31] sm:$0xff]  ;;  %v10593_v28 = vpack.c.bf16 %v10577_v24, %v377_v23  ;;  %v7594_v30 = vld [vmem:[%s15240_s0 + $0x80] sm:$0xff] }
   0x8   :  { %8676 = vmatprep.mubr.msk.bf16.mxu0 %vm10450_vm2, %v15247_v2  ;;  %8698 = vmatprep.mubr.msk.bf16.mxu1 %vm10450_vm2, %v15247_v2  ;;  %v7593_v29 = vld [vmem:[%s15240_s0 + $0x78] sm:$0xff]  ;;  %v167_v31 = vld [vmem:[%s15240_s0 + $0x20] sm:$0xff]  ;;  %v10609_v32 = vpack.c.bf16 %v10590_v27, %v10585_v26  ;;  %v168_v33 = vld [vmem:[%s15240_s0 + $0x28] sm:$0xff] }
   0x9   :  { %8758 = vmatprep.subr.bf16.mxu0 %v15247_v2  ;;  %8780 = vmatprep.subr.bf16.mxu1 %v15247_v2  ;;  %v10621_v34 = vld [vmem:[%s15240_s0 + $0x39] sm:$0xff]  ;;  %v10626_v35 = vld [vmem:[%s15240_s0 + $0x41] sm:$0xff]  ;;  %v10632_v37 = vpack.c.bf16 %v7594_v30, %v7593_v29  ;;  %v174_v38 = vpack.c.bf16 %v168_v33, %v167_v31  ;;  %v7596_v40 = vld [vmem:[%s15240_s0 + $0x90] sm:$0xff] }
   0xa   :  { %v10630_v36 = vpack.c.bf16 %v10626_v35, %v10621_v34  ;;  %v7595_v39 = vld [vmem:[%s15240_s0 + $0x88] sm:$0xff]  ;;  %v169_v41 = vld [vmem:[%s15240_s0 + $0x30] sm:$0xff]  ;;  %v170_v42 = vld [vmem:[%s15240_s0 + $0x38] sm:$0xff] }
   0xb   :  { %v10653_v43 = vpack.c.bf16 %v7596_v40, %v7595_v39  ;;  %v175_v44 = vpack.c.bf16 %v170_v42, %v169_v41  ;;  %v7597_v45 = vld [vmem:[%s15240_s0 + $0x98] sm:$0xff]  ;;  %v171_v46 = vld [vmem:[%s15240_s0 + $0x40] sm:$0xff] }
   0xe   :  { %8677 = vmatmul.mubr.msk.bf16.gmra.mrb[4].mxu0 %vm192_vm1, %v10561_v19  ;;  %8699 = vmatmul.mubr.msk.bf16.gmra.mrb[4].mxu1 %vm192_vm1, %v173_v20 }
   0xf   :  { %8680 = vmatprep.mubr.msk.bf16.mxu0 %vm10450_vm2, %v15247_v2  ;;  %8702 = vmatprep.mubr.msk.bf16.mxu1 %vm10450_vm2, %v15247_v2 }
  0x16   :  { %8681 = vmatmul.mubr.msk.bf16.gmra.mrb[8].mxu0 %vm192_vm1, %v10632_v37  ;;  %8703 = vmatmul.mubr.msk.bf16.gmra.mrb[8].mxu1 %vm192_vm1, %v174_v38 }
  0x17   :  { %8684 = vmatprep.mubr.msk.bf16.mxu0 %vm10450_vm2, %v15247_v2  ;;  %8706 = vmatprep.mubr.msk.bf16.mxu1 %vm10450_vm2, %v15247_v2 }
  0x1e   :  { %8685 = vmatmul.mubr.msk.bf16.gmra.mrb[12].mxu0 %vm192_vm1, %v10653_v43  ;;  %8707 = vmatmul.mubr.msk.bf16.gmra.mrb[12].mxu1 %vm192_vm1, %v175_v44 }
  0x1f   :  { %8688 = vmatprep.mubr.msk.bf16.mxu0 %vm10450_vm2, %v15247_v2  ;;  %8710 = vmatprep.mubr.msk.bf16.mxu1 %vm10450_vm2, %v15247_v2 }
  0x20   :  { %11 = vsyncpa [#allocation3], 0  ;;  %v10668_v47 = vpack.c.bf16 %v7597_v45, %v7597_v45  ;;  %v176_v48 = vpack.c.bf16 %v171_v46, %v171_v46  ;;  %v374_v49 = vld [vmem:[%s15240_s0 + $0x1] sm:$0xff]  ;;  %v7613_v50 = vld [vmem:[%s15240_s0 + $0xb0] sm:$0xff]  ;;  %v10721_v60 = vpack.c.bf16 %v377_v23, %v10569_v22  ;;  %v10741_v0 = vpack.c.bf16 %v10585_v26, %v10577_v24 }
  0x21   :  { %v7614_v51 = vld [vmem:[%s15240_s0 + $0xb8] sm:$0xff]  ;;  %v7582_v52 = vld [vmem:[%s15241_s1 + $0x8] sm:$0x3]  ;;  %v7583_v53 = vld [vmem:[%s15241_s1 + $0xa] sm:$0x3]  ;;  %v10692_v54 = vpack.c.bf16 %v375_v21, %v374_v49  ;;  %v10761_v8 = vpack.c.bf16 %v10621_v34, %v10590_v27  ;;  %v10778_v11 = vpack.c.bf16 %v10626_v35, %v10626_v35 }
  0x22   :  { %v10694_v55 = vpack.c.bf16 %v7614_v51, %v7613_v50  ;;  %v10697_v56 = vsel %vm208_vm0, %v7582_v52, 0  ;;  %v10700_v57 = vsel %vm208_vm0, %v7583_v53, 0  ;;  %v7615_v58 = vld [vmem:[%s15240_s0 + $0xc0] sm:$0xff]  ;;  %v7616_v59 = vld [vmem:[%s15240_s0 + $0xc8] sm:$0xff]  ;;  %v7617_v62 = vld [vmem:[%s15240_s0 + $0xd0] sm:$0xff] }
  0x23   :  { %15383 = vst [vmem:[#allocation9_spill] sm:$0xff] %v10697_v56  ;;  %15384 = vst [vmem:[#allocation10_spill] sm:$0xff] %v10700_v57  ;;  %v10723_v61 = vpack.c.bf16 %v7616_v59, %v7615_v58  ;;  %v7618_v63 = vld [vmem:[%s15240_s0 + $0xd8] sm:$0xff]  ;;  %v7619_v5 = vld [vmem:[%s15240_s0 + $0xe0] sm:$0xff] }
  0x24   :  { %v10743_v1 = vpack.c.bf16 %v7618_v63, %v7617_v62  ;;  %v7620_v6 = vld [vmem:[%s15240_s0 + $0xe8] sm:$0xff]  ;;  %v7621_v10 = vld [vmem:[%s15240_s0 + $0xf0] sm:$0xff]  ;;  %v7642_v18 = vld [vmem:[%s15240_s0 + $0xb9] sm:$0xff] }
  0x25   :  { %v10763_v9 = vpack.c.bf16 %v7620_v6, %v7619_v5  ;;  %v10780_v13 = vpack.c.bf16 %v7621_v10, %v7621_v10  ;;  %v7627_v15 = vld [vmem:[%s15240_s0 + $0x108] sm:$0xff]  ;;  %v7628_v16 = vld [vmem:[%s15240_s0 + $0x110] sm:$0xff]  ;;  %v7629_v31 = vld [vmem:[%s15240_s0 + $0x118] sm:$0xff] }
  0x26   :  { %8689 = vmatmul.mubr.msk.bf16.gmra.mrb[16].mxu0 %vm192_vm1, %v10668_v47  ;;  %8711 = vmatmul.mubr.msk.bf16.gmra.mrb[16].mxu1 %vm192_vm1, %v176_v48  ;;  %v7641_v17 = vld [vmem:[%s15240_s0 + $0xb1] sm:$0xff]  ;;  %v7584_v20 = vld [vmem:[%s15241_s1 + $0xc] sm:$0x3]  ;;  %v7585_v21 = vld [vmem:[%s15241_s1 + $0xe] sm:$0x3]  ;;  %v10808_v22 = vpack.c.bf16 %v7628_v16, %v7627_v15 }
  0x27   :  { %8716 = vmatprep.mubr.msk.bf16.mxu0 %vm10450_vm2, %v15247_v2  ;;  %8738 = vmatprep.mubr.msk.bf16.mxu1 %vm10450_vm2, %v15247_v2  ;;  %v10810_v23 = vpack.c.bf16 %v7642_v18, %v7641_v17  ;;  %v10815_v24 = vld [vmem:[%s15240_s0 + $0x69] sm:$0xff]  ;;  %v10820_v26 = vld [vmem:[%s15240_s0 + $0x71] sm:$0xff]  ;;  %v10823_v27 = vsel %vm208_vm0, %v7584_v20, 0  ;;  %v10826_v29 = vsel %vm208_vm0, %v7585_v21, 0  ;;  %v7630_v33 = vld [vmem:[%s15240_s0 + $0x120] sm:$0xff] }
  0x28   :  { %15385 = vst [vmem:[#allocation11_spill] sm:$0xff] %v10823_v27  ;;  %15386 = vst [vmem:[#allocation12_spill] sm:$0xff] %v10826_v29  ;;  %v1363_v30 = vpack.c.bf16 %v10820_v26, %v10815_v24  ;;  %v7643_v34 = vld [vmem:[%s15240_s0 + $0xc1] sm:$0xff]  ;;  %v7644_v35 = vld [vmem:[%s15240_s0 + $0xc9] sm:$0xff]  ;;  %v10854_v38 = vpack.c.bf16 %v7630_v33, %v7629_v31 }
  0x29   :  { %v10856_v39 = vpack.c.bf16 %v7644_v35, %v7643_v34  ;;  %v7631_v40 = vld [vmem:[%s15240_s0 + $0x128] sm:$0xff]  ;;  %v7632_v41 = vld [vmem:[%s15240_s0 + $0x130] sm:$0xff]  ;;  %v7646_v44 = vld [vmem:[%s15240_s0 + $0xd9] sm:$0xff] }
  0x2a   :  { %v7645_v42 = vld [vmem:[%s15240_s0 + $0xd1] sm:$0xff]  ;;  %v10878_v45 = vpack.c.bf16 %v7632_v41, %v7631_v40  ;;  %v7634_v49 = vld [vmem:[%s15240_s0 + $0x140] sm:$0xff]  ;;  %v7648_v51 = vld [vmem:[%s15240_s0 + $0xe9] sm:$0xff] }
  0x2b   :  { %v10880_v46 = vpack.c.bf16 %v7646_v44, %v7645_v42  ;;  %v7633_v48 = vld [vmem:[%s15240_s0 + $0x138] sm:$0xff]  ;;  %v7647_v50 = vld [vmem:[%s15240_s0 + $0xe1] sm:$0xff]  ;;  %v7586_v6 = vld [vmem:[%s15241_s1 + $0x10] sm:$0x3] }
  0x2c   :  { %v10902_v52 = vpack.c.bf16 %v7634_v49, %v7633_v48  ;;  %v10904_v53 = vpack.c.bf16 %v7648_v51, %v7647_v50  ;;  %v7635_v58 = vld [vmem:[%s15240_s0 + $0x148] sm:$0xff]  ;;  %v7649_v59 = vld [vmem:[%s15240_s0 + $0xf1] sm:$0xff]  ;;  %v10945_v15 = vsel %vm208_vm0, %v7586_v6, 0  ;;  %v10956_v16 = vld [vmem:[%s15240_s0 + $0x79] sm:$0xff] }
  0x2d   :  { %v10920_v62 = vpack.c.bf16 %v7635_v58, %v7635_v58  ;;  %v10922_v63 = vpack.c.bf16 %v7649_v59, %v7649_v59  ;;  %v10935_v5 = vld [vmem:[%s15240_s0 + $0x61] sm:$0xff]  ;;  %15387 = vst [vmem:[#allocation13_spill] sm:$0xff] %v10945_v15  ;;  %v10966_v17 = vpack.c.bf16 %v10956_v16, %v10820_v26  ;;  %v10984_v20 = vld [vmem:[%s15240_s0 + $0x89] sm:$0xff]  ;;  %v11001_v31 = vld [vmem:[%s15240_s0 + $0x91] sm:$0xff] }
  0x2e   :  { %8717 = vmatmul.mubr.msk.bf16.vlgmr.msra.gmra.mrb[20].mxu0 %vm192_vm1, %v10692_v54  ;;  %8739 = vmatmul.mubr.msk.bf16.vlgmr.msra.gmra.mrb[20].mxu1 %vm192_vm1, %v10694_v55  ;;  %v10942_v10 = vpack.c.bf16 %v10815_v24, %v10935_v5  ;;  %v10979_v18 = vld [vmem:[%s15240_s0 + $0x81] sm:$0xff]  ;;  %v11006_v33 = vld [vmem:[%s15240_s0 + $0x99] sm:$0xff]  ;;  %v836_v35 = vld [vmem:[%s15240_s0 + $0x49] sm:$0xff] }
  0x2f   :  { %8759 = vmatpush3.bf16.msra.mxu0 %v10697_v56  ;;  %8781 = vmatpush3.bf16.msra.mxu1 %v10700_v57  ;;  %v10988_v21 = vpack.c.bf16 %v10984_v20, %v10979_v18  ;;  %v11010_v34 = vpack.c.bf16 %v11006_v33, %v11001_v31  ;;  %v7668_v40 = vld [vmem:[%s15240_s0 + $0xa1] sm:$0xff]  ;;  %v11026_v41 = vpack.c.bf16 %v836_v35, %v836_v35  ;;  %v1054_v44 = vld [vmem:[%s15240_s0 + $0xa] sm:$0xff]  ;;  %v1055_v48 = vld [vmem:[%s15240_s0 + $0x12] sm:$0xff] }
  0x30   :  { %8720 = vmatprep.mubr.msk.bf16.mxu0 %vm10450_vm2, %v15247_v2  ;;  %8742 = vmatprep.mubr.msk.bf16.mxu1 %vm10450_vm2, %v15247_v2  ;;  %v11028_v42 = vpack.c.bf16 %v7668_v40, %v7668_v40  ;;  %v11044_v49 = vpack.c.bf16 %v1055_v48, %v1054_v44  ;;  %v1056_v50 = vld [vmem:[%s15240_s0 + $0x1a] sm:$0xff]  ;;  %v1057_v51 = vld [vmem:[%s15240_s0 + $0x22] sm:$0xff]  ;;  %v1058_v58 = vld [vmem:[%s15240_s0 + $0x2a] sm:$0xff] }
  0x31   :  { %8802 = vmatprep.subr.bf16.mxu0 %v15247_v2  ;;  %8824 = vmatprep.subr.bf16.mxu1 %v15247_v2  ;;  %v1059_v59 = vld [vmem:[%s15240_s0 + $0x32] sm:$0xff]  ;;  %v1061_v35 = vld [vmem:[%s15240_s0 + $0x42] sm:$0xff] }
  0x32   :  { %v11080_v6 = vpack.c.bf16 %v1059_v59, %v1058_v58 }
  0x36   :  { %8721 = vmatmul.mubr.msk.bf16.gmra.mrb[24].mxu0 %vm192_vm1, %v10721_v60  ;;  %8743 = vmatmul.mubr.msk.bf16.gmra.mrb[24].mxu1 %vm192_vm1, %v10723_v61 }
  0x37   :  { %8724 = vmatprep.mubr.msk.bf16.mxu0 %vm10450_vm2, %v15247_v2  ;;  %8746 = vmatprep.mubr.msk.bf16.mxu1 %vm10450_vm2, %v15247_v2 }
  0x3e   :  { %8725 = vmatmul.mubr.msk.bf16.gmra.mrb[28].mxu0 %vm192_vm1, %v10741_v0  ;;  %8747 = vmatmul.mubr.msk.bf16.gmra.mrb[28].mxu1 %vm192_vm1, %v10743_v1 }
  0x3f   :  { %8728 = vmatprep.mubr.msk.bf16.mxu0 %vm10450_vm2, %v15247_v2  ;;  %8750 = vmatprep.mubr.msk.bf16.mxu1 %vm10450_vm2, %v15247_v2 }
  0x46   :  { %8729 = vmatmul.mubr.msk.bf16.gmra.mrb[32].mxu0 %vm192_vm1, %v10761_v8  ;;  %8751 = vmatmul.mubr.msk.bf16.gmra.mrb[32].mxu1 %vm192_vm1, %v10763_v9 }
  0x47   :  { %8732 = vmatprep.mubr.msk.bf16.mxu0 %vm10450_vm2, %v15247_v2  ;;  %8754 = vmatprep.mubr.msk.bf16.mxu1 %vm10450_vm2, %v15247_v2 }
  0x4e   :  { %8733 = vmatmul.mubr.msk.bf16.gmra.mrb[36].mxu0 %vm192_vm1, %v10778_v11  ;;  %8755 = vmatmul.mubr.msk.bf16.gmra.mrb[36].mxu1 %vm192_vm1, %v10780_v13 }
  0x4f   :  { %8760 = vmatprep.mubr.msk.bf16.mxu0 %vm10450_vm2, %v15247_v2  ;;  %8782 = vmatprep.mubr.msk.bf16.mxu1 %vm10450_vm2, %v15247_v2 }
  0x56   :  { %8761 = vmatmul.mubr.msk.bf16.vlgmr.msra.gmra.mrb[40].mxu0 %vm192_vm1, %v10808_v22  ;;  %8783 = vmatmul.mubr.msk.bf16.vlgmr.msra.gmra.mrb[40].mxu1 %vm192_vm1, %v10810_v23 }
  0x57   :  { %8803 = vmatpush3.bf16.msra.mxu0 %v10823_v27  ;;  %8825 = vmatpush3.bf16.msra.mxu1 %v10826_v29 }
  0x58   :  { %8764 = vmatprep.mubr.msk.bf16.mxu0 %vm10450_vm2, %v15247_v2  ;;  %8786 = vmatprep.mubr.msk.bf16.mxu1 %vm10450_vm2, %v15247_v2 }
  0x59   :  { %8846 = vmatprep.subr.bf16.mxu0 %v15247_v2  ;;  %8868 = vmatprep.subr.bf16.mxu1 %v15247_v2 }
  0x5e   :  { %8765 = vmatmul.mubr.msk.bf16.gmra.mrb[44].mxu0 %vm192_vm1, %v10854_v38  ;;  %8787 = vmatmul.mubr.msk.bf16.gmra.mrb[44].mxu1 %vm192_vm1, %v10856_v39 }
  0x5f   :  { %8768 = vmatprep.mubr.msk.bf16.mxu0 %vm10450_vm2, %v15247_v2  ;;  %8790 = vmatprep.mubr.msk.bf16.mxu1 %vm10450_vm2, %v15247_v2 }
  0x66   :  { %8769 = vmatmul.mubr.msk.bf16.gmra.mrb[48].mxu0 %vm192_vm1, %v10878_v45  ;;  %8791 = vmatmul.mubr.msk.bf16.gmra.mrb[48].mxu1 %vm192_vm1, %v10880_v46 }
  0x67   :  { %8772 = vmatprep.mubr.msk.bf16.mxu0 %vm10450_vm2, %v15247_v2  ;;  %8794 = vmatprep.mubr.msk.bf16.mxu1 %vm10450_vm2, %v15247_v2 }
  0x6e   :  { %8773 = vmatmul.mubr.msk.bf16.gmra.mrb[52].mxu0 %vm192_vm1, %v10902_v52  ;;  %8795 = vmatmul.mubr.msk.bf16.gmra.mrb[52].mxu1 %vm192_vm1, %v10904_v53 }
  0x6f   :  { %8776 = vmatprep.mubr.msk.bf16.mxu0 %vm10450_vm2, %v15247_v2  ;;  %8798 = vmatprep.mubr.msk.bf16.mxu1 %vm10450_vm2, %v15247_v2 }
  0x76   :  { %8777 = vmatmul.mubr.msk.bf16.gmra.mrb[56].mxu0 %vm192_vm1, %v10920_v62  ;;  %8799 = vmatmul.mubr.msk.bf16.gmra.mrb[56].mxu1 %vm192_vm1, %v10922_v63 }
  0x77   :  { %8804 = vmatprep.mubr.msk.bf16.mxu0 %vm10450_vm2, %v15247_v2  ;;  %8826 = vmatprep.mubr.msk.bf16.mxu1 %vm10450_vm2, %v15247_v2 }
  0x7e   :  { %8805 = vmatmul.mubr.msk.bf16.vlgmr.msra.gmra.mrb[60].mxu0 %vm192_vm1, %v10580_v25  ;;  %8827 = vmatmul.mubr.msk.bf16.vlgmr.msra.gmra.mrb[60].mxu1 %vm192_vm1, %v10942_v10 }
  0x7f   :  { %8847 = vmatpush3.bf16.msra.mxu0 %v10945_v15  ;;  %8869 = vmatpush3.bf16.msra.mxu1 %v10499_v3 }
  0x80   :  { %8808 = vmatprep.mubr.msk.bf16.mxu0 %vm10450_vm2, %v15247_v2  ;;  %8830 = vmatprep.mubr.msk.bf16.mxu1 %vm10450_vm2, %v15247_v2 }
  0x81   :  { %8890 = vmatprep.subr.bf16.mxu0 %v15247_v2  ;;  %8912 = vmatprep.subr.bf16.mxu1 %v15247_v2 }
  0x86   :  { %8809 = vmatmul.mubr.msk.bf16.gmra.mrb[64].mxu0 %vm192_vm1, %v10593_v28  ;;  %8831 = vmatmul.mubr.msk.bf16.gmra.mrb[64].mxu1 %vm192_vm1, %v10966_v17 }
  0x87   :  { %8812 = vmatprep.mubr.msk.bf16.mxu0 %vm10450_vm2, %v15247_v2  ;;  %8834 = vmatprep.mubr.msk.bf16.mxu1 %vm10450_vm2, %v15247_v2 }
  0x8e   :  { %8813 = vmatmul.mubr.msk.bf16.gmra.mrb[68].mxu0 %vm192_vm1, %v10609_v32  ;;  %8835 = vmatmul.mubr.msk.bf16.gmra.mrb[68].mxu1 %vm192_vm1, %v10988_v21 }
  0x8f   :  { %8816 = vmatprep.mubr.msk.bf16.mxu0 %vm10450_vm2, %v15247_v2  ;;  %8838 = vmatprep.mubr.msk.bf16.mxu1 %vm10450_vm2, %v15247_v2 }
  0x96   :  { %8817 = vmatmul.mubr.msk.bf16.gmra.mrb[72].mxu0 %vm192_vm1, %v10630_v36  ;;  %8839 = vmatmul.mubr.msk.bf16.gmra.mrb[72].mxu1 %vm192_vm1, %v11010_v34 }
  0x97   :  { %8820 = vmatprep.mubr.msk.bf16.mxu0 %vm10450_vm2, %v15247_v2  ;;  %8842 = vmatprep.mubr.msk.bf16.mxu1 %vm10450_vm2, %v15247_v2 }
  0x9e   :  { %8821 = vmatmul.mubr.msk.bf16.gmra.mrb[76].mxu0 %vm192_vm1, %v11026_v41  ;;  %8843 = vmatmul.mubr.msk.bf16.gmra.mrb[76].mxu1 %vm192_vm1, %v11028_v42 }
  0x9f   :  { %8848 = vmatprep.mubr.msk.bf16.mxu0 %vm10450_vm2, %v15247_v2  ;;  %8870 = vmatprep.mubr.msk.bf16.mxu1 %vm10450_vm2, %v15247_v2 }
  0xa6   :  { %8849 = vmatmul.mubr.msk.bf16.vlgmr.msra.gmra.mrb[80].mxu0 %vm192_vm1, %v11044_v49  ;;  %8871 = vmatmul.mubr.msk.bf16.vlgmr.msra.gmra.mrb[80].mxu1 %vm192_vm1, %v10692_v54  ;;  %v11064_v54 = vpack.c.bf16 %v1057_v51, %v1056_v50 }
  0xa7   :  { %8891 = vmatpush3.bf16.msra.mxu0 %v10502_v4  ;;  %8913 = vmatpush3.bf16.msra.mxu1 %v10528_v12 }
  0xa8   :  { %8852 = vmatprep.mubr.msk.bf16.mxu0 %vm10450_vm2, %v15247_v2  ;;  %8874 = vmatprep.mubr.msk.bf16.mxu1 %vm10450_vm2, %v15247_v2 }
  0xa9   :  { %8934 = vmatprep.subr.bf16.mxu0 %v15247_v2  ;;  %8956 = vmatprep.subr.bf16.mxu1 %v15247_v2 }
  0xae   :  { %8853 = vmatmul.mubr.msk.bf16.gmra.mrb[84].mxu0 %vm192_vm1, %v11064_v54  ;;  %8875 = vmatmul.mubr.msk.bf16.gmra.mrb[84].mxu1 %vm192_vm1, %v10721_v60  ;;  %v1060_v60 = vld [vmem:[%s15240_s0 + $0x3a] sm:$0xff] }
  0xaf   :  { %8856 = vmatprep.mubr.msk.bf16.mxu0 %vm10450_vm2, %v15247_v2  ;;  %8878 = vmatprep.mubr.msk.bf16.mxu1 %vm10450_vm2, %v15247_v2  ;;  %v11096_v40 = vpack.c.bf16 %v1061_v35, %v1060_v60 }
  0xb6   :  { %8857 = vmatmul.mubr.msk.bf16.gmra.mrb[88].mxu0 %vm192_vm1, %v11080_v6  ;;  %8879 = vmatmul.mubr.msk.bf16.gmra.mrb[88].mxu1 %vm192_vm1, %v10741_v0  ;;  %v1062_v0 = vld [vmem:[%s15240_s0 + $0x4a] sm:$0xff] }
  0xb7   :  { %8860 = vmatprep.mubr.msk.bf16.mxu0 %vm10450_vm2, %v15247_v2  ;;  %8882 = vmatprep.mubr.msk.bf16.mxu1 %vm10450_vm2, %v15247_v2  ;;  %v11109_v44 = vpack.c.bf16 %v1062_v0, %v1062_v0 }
  0xbe   :  { %8861 = vmatmul.mubr.msk.bf16.gmra.mrb[92].mxu0 %vm192_vm1, %v11096_v40  ;;  %8883 = vmatmul.mubr.msk.bf16.gmra.mrb[92].mxu1 %vm192_vm1, %v10761_v8  ;;  %v7690_v8 = vld [vmem:[%s15240_s0 + $0x59] sm:$0xff] }
  0xbf   :  { %8864 = vmatprep.mubr.msk.bf16.mxu0 %vm10450_vm2, %v15247_v2  ;;  %8886 = vmatprep.mubr.msk.bf16.mxu1 %vm10450_vm2, %v15247_v2  ;;  %v1362_v48 = vpack.c.bf16 %v10935_v5, %v7690_v8  ;;  %v1365_v8 = vpack.c.bf16 %v11001_v31, %v10984_v20 }
  0xc6   :  { %8865 = vmatmul.mubr.msk.bf16.gmra.mrb[96].mxu0 %vm192_vm1, %v11109_v44  ;;  %8887 = vmatmul.mubr.msk.bf16.gmra.mrb[96].mxu1 %vm192_vm1, %v10778_v11 }
  0xc7   :  { %8892 = vmatprep.mubr.msk.bf16.mxu0 %vm10450_vm2, %v15247_v2  ;;  %8914 = vmatprep.mubr.msk.bf16.mxu1 %vm10450_vm2, %v15247_v2 }
  0xce   :  { %8893 = vmatmul.mubr.msk.bf16.vlgmr.msra.gmra.mrb[100].mxu0 %vm192_vm1, %v10512_v7  ;;  %8915 = vmatmul.mubr.msk.bf16.vlgmr.msra.gmra.mrb[100].mxu1 %vm192_vm1, %v1362_v48 }
  0xcf   :  { %8935 = vmatpush3.bf16.msra.mxu0 %v10536_v14  ;;  %8957 = vmatpush3.bf16.msra.mxu1 %v10697_v56 }
  0xd0   :  { %8896 = vmatprep.mubr.msk.bf16.mxu0 %vm10450_vm2, %v15247_v2  ;;  %8918 = vmatprep.mubr.msk.bf16.mxu1 %vm10450_vm2, %v15247_v2 }
  0xd1   :  { %8978 = vmatprep.subr.bf16.mxu0 %v15247_v2  ;;  %9000 = vmatprep.subr.bf16.mxu1 %v15247_v2 }
  0xd6   :  { %8897 = vmatmul.mubr.msk.bf16.gmra.mrb[104].mxu0 %vm192_vm1, %v10561_v19  ;;  %8919 = vmatmul.mubr.msk.bf16.gmra.mrb[104].mxu1 %vm192_vm1, %v1363_v30  ;;  %v1364_v19 = vpack.c.bf16 %v10979_v18, %v10956_v16 }
  0xd7   :  { %8900 = vmatprep.mubr.msk.bf16.mxu0 %vm10450_vm2, %v15247_v2  ;;  %8922 = vmatprep.mubr.msk.bf16.mxu1 %vm10450_vm2, %v15247_v2 }
  0xd9   :  { %v246_v7 = vpop.f32.mrb[0].mxu0  ;;  %v336_v11 = vpop.f32.mrb[0].mxu1 }
  0xda   :  { %v11144_v5 = vadd.f32 %v336_v11, %v246_v7  ;;  %v8674_v50 = vpop.f32.mrb[1].mxu0  ;;  %v8696_v51 = vpop.f32.mrb[1].mxu1 }
  0xdb   :  { %v249_v58 = vpop.f32.mrb[2].mxu0  ;;  %v339_v59 = vpop.f32.mrb[2].mxu1 }
  0xdc   :  { %v11148_v24 = vadd.f32 %v339_v59, %v249_v58  ;;  %v8675_v26 = vpop.f32.mrb[3].mxu0  ;;  %v8697_v30 = vpop.f32.mrb[3].mxu1  ;;  %v1366_v59 = vpack.c.bf16 %v11006_v33, %v11006_v33 }
  0xde   :  { %8901 = vmatmul.mubr.msk.bf16.gmra.mrb[108].mxu0 %vm192_vm1, %v10632_v37  ;;  %8923 = vmatmul.mubr.msk.bf16.gmra.mrb[108].mxu1 %vm192_vm1, %v1364_v19 }
  0xdf   :  { %8904 = vmatprep.mubr.msk.bf16.mxu0 %vm10450_vm2, %v15247_v2  ;;  %8926 = vmatprep.mubr.msk.bf16.mxu1 %vm10450_vm2, %v15247_v2 }
  0xe1   :  { %v254_v60 = vpop.f32.mrb[4].mxu0  ;;  %v344_v35 = vpop.f32.mrb[4].mxu1 }
  0xe2   :  { %v11157_v16 = vadd.f32 %v344_v35, %v254_v60  ;;  %v8678_v18 = vpop.f32.mrb[5].mxu0  ;;  %v8700_v0 = vpop.f32.mrb[5].mxu1 }
  0xe3   :  { %v257_v48 = vpop.f32.mrb[6].mxu0  ;;  %v347_v7 = vpop.f32.mrb[6].mxu1 }
  0xe4   :  { %v11161_v37 = vadd.f32 %v347_v7, %v257_v48  ;;  %v8679_v11 = vpop.f32.mrb[7].mxu0  ;;  %v8701_v50 = vpop.f32.mrb[7].mxu1 }
  0xe6   :  { %8905 = vmatmul.mubr.msk.bf16.gmra.mrb[112].mxu0 %vm192_vm1, %v10653_v43  ;;  %8927 = vmatmul.mubr.msk.bf16.gmra.mrb[112].mxu1 %vm192_vm1, %v1365_v8 }
  0xe7   :  { %8908 = vmatprep.mubr.msk.bf16.mxu0 %vm10450_vm2, %v15247_v2  ;;  %8930 = vmatprep.mubr.msk.bf16.mxu1 %vm10450_vm2, %v15247_v2 }
  0xe9   :  { %v262_v51 = vpop.f32.mrb[8].mxu0  ;;  %v352_v19 = vpop.f32.mrb[8].mxu1 }
  0xea   :  { %v11170_v20 = vadd.f32 %v352_v19, %v262_v51  ;;  %v8682_v31 = vpop.f32.mrb[9].mxu0  ;;  %v8704_v58 = vpop.f32.mrb[9].mxu1 }
  0xeb   :  { %v265_v26 = vpop.f32.mrb[10].mxu0  ;;  %v355_v30 = vpop.f32.mrb[10].mxu1 }
  0xec   :  { %v11174_v43 = vadd.f32 %v355_v30, %v265_v26  ;;  %v8683_v60 = vpop.f32.mrb[11].mxu0  ;;  %v8705_v35 = vpop.f32.mrb[11].mxu1 }
  0xee   :  { %8909 = vmatmul.mubr.msk.bf16.gmra.mrb[116].mxu0 %vm192_vm1, %v10668_v47  ;;  %8931 = vmatmul.mubr.msk.bf16.gmra.mrb[116].mxu1 %vm192_vm1, %v1366_v59 }
  0xef   :  { %8936 = vmatprep.mubr.msk.bf16.mxu0 %vm10450_vm2, %v15247_v2  ;;  %8958 = vmatprep.mubr.msk.bf16.mxu1 %vm10450_vm2, %v15247_v2 }
  0xf1   :  { %v270_v18 = vpop.f32.mrb[12].mxu0  ;;  %v360_v0 = vpop.f32.mrb[12].mxu1 }
  0xf2   :  { %v11183_v33 = vadd.f32 %v360_v0, %v270_v18  ;;  %v8686_v8 = vpop.f32.mrb[13].mxu0  ;;  %v8708_v48 = vpop.f32.mrb[13].mxu1 }
  0xf3   :  { %v273_v7 = vpop.f32.mrb[14].mxu0  ;;  %v363_v11 = vpop.f32.mrb[14].mxu1 }
  0xf4   :  { %v11185_v50 = vadd.f32 %v363_v11, %v273_v7  ;;  %v8687_v51 = vpop.f32.mrb[15].mxu0  ;;  %v8709_v47 = vpop.f32.mrb[15].mxu1 }
  0xf6   :  { %8937 = vmatmul.mubr.msk.bf16.vlgmr.msra.gmra.mrb[120].mxu0 %vm192_vm1, %v10808_v22  ;;  %8959 = vmatmul.mubr.msk.bf16.vlgmr.msra.gmra.mrb[120].mxu1 %vm192_vm1, %v10810_v23 }
  0xf7   :  { %8979 = vmatpush3.bf16.msra.mxu0 %v10700_v57  ;;  %9001 = vmatpush3.bf16.msra.mxu1 %v10823_v27 }
  0xf8   :  { %8940 = vmatprep.mubr.msk.bf16.mxu0 %vm10450_vm2, %v15247_v2  ;;  %8962 = vmatprep.mubr.msk.bf16.mxu1 %vm10450_vm2, %v15247_v2 }
  0xf9   :  { %v278_v19 = vpop.f32.mrb[16].mxu0  ;;  %v368_v31 = vpop.f32.mrb[16].mxu1  ;;  %9022 = vmatprep.subr.bf16.mxu0 %v15247_v2  ;;  %9044 = vmatprep.subr.bf16.mxu1 %v15247_v2 }
  0xfa   :  { %v11199_v58 = vadd.f32 %v368_v31, %v278_v19  ;;  %v8690_v59 = vpop.f32.mrb[17].mxu0  ;;  %v8712_v26 = vpop.f32.mrb[17].mxu1 }
  0xfb   :  { %v281_v30 = vpop.f32.mrb[18].mxu0  ;;  %v371_v60 = vpop.f32.mrb[18].mxu1 }
  0xfc   :  { %v8691_v35 = vpop.f32.mrb[19].mxu0  ;;  %v8713_v18 = vpop.f32.mrb[19].mxu1 }
  0xfe   :  { %8941 = vmatmul.mubr.msk.bf16.gmra.mrb[124].mxu0 %vm192_vm1, %v10854_v38  ;;  %8963 = vmatmul.mubr.msk.bf16.gmra.mrb[124].mxu1 %vm192_vm1, %v10856_v39 }
  0xff   :  { %8944 = vmatprep.mubr.msk.bf16.mxu0 %vm10450_vm2, %v15247_v2  ;;  %8966 = vmatprep.mubr.msk.bf16.mxu1 %vm10450_vm2, %v15247_v2 }
 0x101   :  { %v440_v0 = vpop.f32.mrb[20].mxu0  ;;  %v554_v8 = vpop.f32.mrb[20].mxu1 }
 0x102   :  { %v478_v48 = vadd.f32 %v440_v0, %v11144_v5  ;;  %v8718_v7 = vpop.f32.mrb[21].mxu0  ;;  %v8740_v11 = vpop.f32.mrb[21].mxu1 }
 0x103   :  { %v443_v51 = vpop.f32.mrb[22].mxu0  ;;  %v557_v47 = vpop.f32.mrb[22].mxu1 }
 0x104   :  { %v11210_v19 = vadd.f32 %v554_v8, %v478_v48  ;;  %v479_v31 = vadd.f32 %v443_v51, %v11148_v24  ;;  %v8719_v59 = vpop.f32.mrb[23].mxu0  ;;  %v8741_v26 = vpop.f32.mrb[23].mxu1 }
 0x106   :  { %v11213_v30 = vadd.f32 %v557_v47, %v479_v31  ;;  %8945 = vmatmul.mubr.msk.bf16.gmra.mrb[128].mxu0 %vm192_vm1, %v10878_v45  ;;  %8967 = vmatmul.mubr.msk.bf16.gmra.mrb[128].mxu1 %vm192_vm1, %v10880_v46 }
 0x107   :  { %8948 = vmatprep.mubr.msk.bf16.mxu0 %vm10450_vm2, %v15247_v2  ;;  %8970 = vmatprep.mubr.msk.bf16.mxu1 %vm10450_vm2, %v15247_v2 }
 0x109   :  { %v448_v5 = vpop.f32.mrb[24].mxu0  ;;  %v562_v60 = vpop.f32.mrb[24].mxu1 }
 0x10a   :  { %v480_v24 = vadd.f32 %v448_v5, %v11157_v16  ;;  %v8722_v35 = vpop.f32.mrb[25].mxu0  ;;  %v8744_v18 = vpop.f32.mrb[25].mxu1 }
 0x10b   :  { %v451_v0 = vpop.f32.mrb[26].mxu0  ;;  %v565_v8 = vpop.f32.mrb[26].mxu1 }
 0x10c   :  { %v11224_v48 = vadd.f32 %v562_v60, %v480_v24  ;;  %v481_v7 = vadd.f32 %v451_v0, %v11161_v37  ;;  %v8723_v11 = vpop.f32.mrb[27].mxu0  ;;  %v8745_v51 = vpop.f32.mrb[27].mxu1 }
 0x10e   :  { %v11227_v47 = vadd.f32 %v565_v8, %v481_v7  ;;  %8949 = vmatmul.mubr.msk.bf16.gmra.mrb[132].mxu0 %vm192_vm1, %v10902_v52  ;;  %8971 = vmatmul.mubr.msk.bf16.gmra.mrb[132].mxu1 %vm192_vm1, %v10904_v53 }
 0x10f   :  { %8952 = vmatprep.mubr.msk.bf16.mxu0 %vm10450_vm2, %v15247_v2  ;;  %8974 = vmatprep.mubr.msk.bf16.mxu1 %vm10450_vm2, %v15247_v2 }
 0x111   :  { %v456_v16 = vpop.f32.mrb[28].mxu0  ;;  %v570_v31 = vpop.f32.mrb[28].mxu1 }
 0x112   :  { %v482_v37 = vadd.f32 %v456_v16, %v11170_v20  ;;  %v8726_v59 = vpop.f32.mrb[29].mxu0  ;;  %v8748_v26 = vpop.f32.mrb[29].mxu1  ;;  %v7714_v20 = vld [vmem:[%s15240_s0 + $0x109] sm:$0xff] }
 0x113   :  { %v459_v5 = vpop.f32.mrb[30].mxu0  ;;  %v573_v60 = vpop.f32.mrb[30].mxu1 }
 0x114   :  { %v11238_v24 = vadd.f32 %v570_v31, %v482_v37  ;;  %v483_v35 = vadd.f32 %v459_v5, %v11174_v43  ;;  %v8727_v18 = vpop.f32.mrb[31].mxu0  ;;  %v8749_v0 = vpop.f32.mrb[31].mxu1  ;;  %v11257_v43 = vld [vmem:[%s15240_s0 + $0x111] sm:$0xff] }
 0x115   :  { %v11261_v37 = vpack.c.bf16 %v11257_v43, %v7714_v20 }
 0x116   :  { %v11241_v8 = vadd.f32 %v573_v60, %v483_v35  ;;  %8953 = vmatmul.mubr.msk.bf16.gmra.mrb[136].mxu0 %vm192_vm1, %v10920_v62  ;;  %8975 = vmatmul.mubr.msk.bf16.gmra.mrb[136].mxu1 %vm192_vm1, %v10922_v63 }
 0x117   :  { %8980 = vmatprep.mubr.msk.bf16.mxu0 %vm10450_vm2, %v15247_v2  ;;  %9002 = vmatprep.mubr.msk.bf16.mxu1 %vm10450_vm2, %v15247_v2  ;;  %15388 = vst [vmem:[#allocation14_spill] sm:$0xff] %v11261_v37 }
 0x119   :  { %v464_v7 = vpop.f32.mrb[32].mxu0  ;;  %v578_v11 = vpop.f32.mrb[32].mxu1 }
 0x11a   :  { %v484_v51 = vadd.f32 %v464_v7, %v11183_v33  ;;  %v8730_v16 = vpop.f32.mrb[33].mxu0  ;;  %v8752_v31 = vpop.f32.mrb[33].mxu1  ;;  %v11277_v33 = vld [vmem:[%s15240_s0 + $0x119] sm:$0xff] }
 0x11b   :  { %v467_v59 = vpop.f32.mrb[34].mxu0  ;;  %v581_v26 = vpop.f32.mrb[34].mxu1  ;;  %15389 = vst [vmem:[#allocation15_spill] sm:$0xff] %v11277_v33 }
 0x11c   :  { %v11263_v5 = vadd.f32 %v578_v11, %v484_v51  ;;  %v485_v60 = vadd.f32 %v467_v59, %v11185_v50  ;;  %v8731_v35 = vpop.f32.mrb[35].mxu0  ;;  %v8753_v18 = vpop.f32.mrb[35].mxu1  ;;  %v11282_v50 = vld [vmem:[%s15240_s0 + $0x121] sm:$0xff] }
 0x11d   :  { %15390 = vst [vmem:[#allocation16_spill] sm:$0xff] %v11282_v50  ;;  %v11293_v31 = vpack.c.bf16 %v11282_v50, %v11277_v33 }
 0x11e   :  { %v11266_v0 = vadd.f32 %v581_v26, %v485_v60  ;;  %8981 = vmatmul.mubr.msk.bf16.vlgmr.msra.gmra.mrb[140].mxu0 %vm192_vm1, %v11261_v37  ;;  %9003 = vmatmul.mubr.msk.bf16.vlgmr.msra.gmra.mrb[140].mxu1 %vm192_vm1, %v10942_v10 }
 0x11f   :  { %9023 = vmatpush3.bf16.msra.mxu0 %v10826_v29  ;;  %9045 = vmatpush3.bf16.msra.mxu1 %v10945_v15  ;;  %15391 = vst [vmem:[#allocation17_spill] sm:$0xff] %v11293_v31 }
 0x120   :  { %8984 = vmatprep.mubr.msk.bf16.mxu0 %vm10450_vm2, %v15247_v2  ;;  %9006 = vmatprep.mubr.msk.bf16.mxu1 %vm10450_vm2, %v15247_v2 }
 0x121   :  { %v472_v20 = vpop.f32.mrb[36].mxu0  ;;  %v586_v7 = vpop.f32.mrb[36].mxu1  ;;  %9066 = vmatprep.subr.bf16.mxu0 %v15247_v2  ;;  %9088 = vmatprep.subr.bf16.mxu1 %v15247_v2 }
 0x122   :  { %v486_v11 = vadd.f32 %v472_v20, %v11199_v58  ;;  %v8734_v51 = vpop.f32.mrb[37].mxu0  ;;  %v8756_v16 = vpop.f32.mrb[37].mxu1  ;;  %v11308_v58 = vld [vmem:[%s15240_s0 + $0x129] sm:$0xff]  ;;  %v11313_v20 = vld [vmem:[%s15240_s0 + $0x131] sm:$0xff] }
 0x123   :  { %v475_v59 = vpop.f32.mrb[38].mxu0  ;;  %v589_v26 = vpop.f32.mrb[38].mxu1  ;;  %15392 = vst [vmem:[#allocation18_spill] sm:$0xff] %v11308_v58  ;;  %15393 = vst [vmem:[#allocation19_spill] sm:$0xff] %v11313_v20 }
 0x124   :  { %v11295_v60 = vadd.f32 %v586_v7, %v486_v11  ;;  %v8735_v35 = vpop.f32.mrb[39].mxu0  ;;  %v8757_v18 = vpop.f32.mrb[39].mxu1  ;;  %v11318_v26 = vpack.c.bf16 %v11313_v20, %v11308_v58 }
 0x126   :  { %8985 = vmatmul.mubr.msk.bf16.gmra.mrb[144].mxu0 %vm192_vm1, %v11293_v31  ;;  %9007 = vmatmul.mubr.msk.bf16.gmra.mrb[144].mxu1 %vm192_vm1, %v10966_v17  ;;  %15394 = vst [vmem:[#allocation20_spill] sm:$0xff] %v11318_v26 }
 0x127   :  { %8988 = vmatprep.mubr.msk.bf16.mxu0 %vm10450_vm2, %v15247_v2  ;;  %9010 = vmatprep.mubr.msk.bf16.mxu1 %vm10450_vm2, %v15247_v2 }
 0x129   :  { %v668_v7 = vpop.f32.mrb[40].mxu0  ;;  %v781_v11 = vpop.f32.mrb[40].mxu1 }
 0x12a   :  { %v706_v51 = vadd.f32 %v668_v7, %v11210_v19  ;;  %v8762_v16 = vpop.f32.mrb[41].mxu0  ;;  %v8784_v59 = vpop.f32.mrb[41].mxu1  ;;  %v15395_v19 = vmov 0.0  }
 0x12b   :  { %v671_v35 = vpop.f32.mrb[42].mxu0  ;;  %v784_v18 = vpop.f32.mrb[42].mxu1 }
 0x12c   :  { %v11320_v2 = vadd.f32 %v781_v11, %v706_v51  ;;  %v707_v31 = vadd.f32 %v671_v35, %v11213_v30  ;;  %v8763_v37 = vpop.f32.mrb[43].mxu0  ;;  %v8785_v50 = vpop.f32.mrb[43].mxu1  ;;  %v11336_v30 = vld [vmem:[%s15240_s0 + $0x139] sm:$0xff] }
 0x12d   :  { %15396 = vst [vmem:[#allocation21_spill] sm:$0xff] %v11336_v30  ;;  %v11341_v37 = vld [vmem:[%s15240_s0 + $0x141] sm:$0xff] }
 0x12e   :  { %v11323_v15 = vadd.f32 %v784_v18, %v707_v31  ;;  %8989 = vmatmul.mubr.msk.bf16.gmra.mrb[148].mxu0 %vm192_vm1, %v11318_v26  ;;  %9011 = vmatmul.mubr.msk.bf16.gmra.mrb[148].mxu1 %vm192_vm1, %v10988_v21  ;;  %15397 = vst [vmem:[#allocation22_spill] sm:$0xff] %v11341_v37  ;;  %v11346_v16 = vpack.c.bf16 %v11341_v37, %v11336_v30 }
 0x12f   :  { %8992 = vmatprep.mubr.msk.bf16.mxu0 %vm10450_vm2, %v15395_v19  ;;  %9014 = vmatprep.mubr.msk.bf16.mxu1 %vm10450_vm2, %v15395_v19 }
 0x130   :  { %15398 = vst [vmem:[#allocation23_spill] sm:$0xff] %v11346_v16 }
 0x131   :  { %v676_v50 = vpop.f32.mrb[44].mxu0  ;;  %v789_v31 = vpop.f32.mrb[44].mxu1 }
 0x132   :  { %v708_v7 = vadd.f32 %v676_v50, %v11224_v48  ;;  %v8766_v11 = vpop.f32.mrb[45].mxu0  ;;  %v8788_v51 = vpop.f32.mrb[45].mxu1  ;;  %v11364_v48 = vld [vmem:[%s15240_s0 + $0x149] sm:$0xff] }
 0x133   :  { %v679_v59 = vpop.f32.mrb[46].mxu0  ;;  %v792_v35 = vpop.f32.mrb[46].mxu1  ;;  %15399 = vst [vmem:[#allocation24_spill] sm:$0xff] %v11364_v48 }
 0x134   :  { %v11348_v18 = vadd.f32 %v789_v31, %v708_v7  ;;  %v709_v26 = vadd.f32 %v679_v59, %v11227_v47  ;;  %v8767_v20 = vpop.f32.mrb[47].mxu0  ;;  %v8789_v58 = vpop.f32.mrb[47].mxu1  ;;  %v11369_v31 = vpack.c.bf16 %v11364_v48, %v11364_v48 }
 0x136   :  { %v11351_v33 = vadd.f32 %v792_v35, %v709_v26  ;;  %8993 = vmatmul.mubr.msk.bf16.gmra.mrb[152].mxu0 %vm192_vm1, %v11346_v16  ;;  %9015 = vmatmul.mubr.msk.bf16.gmra.mrb[152].mxu1 %vm192_vm1, %v11010_v34  ;;  %15400 = vst [vmem:[#allocation25_spill] sm:$0xff] %v11369_v31 }
 0x137   :  { %8996 = vmatprep.mubr.msk.bf16.mxu0 %vm10450_vm2, %v15395_v19  ;;  %9018 = vmatprep.mubr.msk.bf16.mxu1 %vm10450_vm2, %v15395_v19 }
 0x139   :  { %v684_v47 = vpop.f32.mrb[48].mxu0  ;;  %v797_v58 = vpop.f32.mrb[48].mxu1 }
 0x13a   :  { %v710_v20 = vadd.f32 %v684_v47, %v11238_v24  ;;  %v8770_v26 = vpop.f32.mrb[49].mxu0  ;;  %v8792_v50 = vpop.f32.mrb[49].mxu1  ;;  %v7738_v24 = vld [vmem:[%s15240_s0 + $0x62] sm:$0xff] }
 0x13b   :  { %v687_v7 = vpop.f32.mrb[50].mxu0  ;;  %v800_v11 = vpop.f32.mrb[50].mxu1 }
 0x13c   :  { %v11371_v51 = vadd.f32 %v797_v58, %v710_v20  ;;  %v711_v59 = vadd.f32 %v687_v7, %v11241_v8  ;;  %v8771_v35 = vpop.f32.mrb[51].mxu0  ;;  %v8793_v16 = vpop.f32.mrb[51].mxu1  ;;  %v7739_v8 = vld [vmem:[%s15240_s0 + $0x6a] sm:$0xff] }
 0x13d   :  { %v11391_v50 = vpack.c.bf16 %v7739_v8, %v7738_v24 }
 0x13e   :  { %v11374_v37 = vadd.f32 %v800_v11, %v711_v59  ;;  %8997 = vmatmul.mubr.msk.bf16.gmra.mrb[156].mxu0 %vm192_vm1, %v11369_v31  ;;  %9019 = vmatmul.mubr.msk.bf16.gmra.mrb[156].mxu1 %vm192_vm1, %v11028_v42 }
 0x13f   :  { %9024 = vmatprep.mubr.msk.bf16.mxu0 %vm10450_vm2, %v15395_v19  ;;  %9046 = vmatprep.mubr.msk.bf16.mxu1 %vm10450_vm2, %v15395_v19  ;;  %15401 = vst [vmem:[#allocation26_spill] sm:$0xff] %v11391_v50 }
 0x141   :  { %v692_v16 = vpop.f32.mrb[52].mxu0  ;;  %v805_v47 = vpop.f32.mrb[52].mxu1 }
 0x142   :  { %v712_v58 = vadd.f32 %v692_v16, %v11263_v5  ;;  %v8774_v20 = vpop.f32.mrb[53].mxu0  ;;  %v8796_v26 = vpop.f32.mrb[53].mxu1  ;;  %v7740_v5 = vld [vmem:[%s15240_s0 + $0x72] sm:$0xff] }
 0x143   :  { %v695_v7 = vpop.f32.mrb[54].mxu0  ;;  %v808_v11 = vpop.f32.mrb[54].mxu1 }
 0x144   :  { %v11393_v59 = vadd.f32 %v805_v47, %v712_v58  ;;  %v713_v35 = vadd.f32 %v695_v7, %v11266_v0  ;;  %v8775_v31 = vpop.f32.mrb[55].mxu0  ;;  %v8797_v48 = vpop.f32.mrb[55].mxu1  ;;  %v7741_v0 = vld [vmem:[%s15240_s0 + $0x7a] sm:$0xff] }
 0x145   :  { %v11417_v47 = vpack.c.bf16 %v7741_v0, %v7740_v5 }
 0x146   :  { %v11396_v30 = vadd.f32 %v808_v11, %v713_v35  ;;  %9025 = vmatmul.mubr.msk.bf16.vlgmr.msra.gmra.mrb[160].mxu0 %vm192_vm1, %v11044_v49  ;;  %9047 = vmatmul.mubr.msk.bf16.vlgmr.msra.gmra.mrb[160].mxu1 %vm192_vm1, %v11391_v50  ;;  %v7743_v35 = vld [vmem:[%s15240_s0 + $0x8a] sm:$0xff] }
 0x147   :  { %9067 = vmatpush3.bf16.msra.mxu0 %v10499_v3  ;;  %9089 = vmatpush3.bf16.msra.mxu1 %v10502_v4  ;;  %15402 = vst [vmem:[#allocation27_spill] sm:$0xff] %v11417_v47 }
 0x148   :  { %9028 = vmatprep.mubr.msk.bf16.mxu0 %vm10450_vm2, %v15395_v19  ;;  %9050 = vmatprep.mubr.msk.bf16.mxu1 %vm10450_vm2, %v15395_v19 }
 0x149   :  { %v700_v48 = vpop.f32.mrb[56].mxu0  ;;  %v813_v31 = vpop.f32.mrb[56].mxu1  ;;  %9110 = vmatprep.subr.bf16.mxu0 %v15395_v19  ;;  %9132 = vmatprep.subr.bf16.mxu1 %v15395_v19 }
 0x14a   :  { %v714_v24 = vadd.f32 %v700_v48, %v11295_v60  ;;  %v8778_v8 = vpop.f32.mrb[57].mxu0  ;;  %v8800_v16 = vpop.f32.mrb[57].mxu1  ;;  %v7742_v60 = vld [vmem:[%s15240_s0 + $0x82] sm:$0xff] }
 0x14b   :  { %v703_v58 = vpop.f32.mrb[58].mxu0  ;;  %v816_v20 = vpop.f32.mrb[58].mxu1  ;;  %v11436_v8 = vpack.c.bf16 %v7743_v35, %v7742_v60 }
 0x14c   :  { %v11419_v26 = vadd.f32 %v813_v31, %v714_v24  ;;  %v8779_v7 = vpop.f32.mrb[59].mxu0  ;;  %v8801_v11 = vpop.f32.mrb[59].mxu1 }
 0x14d   :  { %15403 = vst [vmem:[#allocation28_spill] sm:$0xff] %v11436_v8 }
 0x14e   :  { %9029 = vmatmul.mubr.msk.bf16.gmra.mrb[164].mxu0 %vm192_vm1, %v11064_v54  ;;  %9051 = vmatmul.mubr.msk.bf16.gmra.mrb[164].mxu1 %vm192_vm1, %v11417_v47 }
 0x14f   :  { %9032 = vmatprep.mubr.msk.bf16.mxu0 %vm10450_vm2, %v15395_v19  ;;  %9054 = vmatprep.mubr.msk.bf16.mxu1 %vm10450_vm2, %v15395_v19 }
 0x151   :  { %v894_v5 = vpop.f32.mrb[60].mxu0  ;;  %v1007_v0 = vpop.f32.mrb[60].mxu1 }
 0x152   :  { %v932_v48 = vadd.f32 %v894_v5, %v11320_v2  ;;  %v8806_v31 = vpop.f32.mrb[61].mxu0  ;;  %v8828_v24 = vpop.f32.mrb[61].mxu1  ;;  %v7744_v2 = vld [vmem:[%s15240_s0 + $0x92] sm:$0xff] }
 0x153   :  { %v897_v16 = vpop.f32.mrb[62].mxu0  ;;  %v1010_v58 = vpop.f32.mrb[62].mxu1 }
 0x154   :  { %v11438_v20 = vadd.f32 %v1007_v0, %v932_v48  ;;  %v933_v7 = vadd.f32 %v897_v16, %v11323_v15  ;;  %v8807_v11 = vpop.f32.mrb[63].mxu0  ;;  %v8829_v47 = vpop.f32.mrb[63].mxu1  ;;  %v7745_v15 = vld [vmem:[%s15240_s0 + $0x9a] sm:$0xff] }
 0x155   :  { %v11458_v48 = vpack.c.bf16 %v7745_v15, %v7744_v2 }
 0x156   :  { %v11441_v50 = vadd.f32 %v1010_v58, %v933_v7  ;;  %9033 = vmatmul.mubr.msk.bf16.gmra.mrb[168].mxu0 %vm192_vm1, %v11080_v6  ;;  %9055 = vmatmul.mubr.msk.bf16.gmra.mrb[168].mxu1 %vm192_vm1, %v11436_v8 }
 0x157   :  { %9036 = vmatprep.mubr.msk.bf16.mxu0 %vm10450_vm2, %v15395_v19  ;;  %9058 = vmatprep.mubr.msk.bf16.mxu1 %vm10450_vm2, %v15395_v19  ;;  %15404 = vst [vmem:[#allocation29_spill] sm:$0xff] %v11458_v48 }
 0x159   :  { %v902_v47 = vpop.f32.mrb[64].mxu0  ;;  %v1015_v60 = vpop.f32.mrb[64].mxu1 }
 0x15a   :  { %v934_v35 = vadd.f32 %v902_v47, %v11348_v18  ;;  %v8810_v5 = vpop.f32.mrb[65].mxu0  ;;  %v8832_v0 = vpop.f32.mrb[65].mxu1 }
 0x15b   :  { %v905_v31 = vpop.f32.mrb[66].mxu0  ;;  %v1018_v24 = vpop.f32.mrb[66].mxu1 }
 0x15c   :  { %v11460_v16 = vadd.f32 %v1015_v60, %v934_v35  ;;  %v935_v58 = vadd.f32 %v905_v31, %v11351_v33  ;;  %v8811_v7 = vpop.f32.mrb[67].mxu0  ;;  %v8833_v11 = vpop.f32.mrb[67].mxu1  ;;  %v7746_v33 = vld [vmem:[%s15240_s0 + $0xa2] sm:$0xff] }
 0x15d   :  { %v11477_v35 = vpack.c.bf16 %v7746_v33, %v7746_v33 }
 0x15e   :  { %v11463_v8 = vadd.f32 %v1018_v24, %v935_v58  ;;  %9037 = vmatmul.mubr.msk.bf16.gmra.mrb[172].mxu0 %vm192_vm1, %v11096_v40  ;;  %9059 = vmatmul.mubr.msk.bf16.gmra.mrb[172].mxu1 %vm192_vm1, %v11458_v48 }
 0x15f   :  { %9040 = vmatprep.mubr.msk.bf16.mxu0 %vm10450_vm2, %v15395_v19  ;;  %9062 = vmatprep.mubr.msk.bf16.mxu1 %vm10450_vm2, %v15395_v19  ;;  %15405 = vst [vmem:[#allocation30_spill] sm:$0xff] %v11477_v35 }
 0x161   :  { %v910_v18 = vpop.f32.mrb[68].mxu0  ;;  %v1023_v2 = vpop.f32.mrb[68].mxu1 }
 0x162   :  { %v936_v15 = vadd.f32 %v910_v18, %v11371_v51  ;;  %v8814_v47 = vpop.f32.mrb[69].mxu0  ;;  %v8836_v60 = vpop.f32.mrb[69].mxu1 }
 0x163   :  { %v913_v5 = vpop.f32.mrb[70].mxu0  ;;  %v1026_v0 = vpop.f32.mrb[70].mxu1 }
 0x164   :  { %v11479_v31 = vadd.f32 %v1023_v2, %v936_v15  ;;  %v937_v24 = vadd.f32 %v913_v5, %v11374_v37  ;;  %v8815_v58 = vpop.f32.mrb[71].mxu0  ;;  %v8837_v7 = vpop.f32.mrb[71].mxu1 }
 0x166   :  { %v11482_v11 = vadd.f32 %v1026_v0, %v937_v24  ;;  %9041 = vmatmul.mubr.msk.bf16.gmra.mrb[176].mxu0 %vm192_vm1, %v11109_v44  ;;  %9063 = vmatmul.mubr.msk.bf16.gmra.mrb[176].mxu1 %vm192_vm1, %v11477_v35 }
 0x167   :  { %9068 = vmatprep.mubr.msk.bf16.mxu0 %vm10450_vm2, %v15395_v19  ;;  %9090 = vmatprep.mubr.msk.bf16.mxu1 %vm10450_vm2, %v15395_v19 }
 0x169   :  { %v918_v51 = vpop.f32.mrb[72].mxu0  ;;  %v1031_v33 = vpop.f32.mrb[72].mxu1 }
 0x16a   :  { %v938_v37 = vadd.f32 %v918_v51, %v11393_v59  ;;  %v8818_v18 = vpop.f32.mrb[73].mxu0  ;;  %v8840_v2 = vpop.f32.mrb[73].mxu1 }
 0x16b   :  { %v921_v15 = vpop.f32.mrb[74].mxu0  ;;  %v1034_v47 = vpop.f32.mrb[74].mxu1 }
 0x16c   :  { %v11493_v60 = vadd.f32 %v1031_v33, %v938_v37  ;;  %v939_v5 = vadd.f32 %v921_v15, %v11396_v30  ;;  %v8819_v0 = vpop.f32.mrb[75].mxu0  ;;  %v8841_v24 = vpop.f32.mrb[75].mxu1 }
 0x16e   :  { %v11496_v58 = vadd.f32 %v1034_v47, %v939_v5  ;;  %9069 = vmatmul.mubr.msk.bf16.vlgmr.msra.gmra.mrb[180].mxu0 %vm192_vm1, %v10808_v22  ;;  %9091 = vmatmul.mubr.msk.bf16.vlgmr.msra.gmra.mrb[180].mxu1 %vm192_vm1, %v10694_v55 }
 0x16f   :  { %9111 = vmatpush3.bf16.msra.mxu0 %v10528_v12  ;;  %9133 = vmatpush3.bf16.msra.mxu1 %v10536_v14 }
 0x170   :  { %9072 = vmatprep.mubr.msk.bf16.mxu0 %vm10450_vm2, %v15395_v19  ;;  %9094 = vmatprep.mubr.msk.bf16.mxu1 %vm10450_vm2, %v15395_v19 }
 0x171   :  { %v926_v30 = vpop.f32.mrb[76].mxu0  ;;  %v1039_v59 = vpop.f32.mrb[76].mxu1  ;;  %9154 = vmatprep.subr.bf16.mxu0 %v15395_v19  ;;  %9176 = vmatprep.subr.bf16.mxu1 %v15395_v19 }
 0x172   :  { %v940_v7 = vadd.f32 %v926_v30, %v11419_v26  ;;  %v8822_v51 = vpop.f32.mrb[77].mxu0  ;;  %v8844_v55 = vpop.f32.mrb[77].mxu1 }
 0x173   :  { %v929_v33 = vpop.f32.mrb[78].mxu0  ;;  %v1042_v37 = vpop.f32.mrb[78].mxu1 }
 0x174   :  { %v11511_v18 = vadd.f32 %v1039_v59, %v940_v7  ;;  %v8823_v2 = vpop.f32.mrb[79].mxu0  ;;  %v8845_v15 = vpop.f32.mrb[79].mxu1 }
 0x176   :  { %9073 = vmatmul.mubr.msk.bf16.gmra.mrb[184].mxu0 %vm192_vm1, %v10854_v38  ;;  %9095 = vmatmul.mubr.msk.bf16.gmra.mrb[184].mxu1 %vm192_vm1, %v10723_v61 }
 0x177   :  { %9076 = vmatprep.mubr.msk.bf16.mxu0 %vm10450_vm2, %v15395_v19  ;;  %9098 = vmatprep.mubr.msk.bf16.mxu1 %vm10450_vm2, %v15395_v19 }
 0x179   :  { %v1120_v26 = vpop.f32.mrb[80].mxu0  ;;  %v11521_v47 = vpop.f32.mrb[80].mxu1 }
 0x17a   :  { %v11524_v5 = vadd.f32 %v1120_v26, %v11438_v20  ;;  %v8850_v0 = vpop.f32.mrb[81].mxu0  ;;  %v8872_v24 = vpop.f32.mrb[81].mxu1 }
 0x17b   :  { %v1123_v30 = vpop.f32.mrb[82].mxu0  ;;  %v11526_v59 = vpop.f32.mrb[82].mxu1 }
 0x17c   :  { %v11529_v7 = vadd.f32 %v1123_v30, %v11441_v50  ;;  %v8851_v61 = vpop.f32.mrb[83].mxu0  ;;  %v8873_v51 = vpop.f32.mrb[83].mxu1 }
 0x17e   :  { %9077 = vmatmul.mubr.msk.bf16.gmra.mrb[188].mxu0 %vm192_vm1, %v10878_v45  ;;  %9099 = vmatmul.mubr.msk.bf16.gmra.mrb[188].mxu1 %vm192_vm1, %v10743_v1 }
 0x17f   :  { %9080 = vmatprep.mubr.msk.bf16.mxu0 %vm10450_vm2, %v15395_v19  ;;  %9102 = vmatprep.mubr.msk.bf16.mxu1 %vm10450_vm2, %v15395_v19 }
 0x181   :  { %v1128_v20 = vpop.f32.mrb[84].mxu0  ;;  %v11539_v55 = vpop.f32.mrb[84].mxu1 }
 0x182   :  { %v11542_v50 = vadd.f32 %v1128_v20, %v11460_v16  ;;  %v8854_v33 = vpop.f32.mrb[85].mxu0  ;;  %v8876_v37 = vpop.f32.mrb[85].mxu1 }
 0x183   :  { %v1131_v2 = vpop.f32.mrb[86].mxu0  ;;  %v11544_v15 = vpop.f32.mrb[86].mxu1 }
 0x184   :  { %v11547_v26 = vadd.f32 %v1131_v2, %v11463_v8  ;;  %v8855_v1 = vpop.f32.mrb[87].mxu0  ;;  %v8877_v0 = vpop.f32.mrb[87].mxu1 }
 0x186   :  { %9081 = vmatmul.mubr.msk.bf16.gmra.mrb[192].mxu0 %vm192_vm1, %v10902_v52  ;;  %9103 = vmatmul.mubr.msk.bf16.gmra.mrb[192].mxu1 %vm192_vm1, %v10763_v9 }
 0x187   :  { %9084 = vmatprep.mubr.msk.bf16.mxu0 %vm10450_vm2, %v15395_v19  ;;  %9106 = vmatprep.mubr.msk.bf16.mxu1 %vm10450_vm2, %v15395_v19 }
 0x189   :  { %v1136_v16 = vpop.f32.mrb[88].mxu0  ;;  %v11557_v24 = vpop.f32.mrb[88].mxu1 }
 0x18a   :  { %v11560_v8 = vadd.f32 %v1136_v16, %v11479_v31  ;;  %v8858_v30 = vpop.f32.mrb[89].mxu0  ;;  %v8880_v61 = vpop.f32.mrb[89].mxu1 }
 0x18b   :  { %v1139_v51 = vpop.f32.mrb[90].mxu0  ;;  %v11562_v20 = vpop.f32.mrb[90].mxu1 }
 0x18c   :  { %v11565_v33 = vadd.f32 %v1139_v51, %v11482_v11  ;;  %v8859_v9 = vpop.f32.mrb[91].mxu0  ;;  %v8881_v37 = vpop.f32.mrb[91].mxu1 }
 0x18e   :  { %9085 = vmatmul.mubr.msk.bf16.gmra.mrb[196].mxu0 %vm192_vm1, %v10920_v62  ;;  %9107 = vmatmul.mubr.msk.bf16.gmra.mrb[196].mxu1 %vm192_vm1, %v10780_v13 }
 0x18f   :  { %9112 = vmatprep.mubr.msk.bf16.mxu0 %vm10450_vm2, %v15395_v19  ;;  %9134 = vmatprep.mubr.msk.bf16.mxu1 %vm10450_vm2, %v15395_v19 }
 0x191   :  { %v1144_v31 = vpop.f32.mrb[92].mxu0  ;;  %v11575_v2 = vpop.f32.mrb[92].mxu1 }
 0x192   :  { %v11578_v11 = vadd.f32 %v1144_v31, %v11493_v60  ;;  %v8862_v1 = vpop.f32.mrb[93].mxu0  ;;  %v8884_v0 = vpop.f32.mrb[93].mxu1 }
 0x193   :  { %v1147_v16 = vpop.f32.mrb[94].mxu0  ;;  %v11580_v30 = vpop.f32.mrb[94].mxu1 }
 0x194   :  { %v11583_v61 = vadd.f32 %v1147_v16, %v11496_v58  ;;  %v8863_v13 = vpop.f32.mrb[95].mxu0  ;;  %v8885_v51 = vpop.f32.mrb[95].mxu1 }
 0x196   :  { %9113 = vmatmul.mubr.msk.bf16.vlgmr.msra.gmra.mrb[200].mxu0 %vm192_vm1, %v10810_v23  ;;  %9135 = vmatmul.mubr.msk.bf16.vlgmr.msra.gmra.mrb[200].mxu1 %vm192_vm1, %v10580_v25 }
 0x197   :  { %9155 = vmatpush3.bf16.msra.mxu0 %v10697_v56  ;;  %9177 = vmatpush3.bf16.msra.mxu1 %v10700_v57 }
 0x198   :  { %9116 = vmatprep.mubr.msk.bf16.mxu0 %vm10450_vm2, %v15395_v19  ;;  %9138 = vmatprep.mubr.msk.bf16.mxu1 %vm10450_vm2, %v15395_v19 }
 0x199   :  { %v1152_v60 = vpop.f32.mrb[96].mxu0  ;;  %v11595_v58 = vpop.f32.mrb[96].mxu1  ;;  %9198 = vmatprep.subr.bf16.mxu0 %v15395_v19  ;;  %9220 = vmatprep.subr.bf16.mxu1 %v15395_v19 }
 0x19a   :  { %v11600_v9 = vadd.f32 %v1152_v60, %v11511_v18  ;;  %v8866_v25 = vpop.f32.mrb[97].mxu0  ;;  %v8888_v37 = vpop.f32.mrb[97].mxu1 }
 0x19b   :  { %v1155_v31 = vpop.f32.mrb[98].mxu0  ;;  %v1278_v1 = vpop.f32.mrb[98].mxu1 }
 0x19c   :  { %v8867_v0 = vpop.f32.mrb[99].mxu0  ;;  %v8889_v16 = vpop.f32.mrb[99].mxu1 }
 0x19e   :  { %9117 = vmatmul.mubr.msk.bf16.gmra.mrb[204].mxu0 %vm192_vm1, %v10856_v39  ;;  %9139 = vmatmul.mubr.msk.bf16.gmra.mrb[204].mxu1 %vm192_vm1, %v10593_v28 }
 0x19f   :  { %9120 = vmatprep.mubr.msk.bf16.mxu0 %vm10450_vm2, %v15395_v19  ;;  %9142 = vmatprep.mubr.msk.bf16.mxu1 %vm10450_vm2, %v15395_v19 }
 0x1a1   :  { %v1315_v18 = vpop.f32.mrb[100].mxu0  ;;  %v1416_v13 = vpop.f32.mrb[100].mxu1 }
 0x1a2   :  { %v1316_v51 = vadd.f32 %v1315_v18, %v11521_v47  ;;  %v8894_v60 = vpop.f32.mrb[101].mxu0  ;;  %v8916_v25 = vpop.f32.mrb[101].mxu1 }
 0x1a3   :  { %v1318_v37 = vpop.f32.mrb[102].mxu0  ;;  %v1419_v31 = vpop.f32.mrb[102].mxu1 }
 0x1a4   :  { %v11611_v1 = vadd.f32 %v1416_v13, %v1316_v51  ;;  %v1319_v0 = vadd.f32 %v1318_v37, %v11526_v59  ;;  %v8895_v16 = vpop.f32.mrb[103].mxu0  ;;  %v8917_v28 = vpop.f32.mrb[103].mxu1 }
 0x1a6   :  { %v11614_v35 = vadd.f32 %v1419_v31, %v1319_v0  ;;  %9121 = vmatmul.mubr.msk.bf16.gmra.mrb[208].mxu0 %vm192_vm1, %v10880_v46  ;;  %9143 = vmatmul.mubr.msk.bf16.gmra.mrb[208].mxu1 %vm192_vm1, %v10609_v32 }
 0x1a7   :  { %9124 = vmatprep.mubr.msk.bf16.mxu0 %vm10450_vm2, %v15395_v19  ;;  %9146 = vmatprep.mubr.msk.bf16.mxu1 %vm10450_vm2, %v15395_v19 }
 0x1a9   :  { %v1323_v47 = vpop.f32.mrb[104].mxu0  ;;  %v1424_v18 = vpop.f32.mrb[104].mxu1 }
 0x1aa   :  { %v1324_v59 = vadd.f32 %v1323_v47, %v11539_v55  ;;  %v8898_v13 = vpop.f32.mrb[105].mxu0  ;;  %v8920_v51 = vpop.f32.mrb[105].mxu1 }
 0x1ab   :  { %v1326_v60 = vpop.f32.mrb[106].mxu0  ;;  %v1427_v25 = vpop.f32.mrb[106].mxu1 }
 0x1ac   :  { %v11625_v37 = vadd.f32 %v1424_v18, %v1324_v59  ;;  %v1327_v31 = vadd.f32 %v1326_v60, %v11544_v15  ;;  %v8899_v0 = vpop.f32.mrb[107].mxu0  ;;  %v8921_v32 = vpop.f32.mrb[107].mxu1 }
 0x1ae   :  { %v11628_v16 = vadd.f32 %v1427_v25, %v1327_v31  ;;  %9125 = vmatmul.mubr.msk.bf16.gmra.mrb[212].mxu0 %vm192_vm1, %v10904_v53  ;;  %9147 = vmatmul.mubr.msk.bf16.gmra.mrb[212].mxu1 %vm192_vm1, %v10630_v36 }
 0x1af   :  { %9128 = vmatprep.mubr.msk.bf16.mxu0 %vm10450_vm2, %v15395_v19  ;;  %9150 = vmatprep.mubr.msk.bf16.mxu1 %vm10450_vm2, %v15395_v19 }
 0x1b1   :  { %v1331_v55 = vpop.f32.mrb[108].mxu0  ;;  %v1432_v28 = vpop.f32.mrb[108].mxu1 }
 0x1b2   :  { %v1332_v15 = vadd.f32 %v1331_v55, %v11557_v24  ;;  %v8902_v47 = vpop.f32.mrb[109].mxu0  ;;  %v8924_v18 = vpop.f32.mrb[109].mxu1 }
 0x1b3   :  { %v1334_v59 = vpop.f32.mrb[110].mxu0  ;;  %v1435_v13 = vpop.f32.mrb[110].mxu1 }
 0x1b4   :  { %v11639_v51 = vadd.f32 %v1432_v28, %v1332_v15  ;;  %v1335_v60 = vadd.f32 %v1334_v59, %v11562_v20  ;;  %v8903_v25 = vpop.f32.mrb[111].mxu0  ;;  %v8925_v36 = vpop.f32.mrb[111].mxu1 }
 0x1b6   :  { %v11642_v31 = vadd.f32 %v1435_v13, %v1335_v60  ;;  %9129 = vmatmul.mubr.msk.bf16.gmra.mrb[216].mxu0 %vm192_vm1, %v10922_v63  ;;  %9151 = vmatmul.mubr.msk.bf16.gmra.mrb[216].mxu1 %vm192_vm1, %v11026_v41 }
 0x1b7   :  { %9156 = vmatprep.mubr.msk.bf16.mxu0 %vm10450_vm2, %v15395_v19  ;;  %9178 = vmatprep.mubr.msk.bf16.mxu1 %vm10450_vm2, %v15395_v19 }
 0x1b9   :  { %v1339_v24 = vpop.f32.mrb[112].mxu0  ;;  %v1440_v0 = vpop.f32.mrb[112].mxu1 }
 0x1ba   :  { %v1340_v20 = vadd.f32 %v1339_v24, %v11575_v2  ;;  %v8906_v32 = vpop.f32.mrb[113].mxu0  ;;  %v8928_v55 = vpop.f32.mrb[113].mxu1 }
 0x1bb   :  { %v1342_v28 = vpop.f32.mrb[114].mxu0  ;;  %v1443_v15 = vpop.f32.mrb[114].mxu1 }
 0x1bc   :  { %v11653_v47 = vadd.f32 %v1440_v0, %v1340_v20  ;;  %v1343_v18 = vadd.f32 %v1342_v28, %v11580_v30  ;;  %v8907_v59 = vpop.f32.mrb[115].mxu0  ;;  %v8929_v41 = vpop.f32.mrb[115].mxu1 }
 0x1be   :  { %v11656_v13 = vadd.f32 %v1443_v15, %v1343_v18  ;;  %9157 = vmatmul.mubr.msk.bf16.vlgmr.msra.gmra.mrb[220].mxu0 %vm192_vm1, %v10942_v10  ;;  %9179 = vmatmul.mubr.msk.bf16.vlgmr.msra.gmra.mrb[220].mxu1 %vm192_vm1, %v11044_v49 }
 0x1bf   :  { %9199 = vmatpush3.bf16.msra.mxu0 %v10823_v27  ;;  %9221 = vmatpush3.bf16.msra.mxu1 %v10826_v29 }
 0x1c0   :  { %9160 = vmatprep.mubr.msk.bf16.mxu0 %vm10450_vm2, %v15395_v19  ;;  %9182 = vmatprep.mubr.msk.bf16.mxu1 %vm10450_vm2, %v15395_v19 }
 0x1c1   :  { %v1347_v2 = vpop.f32.mrb[116].mxu0  ;;  %v1448_v30 = vpop.f32.mrb[116].mxu1  ;;  %9242 = vmatprep.subr.bf16.mxu0 %v15395_v19  ;;  %9264 = vmatprep.subr.bf16.mxu1 %v15395_v19 }
 0x1c2   :  { %v1348_v60 = vadd.f32 %v1347_v2, %v11595_v58  ;;  %v8910_v25 = vpop.f32.mrb[117].mxu0  ;;  %v8932_v36 = vpop.f32.mrb[117].mxu1 }
 0x1c3   :  { %v1350_v24 = vpop.f32.mrb[118].mxu0  ;;  %v1451_v0 = vpop.f32.mrb[118].mxu1 }
 0x1c4   :  { %v11671_v20 = vadd.f32 %v1448_v30, %v1348_v60  ;;  %v8911_v32 = vpop.f32.mrb[119].mxu0  ;;  %v8933_v55 = vpop.f32.mrb[119].mxu1 }
 0x1c6   :  { %9161 = vmatmul.mubr.msk.bf16.gmra.mrb[224].mxu0 %vm192_vm1, %v10966_v17  ;;  %9183 = vmatmul.mubr.msk.bf16.gmra.mrb[224].mxu1 %vm192_vm1, %v11064_v54 }
 0x1c7   :  { %9164 = vmatprep.mubr.msk.bf16.mxu0 %vm10450_vm2, %v15395_v19  ;;  %9186 = vmatprep.mubr.msk.bf16.mxu1 %vm10450_vm2, %v15395_v19 }
 0x1c9   :  { %v1497_v58 = vpop.f32.mrb[120].mxu0  ;;  %v1578_v28 = vpop.f32.mrb[120].mxu1 }
 0x1ca   :  { %v1535_v15 = vadd.f32 %v1497_v58, %v11611_v1  ;;  %v8938_v18 = vpop.f32.mrb[121].mxu0  ;;  %v8960_v59 = vpop.f32.mrb[121].mxu1 }
 0x1cb   :  { %v1500_v41 = vpop.f32.mrb[122].mxu0  ;;  %v1581_v2 = vpop.f32.mrb[122].mxu1 }
 0x1cc   :  { %v11682_v30 = vadd.f32 %v1578_v28, %v1535_v15  ;;  %v1536_v60 = vadd.f32 %v1500_v41, %v11614_v35  ;;  %v8939_v25 = vpop.f32.mrb[123].mxu0  ;;  %v8961_v36 = vpop.f32.mrb[123].mxu1 }
 0x1ce   :  { %v11685_v24 = vadd.f32 %v1581_v2, %v1536_v60  ;;  %9165 = vmatmul.mubr.msk.bf16.gmra.mrb[228].mxu0 %vm192_vm1, %v10988_v21  ;;  %9187 = vmatmul.mubr.msk.bf16.gmra.mrb[228].mxu1 %vm192_vm1, %v11080_v6 }
 0x1cf   :  { %9168 = vmatprep.mubr.msk.bf16.mxu0 %vm10450_vm2, %v15395_v19  ;;  %9190 = vmatprep.mubr.msk.bf16.mxu1 %vm10450_vm2, %v15395_v19 }
 0x1d1   :  { %v1505_v1 = vpop.f32.mrb[124].mxu0  ;;  %v1586_v0 = vpop.f32.mrb[124].mxu1 }
 0x1d2   :  { %v1537_v35 = vadd.f32 %v1505_v1, %v11625_v37  ;;  %v8942_v32 = vpop.f32.mrb[125].mxu0  ;;  %v8964_v55 = vpop.f32.mrb[125].mxu1 }
 0x1d3   :  { %v1508_v58 = vpop.f32.mrb[126].mxu0  ;;  %v1589_v28 = vpop.f32.mrb[126].mxu1 }
 0x1d4   :  { %v11696_v15 = vadd.f32 %v1586_v0, %v1537_v35  ;;  %v1538_v18 = vadd.f32 %v1508_v58, %v11628_v16  ;;  %v8943_v59 = vpop.f32.mrb[127].mxu0  ;;  %v8965_v41 = vpop.f32.mrb[127].mxu1 }
 0x1d6   :  { %v11699_v2 = vadd.f32 %v1589_v28, %v1538_v18  ;;  %9169 = vmatmul.mubr.msk.bf16.gmra.mrb[232].mxu0 %vm192_vm1, %v11010_v34  ;;  %9191 = vmatmul.mubr.msk.bf16.gmra.mrb[232].mxu1 %vm192_vm1, %v11096_v40 }
 0x1d7   :  { %9172 = vmatprep.mubr.msk.bf16.mxu0 %vm10450_vm2, %v15395_v19  ;;  %9194 = vmatprep.mubr.msk.bf16.mxu1 %vm10450_vm2, %v15395_v19 }
 0x1d9   :  { %v1513_v37 = vpop.f32.mrb[128].mxu0  ;;  %v1594_v60 = vpop.f32.mrb[128].mxu1 }
 0x1da   :  { %v1539_v16 = vadd.f32 %v1513_v37, %v11639_v51  ;;  %v8946_v25 = vpop.f32.mrb[129].mxu0  ;;  %v8968_v36 = vpop.f32.mrb[129].mxu1  ;;  %v7782_v51 = vld [vmem:[%s15240_s0 + $0xb9] sm:$0xff] }
 0x1db   :  { %v1516_v1 = vpop.f32.mrb[130].mxu0  ;;  %v1597_v0 = vpop.f32.mrb[130].mxu1  ;;  %v15406_v25 = vld [vmem:[#allocation15_spill] sm:$0xff] }
 0x1dc   :  { %v11710_v35 = vadd.f32 %v1594_v60, %v1539_v16  ;;  %v1540_v32 = vadd.f32 %v1516_v1, %v11642_v31  ;;  %v8947_v55 = vpop.f32.mrb[131].mxu0  ;;  %v8969_v58 = vpop.f32.mrb[131].mxu1  ;;  %v7783_v31 = vld [vmem:[%s15240_s0 + $0xc1] sm:$0xff]  ;;  %v11732_v36 = vpack.c.bf16 %v15406_v25, %v11257_v43  ;;  %v7784_v43 = vld [vmem:[%s15240_s0 + $0xc9] sm:$0xff] }
 0x1dd   :  { %v2529_v16 = vpack.c.bf16 %v7783_v31, %v7782_v51 }
 0x1de   :  { %v11713_v28 = vadd.f32 %v1597_v0, %v1540_v32  ;;  %9173 = vmatmul.mubr.msk.bf16.gmra.mrb[236].mxu0 %vm192_vm1, %v11028_v42  ;;  %9195 = vmatmul.mubr.msk.bf16.gmra.mrb[236].mxu1 %vm192_vm1, %v11109_v44 }
 0x1df   :  { %9200 = vmatprep.mubr.msk.bf16.mxu0 %vm10450_vm2, %v15395_v19  ;;  %9222 = vmatprep.mubr.msk.bf16.mxu1 %vm10450_vm2, %v15395_v19 }
 0x1e1   :  { %v1521_v18 = vpop.f32.mrb[132].mxu0  ;;  %v1602_v59 = vpop.f32.mrb[132].mxu1 }
 0x1e2   :  { %v1541_v41 = vadd.f32 %v1521_v18, %v11653_v47  ;;  %v8950_v37 = vpop.f32.mrb[133].mxu0  ;;  %v8972_v60 = vpop.f32.mrb[133].mxu1  ;;  %v15407_v47 = vld [vmem:[#allocation13_spill] sm:$0xff] }
 0x1e3   :  { %v1524_v1 = vpop.f32.mrb[134].mxu0  ;;  %v1605_v0 = vpop.f32.mrb[134].mxu1  ;;  %v15408_v37 = vld [vmem:[#allocation16_spill] sm:$0xff]  ;;  %v15409_v60 = vld [vmem:[#allocation18_spill] sm:$0xff] }
 0x1e4   :  { %v11734_v32 = vadd.f32 %v1602_v59, %v1541_v41  ;;  %v1542_v55 = vadd.f32 %v1524_v1, %v11656_v13  ;;  %v8951_v58 = vpop.f32.mrb[135].mxu0  ;;  %v8973_v48 = vpop.f32.mrb[135].mxu1  ;;  %v7785_v13 = vld [vmem:[%s15240_s0 + $0xd1] sm:$0xff] }
 0x1e5   :  { %v2530_v41 = vpack.c.bf16 %v7785_v13, %v7784_v43  ;;  %v7787_v43 = vld [vmem:[%s15240_s0 + $0xe1] sm:$0xff] }
 0x1e6   :  { %v11737_v29 = vadd.f32 %v1605_v0, %v1542_v55  ;;  %9201 = vmatmul.mubr.msk.bf16.vlgmr.msra.gmra.mrb[240].mxu0 %vm192_vm1, %v2529_v16  ;;  %9223 = vmatmul.mubr.msk.bf16.vlgmr.msra.gmra.mrb[240].mxu1 %vm192_vm1, %v11732_v36  ;;  %v11759_v16 = vpack.c.bf16 %v15409_v60, %v15408_v37  ;;  %v15412_v37 = vld [vmem:[#allocation21_spill] sm:$0xff] }
 0x1e7   :  { %9243 = vmatpush3.bf16.msra.mxu0 %v15407_v47  ;;  %9265 = vmatpush3.bf16.msra.mxu1 %v10499_v3 }
 0x1e8   :  { %9204 = vmatprep.mubr.msk.bf16.mxu0 %vm10450_vm2, %v15395_v19  ;;  %9226 = vmatprep.mubr.msk.bf16.mxu1 %vm10450_vm2, %v15395_v19  ;;  %15410 = vst [vmem:[#allocation15_spill] sm:$0xff] %v11759_v16 }
 0x1e9   :  { %v1529_v48 = vpop.f32.mrb[136].mxu0  ;;  %v1610_v51 = vpop.f32.mrb[136].mxu1  ;;  %9286 = vmatprep.subr.bf16.mxu0 %v15395_v19  ;;  %9308 = vmatprep.subr.bf16.mxu1 %v15395_v19 }
 0x1ea   :  { %v1543_v31 = vadd.f32 %v1529_v48, %v11671_v20  ;;  %v8954_v18 = vpop.f32.mrb[137].mxu0  ;;  %v8976_v59 = vpop.f32.mrb[137].mxu1  ;;  %v7786_v20 = vld [vmem:[%s15240_s0 + $0xd9] sm:$0xff] }
 0x1eb   :  { %v1532_v25 = vpop.f32.mrb[138].mxu0  ;;  %v1613_v1 = vpop.f32.mrb[138].mxu1  ;;  %v2531_v59 = vpack.c.bf16 %v7787_v43, %v7786_v20 }
 0x1ec   :  { %v11761_v0 = vadd.f32 %v1610_v51, %v1543_v31  ;;  %v8955_v55 = vpop.f32.mrb[139].mxu0  ;;  %v8977_v58 = vpop.f32.mrb[139].mxu1 }
 0x1ee   :  { %9205 = vmatmul.mubr.msk.bf16.gmra.mrb[244].mxu0 %vm192_vm1, %v2530_v41  ;;  %9227 = vmatmul.mubr.msk.bf16.gmra.mrb[244].mxu1 %vm192_vm1, %v11759_v16  ;;  %v15411_v41 = vld [vmem:[#allocation19_spill] sm:$0xff] }
 0x1ef   :  { %9208 = vmatprep.mubr.msk.bf16.mxu0 %vm10450_vm2, %v15395_v19  ;;  %9230 = vmatprep.mubr.msk.bf16.mxu1 %vm10450_vm2, %v15395_v19  ;;  %v11779_v60 = vpack.c.bf16 %v15412_v37, %v15411_v41 }
 0x1f1   :  { %v1688_v13 = vpop.f32.mrb[140].mxu0  ;;  %v1769_v48 = vpop.f32.mrb[140].mxu1  ;;  %15413 = vst [vmem:[#allocation16_spill] sm:$0xff] %v11779_v60 }
 0x1f2   :  { %v1726_v51 = vadd.f32 %v1688_v13, %v11682_v30  ;;  %v8982_v31 = vpop.f32.mrb[141].mxu0  ;;  %v9004_v18 = vpop.f32.mrb[141].mxu1  ;;  %v7788_v30 = vld [vmem:[%s15240_s0 + $0xe9] sm:$0xff] }
 0x1f3   :  { %v1691_v25 = vpop.f32.mrb[142].mxu0  ;;  %v1772_v1 = vpop.f32.mrb[142].mxu1  ;;  %v15415_v31 = vld [vmem:[#allocation24_spill] sm:$0xff] }
 0x1f4   :  { %v11781_v55 = vadd.f32 %v1769_v48, %v1726_v51  ;;  %v1727_v58 = vadd.f32 %v1691_v25, %v11685_v24  ;;  %v8983_v3 = vpop.f32.mrb[143].mxu0  ;;  %v9005_v16 = vpop.f32.mrb[143].mxu1  ;;  %v15414_v51 = vld [vmem:[#allocation22_spill] sm:$0xff] }
 0x1f5   :  { %v7789_v3 = vld [vmem:[%s15240_s0 + $0xf1] sm:$0xff]  ;;  %v11802_v18 = vpack.c.bf16 %v15415_v31, %v15414_v51 }
 0x1f6   :  { %v11784_v47 = vadd.f32 %v1772_v1, %v1727_v58  ;;  %9209 = vmatmul.mubr.msk.bf16.gmra.mrb[248].mxu0 %vm192_vm1, %v2531_v59  ;;  %9231 = vmatmul.mubr.msk.bf16.gmra.mrb[248].mxu1 %vm192_vm1, %v11779_v60  ;;  %v2532_v48 = vpack.c.bf16 %v7789_v3, %v7788_v30 }
 0x1f7   :  { %9212 = vmatprep.mubr.msk.bf16.mxu0 %vm10450_vm2, %v15395_v19  ;;  %9234 = vmatprep.mubr.msk.bf16.mxu1 %vm10450_vm2, %v15395_v19 }
 0x1f9   :  { %v1696_v24 = vpop.f32.mrb[144].mxu0  ;;  %v1777_v16 = vpop.f32.mrb[144].mxu1 }
 0x1fa   :  { %v1728_v20 = vadd.f32 %v1696_v24, %v11696_v15  ;;  %v8986_v43 = vpop.f32.mrb[145].mxu0  ;;  %v9008_v13 = vpop.f32.mrb[145].mxu1  ;;  %v7790_v15 = vld [vmem:[%s15240_s0 + $0xf9] sm:$0xff] }
 0x1fb   :  { %v1699_v59 = vpop.f32.mrb[146].mxu0  ;;  %v1780_v41 = vpop.f32.mrb[146].mxu1  ;;  %v2533_v43 = vpack.c.bf16 %v7790_v15, %v7790_v15 }
 0x1fc   :  { %v11804_v37 = vadd.f32 %v1777_v16, %v1728_v20  ;;  %v1729_v25 = vadd.f32 %v1699_v59, %v11699_v2  ;;  %v8987_v1 = vpop.f32.mrb[147].mxu0  ;;  %v9009_v58 = vpop.f32.mrb[147].mxu1  ;;  %v7804_v2 = vld [vmem:[%s15240_s0 + $0x151] sm:$0xff] }
 0x1fd   :  { %v11823_v13 = vpack.c.bf16 %v7804_v2, %v7804_v2 }
 0x1fe   :  { %v11807_v60 = vadd.f32 %v1780_v41, %v1729_v25  ;;  %9213 = vmatmul.mubr.msk.bf16.gmra.mrb[252].mxu0 %vm192_vm1, %v2532_v48  ;;  %9235 = vmatmul.mubr.msk.bf16.gmra.mrb[252].mxu1 %vm192_vm1, %v11802_v18 }
 0x1ff   :  { %9216 = vmatprep.mubr.msk.bf16.mxu0 %vm10450_vm2, %v15395_v19  ;;  %9238 = vmatprep.mubr.msk.bf16.mxu1 %vm10450_vm2, %v15395_v19 }
 0x201   :  { %v1704_v30 = vpop.f32.mrb[148].mxu0  ;;  %v1785_v3 = vpop.f32.mrb[148].mxu1 }
 0x202   :  { %v1730_v24 = vadd.f32 %v1704_v30, %v11710_v35  ;;  %v8990_v16 = vpop.f32.mrb[149].mxu0  ;;  %v9012_v20 = vpop.f32.mrb[149].mxu1  ;;  %v7810_v35 = vld [vmem:[%s15240_s0 + $0xba] sm:$0xff] }
 0x203   :  { %v1707_v48 = vpop.f32.mrb[150].mxu0  ;;  %v1788_v51 = vpop.f32.mrb[150].mxu1 }
 0x204   :  { %v11825_v31 = vadd.f32 %v1785_v3, %v1730_v24  ;;  %v1731_v59 = vadd.f32 %v1707_v48, %v11713_v28  ;;  %v8991_v41 = vpop.f32.mrb[151].mxu0  ;;  %v9013_v25 = vpop.f32.mrb[151].mxu1  ;;  %v7811_v28 = vld [vmem:[%s15240_s0 + $0xc2] sm:$0xff] }
 0x205   :  { %v11844_v24 = vpack.c.bf16 %v7811_v28, %v7810_v35 }
 0x206   :  { %v11828_v1 = vadd.f32 %v1788_v51, %v1731_v59  ;;  %9217 = vmatmul.mubr.msk.bf16.gmra.mrb[0].mxu0 %vm192_vm1, %v2533_v43  ;;  %9239 = vmatmul.mubr.msk.bf16.gmra.mrb[0].mxu1 %vm192_vm1, %v11823_v13 }
 0x207   :  { %9244 = vmatprep.mubr.msk.bf16.mxu0 %vm10450_vm2, %v15395_v19  ;;  %9266 = vmatprep.mubr.msk.bf16.mxu1 %vm10450_vm2, %v15395_v19 }
 0x209   :  { %v1712_v58 = vpop.f32.mrb[152].mxu0  ;;  %v1793_v15 = vpop.f32.mrb[152].mxu1 }
 0x20a   :  { %v1732_v2 = vadd.f32 %v1712_v58, %v11734_v32  ;;  %v8994_v30 = vpop.f32.mrb[153].mxu0  ;;  %v9016_v3 = vpop.f32.mrb[153].mxu1  ;;  %v7812_v32 = vld [vmem:[%s15240_s0 + $0xca] sm:$0xff] }
 0x20b   :  { %v1715_v16 = vpop.f32.mrb[154].mxu0  ;;  %v1796_v20 = vpop.f32.mrb[154].mxu1 }
 0x20c   :  { %v11846_v43 = vadd.f32 %v1793_v15, %v1732_v2  ;;  %v1733_v48 = vadd.f32 %v1715_v16, %v11737_v29  ;;  %v8995_v51 = vpop.f32.mrb[155].mxu0  ;;  %v9017_v59 = vpop.f32.mrb[155].mxu1  ;;  %v7813_v29 = vld [vmem:[%s15240_s0 + $0xd2] sm:$0xff] }
 0x20d   :  { %v11870_v15 = vpack.c.bf16 %v7813_v29, %v7812_v32  ;;  %v7815_v51 = vld [vmem:[%s15240_s0 + $0xe2] sm:$0xff] }
 0x20e   :  { %v11849_v41 = vadd.f32 %v1796_v20, %v1733_v48  ;;  %9245 = vmatmul.mubr.msk.bf16.vlgmr.msra.gmra.mrb[4].mxu0 %vm192_vm1, %v11844_v24  ;;  %9267 = vmatmul.mubr.msk.bf16.vlgmr.msra.gmra.mrb[4].mxu1 %vm192_vm1, %v10810_v23  ;;  %v11877_v48 = vld [vmem:[%s15242_s2] ss:$0 sm:$0xff] }
 0x20f   :  { %9287 = vmatpush3.bf16.msra.mxu0 %v10502_v4  ;;  %9309 = vmatpush3.bf16.msra.mxu1 %v10528_v12  ;;  %15416 = vst [vmem:[#allocation18_spill] sm:$0xff] %v11870_v15  ;;  %v1173_v59 = vadd.f32 %v11877_v48, %v11524_v5 }
 0x210   :  { %9248 = vmatprep.mubr.msk.bf16.mxu0 %vm10450_vm2, %v15395_v19  ;;  %9270 = vmatprep.mubr.msk.bf16.mxu1 %vm10450_vm2, %v15395_v19 }
 0x211   :  { %v1720_v25 = vpop.f32.mrb[156].mxu0  ;;  %v1801_v23 = vpop.f32.mrb[156].mxu1  ;;  %9330 = vmatprep.subr.bf16.mxu0 %v15395_v19  ;;  %9352 = vmatprep.subr.bf16.mxu1 %v15395_v19  ;;  %v1191_v12 = vmul.f32 0.1, %v1173_v59  ;;  %vm1182_vm3 = vcmp.gt.f32.partialorder %v1173_v59, 0.0 }
 0x212   :  { %v1734_v35 = vadd.f32 %v1720_v25, %v11761_v0  ;;  %v8998_v28 = vpop.f32.mrb[157].mxu0  ;;  %v9020_v58 = vpop.f32.mrb[157].mxu1  ;;  %v7814_v0 = vld [vmem:[%s15240_s0 + $0xda] sm:$0xff] }
 0x213   :  { %v1723_v2 = vpop.f32.mrb[158].mxu0  ;;  %v1804_v30 = vpop.f32.mrb[158].mxu1  ;;  %v1174_v28 = vadd.f32 %v11877_v48, %v11529_v7  ;;  %v7816_v7 = vld [vmem:[%s15240_s0 + $0xea] sm:$0xff] }
 0x214   :  { %v11872_v3 = vadd.f32 %v1801_v23, %v1734_v35  ;;  %v8999_v16 = vpop.f32.mrb[159].mxu0  ;;  %v9021_v20 = vpop.f32.mrb[159].mxu1  ;;  %v11896_v35 = vpack.c.bf16 %v7815_v51, %v7814_v0  ;;  %v11917_v0 = vsel %vm1182_vm3, %v1173_v59, %v1191_v12  ;;  %v1175_v51 = vadd.f32 %v11877_v48, %v11542_v50 }
 0x215   :  { %vm1183_vm4 = vcmp.gt.f32.partialorder %v1174_v28, 0.0  ;;  %v1176_v50 = vadd.f32 %v11877_v48, %v11547_v26  ;;  %v7818_v26 = vld [vmem:[%s15240_s0 + $0xfa] sm:$0xff] }
 0x216   :  { %9249 = vmatmul.mubr.msk.bf16.gmra.mrb[8].mxu0 %vm192_vm1, %v11870_v15  ;;  %9271 = vmatmul.mubr.msk.bf16.gmra.mrb[8].mxu1 %vm192_vm1, %v10856_v39  ;;  %vm1184_vm7 = vcmp.gt.f32.partialorder %v1175_v51, 0.0 }
 0x217   :  { %9252 = vmatprep.mubr.msk.bf16.mxu0 %vm10450_vm2, %v15395_v19  ;;  %9274 = vmatprep.mubr.msk.bf16.mxu1 %vm10450_vm2, %v15395_v19  ;;  %vm1185_vm9 = vcmp.gt.f32.partialorder %v1176_v50, 0.0 }
 0x219   :  { %v1850_v32 = vpop.f32.mrb[160].mxu0  ;;  %v1960_v29 = vpop.f32.mrb[160].mxu1 }
 0x21a   :  { %v1888_v39 = vadd.f32 %v1850_v32, %v11781_v55  ;;  %v9026_v25 = vpop.f32.mrb[161].mxu0  ;;  %v9048_v23 = vpop.f32.mrb[161].mxu1 }
 0x21b   :  { %v1853_v58 = vpop.f32.mrb[162].mxu0  ;;  %v1963_v2 = vpop.f32.mrb[162].mxu1 }
 0x21c   :  { %v1998_v30 = vadd.f32 %v1960_v29, %v1888_v39  ;;  %v1889_v16 = vadd.f32 %v1853_v58, %v11784_v47  ;;  %v9027_v20 = vpop.f32.mrb[163].mxu0  ;;  %v9049_v4 = vpop.f32.mrb[163].mxu1  ;;  %v7817_v47 = vld [vmem:[%s15240_s0 + $0xf2] sm:$0xff] }
 0x21d   :  { %v1192_v4 = vmul.f32 0.1, %v1174_v28  ;;  %v11921_v39 = vpack.c.bf16 %v7817_v47, %v7816_v7 }
 0x21e   :  { %v2007_v5 = vadd.f32 %v11877_v48, %v1998_v30  ;;  %v1999_v15 = vadd.f32 %v1963_v2, %v1889_v16  ;;  %9253 = vmatmul.mubr.msk.bf16.gmra.mrb[12].mxu0 %vm192_vm1, %v11896_v35  ;;  %9275 = vmatmul.mubr.msk.bf16.gmra.mrb[12].mxu1 %vm192_vm1, %v10880_v46 }
 0x21f   :  { %9256 = vmatprep.mubr.msk.bf16.mxu0 %vm10450_vm2, %v15395_v19  ;;  %9278 = vmatprep.mubr.msk.bf16.mxu1 %vm10450_vm2, %v15395_v19  ;;  %v11926_v16 = vsel %vm1183_vm4, %v1174_v28, %v1192_v4 }
 0x220   :  { %vm2016_vm5 = vcmp.gt.f32.partialorder %v2007_v5, 0.0  ;;  %v2025_v55 = vmul.f32 0.1, %v2007_v5  ;;  %v2008_v46 = vadd.f32 %v11877_v48, %v1999_v15 }
 0x221   :  { %v1858_v32 = vpop.f32.mrb[164].mxu0  ;;  %v1968_v29 = vpop.f32.mrb[164].mxu1 }
 0x222   :  { %v11923_v25 = vsel %vm2016_vm5, %v2007_v5, %v2025_v55  ;;  %vm2017_vm6 = vcmp.gt.f32.partialorder %v2008_v46, 0.0  ;;  %v2026_v23 = vmul.f32 0.1, %v2008_v46  ;;  %v1890_v58 = vadd.f32 %v1858_v32, %v11804_v37  ;;  %v9030_v2 = vpop.f32.mrb[165].mxu0  ;;  %v9052_v30 = vpop.f32.mrb[165].mxu1 }
 0x223   :  { %v1861_v15 = vpop.f32.mrb[166].mxu0  ;;  %v1971_v59 = vpop.f32.mrb[166].mxu1  ;;  %v1193_v37 = vmul.f32 0.1, %v1175_v51  ;;  %v11954_v30 = vpack.c.bf16 %v7818_v26, %v7818_v26 }
 0x224   :  { %v11932_v20 = vsel %vm2017_vm6, %v2008_v46, %v2026_v23  ;;  %v2000_v5 = vadd.f32 %v1968_v29, %v1890_v58  ;;  %v1891_v7 = vadd.f32 %v1861_v15, %v11807_v60  ;;  %v9031_v47 = vpop.f32.mrb[167].mxu0  ;;  %v9053_v55 = vpop.f32.mrb[167].mxu1  ;;  %v1194_v60 = vmul.f32 0.1, %v1176_v50 }
 0x225   :  { %v11950_v23 = vsel %vm1184_vm7, %v1175_v51, %v1193_v37  ;;  %v1178_v51 = vadd.f32 %v11877_v48, %v11565_v33 }
 0x226   :  { %v2009_v4 = vadd.f32 %v11877_v48, %v2000_v5  ;;  %v2001_v32 = vadd.f32 %v1971_v59, %v1891_v7  ;;  %9257 = vmatmul.mubr.msk.bf16.gmra.mrb[16].mxu0 %vm192_vm1, %v11921_v39  ;;  %9279 = vmatmul.mubr.msk.bf16.gmra.mrb[16].mxu1 %vm192_vm1, %v10904_v53  ;;  %v1177_v53 = vadd.f32 %v11877_v48, %v11560_v8 }
 0x227   :  { %9260 = vmatprep.mubr.msk.bf16.mxu0 %vm10450_vm2, %v15395_v19  ;;  %9282 = vmatprep.mubr.msk.bf16.mxu1 %vm10450_vm2, %v15395_v19  ;;  %vm1187_vm12 = vcmp.gt.f32.partialorder %v1178_v51, 0.0 }
 0x228   :  { %vm2018_vm8 = vcmp.gt.f32.partialorder %v2009_v4, 0.0  ;;  %v2027_v46 = vmul.f32 0.1, %v2009_v4  ;;  %v2010_v29 = vadd.f32 %v11877_v48, %v2001_v32  ;;  %v11963_v32 = vsel %vm1185_vm9, %v1176_v50, %v1194_v60 }
 0x229   :  { %v1866_v58 = vpop.f32.mrb[168].mxu0  ;;  %v1976_v2 = vpop.f32.mrb[168].mxu1  ;;  %vm1186_vm11 = vcmp.gt.f32.partialorder %v1177_v53, 0.0  ;;  %v1196_v50 = vmul.f32 0.1, %v1178_v51  ;;  %v1179_v60 = vadd.f32 %v11877_v48, %v11578_v11  ;;  %v1180_v11 = vadd.f32 %v11877_v48, %v11583_v61 }
 0x22a   :  { %v11956_v15 = vsel %vm2018_vm8, %v2009_v4, %v2027_v46  ;;  %vm2019_vm10 = vcmp.gt.f32.partialorder %v2010_v29, 0.0  ;;  %v2028_v59 = vmul.f32 0.1, %v2010_v29  ;;  %v1892_v5 = vadd.f32 %v1866_v58, %v11825_v31  ;;  %v9034_v7 = vpop.f32.mrb[169].mxu0  ;;  %v9056_v47 = vpop.f32.mrb[169].mxu1 }
 0x22b   :  { %v2045_v55 = vmax.f32 %v11950_v23, %v11956_v15  ;;  %v1869_v37 = vpop.f32.mrb[170].mxu0  ;;  %v1979_v8 = vpop.f32.mrb[170].mxu1  ;;  %v1195_v31 = vmul.f32 0.1, %v1177_v53  ;;  %vm1188_vm15 = vcmp.gt.f32.partialorder %v1179_v60, 0.0  ;;  %vm1189_vm3 = vcmp.gt.f32.partialorder %v1180_v11, 0.0 }
 0x22c   :  { %v11965_v26 = vsel %vm2019_vm10, %v2010_v29, %v2028_v59  ;;  %v2002_v4 = vadd.f32 %v1976_v2, %v1892_v5  ;;  %v1893_v46 = vadd.f32 %v1869_v37, %v11828_v1  ;;  %v9035_v28 = vpop.f32.mrb[171].mxu0  ;;  %v9057_v12 = vpop.f32.mrb[171].mxu1  ;;  %v1198_v61 = vmul.f32 0.1, %v1180_v11 }
 0x22d   :  { %v11980_v28 = vsel %vm1186_vm11, %v1177_v53, %v1195_v31 }
 0x22e   :  { %v2011_v33 = vadd.f32 %v11877_v48, %v2002_v4  ;;  %v2003_v7 = vadd.f32 %v1979_v8, %v1893_v46  ;;  %9261 = vmatmul.mubr.msk.bf16.gmra.mrb[20].mxu0 %vm192_vm1, %v11954_v30  ;;  %9283 = vmatmul.mubr.msk.bf16.gmra.mrb[20].mxu1 %vm192_vm1, %v10922_v63  ;;  %v11987_v8 = vsel %vm1187_vm12, %v1178_v51, %v1196_v50 }
 0x22f   :  { %9288 = vmatprep.mubr.msk.bf16.mxu0 %vm10450_vm2, %v15395_v19  ;;  %9310 = vmatprep.mubr.msk.bf16.mxu1 %vm10450_vm2, %v15395_v19 }
 0x230   :  { %vm2020_vm13 = vcmp.gt.f32.partialorder %v2011_v33, 0.0  ;;  %v2029_v1 = vmul.f32 0.1, %v2011_v33  ;;  %v2012_v12 = vadd.f32 %v11877_v48, %v2003_v7 }
 0x231   :  { %v1874_v29 = vpop.f32.mrb[172].mxu0  ;;  %v1984_v2 = vpop.f32.mrb[172].mxu1 }
 0x232   :  { %v11984_v63 = vsel %vm2020_vm13, %v2011_v33, %v2029_v1  ;;  %vm2021_vm14 = vcmp.gt.f32.partialorder %v2012_v12, 0.0  ;;  %v2030_v59 = vmul.f32 0.1, %v2012_v12  ;;  %v1894_v5 = vadd.f32 %v1874_v29, %v11846_v43  ;;  %v9038_v47 = vpop.f32.mrb[173].mxu0  ;;  %v9060_v37 = vpop.f32.mrb[173].mxu1 }
 0x233   :  { %v2047_v4 = vmax.f32 %v11980_v28, %v11984_v63  ;;  %v1877_v53 = vpop.f32.mrb[174].mxu0  ;;  %v1987_v46 = vpop.f32.mrb[174].mxu1  ;;  %v1197_v43 = vmul.f32 0.1, %v1179_v60  ;;  %v15417_v47 = vld [vmem:[#allocation14_spill] sm:$0xff] }
 0x234   :  { %v11993_v31 = vsel %vm2021_vm14, %v2012_v12, %v2030_v59  ;;  %v2004_v33 = vadd.f32 %v1984_v2, %v1894_v5  ;;  %v1895_v7 = vadd.f32 %v1877_v53, %v11849_v41  ;;  %v9039_v1 = vpop.f32.mrb[175].mxu0  ;;  %v9061_v58 = vpop.f32.mrb[175].mxu1 }
 0x235   :  { %v12010_v12 = vsel %vm1188_vm15, %v1179_v60, %v1197_v43 }
 0x236   :  { %v2013_v50 = vadd.f32 %v11877_v48, %v2004_v33  ;;  %v2005_v29 = vadd.f32 %v1987_v46, %v1895_v7  ;;  %9289 = vmatmul.mubr.msk.bf16.vlgmr.msra.gmra.mrb[24].mxu0 %vm192_vm1, %v10808_v22  ;;  %9311 = vmatmul.mubr.msk.bf16.vlgmr.msra.gmra.mrb[24].mxu1 %vm192_vm1, %v15417_v47  ;;  %v1181_v22 = vadd.f32 %v11877_v48, %v11600_v9 }
 0x237   :  { %9331 = vmatpush3.bf16.msra.mxu0 %v10536_v14  ;;  %9353 = vmatpush3.bf16.msra.mxu1 %v10697_v56  ;;  %v12021_v9 = vsel %vm1189_vm3, %v1180_v11, %v1198_v61 }
 0x238   :  { %vm2022_vm0 = vcmp.gt.f32.partialorder %v2013_v50, 0.0  ;;  %v2031_v41 = vmul.f32 0.1, %v2013_v50  ;;  %v2014_v58 = vadd.f32 %v11877_v48, %v2005_v29  ;;  %9292 = vmatprep.mubr.msk.bf16.mxu0 %vm10450_vm2, %v15395_v19  ;;  %9314 = vmatprep.mubr.msk.bf16.mxu1 %vm10450_vm2, %v15395_v19  ;;  %vm1190_vm5 = vcmp.gt.f32.partialorder %v1181_v22, 0.0 }
 0x239   :  { %v1882_v2 = vpop.f32.mrb[176].mxu0  ;;  %v1992_v59 = vpop.f32.mrb[176].mxu1  ;;  %9374 = vmatprep.subr.bf16.mxu0 %v15395_v19  ;;  %9396 = vmatprep.subr.bf16.mxu1 %v15395_v19 }
 0x23a   :  { %v12016_v5 = vsel %vm2022_vm0, %v2013_v50, %v2031_v41  ;;  %vm2023_vm4 = vcmp.gt.f32.partialorder %v2014_v58, 0.0  ;;  %v2032_v37 = vmul.f32 0.1, %v2014_v58  ;;  %v1896_v53 = vadd.f32 %v1882_v2, %v11872_v3  ;;  %v9042_v46 = vpop.f32.mrb[177].mxu0  ;;  %v9064_v33 = vpop.f32.mrb[177].mxu1  ;;  %v15418_v2 = vld [vmem:[#allocation17_spill] sm:$0xff] }
 0x23b   :  { %v2049_v60 = vmax.f32 %v12010_v12, %v12016_v5  ;;  %v1885_v7 = vpop.f32.mrb[178].mxu0  ;;  %v1995_v1 = vpop.f32.mrb[178].mxu1  ;;  %v1199_v41 = vmul.f32 0.1, %v1181_v22 }
 0x23c   :  { %v12023_v43 = vsel %vm2023_vm4, %v2014_v58, %v2032_v37  ;;  %v2006_v29 = vadd.f32 %v1992_v59, %v1896_v53  ;;  %v9043_v47 = vpop.f32.mrb[179].mxu0  ;;  %v9065_v51 = vpop.f32.mrb[179].mxu1 }
 0x23d   :  { %v2050_v50 = vmax.f32 %v12021_v9, %v12023_v43  ;;  %v12036_v58 = vsel %vm1190_vm5, %v1181_v22, %v1199_v41  ;;  %v15419_v22 = vld [vmem:[#allocation20_spill] sm:$0xff]  ;;  %v10338_v43 = vld [vmem:[%s15243_s3 + $0x30] sm:$0xff]  }
 0x23e   :  { %v2015_v3 = vadd.f32 %v11877_v48, %v2006_v29  ;;  %9293 = vmatmul.mubr.msk.bf16.gmra.mrb[28].mxu0 %vm192_vm1, %v10854_v38  ;;  %9315 = vmatmul.mubr.msk.bf16.gmra.mrb[28].mxu1 %vm192_vm1, %v15418_v2 }
 0x23f   :  { %9296 = vmatprep.mubr.msk.bf16.mxu0 %vm10450_vm2, %v15395_v19  ;;  %9318 = vmatprep.mubr.msk.bf16.mxu1 %vm10450_vm2, %v15395_v19 }
 0x240   :  { %vm2024_vm6 = vcmp.gt.f32.partialorder %v2015_v3, 0.0  ;;  %v2033_v11 = vmul.f32 0.1, %v2015_v3 }
 0x241   :  { %v2086_v51 = vpop.f32.mrb[180].mxu0  ;;  %v2158_v61 = vpop.f32.mrb[180].mxu1 }
 0x242   :  { %v12038_v59 = vsel %vm2024_vm6, %v2015_v3, %v2033_v11  ;;  %v12040_v37 = vadd.f32 %v2158_v61, %v2086_v51  ;;  %v9070_v38 = vpop.f32.mrb[181].mxu0  ;;  %v9092_v53 = vpop.f32.mrb[181].mxu1 }
 0x243   :  { %v2051_v46 = vmax.f32 %v12036_v58, %v12038_v59  ;;  %v2089_v33 = vpop.f32.mrb[182].mxu0  ;;  %v2161_v7 = vpop.f32.mrb[182].mxu1  ;;  %v10339_v58 = vld [vmem:[%s15243_s3 + $0x38] sm:$0xff]  }
 0x244   :  { %v12044_v1 = vadd.f32 %v2161_v7, %v2089_v33  ;;  %v9071_v29 = vpop.f32.mrb[183].mxu0  ;;  %v9093_v47 = vpop.f32.mrb[183].mxu1  ;;  %v15420_v7 = vld [vmem:[#allocation23_spill] sm:$0xff] }
 0x246   :  { %9297 = vmatmul.mubr.msk.bf16.gmra.mrb[32].mxu0 %vm192_vm1, %v10878_v45  ;;  %9319 = vmatmul.mubr.msk.bf16.gmra.mrb[32].mxu1 %vm192_vm1, %v15419_v22 }
 0x247   :  { %9300 = vmatprep.mubr.msk.bf16.mxu0 %vm10450_vm2, %v15395_v19  ;;  %9322 = vmatprep.mubr.msk.bf16.mxu1 %vm10450_vm2, %v15395_v19 }
 0x249   :  { %v2094_v41 = vpop.f32.mrb[184].mxu0  ;;  %v2166_v3 = vpop.f32.mrb[184].mxu1 }
 0x24a   :  { %v12054_v2 = vadd.f32 %v2166_v3, %v2094_v41  ;;  %v9074_v11 = vpop.f32.mrb[185].mxu0  ;;  %v9096_v51 = vpop.f32.mrb[185].mxu1 }
 0x24b   :  { %v2097_v61 = vpop.f32.mrb[186].mxu0  ;;  %v2169_v38 = vpop.f32.mrb[186].mxu1 }
 0x24c   :  { %v12056_v53 = vadd.f32 %v2169_v38, %v2097_v61  ;;  %v9075_v45 = vpop.f32.mrb[187].mxu0  ;;  %v9097_v33 = vpop.f32.mrb[187].mxu1 }
 0x24d   :  { %v15421_v45 = vld [vmem:[#allocation25_spill] sm:$0xff] }
 0x24e   :  { %9301 = vmatmul.mubr.msk.bf16.gmra.mrb[36].mxu0 %vm192_vm1, %v10902_v52  ;;  %9323 = vmatmul.mubr.msk.bf16.gmra.mrb[36].mxu1 %vm192_vm1, %v15420_v7 }
 0x24f   :  { %9304 = vmatprep.mubr.msk.bf16.mxu0 %vm10450_vm2, %v15395_v19  ;;  %9326 = vmatprep.mubr.msk.bf16.mxu1 %vm10450_vm2, %v15395_v19 }
 0x251   :  { %v2102_v29 = vpop.f32.mrb[188].mxu0  ;;  %v2174_v47 = vpop.f32.mrb[188].mxu1 }
 0x252   :  { %v12066_v22 = vadd.f32 %v2174_v47, %v2102_v29  ;;  %v9078_v41 = vpop.f32.mrb[189].mxu0  ;;  %v9100_v3 = vpop.f32.mrb[189].mxu1 }
 0x253   :  { %v2105_v11 = vpop.f32.mrb[190].mxu0  ;;  %v2177_v51 = vpop.f32.mrb[190].mxu1 }
 0x254   :  { %v12068_v61 = vadd.f32 %v2177_v51, %v2105_v11  ;;  %v9079_v52 = vpop.f32.mrb[191].mxu0  ;;  %v9101_v38 = vpop.f32.mrb[191].mxu1 }
 0x256   :  { %9305 = vmatmul.mubr.msk.bf16.gmra.mrb[40].mxu0 %vm192_vm1, %v10920_v62  ;;  %9327 = vmatmul.mubr.msk.bf16.gmra.mrb[40].mxu1 %vm192_vm1, %v15421_v45 }
 0x257   :  { %9332 = vmatprep.mubr.msk.bf16.mxu0 %vm10450_vm2, %v15395_v19  ;;  %9354 = vmatprep.mubr.msk.bf16.mxu1 %vm10450_vm2, %v15395_v19 }
 0x259   :  { %v2110_v33 = vpop.f32.mrb[192].mxu0  ;;  %v2182_v7 = vpop.f32.mrb[192].mxu1 }
 0x25a   :  { %v12078_v29 = vadd.f32 %v2182_v7, %v2110_v33  ;;  %v9082_v47 = vpop.f32.mrb[193].mxu0  ;;  %v9104_v41 = vpop.f32.mrb[193].mxu1 }
 0x25b   :  { %v2113_v3 = vpop.f32.mrb[194].mxu0  ;;  %v2185_v11 = vpop.f32.mrb[194].mxu1 }
 0x25c   :  { %v12080_v51 = vadd.f32 %v2185_v11, %v2113_v3  ;;  %v9083_v62 = vpop.f32.mrb[195].mxu0  ;;  %v9105_v52 = vpop.f32.mrb[195].mxu1 }
 0x25e   :  { %9333 = vmatmul.mubr.msk.bf16.vlgmr.msra.gmra.mrb[44].mxu0 %vm192_vm1, %v10942_v10  ;;  %9355 = vmatmul.mubr.msk.bf16.vlgmr.msra.gmra.mrb[44].mxu1 %vm192_vm1, %v11044_v49 }
 0x25f   :  { %9375 = vmatpush3.bf16.msra.mxu0 %v10700_v57  ;;  %9397 = vmatpush3.bf16.msra.mxu1 %v10823_v27 }
 0x260   :  { %9336 = vmatprep.mubr.msk.bf16.mxu0 %vm10450_vm2, %v15395_v19  ;;  %9358 = vmatprep.mubr.msk.bf16.mxu1 %vm10450_vm2, %v15395_v19 }
 0x261   :  { %v2118_v38 = vpop.f32.mrb[196].mxu0  ;;  %v2190_v45 = vpop.f32.mrb[196].mxu1  ;;  %9418 = vmatprep.subr.bf16.mxu0 %v15395_v19  ;;  %9440 = vmatprep.subr.bf16.mxu1 %v15395_v19 }
 0x262   :  { %v12094_v10 = vadd.f32 %v2190_v45, %v2118_v38  ;;  %v9086_v33 = vpop.f32.mrb[197].mxu0  ;;  %v9108_v49 = vpop.f32.mrb[197].mxu1 }
 0x263   :  { %v2121_v7 = vpop.f32.mrb[198].mxu0  ;;  %v2193_v47 = vpop.f32.mrb[198].mxu1 }
 0x264   :  { %v9087_v41 = vpop.f32.mrb[199].mxu0  ;;  %v9109_v3 = vpop.f32.mrb[199].mxu1 }
 0x266   :  { %9337 = vmatmul.mubr.msk.bf16.gmra.mrb[48].mxu0 %vm192_vm1, %v10966_v17  ;;  %9359 = vmatmul.mubr.msk.bf16.gmra.mrb[48].mxu1 %vm192_vm1, %v11064_v54 }
 0x267   :  { %9340 = vmatprep.mubr.msk.bf16.mxu0 %vm10450_vm2, %v15395_v19  ;;  %9362 = vmatprep.mubr.msk.bf16.mxu1 %vm10450_vm2, %v15395_v19 }
 0x269   :  { %v2230_v11 = vpop.f32.mrb[200].mxu0  ;;  %v2311_v62 = vpop.f32.mrb[200].mxu1 }
 0x26a   :  { %v2268_v52 = vadd.f32 %v2230_v11, %v12040_v37  ;;  %v9114_v38 = vpop.f32.mrb[201].mxu0  ;;  %v9136_v45 = vpop.f32.mrb[201].mxu1 }
 0x26b   :  { %v2233_v33 = vpop.f32.mrb[202].mxu0  ;;  %v2314_v49 = vpop.f32.mrb[202].mxu1 }
 0x26c   :  { %v12105_v7 = vadd.f32 %v2311_v62, %v2268_v52  ;;  %v2269_v17 = vadd.f32 %v2233_v33, %v12044_v1  ;;  %v9115_v47 = vpop.f32.mrb[203].mxu0  ;;  %v9137_v54 = vpop.f32.mrb[203].mxu1 }
 0x26e   :  { %v12108_v41 = vadd.f32 %v2314_v49, %v2269_v17  ;;  %9341 = vmatmul.mubr.msk.bf16.gmra.mrb[52].mxu0 %vm192_vm1, %v10988_v21  ;;  %9363 = vmatmul.mubr.msk.bf16.gmra.mrb[52].mxu1 %vm192_vm1, %v11080_v6 }
 0x26f   :  { %9344 = vmatprep.mubr.msk.bf16.mxu0 %vm10450_vm2, %v15395_v19  ;;  %9366 = vmatprep.mubr.msk.bf16.mxu1 %vm10450_vm2, %v15395_v19 }
 0x271   :  { %v2238_v37 = vpop.f32.mrb[204].mxu0  ;;  %v2319_v3 = vpop.f32.mrb[204].mxu1 }
 0x272   :  { %v2270_v1 = vadd.f32 %v2238_v37, %v12054_v2  ;;  %v9118_v11 = vpop.f32.mrb[205].mxu0  ;;  %v9140_v62 = vpop.f32.mrb[205].mxu1 }
 0x273   :  { %v2241_v52 = vpop.f32.mrb[206].mxu0  ;;  %v2322_v38 = vpop.f32.mrb[206].mxu1 }
 0x274   :  { %v12119_v45 = vadd.f32 %v2319_v3, %v2270_v1  ;;  %v2271_v21 = vadd.f32 %v2241_v52, %v12056_v53  ;;  %v9119_v33 = vpop.f32.mrb[207].mxu0  ;;  %v9141_v6 = vpop.f32.mrb[207].mxu1 }
 0x276   :  { %v12122_v49 = vadd.f32 %v2322_v38, %v2271_v21  ;;  %9345 = vmatmul.mubr.msk.bf16.gmra.mrb[56].mxu0 %vm192_vm1, %v11010_v34  ;;  %9367 = vmatmul.mubr.msk.bf16.gmra.mrb[56].mxu1 %vm192_vm1, %v11096_v40 }
 0x277   :  { %9348 = vmatprep.mubr.msk.bf16.mxu0 %vm10450_vm2, %v15395_v19  ;;  %9370 = vmatprep.mubr.msk.bf16.mxu1 %vm10450_vm2, %v15395_v19 }
 0x279   :  { %v2246_v2 = vpop.f32.mrb[208].mxu0  ;;  %v2327_v17 = vpop.f32.mrb[208].mxu1 }
 0x27a   :  { %v2272_v53 = vadd.f32 %v2246_v2, %v12066_v22  ;;  %v9122_v47 = vpop.f32.mrb[209].mxu0  ;;  %v9144_v54 = vpop.f32.mrb[209].mxu1 }
 0x27b   :  { %v2249_v37 = vpop.f32.mrb[210].mxu0  ;;  %v2330_v3 = vpop.f32.mrb[210].mxu1  ;;  %v15422_v47 = vld [vmem:[#allocation26_spill] sm:$0xff]  ;;  %v15423_v54 = vld [vmem:[#allocation12_spill] sm:$0xff] }
 0x27c   :  { %v12133_v1 = vadd.f32 %v2327_v17, %v2272_v53  ;;  %v2273_v34 = vadd.f32 %v2249_v37, %v12068_v61  ;;  %v9123_v11 = vpop.f32.mrb[211].mxu0  ;;  %v9145_v40 = vpop.f32.mrb[211].mxu1 }
 0x27e   :  { %v12136_v62 = vadd.f32 %v2330_v3, %v2273_v34  ;;  %9349 = vmatmul.mubr.msk.bf16.gmra.mrb[60].mxu0 %vm192_vm1, %v11028_v42  ;;  %9371 = vmatmul.mubr.msk.bf16.gmra.mrb[60].mxu1 %vm192_vm1, %v11109_v44 }
 0x27f   :  { %9376 = vmatprep.mubr.msk.bf16.mxu0 %vm10450_vm2, %v15395_v19  ;;  %9398 = vmatprep.mubr.msk.bf16.mxu1 %vm10450_vm2, %v15395_v19 }
 0x281   :  { %v2254_v22 = vpop.f32.mrb[212].mxu0  ;;  %v2335_v52 = vpop.f32.mrb[212].mxu1 }
 0x282   :  { %v2274_v61 = vadd.f32 %v2254_v22, %v12078_v29  ;;  %v9126_v38 = vpop.f32.mrb[213].mxu0  ;;  %v9148_v21 = vpop.f32.mrb[213].mxu1  ;;  %v15424_v29 = vld [vmem:[#allocation13_spill] sm:$0xff] }
 0x283   :  { %v2257_v33 = vpop.f32.mrb[214].mxu0  ;;  %v2338_v6 = vpop.f32.mrb[214].mxu1  ;;  %v15425_v38 = vld [vmem:[#allocation27_spill] sm:$0xff] }
 0x284   :  { %v12147_v2 = vadd.f32 %v2335_v52, %v2274_v61  ;;  %v2275_v42 = vadd.f32 %v2257_v33, %v12080_v51  ;;  %v9127_v17 = vpop.f32.mrb[215].mxu0  ;;  %v9149_v44 = vpop.f32.mrb[215].mxu1  ;;  %v15426_v21 = vld [vmem:[#allocation15_spill] sm:$0xff] }
 0x286   :  { %v12150_v53 = vadd.f32 %v2338_v6, %v2275_v42  ;;  %9377 = vmatmul.mubr.msk.bf16.vlgmr.msra.gmra.mrb[64].mxu0 %vm192_vm1, %v15422_v47  ;;  %9399 = vmatmul.mubr.msk.bf16.vlgmr.msra.gmra.mrb[64].mxu1 %vm192_vm1, %v11732_v36 }
 0x287   :  { %9419 = vmatpush3.bf16.msra.mxu0 %v15423_v54  ;;  %9441 = vmatpush3.bf16.msra.mxu1 %v15424_v29 }
 0x288   :  { %9380 = vmatprep.mubr.msk.bf16.mxu0 %vm10450_vm2, %v15395_v19  ;;  %9402 = vmatprep.mubr.msk.bf16.mxu1 %vm10450_vm2, %v15395_v19 }
 0x289   :  { %v2262_v51 = vpop.f32.mrb[216].mxu0  ;;  %v2343_v37 = vpop.f32.mrb[216].mxu1  ;;  %9462 = vmatprep.subr.bf16.mxu0 %v15395_v19  ;;  %9498 = vmatprep.subr.bf16.mxu1 %v15395_v19 }
 0x28a   :  { %v2276_v3 = vadd.f32 %v2262_v51, %v12094_v10  ;;  %v9130_v34 = vpop.f32.mrb[217].mxu0  ;;  %v9152_v36 = vpop.f32.mrb[217].mxu1 }
 0x28b   :  { %v2265_v11 = vpop.f32.mrb[218].mxu0  ;;  %v2346_v40 = vpop.f32.mrb[218].mxu1 }
 0x28c   :  { %v12165_v22 = vadd.f32 %v2343_v37, %v2276_v3  ;;  %v9131_v52 = vpop.f32.mrb[219].mxu0  ;;  %v9153_v61 = vpop.f32.mrb[219].mxu1  ;;  %v15427_v11 = vld [vmem:[#allocation28_spill] sm:$0xff] }
 0x28d   :  { %v15428_v40 = vld [vmem:[#allocation16_spill] sm:$0xff] }
 0x28e   :  { %9381 = vmatmul.mubr.msk.bf16.gmra.mrb[68].mxu0 %vm192_vm1, %v15425_v38  ;;  %9403 = vmatmul.mubr.msk.bf16.gmra.mrb[68].mxu1 %vm192_vm1, %v15426_v21 }
 0x28f   :  { %9384 = vmatprep.mubr.msk.bf16.mxu0 %vm10450_vm2, %v15395_v19  ;;  %9406 = vmatprep.mubr.msk.bf16.mxu1 %vm10450_vm2, %v15395_v19 }
 0x291   :  { %v2392_v10 = vpop.f32.mrb[220].mxu0  ;;  %v2473_v33 = vpop.f32.mrb[220].mxu1 }
 0x292   :  { %v2430_v6 = vadd.f32 %v2392_v10, %v12105_v7  ;;  %v9158_v42 = vpop.f32.mrb[221].mxu0  ;;  %v9180_v17 = vpop.f32.mrb[221].mxu1 }
 0x293   :  { %v2395_v44 = vpop.f32.mrb[222].mxu0  ;;  %v2476_v47 = vpop.f32.mrb[222].mxu1 }
 0x294   :  { %v12176_v51 = vadd.f32 %v2473_v33, %v2430_v6  ;;  %v2431_v37 = vadd.f32 %v2395_v44, %v12108_v41  ;;  %v9159_v3 = vpop.f32.mrb[223].mxu0  ;;  %v9181_v34 = vpop.f32.mrb[223].mxu1 }
 0x296   :  { %v12179_v36 = vadd.f32 %v2476_v47, %v2431_v37  ;;  %9385 = vmatmul.mubr.msk.bf16.gmra.mrb[72].mxu0 %vm192_vm1, %v15427_v11  ;;  %9407 = vmatmul.mubr.msk.bf16.gmra.mrb[72].mxu1 %vm192_vm1, %v15428_v40  ;;  %v15429_v47 = vld [vmem:[#allocation29_spill] sm:$0xff] }
 0x297   :  { %9388 = vmatprep.mubr.msk.bf16.mxu0 %vm10450_vm2, %v15395_v19  ;;  %9410 = vmatprep.mubr.msk.bf16.mxu1 %vm10450_vm2, %v15395_v19 }
 0x299   :  { %v2400_v7 = vpop.f32.mrb[224].mxu0  ;;  %v2481_v52 = vpop.f32.mrb[224].mxu1 }
 0x29a   :  { %v2432_v41 = vadd.f32 %v2400_v7, %v12119_v45  ;;  %v9162_v61 = vpop.f32.mrb[225].mxu0  ;;  %v9184_v38 = vpop.f32.mrb[225].mxu1 }
 0x29b   :  { %v2403_v21 = vpop.f32.mrb[226].mxu0  ;;  %v2484_v10 = vpop.f32.mrb[226].mxu1  ;;  %v15430_v38 = vld [vmem:[#allocation30_spill] sm:$0xff] }
 0x29c   :  { %v12190_v33 = vadd.f32 %v2481_v52, %v2432_v41  ;;  %v2433_v6 = vadd.f32 %v2403_v21, %v12122_v49  ;;  %v9163_v42 = vpop.f32.mrb[227].mxu0  ;;  %v9185_v17 = vpop.f32.mrb[227].mxu1 }
 0x29e   :  { %v12193_v44 = vadd.f32 %v2484_v10, %v2433_v6  ;;  %9389 = vmatmul.mubr.msk.bf16.gmra.mrb[76].mxu0 %vm192_vm1, %v15429_v47  ;;  %9411 = vmatmul.mubr.msk.bf16.gmra.mrb[76].mxu1 %vm192_vm1, %v11802_v18 }
 0x29f   :  { %9392 = vmatprep.mubr.msk.bf16.mxu0 %vm10450_vm2, %v15395_v19  ;;  %9414 = vmatprep.mubr.msk.bf16.mxu1 %vm10450_vm2, %v15395_v19 }
 0x2a1   :  { %v2408_v45 = vpop.f32.mrb[228].mxu0  ;;  %v2489_v37 = vpop.f32.mrb[228].mxu1 }
 0x2a2   :  { %v2434_v49 = vadd.f32 %v2408_v45, %v12133_v1  ;;  %v9166_v3 = vpop.f32.mrb[229].mxu0  ;;  %v9188_v34 = vpop.f32.mrb[229].mxu1  ;;  %v7864_v1 = vld [vmem:[%s15240_s0 + $0x112] sm:$0xff] }
 0x2a3   :  { %v2411_v11 = vpop.f32.mrb[230].mxu0  ;;  %v2492_v40 = vpop.f32.mrb[230].mxu1 }
 0x2a4   :  { %v12204_v7 = vadd.f32 %v2489_v37, %v2434_v49  ;;  %v2435_v52 = vadd.f32 %v2411_v11, %v12136_v62  ;;  %v9167_v41 = vpop.f32.mrb[231].mxu0  ;;  %v9189_v18 = vpop.f32.mrb[231].mxu1  ;;  %v7865_v62 = vld [vmem:[%s15240_s0 + $0x11a] sm:$0xff] }
 0x2a5   :  { %v3534_v17 = vpack.c.bf16 %v7865_v62, %v7864_v1 }
 0x2a6   :  { %v12207_v61 = vadd.f32 %v2492_v40, %v2435_v52  ;;  %9393 = vmatmul.mubr.msk.bf16.gmra.mrb[80].mxu0 %vm192_vm1, %v15430_v38  ;;  %9415 = vmatmul.mubr.msk.bf16.gmra.mrb[80].mxu1 %vm192_vm1, %v11823_v13  ;;  %v15431_v40 = vld [vmem:[#allocation5_spill] sm:$0xff] }
 0x2a7   :  { %9420 = vmatprep.mubr.msk.bf16.mxu0 %vm10450_vm2, %v15395_v19  ;;  %9442 = vmatprep.mubr.msk.bf16.mxu1 %vm10450_vm2, %v15395_v19 }
 0x2a9   :  { %v2416_v21 = vpop.f32.mrb[232].mxu0  ;;  %v2497_v10 = vpop.f32.mrb[232].mxu1 }
 0x2aa   :  { %v2436_v6 = vadd.f32 %v2416_v21, %v12147_v2  ;;  %v9170_v42 = vpop.f32.mrb[233].mxu0  ;;  %v9192_v13 = vpop.f32.mrb[233].mxu1  ;;  %v7866_v2 = vld [vmem:[%s15240_s0 + $0x122] sm:$0xff] }
 0x2ab   :  { %v2419_v47 = vpop.f32.mrb[234].mxu0  ;;  %v2500_v45 = vpop.f32.mrb[234].mxu1  ;;  %v15432_v13 = vld [vmem:[#allocation18_spill] sm:$0xff] }
 0x2ac   :  { %v12224_v37 = vadd.f32 %v2497_v10, %v2436_v6  ;;  %v2437_v49 = vadd.f32 %v2419_v47, %v12150_v53  ;;  %v9171_v3 = vpop.f32.mrb[235].mxu0  ;;  %v9193_v34 = vpop.f32.mrb[235].mxu1  ;;  %v7867_v53 = vld [vmem:[%s15240_s0 + $0x12a] sm:$0xff] }
 0x2ad   :  { %v3535_v1 = vpack.c.bf16 %v7867_v53, %v7866_v2 }
 0x2ae   :  { %v12227_v11 = vadd.f32 %v2500_v45, %v2437_v49  ;;  %9421 = vmatmul.mubr.msk.bf16.vlgmr.msra.gmra.mrb[84].mxu0 %vm192_vm1, %v11844_v24  ;;  %9443 = vmatmul.mubr.msk.bf16.vlgmr.msra.gmra.mrb[84].mxu1 %vm192_vm1, %v3534_v17  ;;  %v7869_v17 = vld [vmem:[%s15240_s0 + $0x13a] sm:$0xff] }
 0x2af   :  { %9424 = vmatprep.mubr.msk.bf16.mxu0 %vm10450_vm2, %v15395_v19  ;;  %9446 = vmatprep.mubr.msk.bf16.mxu1 %vm10450_vm2, %v15395_v19 }
 0x2b0   :  { %9499 = vmatpush3.bf16.msra.mxu1 %v15431_v40 }
 0x2b1   :  { %v2424_v52 = vpop.f32.mrb[236].mxu0  ;;  %v2505_v24 = vpop.f32.mrb[236].mxu1  ;;  %9542 = vmatprep.subr.bf16.mxu1 %v15395_v19 }
 0x2b2   :  { %v2438_v41 = vadd.f32 %v2424_v52, %v12165_v22  ;;  %v9174_v18 = vpop.f32.mrb[237].mxu0  ;;  %v9196_v38 = vpop.f32.mrb[237].mxu1  ;;  %v7868_v22 = vld [vmem:[%s15240_s0 + $0x132] sm:$0xff] }
 0x2b3   :  { %v2427_v62 = vpop.f32.mrb[238].mxu0  ;;  %v2508_v21 = vpop.f32.mrb[238].mxu1  ;;  %v3536_v2 = vpack.c.bf16 %v7869_v17, %v7868_v22 }
 0x2b4   :  { %v12245_v10 = vadd.f32 %v2505_v24, %v2438_v41  ;;  %v9175_v6 = vpop.f32.mrb[239].mxu0  ;;  %v9197_v42 = vpop.f32.mrb[239].mxu1 }
 0x2b6   :  { %9425 = vmatmul.mubr.msk.bf16.gmra.mrb[88].mxu0 %vm192_vm1, %v15432_v13  ;;  %9447 = vmatmul.mubr.msk.bf16.gmra.mrb[88].mxu1 %vm192_vm1, %v3535_v1 }
 0x2b7   :  { %9428 = vmatprep.mubr.msk.bf16.mxu0 %vm10450_vm2, %v15395_v19  ;;  %9450 = vmatprep.mubr.msk.bf16.mxu1 %vm10450_vm2, %v15395_v19 }
 0x2b9   :  { %v2583_v47 = vpop.f32.mrb[240].mxu0  ;;  %v2693_v45 = vpop.f32.mrb[240].mxu1 }
 0x2ba   :  { %v2621_v49 = vadd.f32 %v2583_v47, %v12176_v51  ;;  %v9202_v3 = vpop.f32.mrb[241].mxu0  ;;  %v9224_v34 = vpop.f32.mrb[241].mxu1  ;;  %v7870_v51 = vld [vmem:[%s15240_s0 + $0x142] sm:$0xff] }
 0x2bb   :  { %v2586_v53 = vpop.f32.mrb[242].mxu0  ;;  %v2696_v52 = vpop.f32.mrb[242].mxu1 }
 0x2bc   :  { %v12261_v24 = vadd.f32 %v2693_v45, %v2621_v49  ;;  %v2622_v41 = vadd.f32 %v2586_v53, %v12179_v36  ;;  %v9203_v18 = vpop.f32.mrb[243].mxu0  ;;  %v9225_v38 = vpop.f32.mrb[243].mxu1  ;;  %v7871_v36 = vld [vmem:[%s15240_s0 + $0x14a] sm:$0xff] }
 0x2bd   :  { %v3537_v13 = vpack.c.bf16 %v7871_v36, %v7870_v51 }
 0x2be   :  { %v12264_v1 = vadd.f32 %v2696_v52, %v2622_v41  ;;  %9429 = vmatmul.mubr.msk.bf16.gmra.mrb[92].mxu0 %vm192_vm1, %v11896_v35  ;;  %9451 = vmatmul.mubr.msk.bf16.gmra.mrb[92].mxu1 %vm192_vm1, %v3536_v2 }
 0x2bf   :  { %9432 = vmatprep.mubr.msk.bf16.mxu0 %vm10450_vm2, %v15395_v19  ;;  %9454 = vmatprep.mubr.msk.bf16.mxu1 %vm10450_vm2, %v15395_v19 }
 0x2c1   :  { %v2591_v62 = vpop.f32.mrb[244].mxu0  ;;  %v2701_v21 = vpop.f32.mrb[244].mxu1 }
 0x2c2   :  { %v2623_v35 = vadd.f32 %v2591_v62, %v12190_v33  ;;  %v9206_v6 = vpop.f32.mrb[245].mxu0  ;;  %v9228_v42 = vpop.f32.mrb[245].mxu1  ;;  %v7872_v33 = vld [vmem:[%s15240_s0 + $0x152] sm:$0xff] }
 0x2c3   :  { %v2594_v22 = vpop.f32.mrb[246].mxu0  ;;  %v2704_v17 = vpop.f32.mrb[246].mxu1  ;;  %v3538_v18 = vpack.c.bf16 %v7872_v33, %v7872_v33 }
 0x2c4   :  { %v12280_v47 = vadd.f32 %v2701_v21, %v2623_v35  ;;  %v2624_v45 = vadd.f32 %v2594_v22, %v12193_v44  ;;  %v9207_v49 = vpop.f32.mrb[247].mxu0  ;;  %v9229_v3 = vpop.f32.mrb[247].mxu1 }
 0x2c6   :  { %v12283_v34 = vadd.f32 %v2704_v17, %v2624_v45  ;;  %9433 = vmatmul.mubr.msk.bf16.gmra.mrb[96].mxu0 %vm192_vm1, %v11921_v39  ;;  %9455 = vmatmul.mubr.msk.bf16.gmra.mrb[96].mxu1 %vm192_vm1, %v3537_v13 }
 0x2c7   :  { %9436 = vmatprep.mubr.msk.bf16.mxu0 %vm10450_vm2, %v15395_v19  ;;  %9458 = vmatprep.mubr.msk.bf16.mxu1 %vm10450_vm2, %v15395_v19 }
 0x2c9   :  { %v2599_v44 = vpop.f32.mrb[248].mxu0  ;;  %v2709_v2 = vpop.f32.mrb[248].mxu1 }
 0x2ca   :  { %v2625_v53 = vadd.f32 %v2599_v44, %v12204_v7  ;;  %v9210_v52 = vpop.f32.mrb[249].mxu0  ;;  %v9232_v41 = vpop.f32.mrb[249].mxu1 }
 0x2cb   :  { %v2602_v39 = vpop.f32.mrb[250].mxu0  ;;  %v2712_v38 = vpop.f32.mrb[250].mxu1 }
 0x2cc   :  { %v12296_v51 = vadd.f32 %v2709_v2, %v2625_v53  ;;  %v2626_v36 = vadd.f32 %v2602_v39, %v12207_v61  ;;  %v9211_v62 = vpop.f32.mrb[251].mxu0  ;;  %v9233_v21 = vpop.f32.mrb[251].mxu1 }
 0x2ce   :  { %v12299_v35 = vadd.f32 %v2712_v38, %v2626_v36  ;;  %9437 = vmatmul.mubr.msk.bf16.gmra.mrb[100].mxu0 %vm192_vm1, %v11954_v30  ;;  %9459 = vmatmul.mubr.msk.bf16.gmra.mrb[100].mxu1 %vm192_vm1, %v3538_v18 }
 0x2cf   :  { %9478 = vmatprep.mubr.msk.bf16.mxu0 %vm10450_vm2, %v15395_v19  ;;  %9500 = vmatprep.mubr.msk.bf16.mxu1 %vm10450_vm2, %v15395_v19 }
 0x2d1   :  { %v2607_v7 = vpop.f32.mrb[252].mxu0  ;;  %v2717_v6 = vpop.f32.mrb[252].mxu1 }
 0x2d2   :  { %v2627_v42 = vadd.f32 %v2607_v7, %v12224_v37  ;;  %v9214_v61 = vpop.f32.mrb[253].mxu0  ;;  %v9236_v13 = vpop.f32.mrb[253].mxu1 }
 0x2d3   :  { %v2610_v22 = vpop.f32.mrb[254].mxu0  ;;  %v2720_v17 = vpop.f32.mrb[254].mxu1 }
 0x2d4   :  { %v12309_v45 = vadd.f32 %v2717_v6, %v2627_v42  ;;  %v2628_v30 = vadd.f32 %v2610_v22, %v12227_v11  ;;  %v9215_v49 = vpop.f32.mrb[255].mxu0  ;;  %v9237_v3 = vpop.f32.mrb[255].mxu1 }
 0x2d6   :  { %v12312_v33 = vadd.f32 %v2720_v17, %v2628_v30 }
 0x2d9   :  { %v2615_v44 = vpop.f32.mrb[0].mxu0  ;;  %v2725_v2 = vpop.f32.mrb[0].mxu1 }
 0x2da   :  { %v2629_v53 = vadd.f32 %v2615_v44, %v12245_v10  ;;  %v9218_v52 = vpop.f32.mrb[1].mxu0  ;;  %v9240_v41 = vpop.f32.mrb[1].mxu1 }
 0x2db   :  { %v2618_v18 = vpop.f32.mrb[2].mxu0  ;;  %v2728_v37 = vpop.f32.mrb[2].mxu1 }
 0x2dc   :  { %v12315_v39 = vadd.f32 %v2725_v2, %v2629_v53  ;;  %v9219_v38 = vpop.f32.mrb[3].mxu0  ;;  %v9241_v36 = vpop.f32.mrb[3].mxu1 }
 0x2dd   :  { %v15434_v38 = vmax.f32 %v11926_v16, %v11932_v20  ;;  %v10332_v16 = vld [vmem:[%s15243_s3] sm:$0xff]  }
 0x2de   :  { %9463 = vmatpush3.bf16.msra.mxu0 %v10332_v16 }
 0x2df   :  { %9464 = vmatprep.subr.bf16.mxu0 %v15395_v19 }
 0x2e1   :  { %v2803_v62 = vpop.f32.mrb[4].mxu0  ;;  %v12317_v21 = vpop.f32.mrb[4].mxu1 }
 0x2e2   :  { %v2841_v11 = vadd.f32 %v2803_v62, %v12261_v24  ;;  %v9246_v7 = vpop.f32.mrb[5].mxu0  ;;  %v9268_v6 = vpop.f32.mrb[5].mxu1  ;;  %v15433_v24 = vmax.f32 %v11917_v0, %v11923_v25  ;;  %v12343_v0 = vld [vmem:[%s15242_s2] ss:$0 sm:$0xff] }
 0x2e3   :  { %v2806_v42 = vpop.f32.mrb[6].mxu0  ;;  %v12320_v61 = vpop.f32.mrb[6].mxu1 }
 0x2e4   :  { %v2850_v10 = vadd.f32 %v11877_v48, %v2841_v11  ;;  %v2842_v13 = vadd.f32 %v2806_v42, %v12264_v1  ;;  %v9247_v22 = vpop.f32.mrb[7].mxu0  ;;  %v9269_v17 = vpop.f32.mrb[7].mxu1  ;;  %v10333_v42 = vld [vmem:[%s15243_s3 + $0x8] sm:$0xff]  }
 0x2e5   :  { %9465 = vmatpush3.bf16.msra.mxu0 %v10333_v42 }
 0x2e6   :  { %vm2859_vm7 = vcmp.gt.f32.partialorder %v2850_v10, 0.0  ;;  %v2868_v30 = vmul.f32 0.1, %v2850_v10  ;;  %v2851_v49 = vadd.f32 %v11877_v48, %v2842_v13  ;;  %9466 = vmatprep.subr.bf16.mxu0 %v15395_v19 }
 0x2e8   :  { %v2877_v3 = vsel %vm2859_vm7, %v2850_v10, %v2868_v30  ;;  %vm2860_vm8 = vcmp.gt.f32.partialorder %v2851_v49, 0.0  ;;  %v2869_v44 = vmul.f32 0.1, %v2851_v49 }
 0x2e9   :  { %v12328_v2 = vmax.f32 %v15433_v24, %v2877_v3  ;;  %v2811_v53 = vpop.f32.mrb[8].mxu0  ;;  %v12330_v52 = vpop.f32.mrb[8].mxu1  ;;  %v15435_v24 = vmax.f32 %v11963_v32, %v11965_v26  ;;  %v10334_v32 = vld [vmem:[%s15243_s3 + $0x10] sm:$0xff]  }
 0x2ea   :  { %v2878_v41 = vsel %vm2860_vm8, %v2851_v49, %v2869_v44  ;;  %v2843_v1 = vadd.f32 %v2811_v53, %v12280_v47  ;;  %v9250_v18 = vpop.f32.mrb[9].mxu0  ;;  %v9272_v37 = vpop.f32.mrb[9].mxu1  ;;  %9467 = vmatpush3.bf16.msra.mxu0 %v10334_v32 }
 0x2eb   :  { %v12336_v48 = vmax.f32 %v15434_v38, %v2878_v41  ;;  %v2814_v36 = vpop.f32.mrb[10].mxu0  ;;  %v12338_v62 = vpop.f32.mrb[10].mxu1  ;;  %9468 = vmatprep.subr.bf16.mxu0 %v15395_v19 }
 0x2ec   :  { %v2852_v25 = vadd.f32 %v12343_v0, %v2843_v1  ;;  %v2844_v11 = vadd.f32 %v2814_v36, %v12283_v34  ;;  %v9251_v47 = vpop.f32.mrb[11].mxu0  ;;  %v9273_v7 = vpop.f32.mrb[11].mxu1 }
 0x2ee   :  { %vm2861_vm9 = vcmp.gt.f32.partialorder %v2852_v25, 0.0  ;;  %v2870_v20 = vmul.f32 0.1, %v2852_v25  ;;  %v2853_v6 = vadd.f32 %v12343_v0, %v2844_v11 }
 0x2f0   :  { %v2879_v10 = vsel %vm2861_vm9, %v2852_v25, %v2870_v20  ;;  %vm2862_vm10 = vcmp.gt.f32.partialorder %v2853_v6, 0.0  ;;  %v2871_v34 = vmul.f32 0.1, %v2853_v6  ;;  %v15436_v20 = vmax.f32 %v11987_v8, %v11993_v31  ;;  %v10336_v8 = vld [vmem:[%s15243_s3 + $0x20] sm:$0xff]  }
 0x2f1   :  { %v12358_v13 = vmax.f32 %v2045_v55, %v2879_v10  ;;  %v2819_v22 = vpop.f32.mrb[12].mxu0  ;;  %v12360_v17 = vpop.f32.mrb[12].mxu1 }
 0x2f2   :  { %v2880_v30 = vsel %vm2862_vm10, %v2853_v6, %v2871_v34  ;;  %v2845_v49 = vadd.f32 %v2819_v22, %v12296_v51  ;;  %v9254_v3 = vpop.f32.mrb[13].mxu0  ;;  %v9276_v44 = vpop.f32.mrb[13].mxu1 }
 0x2f3   :  { %v12366_v53 = vmax.f32 %v15435_v24, %v2880_v30  ;;  %v2822_v41 = vpop.f32.mrb[14].mxu0  ;;  %v12368_v1 = vpop.f32.mrb[14].mxu1 }
 0x2f4   :  { %v2854_v23 = vadd.f32 %v12343_v0, %v2845_v49  ;;  %v2846_v15 = vadd.f32 %v2822_v41, %v12299_v35  ;;  %v9255_v55 = vpop.f32.mrb[15].mxu0  ;;  %v9277_v18 = vpop.f32.mrb[15].mxu1 }
 0x2f6   :  { %vm2863_vm11 = vcmp.gt.f32.partialorder %v2854_v23, 0.0  ;;  %v2872_v51 = vmul.f32 0.1, %v2854_v23  ;;  %v2855_v37 = vadd.f32 %v12343_v0, %v2846_v15 }
 0x2f8   :  { %v2881_v26 = vsel %vm2863_vm11, %v2854_v23, %v2872_v51  ;;  %vm2864_vm12 = vcmp.gt.f32.partialorder %v2855_v37, 0.0  ;;  %v2873_v38 = vmul.f32 0.1, %v2855_v37 }
 0x2f9   :  { %v12380_v36 = vmax.f32 %v2047_v4, %v2881_v26  ;;  %v2827_v35 = vpop.f32.mrb[16].mxu0  ;;  %v12382_v25 = vpop.f32.mrb[16].mxu1 }
 0x2fa   :  { %v2882_v11 = vsel %vm2864_vm12, %v2855_v37, %v2873_v38  ;;  %v2847_v47 = vadd.f32 %v2827_v35, %v12309_v45  ;;  %v9258_v7 = vpop.f32.mrb[17].mxu0  ;;  %v9280_v16 = vpop.f32.mrb[17].mxu1  ;;  %v10335_v45 = vld [vmem:[%s15243_s3 + $0x18] sm:$0xff]  }
 0x2fb   :  { %v12389_v6 = vmax.f32 %v15436_v20, %v2882_v11  ;;  %v2830_v42 = vpop.f32.mrb[18].mxu0  ;;  %v12391_v10 = vpop.f32.mrb[18].mxu1  ;;  %9469 = vmatpush3.bf16.msra.mxu0 %v10335_v45 }
 0x2fc   :  { %v2856_v28 = vadd.f32 %v12343_v0, %v2847_v47  ;;  %v2848_v63 = vadd.f32 %v2830_v42, %v12312_v33  ;;  %v9259_v4 = vpop.f32.mrb[19].mxu0  ;;  %v9281_v34 = vpop.f32.mrb[19].mxu1  ;;  %9470 = vmatprep.subr.bf16.mxu0 %v15395_v19 }
 0x2fe   :  { %vm2865_vm13 = vcmp.gt.f32.partialorder %v2856_v28, 0.0  ;;  %v2874_v22 = vmul.f32 0.1, %v2856_v28  ;;  %v2857_v30 = vadd.f32 %v12343_v0, %v2848_v63 }
 0x2ff   :  { %9471 = vmatpush3.bf16.msra.mxu0 %v10336_v8 }
 0x300   :  { %v2883_v31 = vsel %vm2865_vm13, %v2856_v28, %v2874_v22  ;;  %vm2866_vm14 = vcmp.gt.f32.partialorder %v2857_v30, 0.0  ;;  %v2875_v33 = vmul.f32 0.1, %v2857_v30  ;;  %9472 = vmatprep.subr.bf16.mxu0 %v15395_v19 }
 0x301   :  { %v12406_v49 = vmax.f32 %v2049_v60, %v2883_v31  ;;  %v2835_v3 = vpop.f32.mrb[20].mxu0  ;;  %v12408_v44 = vpop.f32.mrb[20].mxu1 }
 0x302   :  { %v2884_v24 = vsel %vm2866_vm14, %v2857_v30, %v2875_v33  ;;  %v2849_v41 = vadd.f32 %v2835_v3, %v12315_v39  ;;  %v9262_v23 = vpop.f32.mrb[21].mxu0  ;;  %v9284_v15 = vpop.f32.mrb[21].mxu1  ;;  %v10337_v39 = vld [vmem:[%s15243_s3 + $0x28] sm:$0xff]   ;;  %v15437_v30 = vld [vmem:[#allocation7_spill] sm:$0xff] }
 0x303   :  { %v12414_v55 = vmax.f32 %v2050_v50, %v2884_v24  ;;  %v2838_v18 = vpop.f32.mrb[22].mxu0  ;;  %v2964_v51 = vpop.f32.mrb[22].mxu1  ;;  %9473 = vmatpush3.bf16.msra.mxu0 %v10337_v39  ;;  %v7900_v15 = vld [vmem:[%s15240_s0 + $0x1d0] sm:$0xff] }
 0x304   :  { %v2858_v12 = vadd.f32 %v12343_v0, %v2849_v41  ;;  %v9263_v5 = vpop.f32.mrb[23].mxu0  ;;  %v9285_v60 = vpop.f32.mrb[23].mxu1  ;;  %9474 = vmatprep.subr.bf16.mxu0 %v15395_v19 }
 0x306   :  { %vm2867_vm15 = vcmp.gt.f32.partialorder %v2858_v12, 0.0  ;;  %v2876_v37 = vmul.f32 0.1, %v2858_v12 }
 0x307   :  { %9475 = vmatpush3.bf16.msra.mxu0 %v10338_v43 }
 0x308   :  { %v2885_v9 = vsel %vm2867_vm15, %v2858_v12, %v2876_v37  ;;  %9476 = vmatprep.subr.bf16.mxu0 %v15395_v19 }
 0x309   :  { %v12428_v50 = vmax.f32 %v2051_v46, %v2885_v9  ;;  %v3001_v32 = vpop.f32.mrb[24].mxu0  ;;  %v3073_v26 = vpop.f32.mrb[24].mxu1  ;;  %v7897_v46 = vld [vmem:[%s15240_s0 + $0x1b8] sm:$0xff] }
 0x30a   :  { %v3002_v38 = vadd.f32 %v3001_v32, %v12317_v21  ;;  %v9290_v35 = vpop.f32.mrb[25].mxu0  ;;  %v9312_v11 = vpop.f32.mrb[25].mxu1  ;;  %v7898_v21 = vld [vmem:[%s15240_s0 + $0x1c0] sm:$0xff] }
 0x30b   :  { %v3004_v47 = vpop.f32.mrb[26].mxu0  ;;  %v3076_v7 = vpop.f32.mrb[26].mxu1  ;;  %9477 = vmatpush3.bf16.msra.mxu0 %v10339_v58  ;;  %v12446_v63 = vpack.c.bf16 %v7898_v21, %v7897_v46  ;;  %v7901_v35 = vld [vmem:[%s15240_s0 + $0x1d8] sm:$0xff] }
 0x30c   :  { %v12432_v16 = vadd.f32 %v3073_v26, %v3002_v38  ;;  %v3005_v20 = vadd.f32 %v3004_v47, %v12320_v61  ;;  %v9291_v42 = vpop.f32.mrb[27].mxu0  ;;  %v9313_v28 = vpop.f32.mrb[27].mxu1  ;;  %9520 = vmatprep.subr.bf16.mxu0 %v15395_v19 }
 0x30d   :  { %9501 = vmatmul.mubr.msk.bf16.vlgmr.msra.gmra.mrb[104].mxu1 %vm192_vm1, %v12446_v63 }
 0x30e   :  { %v12438_v59 = vadd.f32 %v3076_v7, %v3005_v20  ;;  %9504 = vmatprep.mubr.msk.bf16.mxu1 %vm10450_vm2, %v15395_v19  ;;  %9543 = vmatpush3.bf16.msra.mxu1 %v15437_v30 }
 0x30f   :  { %9586 = vmatprep.subr.bf16.mxu1 %v15395_v19 }
 0x311   :  { %v3009_v61 = vpop.f32.mrb[28].mxu0  ;;  %v3081_v4 = vpop.f32.mrb[28].mxu1 }
 0x312   :  { %v3010_v34 = vadd.f32 %v3009_v61, %v12330_v52  ;;  %v9294_v45 = vpop.f32.mrb[29].mxu0  ;;  %v9316_v22 = vpop.f32.mrb[29].mxu1  ;;  %v7899_v52 = vld [vmem:[%s15240_s0 + $0x1c8] sm:$0xff] }
 0x313   :  { %v3012_v8 = vpop.f32.mrb[30].mxu0  ;;  %v3084_v31 = vpop.f32.mrb[30].mxu1  ;;  %v12467_v18 = vpack.c.bf16 %v7900_v15, %v7899_v52  ;;  %v7903_v45 = vld [vmem:[%s15240_s0 + $0x1e8] sm:$0xff] }
 0x314   :  { %v12456_v33 = vadd.f32 %v3081_v4, %v3010_v34  ;;  %v3013_v3 = vadd.f32 %v3012_v8, %v12338_v62  ;;  %v9295_v24 = vpop.f32.mrb[31].mxu0  ;;  %v9317_v41 = vpop.f32.mrb[31].mxu1 }
 0x315   :  { %9505 = vmatmul.mubr.msk.bf16.gmra.mrb[108].mxu1 %vm192_vm1, %v12467_v18 }
 0x316   :  { %v12459_v23 = vadd.f32 %v3084_v31, %v3013_v3  ;;  %9508 = vmatprep.mubr.msk.bf16.mxu1 %vm10450_vm2, %v15395_v19 }
 0x319   :  { %v3017_v51 = vpop.f32.mrb[32].mxu0  ;;  %v3089_v12 = vpop.f32.mrb[32].mxu1 }
 0x31a   :  { %v3018_v62 = vadd.f32 %v3017_v51, %v12360_v17  ;;  %v9298_v5 = vpop.f32.mrb[33].mxu0  ;;  %v9320_v60 = vpop.f32.mrb[33].mxu1  ;;  %v7902_v17 = vld [vmem:[%s15240_s0 + $0x1e0] sm:$0xff] }
 0x31b   :  { %v3020_v39 = vpop.f32.mrb[34].mxu0  ;;  %v3092_v37 = vpop.f32.mrb[34].mxu1  ;;  %v12485_v11 = vpack.c.bf16 %v7902_v17, %v7901_v35 }
 0x31c   :  { %v12474_v9 = vadd.f32 %v3089_v12, %v3018_v62  ;;  %v3021_v43 = vadd.f32 %v3020_v39, %v12368_v1  ;;  %v9299_v32 = vpop.f32.mrb[35].mxu0  ;;  %v9321_v26 = vpop.f32.mrb[35].mxu1  ;;  %v7905_v62 = vld [vmem:[%s15240_s0 + $0x1f8] sm:$0xff] }
 0x31d   :  { %9509 = vmatmul.mubr.msk.bf16.gmra.mrb[112].mxu1 %vm192_vm1, %v12485_v11  ;;  %v12515_v5 = vpack.c.bf16 %v7905_v62, %v7905_v62 }
 0x31e   :  { %v12477_v38 = vadd.f32 %v3092_v37, %v3021_v43  ;;  %9512 = vmatprep.mubr.msk.bf16.mxu1 %vm10450_vm2, %v15395_v19 }
 0x321   :  { %v3025_v47 = vpop.f32.mrb[36].mxu0  ;;  %v3097_v7 = vpop.f32.mrb[36].mxu1 }
 0x322   :  { %v3026_v1 = vadd.f32 %v3025_v47, %v12382_v25  ;;  %v9302_v20 = vpop.f32.mrb[37].mxu0  ;;  %v9324_v42 = vpop.f32.mrb[37].mxu1  ;;  %v7904_v25 = vld [vmem:[%s15240_s0 + $0x1f0] sm:$0xff] }
 0x323   :  { %v3028_v28 = vpop.f32.mrb[38].mxu0  ;;  %v3100_v58 = vpop.f32.mrb[38].mxu1  ;;  %v12503_v22 = vpack.c.bf16 %v7904_v25, %v7903_v45  ;;  %v7916_v20 = vld [vmem:[%s15240_s0 + $0x161] sm:$0xff] }
 0x324   :  { %v12492_v46 = vadd.f32 %v3097_v7, %v3026_v1  ;;  %v3029_v21 = vadd.f32 %v3028_v28, %v12391_v10  ;;  %v9303_v61 = vpop.f32.mrb[39].mxu0  ;;  %v9325_v4 = vpop.f32.mrb[39].mxu1 }
 0x325   :  { %9513 = vmatmul.mubr.msk.bf16.gmra.mrb[116].mxu1 %vm192_vm1, %v12503_v22 }
 0x326   :  { %v12495_v34 = vadd.f32 %v3100_v58, %v3029_v21  ;;  %9516 = vmatprep.mubr.msk.bf16.mxu1 %vm10450_vm2, %v15395_v19 }
 0x329   :  { %v3033_v8 = vpop.f32.mrb[40].mxu0  ;;  %v3105_v31 = vpop.f32.mrb[40].mxu1 }
 0x32a   :  { %v3034_v10 = vadd.f32 %v3033_v8, %v12408_v44  ;;  %v9306_v3 = vpop.f32.mrb[41].mxu0  ;;  %v9328_v24 = vpop.f32.mrb[41].mxu1 }
 0x32b   :  { %v3036_v41 = vpop.f32.mrb[42].mxu0  ;;  %v3108_v52 = vpop.f32.mrb[42].mxu1  ;;  %v12558_v24 = vld [vmem:[%s15240_s0 + $0x179] sm:$0xff] }
 0x32c   :  { %v12510_v15 = vadd.f32 %v3105_v31, %v3034_v10  ;;  %v9307_v51 = vpop.f32.mrb[43].mxu0  ;;  %v9329_v12 = vpop.f32.mrb[43].mxu1 }
 0x32d   :  { %9517 = vmatmul.mubr.msk.bf16.gmra.mrb[120].mxu1 %vm192_vm1, %v12515_v5 }
 0x32e   :  { %9544 = vmatprep.mubr.msk.bf16.mxu1 %vm10450_vm2, %v15395_v19 }
 0x331   :  { %v3154_v60 = vpop.f32.mrb[44].mxu0  ;;  %v3235_v39 = vpop.f32.mrb[44].mxu1 }
 0x332   :  { %v3192_v44 = vadd.f32 %v3154_v60, %v12432_v16  ;;  %v9334_v37 = vpop.f32.mrb[45].mxu0  ;;  %v9356_v43 = vpop.f32.mrb[45].mxu1  ;;  %v12533_v16 = vld [vmem:[%s15240_s0 + $0x169] sm:$0xff] }
 0x333   :  { %v3157_v32 = vpop.f32.mrb[46].mxu0  ;;  %v3238_v26 = vpop.f32.mrb[46].mxu1  ;;  %v12536_v42 = vpack.c.bf16 %v12533_v16, %v7916_v20 }
 0x334   :  { %v12522_v35 = vadd.f32 %v3235_v39, %v3192_v44  ;;  %v3193_v17 = vadd.f32 %v3157_v32, %v12438_v59  ;;  %v9335_v47 = vpop.f32.mrb[47].mxu0  ;;  %v9357_v7 = vpop.f32.mrb[47].mxu1 }
 0x335   :  { %9545 = vmatmul.mubr.msk.bf16.vlgmr.msra.gmra.mrb[124].mxu1 %vm192_vm1, %v12536_v42 }
 0x336   :  { %v12525_v1 = vadd.f32 %v3238_v26, %v3193_v17  ;;  %9548 = vmatprep.mubr.msk.bf16.mxu1 %vm10450_vm2, %v15395_v19  ;;  %9587 = vmatpush3.bf16.msra.mxu1 %v10697_v56  ;;  %v12577_v17 = vld [vmem:[%s15240_s0 + $0x181] sm:$0xff] }
 0x337   :  { %9630 = vmatprep.subr.bf16.mxu1 %v15395_v19 }
 0x339   :  { %v3162_v28 = vpop.f32.mrb[48].mxu0  ;;  %v3243_v58 = vpop.f32.mrb[48].mxu1 }
 0x33a   :  { %v3194_v59 = vadd.f32 %v3162_v28, %v12456_v33  ;;  %v9338_v21 = vpop.f32.mrb[49].mxu0  ;;  %v9360_v61 = vpop.f32.mrb[49].mxu1  ;;  %v12553_v33 = vld [vmem:[%s15240_s0 + $0x171] sm:$0xff] }
 0x33b   :  { %v3165_v4 = vpop.f32.mrb[50].mxu0  ;;  %v3246_v45 = vpop.f32.mrb[50].mxu1  ;;  %v12562_v41 = vpack.c.bf16 %v12558_v24, %v12553_v33 }
 0x33c   :  { %v12545_v25 = vadd.f32 %v3243_v58, %v3194_v59  ;;  %v3195_v8 = vadd.f32 %v3165_v4, %v12459_v23  ;;  %v9339_v31 = vpop.f32.mrb[51].mxu0  ;;  %v9361_v10 = vpop.f32.mrb[51].mxu1 }
 0x33d   :  { %9549 = vmatmul.mubr.msk.bf16.gmra.mrb[128].mxu1 %vm192_vm1, %v12562_v41  ;;  %v12601_v10 = vld [vmem:[%s15240_s0 + $0x191] sm:$0xff] }
 0x33e   :  { %v12548_v3 = vadd.f32 %v3246_v45, %v3195_v8  ;;  %9552 = vmatprep.mubr.msk.bf16.mxu1 %vm10450_vm2, %v15395_v19 }
 0x341   :  { %v3170_v52 = vpop.f32.mrb[52].mxu0  ;;  %v3251_v23 = vpop.f32.mrb[52].mxu1 }
 0x342   :  { %v3196_v51 = vadd.f32 %v3170_v52, %v12474_v9  ;;  %v9342_v12 = vpop.f32.mrb[53].mxu0  ;;  %v9364_v62 = vpop.f32.mrb[53].mxu1  ;;  %v12582_v9 = vld [vmem:[%s15240_s0 + $0x189] sm:$0xff] }
 0x343   :  { %v3173_v60 = vpop.f32.mrb[54].mxu0  ;;  %v3254_v39 = vpop.f32.mrb[54].mxu1  ;;  %v12586_v47 = vpack.c.bf16 %v12582_v9, %v12577_v17 }
 0x344   :  { %v12569_v44 = vadd.f32 %v3251_v23, %v3196_v51  ;;  %v3197_v37 = vadd.f32 %v3173_v60, %v12477_v38  ;;  %v9343_v43 = vpop.f32.mrb[55].mxu0  ;;  %v9365_v32 = vpop.f32.mrb[55].mxu1 }
 0x345   :  { %9553 = vmatmul.mubr.msk.bf16.gmra.mrb[132].mxu1 %vm192_vm1, %v12586_v47 }
 0x346   :  { %v12572_v26 = vadd.f32 %v3254_v39, %v3197_v37  ;;  %9556 = vmatprep.mubr.msk.bf16.mxu1 %vm10450_vm2, %v15395_v19 }
 0x349   :  { %v3178_v7 = vpop.f32.mrb[56].mxu0  ;;  %v3259_v38 = vpop.f32.mrb[56].mxu1 }
 0x34a   :  { %v3198_v20 = vadd.f32 %v3178_v7, %v12492_v46  ;;  %v9346_v28 = vpop.f32.mrb[57].mxu0  ;;  %v9368_v58 = vpop.f32.mrb[57].mxu1  ;;  %v12606_v46 = vld [vmem:[%s15240_s0 + $0x199] sm:$0xff]  ;;  %v12622_v7 = vld [vmem:[%s15240_s0 + $0x1a1] sm:$0xff] }
 0x34b   :  { %v3181_v59 = vpop.f32.mrb[58].mxu0  ;;  %v3262_v21 = vpop.f32.mrb[58].mxu1  ;;  %v12610_v52 = vpack.c.bf16 %v12606_v46, %v12601_v10 }
 0x34c   :  { %v12593_v61 = vadd.f32 %v3259_v38, %v3198_v20  ;;  %v3199_v4 = vadd.f32 %v3181_v59, %v12495_v34  ;;  %v9347_v45 = vpop.f32.mrb[59].mxu0  ;;  %v9369_v8 = vpop.f32.mrb[59].mxu1  ;;  %v12626_v38 = vpack.c.bf16 %v12622_v7, %v12622_v7 }
 0x34d   :  { %9557 = vmatmul.mubr.msk.bf16.gmra.mrb[136].mxu1 %vm192_vm1, %v12610_v52 }
 0x34e   :  { %v12596_v31 = vadd.f32 %v3262_v21, %v3199_v4  ;;  %9560 = vmatprep.mubr.msk.bf16.mxu1 %vm10450_vm2, %v15395_v19 }
 0x351   :  { %v3186_v23 = vpop.f32.mrb[60].mxu0  ;;  %v3267_v34 = vpop.f32.mrb[60].mxu1 }
 0x352   :  { %v3200_v51 = vadd.f32 %v3186_v23, %v12510_v15  ;;  %v9350_v12 = vpop.f32.mrb[61].mxu0  ;;  %v9372_v62 = vpop.f32.mrb[61].mxu1 }
 0x353   :  { %v3189_v60 = vpop.f32.mrb[62].mxu0  ;;  %v3270_v39 = vpop.f32.mrb[62].mxu1  ;;  %v7944_v12 = vld [vmem:[%s15240_s0 + $0x268] sm:$0xff] }
 0x354   :  { %v12617_v37 = vadd.f32 %v3267_v34, %v3200_v51  ;;  %v9351_v43 = vpop.f32.mrb[63].mxu0  ;;  %v9373_v32 = vpop.f32.mrb[63].mxu1 }
 0x355   :  { %9561 = vmatmul.mubr.msk.bf16.gmra.mrb[140].mxu1 %vm192_vm1, %v12626_v38 }
 0x356   :  { %9588 = vmatprep.mubr.msk.bf16.mxu1 %vm10450_vm2, %v15395_v19 }
 0x359   :  { %v3316_v15 = vpop.f32.mrb[64].mxu0  ;;  %v3397_v20 = vpop.f32.mrb[64].mxu1 }
 0x35a   :  { %v3354_v28 = vadd.f32 %v3316_v15, %v12522_v35  ;;  %v9378_v58 = vpop.f32.mrb[65].mxu0  ;;  %v9400_v59 = vpop.f32.mrb[65].mxu1  ;;  %v7945_v35 = vld [vmem:[%s15240_s0 + $0x270] sm:$0xff] }
 0x35b   :  { %v3319_v21 = vpop.f32.mrb[66].mxu0  ;;  %v3400_v4 = vpop.f32.mrb[66].mxu1  ;;  %v12644_v62 = vpack.c.bf16 %v7945_v35, %v7944_v12 }
 0x35c   :  { %v12633_v45 = vadd.f32 %v3397_v20, %v3354_v28  ;;  %v3355_v8 = vadd.f32 %v3319_v21, %v12525_v1  ;;  %v9379_v23 = vpop.f32.mrb[67].mxu0  ;;  %v9401_v34 = vpop.f32.mrb[67].mxu1 }
 0x35d   :  { %15438 = vst [vmem:[#allocation19_spill] sm:$0xff] %v12644_v62  ;;  %9589 = vmatmul.mubr.msk.bf16.vlgmr.msra.gmra.mrb[144].mxu1 %vm192_vm1, %v12644_v62 }
 0x35e   :  { %v12636_v51 = vadd.f32 %v3400_v4, %v3355_v8  ;;  %9592 = vmatprep.mubr.msk.bf16.mxu1 %vm10450_vm2, %v15395_v19  ;;  %9631 = vmatpush3.bf16.msra.mxu1 %v10823_v27  ;;  %v7947_v8 = vld [vmem:[%s15240_s0 + $0x280] sm:$0xff]  ;;  %v12723_v27 = vpack.c.bf16 %v12553_v33, %v12533_v16 }
 0x35f   :  { %9674 = vmatprep.subr.bf16.mxu1 %v15395_v19 }
 0x360   :  { %15439 = vst [vmem:[#allocation21_spill] sm:$0xff] %v12723_v27 }
 0x361   :  { %v3324_v60 = vpop.f32.mrb[68].mxu0  ;;  %v3405_v39 = vpop.f32.mrb[68].mxu1 }
 0x362   :  { %v3356_v1 = vadd.f32 %v3324_v60, %v12545_v25  ;;  %v9382_v43 = vpop.f32.mrb[69].mxu0  ;;  %v9404_v32 = vpop.f32.mrb[69].mxu1  ;;  %v7946_v25 = vld [vmem:[%s15240_s0 + $0x278] sm:$0xff] }
 0x363   :  { %v3327_v15 = vpop.f32.mrb[70].mxu0  ;;  %v3408_v20 = vpop.f32.mrb[70].mxu1  ;;  %v12664_v23 = vpack.c.bf16 %v7947_v8, %v7946_v25 }
 0x364   :  { %v12653_v28 = vadd.f32 %v3405_v39, %v3356_v1  ;;  %v3357_v58 = vadd.f32 %v3327_v15, %v12548_v3  ;;  %v9383_v59 = vpop.f32.mrb[71].mxu0  ;;  %v9405_v21 = vpop.f32.mrb[71].mxu1 }
 0x365   :  { %9593 = vmatmul.mubr.msk.bf16.gmra.mrb[148].mxu1 %vm192_vm1, %v12664_v23  ;;  %v7948_v59 = vld [vmem:[%s15240_s0 + $0x288] sm:$0xff] }
 0x366   :  { %v12656_v4 = vadd.f32 %v3408_v20, %v3357_v58  ;;  %9596 = vmatprep.mubr.msk.bf16.mxu1 %vm10450_vm2, %v15395_v19 }
 0x369   :  { %v3332_v34 = vpop.f32.mrb[72].mxu0  ;;  %v3413_v12 = vpop.f32.mrb[72].mxu1 }
 0x36a   :  { %v3358_v3 = vadd.f32 %v3332_v34, %v12569_v44  ;;  %v9386_v35 = vpop.f32.mrb[73].mxu0  ;;  %v9408_v60 = vpop.f32.mrb[73].mxu1  ;;  %v7949_v44 = vld [vmem:[%s15240_s0 + $0x290] sm:$0xff] }
 0x36b   :  { %v3335_v39 = vpop.f32.mrb[74].mxu0  ;;  %v3416_v1 = vpop.f32.mrb[74].mxu1  ;;  %v12682_v21 = vpack.c.bf16 %v7949_v44, %v7948_v59 }
 0x36c   :  { %v12671_v43 = vadd.f32 %v3413_v12, %v3358_v3  ;;  %v3359_v32 = vadd.f32 %v3335_v39, %v12572_v26  ;;  %v9387_v15 = vpop.f32.mrb[75].mxu0  ;;  %v9409_v20 = vpop.f32.mrb[75].mxu1 }
 0x36d   :  { %9597 = vmatmul.mubr.msk.bf16.gmra.mrb[152].mxu1 %vm192_vm1, %v12682_v21  ;;  %v7950_v20 = vld [vmem:[%s15240_s0 + $0x298] sm:$0xff] }
 0x36e   :  { %v12674_v58 = vadd.f32 %v3416_v1, %v3359_v32  ;;  %9600 = vmatprep.mubr.msk.bf16.mxu1 %vm10450_vm2, %v15395_v19 }
 0x371   :  { %v3340_v25 = vpop.f32.mrb[76].mxu0  ;;  %v3421_v8 = vpop.f32.mrb[76].mxu1 }
 0x372   :  { %v3360_v26 = vadd.f32 %v3340_v25, %v12593_v61  ;;  %v9390_v34 = vpop.f32.mrb[77].mxu0  ;;  %v9412_v12 = vpop.f32.mrb[77].mxu1  ;;  %v7951_v61 = vld [vmem:[%s15240_s0 + $0x2a0] sm:$0xff] }
 0x373   :  { %v3343_v3 = vpop.f32.mrb[78].mxu0  ;;  %v3424_v35 = vpop.f32.mrb[78].mxu1  ;;  %v12700_v59 = vpack.c.bf16 %v7951_v61, %v7950_v20 }
 0x374   :  { %v12689_v60 = vadd.f32 %v3421_v8, %v3360_v26  ;;  %v3361_v39 = vadd.f32 %v3343_v3, %v12596_v31  ;;  %v9391_v1 = vpop.f32.mrb[79].mxu0  ;;  %v9413_v32 = vpop.f32.mrb[79].mxu1 }
 0x375   :  { %9601 = vmatmul.mubr.msk.bf16.gmra.mrb[156].mxu1 %vm192_vm1, %v12700_v59  ;;  %v7952_v1 = vld [vmem:[%s15240_s0 + $0x2a8] sm:$0xff] }
 0x376   :  { %v12692_v15 = vadd.f32 %v3424_v35, %v3361_v39  ;;  %9604 = vmatprep.mubr.msk.bf16.mxu1 %vm10450_vm2, %v15395_v19  ;;  %v12712_v32 = vpack.c.bf16 %v7952_v1, %v7952_v1 }
 0x379   :  { %v3348_v44 = vpop.f32.mrb[80].mxu0  ;;  %v3429_v25 = vpop.f32.mrb[80].mxu1 }
 0x37a   :  { %v3362_v31 = vadd.f32 %v3348_v44, %v12617_v37  ;;  %v9394_v8 = vpop.f32.mrb[81].mxu0  ;;  %v9416_v26 = vpop.f32.mrb[81].mxu1 }
 0x37b   :  { %v3351_v34 = vpop.f32.mrb[82].mxu0  ;;  %v3432_v12 = vpop.f32.mrb[82].mxu1 }
 0x37c   :  { %v12707_v3 = vadd.f32 %v3429_v25, %v3362_v31  ;;  %v9395_v35 = vpop.f32.mrb[83].mxu0  ;;  %v9417_v39 = vpop.f32.mrb[83].mxu1 }
 0x37d   :  { %9605 = vmatmul.mubr.msk.bf16.gmra.mrb[160].mxu1 %vm192_vm1, %v12712_v32 }
 0x37e   :  { %9632 = vmatprep.mubr.msk.bf16.mxu1 %vm10450_vm2, %v15395_v19 }
 0x381   :  { %v3478_v20 = vpop.f32.mrb[84].mxu0  ;;  %v3588_v61 = vpop.f32.mrb[84].mxu1 }
 0x382   :  { %v3516_v37 = vadd.f32 %v3478_v20, %v12633_v45  ;;  %v9422_v44 = vpop.f32.mrb[85].mxu0  ;;  %v9444_v8 = vpop.f32.mrb[85].mxu1 }
 0x383   :  { %v3481_v25 = vpop.f32.mrb[86].mxu0  ;;  %v3591_v31 = vpop.f32.mrb[86].mxu1 }
 0x384   :  { %v3626_v26 = vadd.f32 %v3588_v61, %v3516_v37  ;;  %v3517_v34 = vadd.f32 %v3481_v25, %v12636_v51  ;;  %v9423_v12 = vpop.f32.mrb[87].mxu0  ;;  %v9445_v35 = vpop.f32.mrb[87].mxu1 }
 0x385   :  { %9633 = vmatmul.mubr.msk.bf16.vlgmr.msra.gmra.mrb[164].mxu1 %vm192_vm1, %v12723_v27  ;;  %v13182_v27 = vld [vmem:[%s15240_s0 + $0x1e1] sm:$0xff] }
 0x386   :  { %v3635_v39 = vadd.f32 %v12343_v0, %v3626_v26  ;;  %v3627_v1 = vadd.f32 %v3591_v31, %v3517_v34  ;;  %9636 = vmatprep.mubr.msk.bf16.mxu1 %vm10450_vm2, %v15395_v19  ;;  %9675 = vmatpush3.bf16.msra.mxu1 %v15424_v29  ;;  %v7994_v29 = vld [vmem:[%s15240_s0 + $0x201] sm:$0xff] }
 0x387   :  { %9718 = vmatprep.subr.bf16.mxu1 %v15395_v19 }
 0x388   :  { %vm3644_vm0 = vcmp.gt.f32.partialorder %v3635_v39, 0.0  ;;  %v3653_v45 = vmul.f32 0.1, %v3635_v39  ;;  %v3636_v20 = vadd.f32 %v12343_v0, %v3627_v1 }
 0x389   :  { %v3486_v44 = vpop.f32.mrb[88].mxu0  ;;  %v3596_v8 = vpop.f32.mrb[88].mxu1 }
 0x38a   :  { %v3662_v61 = vsel %vm3644_vm0, %v3635_v39, %v3653_v45  ;;  %vm3645_vm3 = vcmp.gt.f32.partialorder %v3636_v20, 0.0  ;;  %v3654_v51 = vmul.f32 0.1, %v3636_v20  ;;  %v3518_v37 = vadd.f32 %v3486_v44, %v12653_v28  ;;  %v9426_v25 = vpop.f32.mrb[89].mxu0  ;;  %v9448_v31 = vpop.f32.mrb[89].mxu1 }
 0x38b   :  { %v3671_v16 = vmax.f32 %v12328_v2, %v3662_v61  ;;  %v3489_v33 = vpop.f32.mrb[90].mxu0  ;;  %v3599_v26 = vpop.f32.mrb[90].mxu1  ;;  %v12739_v31 = vpack.c.bf16 %v12577_v17, %v12558_v24 }
 0x38c   :  { %v3663_v34 = vsel %vm3645_vm3, %v3636_v20, %v3654_v51  ;;  %v3628_v12 = vadd.f32 %v3596_v8, %v3518_v37  ;;  %v3519_v35 = vadd.f32 %v3489_v33, %v12656_v4  ;;  %v9427_v39 = vpop.f32.mrb[91].mxu0  ;;  %v9449_v1 = vpop.f32.mrb[91].mxu1  ;;  %v15441_v33 = vld [vmem:[#allocation6_spill] sm:$0xff] }
 0x38d   :  { %v3672_v28 = vmax.f32 %v12336_v48, %v3663_v34  ;;  %15440 = vst [vmem:[#allocation22_spill] sm:$0xff] %v12739_v31  ;;  %9637 = vmatmul.mubr.msk.bf16.gmra.mrb[168].mxu1 %vm192_vm1, %v12739_v31 }
 0x38e   :  { %v3637_v45 = vadd.f32 %v12343_v0, %v3628_v12  ;;  %v3629_v44 = vadd.f32 %v3599_v26, %v3519_v35  ;;  %9640 = vmatprep.mubr.msk.bf16.mxu1 %vm10450_vm2, %v15395_v19 }
 0x38f   :  { %v3680_v25 = vpack.c.bf16 %v3672_v28, %v3671_v16 }
 0x390   :  { %vm3646_vm4 = vcmp.gt.f32.partialorder %v3637_v45, 0.0  ;;  %v3655_v2 = vmul.f32 0.1, %v3637_v45  ;;  %v3638_v61 = vadd.f32 %v12343_v0, %v3629_v44 }
 0x391   :  { %v3494_v20 = vpop.f32.mrb[92].mxu0  ;;  %v3604_v8 = vpop.f32.mrb[92].mxu1  ;;  %9479 = vmatmul.mubr.bf16.vlgmr.msra.gmra.mrb[104].mxu0 %v3680_v25 }
 0x392   :  { %v3664_v4 = vsel %vm3646_vm4, %v3637_v45, %v3655_v2  ;;  %vm3647_vm5 = vcmp.gt.f32.partialorder %v3638_v61, 0.0  ;;  %v3656_v48 = vmul.f32 0.1, %v3638_v61  ;;  %v3520_v51 = vadd.f32 %v3494_v20, %v12671_v43  ;;  %v9430_v37 = vpop.f32.mrb[93].mxu0  ;;  %v9452_v16 = vpop.f32.mrb[93].mxu1  ;;  %9521 = vmatpush3.bf16.msra.mxu0 %v15441_v33  ;;  %9482 = vmatprep.mubr.msk.bf16.mxu0 %vm10450_vm2, %v15395_v19 }
 0x393   :  { %v3673_v24 = vmax.f32 %v12358_v13, %v3664_v4  ;;  %v3497_v17 = vpop.f32.mrb[94].mxu0  ;;  %v3607_v26 = vpop.f32.mrb[94].mxu1  ;;  %9564 = vmatprep.subr.bf16.mxu0 %v15395_v19  ;;  %v12757_v13 = vpack.c.bf16 %v12601_v10, %v12582_v9 }
 0x394   :  { %v3665_v34 = vsel %vm3647_vm5, %v3638_v61, %v3656_v48  ;;  %v3630_v12 = vadd.f32 %v3604_v8, %v3520_v51  ;;  %v3521_v43 = vadd.f32 %v3497_v17, %v12674_v58  ;;  %v9431_v35 = vpop.f32.mrb[95].mxu0  ;;  %v9453_v39 = vpop.f32.mrb[95].mxu1 }
 0x395   :  { %v3674_v1 = vmax.f32 %v12366_v53, %v3665_v34  ;;  %15442 = vst [vmem:[#allocation24_spill] sm:$0xff] %v12757_v13  ;;  %9641 = vmatmul.mubr.msk.bf16.gmra.mrb[172].mxu1 %vm192_vm1, %v12757_v13  ;;  %v12773_v35 = vpack.c.bf16 %v12622_v7, %v12606_v46 }
 0x396   :  { %v3639_v28 = vadd.f32 %v12343_v0, %v3630_v12  ;;  %v3631_v45 = vadd.f32 %v3607_v26, %v3521_v43  ;;  %9644 = vmatprep.mubr.msk.bf16.mxu1 %vm10450_vm2, %v15395_v19 }
 0x397   :  { %v3681_v44 = vpack.c.bf16 %v3674_v1, %v3673_v24  ;;  %15443 = vst [vmem:[#allocation14_spill] sm:$0xff] %v12773_v35 }
 0x398   :  { %vm3648_vm6 = vcmp.gt.f32.partialorder %v3639_v28, 0.0  ;;  %v3657_v25 = vmul.f32 0.1, %v3639_v28  ;;  %v3640_v2 = vadd.f32 %v12343_v0, %v3631_v45 }
 0x399   :  { %v3502_v61 = vpop.f32.mrb[96].mxu0  ;;  %v3612_v20 = vpop.f32.mrb[96].mxu1  ;;  %9483 = vmatmul.mubr.bf16.gmra.mrb[108].mxu0 %v3681_v44 }
 0x39a   :  { %v3666_v58 = vsel %vm3648_vm6, %v3639_v28, %v3657_v25  ;;  %vm3649_vm7 = vcmp.gt.f32.partialorder %v3640_v2, 0.0  ;;  %v3658_v53 = vmul.f32 0.1, %v3640_v2  ;;  %v3522_v8 = vadd.f32 %v3502_v61, %v12689_v60  ;;  %v9434_v4 = vpop.f32.mrb[97].mxu0  ;;  %v9456_v48 = vpop.f32.mrb[97].mxu1  ;;  %9486 = vmatprep.mubr.msk.bf16.mxu0 %vm10450_vm2, %v15395_v19 }
 0x39b   :  { %v3675_v9 = vmax.f32 %v12380_v36, %v3666_v58  ;;  %v3505_v10 = vpop.f32.mrb[98].mxu0  ;;  %v3615_v51 = vpop.f32.mrb[98].mxu1  ;;  %v7980_v4 = vld [vmem:[%s15240_s0 + $0x1a9] sm:$0xff] }
 0x39c   :  { %v3667_v37 = vsel %vm3649_vm7, %v3640_v2, %v3658_v53  ;;  %v3632_v16 = vadd.f32 %v3612_v20, %v3522_v8  ;;  %v3523_v24 = vadd.f32 %v3505_v10, %v12692_v15  ;;  %v9435_v17 = vpop.f32.mrb[99].mxu0  ;;  %v9457_v26 = vpop.f32.mrb[99].mxu1 }
 0x39d   :  { %v3676_v60 = vmax.f32 %v12389_v6, %v3667_v37  ;;  %9645 = vmatmul.mubr.msk.bf16.gmra.mrb[176].mxu1 %vm192_vm1, %v12773_v35  ;;  %v8002_v26 = vld [vmem:[%s15240_s0 + $0x17a] sm:$0xff]  ;;  %v13147_v35 = vld [vmem:[%s15240_s0 + $0x1d1] sm:$0xff] }
 0x39e   :  { %v3641_v34 = vadd.f32 %v12343_v0, %v3632_v16  ;;  %v3633_v12 = vadd.f32 %v3615_v51, %v3523_v24  ;;  %9648 = vmatprep.mubr.msk.bf16.mxu1 %vm10450_vm2, %v15395_v19  ;;  %v8001_v51 = vld [vmem:[%s15240_s0 + $0x172] sm:$0xff]  ;;  %v7889_v24 = vld [vmem:[%s15240_s0 + $0x168] sm:$0xff] }
 0x39f   :  { %v3682_v43 = vpack.c.bf16 %v3676_v60, %v3675_v9  ;;  %v12789_v9 = vpack.c.bf16 %v7980_v4, %v7980_v4  ;;  %v8003_v60 = vld [vmem:[%s15240_s0 + $0x182] sm:$0xff]  ;;  %v7931_v4 = vld [vmem:[%s15240_s0 + $0x218] sm:$0xff] }
 0x3a0   :  { %vm3650_vm8 = vcmp.gt.f32.partialorder %v3641_v34, 0.0  ;;  %v3659_v36 = vmul.f32 0.1, %v3641_v34  ;;  %v3642_v39 = vadd.f32 %v12343_v0, %v3633_v12  ;;  %v7890_v12 = vld [vmem:[%s15240_s0 + $0x170] sm:$0xff] }
 0x3a1   :  { %v3510_v1 = vpop.f32.mrb[100].mxu0  ;;  %9487 = vmatmul.mubr.bf16.gmra.mrb[112].mxu0 %v3682_v43  ;;  %v3620_v28 = vpop.f32.mrb[100].mxu1  ;;  %15444 = vst [vmem:[#allocation17_spill] sm:$0xff] %v12789_v9  ;;  %v7891_v43 = vld [vmem:[%s15240_s0 + $0x178] sm:$0xff] }
 0x3a2   :  { %v3668_v15 = vsel %vm3650_vm8, %v3641_v34, %v3659_v36  ;;  %vm3651_vm9 = vcmp.gt.f32.partialorder %v3642_v39, 0.0  ;;  %v3660_v6 = vmul.f32 0.1, %v3642_v39  ;;  %v3524_v45 = vadd.f32 %v3510_v1, %v12707_v3  ;;  %v9438_v44 = vpop.f32.mrb[101].mxu0  ;;  %v9460_v25 = vpop.f32.mrb[101].mxu1  ;;  %9490 = vmatprep.mubr.msk.bf16.mxu0 %vm10450_vm2, %v15395_v19  ;;  %v8005_v1 = vld [vmem:[%s15240_s0 + $0x192] sm:$0xff] }
 0x3a3   :  { %v3677_v46 = vmax.f32 %v12406_v49, %v3668_v15  ;;  %v3513_v7 = vpop.f32.mrb[102].mxu0  ;;  %v3623_v2 = vpop.f32.mrb[102].mxu1  ;;  %v12826_v34 = vpack.c.bf16 %v8003_v60, %v8002_v26  ;;  %v3923_v36 = vpack.c.bf16 %v7891_v43, %v7890_v12  ;;  %v7892_v15 = vld [vmem:[%s15240_s0 + $0x180] sm:$0xff] }
 0x3a4   :  { %v3669_v61 = vsel %vm3651_vm9, %v3642_v39, %v3660_v6  ;;  %v3634_v20 = vadd.f32 %v3620_v28, %v3524_v45  ;;  %v9439_v58 = vpop.f32.mrb[103].mxu0  ;;  %v9461_v53 = vpop.f32.mrb[103].mxu1  ;;  %v8004_v39 = vld [vmem:[%s15240_s0 + $0x18a] sm:$0xff]  ;;  %v8006_v44 = vld [vmem:[%s15240_s0 + $0x19a] sm:$0xff]  ;;  %v8007_v25 = vld [vmem:[%s15240_s0 + $0x1a2] sm:$0xff] }
 0x3a5   :  { %v3678_v8 = vmax.f32 %v12414_v55, %v3669_v61  ;;  %9649 = vmatmul.mubr.msk.bf16.gmra.mrb[180].mxu1 %vm192_vm1, %v12789_v9  ;;  %v8000_v55 = vld [vmem:[%s15240_s0 + $0x16a] sm:$0xff]  ;;  %15446 = vst [vmem:[#allocation23_spill] sm:$0xff] %v12826_v34  ;;  %v12849_v28 = vpack.c.bf16 %v8005_v1, %v8004_v39  ;;  %v7895_v2 = vld [vmem:[%s15240_s0 + $0x198] sm:$0xff]  ;;  %v7896_v53 = vld [vmem:[%s15240_s0 + $0x1a0] sm:$0xff] }
 0x3a6   :  { %v3643_v3 = vadd.f32 %v12343_v0, %v3634_v20  ;;  %9676 = vmatprep.mubr.msk.bf16.mxu1 %vm10450_vm2, %v15395_v19  ;;  %v12804_v16 = vpack.c.bf16 %v8001_v51, %v8000_v55  ;;  %v7893_v6 = vld [vmem:[%s15240_s0 + $0x188] sm:$0xff]  ;;  %v7894_v7 = vld [vmem:[%s15240_s0 + $0x190] sm:$0xff]  ;;  %v7959_v1 = vld [vmem:[%s15240_s0 + $0x219] sm:$0xff] }
 0x3a7   :  { %v3683_v48 = vpack.c.bf16 %v3678_v8, %v3677_v46  ;;  %15447 = vst [vmem:[#allocation25_spill] sm:$0xff] %v12849_v28  ;;  %v3924_v45 = vpack.c.bf16 %v7893_v6, %v7892_v15  ;;  %v12870_v46 = vpack.c.bf16 %v8007_v25, %v8006_v44  ;;  %v3925_v61 = vpack.c.bf16 %v7895_v2, %v7894_v7  ;;  %v8008_v20 = vld [vmem:[%s15240_s0 + $0x1aa] sm:$0xff] }
 0x3a8   :  { %vm3652_vm10 = vcmp.gt.f32.partialorder %v3643_v3, 0.0  ;;  %v3661_v10 = vmul.f32 0.1, %v3643_v3  ;;  %15445 = vst [vmem:[#allocation20_spill] sm:$0xff] %v12804_v16  ;;  %v12888_v58 = vpack.c.bf16 %v8008_v20, %v8008_v20  ;;  %v3926_v8 = vpack.c.bf16 %v7896_v53, %v7896_v53  ;;  %v7937_v51 = vld [vmem:[%s15240_s0 + $0x248] sm:$0xff]  ;;  %v7958_v39 = vld [vmem:[%s15240_s0 + $0x211] sm:$0xff] }
 0x3a9   :  { %9491 = vmatmul.mubr.bf16.gmra.mrb[116].mxu0 %v3683_v48  ;;  %15448 = vst [vmem:[#allocation26_spill] sm:$0xff] %v12870_v46  ;;  %v13008_v44 = vpack.c.bf16 %v7959_v1, %v7958_v39  ;;  %v7960_v53 = vld [vmem:[%s15240_s0 + $0x221] sm:$0xff] }
 0x3aa   :  { %v3670_v49 = vsel %vm3652_vm10, %v3643_v3, %v3661_v10  ;;  %9494 = vmatprep.mubr.msk.bf16.mxu0 %vm10450_vm2, %v15395_v19  ;;  %15449 = vst [vmem:[#allocation27_spill] sm:$0xff] %v12888_v58  ;;  %v7930_v3 = vld [vmem:[%s15240_s0 + $0x210] sm:$0xff]  ;;  %v7933_v10 = vld [vmem:[%s15240_s0 + $0x228] sm:$0xff] }
 0x3ab   :  { %v3679_v0 = vmax.f32 %v12428_v50, %v3670_v49  ;;  %v7888_v50 = vld [vmem:[%s15240_s0 + $0x160] sm:$0xff]  ;;  %v12915_v48 = vpack.c.bf16 %v7931_v4, %v7930_v3  ;;  %15455 = vst [vmem:[#allocation18_spill] sm:$0xff] %v13008_v44 }
 0x3ac   :  { %v3922_v17 = vpack.c.bf16 %v7889_v24, %v7888_v50 }
 0x3ad   :  { %v3684_v37 = vpack.c.bf16 %v3679_v0, %v3679_v0  ;;  %9677 = vmatmul.mubr.msk.bf16.vlgmr.msra.gmra.mrb[184].mxu1 %vm192_vm1, %v12804_v16  ;;  %15450 = vst [vmem:[#allocation15_spill] sm:$0xff] %v12915_v48  ;;  %v7935_v0 = vld [vmem:[%s15240_s0 + $0x238] sm:$0xff] }
 0x3ae   :  { %9680 = vmatprep.mubr.msk.bf16.mxu1 %vm10450_vm2, %v15395_v19  ;;  %9719 = vmatpush3.bf16.msra.mxu1 %v15441_v33 }
 0x3af   :  { %9762 = vmatprep.subr.bf16.mxu1 %v15395_v19 }
 0x3b1   :  { %9495 = vmatmul.mubr.bf16.gmra.mrb[120].mxu0 %v3684_v37 }
 0x3b2   :  { %9522 = vmatprep.mubr.msk.bf16.mxu0 %vm10450_vm2, %v15395_v19 }
 0x3b5   :  { %9681 = vmatmul.mubr.msk.bf16.gmra.mrb[188].mxu1 %vm192_vm1, %v12826_v34 }
 0x3b6   :  { %9684 = vmatprep.mubr.msk.bf16.mxu1 %vm10450_vm2, %v15395_v19 }
 0x3b9   :  { %9523 = vmatmul.mubr.msk.bf16.vlgmr.msra.gmra.mrb[124].mxu0 %vm192_vm1, %v3922_v17 }
 0x3ba   :  { %9565 = vmatpush3.bf16.msra.mxu0 %v10536_v14  ;;  %9526 = vmatprep.mubr.msk.bf16.mxu0 %vm10450_vm2, %v15395_v19 }
 0x3bb   :  { %9608 = vmatprep.subr.bf16.mxu0 %v15395_v19 }
 0x3bd   :  { %9685 = vmatmul.mubr.msk.bf16.gmra.mrb[192].mxu1 %vm192_vm1, %v12849_v28 }
 0x3be   :  { %9688 = vmatprep.mubr.msk.bf16.mxu1 %vm10450_vm2, %v15395_v19 }
 0x3c1   :  { %9527 = vmatmul.mubr.msk.bf16.gmra.mrb[128].mxu0 %vm192_vm1, %v3923_v36 }
 0x3c2   :  { %9530 = vmatprep.mubr.msk.bf16.mxu0 %vm10450_vm2, %v15395_v19 }
 0x3c5   :  { %9689 = vmatmul.mubr.msk.bf16.gmra.mrb[196].mxu1 %vm192_vm1, %v12870_v46 }
 0x3c6   :  { %9692 = vmatprep.mubr.msk.bf16.mxu1 %vm10450_vm2, %v15395_v19 }
 0x3c9   :  { %9531 = vmatmul.mubr.msk.bf16.gmra.mrb[132].mxu0 %vm192_vm1, %v3924_v45 }
 0x3ca   :  { %9534 = vmatprep.mubr.msk.bf16.mxu0 %vm10450_vm2, %v15395_v19 }
 0x3cd   :  { %9693 = vmatmul.mubr.msk.bf16.gmra.mrb[200].mxu1 %vm192_vm1, %v12888_v58 }
 0x3ce   :  { %9720 = vmatprep.mubr.msk.bf16.mxu1 %vm10450_vm2, %v15395_v19 }
 0x3d1   :  { %9535 = vmatmul.mubr.msk.bf16.gmra.mrb[136].mxu0 %vm192_vm1, %v3925_v61 }
 0x3d2   :  { %9538 = vmatprep.mubr.msk.bf16.mxu0 %vm10450_vm2, %v15395_v19 }
 0x3d5   :  { %9721 = vmatmul.mubr.msk.bf16.vlgmr.msra.gmra.mrb[204].mxu1 %vm192_vm1, %v12446_v63  ;;  %v7932_v63 = vld [vmem:[%s15240_s0 + $0x220] sm:$0xff] }
 0x3d6   :  { %9724 = vmatprep.mubr.msk.bf16.mxu1 %vm10450_vm2, %v15395_v19  ;;  %9763 = vmatpush3.bf16.msra.mxu1 %v10536_v14  ;;  %v12933_v49 = vpack.c.bf16 %v7933_v10, %v7932_v63  ;;  %v13216_v14 = vld [vmem:[%s15240_s0 + $0x1f1] sm:$0xff] }
 0x3d7   :  { %9806 = vmatprep.subr.bf16.mxu1 %v15395_v19 }
 0x3d8   :  { %15451 = vst [vmem:[#allocation28_spill] sm:$0xff] %v12933_v49 }
 0x3d9   :  { %9539 = vmatmul.mubr.msk.bf16.gmra.mrb[140].mxu0 %vm192_vm1, %v3926_v8  ;;  %v7961_v8 = vld [vmem:[%s15240_s0 + $0x229] sm:$0xff] }
 0x3da   :  { %9566 = vmatprep.mubr.msk.bf16.mxu0 %vm10450_vm2, %v15395_v19  ;;  %v13032_v10 = vpack.c.bf16 %v7961_v8, %v7960_v53 }
 0x3dc   :  { %15459 = vst [vmem:[#allocation34_spill] sm:$0xff] %v13032_v10 }
 0x3dd   :  { %9725 = vmatmul.mubr.msk.bf16.gmra.mrb[208].mxu1 %vm192_vm1, %v12467_v18  ;;  %v7934_v18 = vld [vmem:[%s15240_s0 + $0x230] sm:$0xff] }
 0x3de   :  { %9728 = vmatprep.mubr.msk.bf16.mxu1 %vm10450_vm2, %v15395_v19  ;;  %v12949_v55 = vpack.c.bf16 %v7935_v0, %v7934_v18 }
 0x3e0   :  { %15452 = vst [vmem:[#allocation16_spill] sm:$0xff] %v12949_v55  ;;  %v12976_v50 = vpop.f32.mrb[104].mxu1 }
 0x3e1   :  { %9567 = vmatmul.mubr.msk.bf16.vlgmr.msra.gmra.mrb[144].mxu0 %vm192_vm1, %v12915_v48  ;;  %v9502_v24 = vpop.f32.mrb[105].mxu1 }
 0x3e2   :  { %9609 = vmatpush3.bf16.msra.mxu0 %v10700_v57  ;;  %9570 = vmatprep.mubr.msk.bf16.mxu0 %vm10450_vm2, %v15395_v19  ;;  %v12980_v17 = vpop.f32.mrb[106].mxu1  ;;  %v7962_v24 = vld [vmem:[%s15240_s0 + $0x231] sm:$0xff] }
 0x3e3   :  { %9652 = vmatprep.subr.bf16.mxu0 %v15395_v19  ;;  %v9503_v60 = vpop.f32.mrb[107].mxu1 }
 0x3e4   :  { %v7963_v60 = vld [vmem:[%s15240_s0 + $0x239] sm:$0xff] }
 0x3e5   :  { %9729 = vmatmul.mubr.msk.bf16.gmra.mrb[212].mxu1 %vm192_vm1, %v12485_v11  ;;  %v7936_v11 = vld [vmem:[%s15240_s0 + $0x240] sm:$0xff] }
 0x3e6   :  { %9732 = vmatprep.mubr.msk.bf16.mxu1 %vm10450_vm2, %v15395_v19  ;;  %v12965_v37 = vpack.c.bf16 %v7937_v51, %v7936_v11 }
 0x3e8   :  { %15453 = vst [vmem:[#allocation29_spill] sm:$0xff] %v12965_v37  ;;  %v12984_v12 = vpop.f32.mrb[108].mxu1 }
 0x3e9   :  { %9571 = vmatmul.mubr.msk.bf16.gmra.mrb[148].mxu0 %vm192_vm1, %v12933_v49 }
 0x3ea   :  { %9574 = vmatprep.mubr.msk.bf16.mxu0 %vm10450_vm2, %v15395_v19 }
 0x3ed   :  { %9733 = vmatmul.mubr.msk.bf16.gmra.mrb[216].mxu1 %vm192_vm1, %v12503_v22  ;;  %v7938_v22 = vld [vmem:[%s15240_s0 + $0x250] sm:$0xff] }
 0x3ee   :  { %9736 = vmatprep.mubr.msk.bf16.mxu1 %vm10450_vm2, %v15395_v19  ;;  %v12982_v26 = vpack.c.bf16 %v7938_v22, %v7938_v22 }
 0x3f0   :  { %15454 = vst [vmem:[#allocation30_spill] sm:$0xff] %v12982_v26 }
 0x3f1   :  { %9575 = vmatmul.mubr.msk.bf16.gmra.mrb[152].mxu0 %vm192_vm1, %v12949_v55 }
 0x3f2   :  { %9578 = vmatprep.mubr.msk.bf16.mxu0 %vm10450_vm2, %v15395_v19 }
 0x3f5   :  { %9737 = vmatmul.mubr.msk.bf16.gmra.mrb[220].mxu1 %vm192_vm1, %v12515_v5  ;;  %v9506_v5 = vpop.f32.mrb[109].mxu1 }
 0x3f6   :  { %9764 = vmatprep.mubr.msk.bf16.mxu1 %vm10450_vm2, %v15395_v19  ;;  %v12986_v43 = vpop.f32.mrb[110].mxu1  ;;  %v13052_v5 = vpack.c.bf16 %v7963_v60, %v7962_v24  ;;  %v8048_v24 = vld [vmem:[%s15240_s0 + $0x269] sm:$0xff]  ;;  %v8049_v60 = vld [vmem:[%s15240_s0 + $0x271] sm:$0xff] }
 0x3f7   :  { %v9507_v36 = vpop.f32.mrb[111].mxu1 }
 0x3f8   :  { %v13000_v15 = vpop.f32.mrb[112].mxu1  ;;  %15460 = vst [vmem:[#allocation35_spill] sm:$0xff] %v13052_v5 }
 0x3f9   :  { %9579 = vmatmul.mubr.msk.bf16.gmra.mrb[156].mxu0 %vm192_vm1, %v12965_v37  ;;  %v9510_v6 = vpop.f32.mrb[113].mxu1 }
 0x3fa   :  { %9582 = vmatprep.mubr.msk.bf16.mxu0 %vm10450_vm2, %v15395_v19  ;;  %v13005_v45 = vpop.f32.mrb[114].mxu1 }
 0x3fb   :  { %v9511_v25 = vpop.f32.mrb[115].mxu1 }
 0x3fc   :  { %v13010_v7 = vpop.f32.mrb[116].mxu1  ;;  %v7964_v25 = vld [vmem:[%s15240_s0 + $0x241] sm:$0xff] }
 0x3fd   :  { %9765 = vmatmul.mubr.msk.bf16.vlgmr.msra.gmra.mrb[224].mxu1 %vm192_vm1, %v12644_v62  ;;  %15456 = vst [vmem:[#allocation31_spill] sm:$0xff] %v13010_v7  ;;  %v9514_v2 = vpop.f32.mrb[117].mxu1 }
 0x3fe   :  { %9768 = vmatprep.mubr.msk.bf16.mxu1 %vm10450_vm2, %v15395_v19  ;;  %9807 = vmatpush3.bf16.msra.mxu1 %v10700_v57  ;;  %v13012_v61 = vpop.f32.mrb[118].mxu1  ;;  %v7965_v2 = vld [vmem:[%s15240_s0 + $0x249] sm:$0xff] }
 0x3ff   :  { %9850 = vmatprep.subr.bf16.mxu1 %v15395_v19  ;;  %15457 = vst [vmem:[#allocation32_spill] sm:$0xff] %v13012_v61  ;;  %v9515_v20 = vpop.f32.mrb[119].mxu1 }
 0x400   :  { %v13027_v3 = vpop.f32.mrb[120].mxu1  ;;  %v13072_v20 = vpack.c.bf16 %v7965_v2, %v7964_v25 }
 0x401   :  { %9583 = vmatmul.mubr.msk.bf16.gmra.mrb[160].mxu0 %vm192_vm1, %v12982_v26  ;;  %15458 = vst [vmem:[#allocation33_spill] sm:$0xff] %v13027_v3  ;;  %v9518_v4 = vpop.f32.mrb[121].mxu1 }
 0x402   :  { %9610 = vmatprep.mubr.msk.bf16.mxu0 %vm10450_vm2, %v15395_v19  ;;  %v4026_v63 = vpop.f32.mrb[122].mxu1  ;;  %15461 = vst [vmem:[#allocation36_spill] sm:$0xff] %v13072_v20 }
 0x403   :  { %v9519_v18 = vpop.f32.mrb[123].mxu1 }
 0x404   :  { %v7966_v18 = vld [vmem:[%s15240_s0 + $0x251] sm:$0xff] }
 0x405   :  { %9769 = vmatmul.mubr.msk.bf16.gmra.mrb[228].mxu1 %vm192_vm1, %v12664_v23 }
 0x406   :  { %9772 = vmatprep.mubr.msk.bf16.mxu1 %vm10450_vm2, %v15395_v19 }
 0x408   :  { %v13034_v0 = vpop.f32.mrb[124].mxu1 }
 0x409   :  { %9611 = vmatmul.mubr.msk.bf16.vlgmr.msra.gmra.mrb[164].mxu0 %vm192_vm1, %v13008_v44  ;;  %v9546_v11 = vpop.f32.mrb[125].mxu1 }
 0x40a   :  { %9653 = vmatpush3.bf16.msra.mxu0 %v15423_v54  ;;  %9614 = vmatprep.mubr.msk.bf16.mxu0 %vm10450_vm2, %v15395_v19  ;;  %v13036_v51 = vpop.f32.mrb[126].mxu1  ;;  %v13089_v11 = vpack.c.bf16 %v7966_v18, %v7966_v18 }
 0x40b   :  { %9696 = vmatprep.subr.bf16.mxu0 %v15395_v19  ;;  %v9547_v22 = vpop.f32.mrb[127].mxu1 }
 0x40c   :  { %15462 = vst [vmem:[#allocation37_spill] sm:$0xff] %v13089_v11 }
 0x40d   :  { %9773 = vmatmul.mubr.msk.bf16.gmra.mrb[232].mxu1 %vm192_vm1, %v12682_v21 }
 0x40e   :  { %9776 = vmatprep.mubr.msk.bf16.mxu1 %vm10450_vm2, %v15395_v19 }
 0x410   :  { %v13054_v36 = vpop.f32.mrb[128].mxu1 }
 0x411   :  { %9615 = vmatmul.mubr.msk.bf16.gmra.mrb[168].mxu0 %vm192_vm1, %v13032_v10  ;;  %v9550_v39 = vpop.f32.mrb[129].mxu1 }
 0x412   :  { %9618 = vmatprep.mubr.msk.bf16.mxu0 %vm10450_vm2, %v15395_v19  ;;  %v13056_v1 = vpop.f32.mrb[130].mxu1 }
 0x413   :  { %v9551_v6 = vpop.f32.mrb[131].mxu1 }
 0x414   :  { %v13099_v6 = vpack.c.bf16 %v8049_v60, %v8048_v24  ;;  %v8050_v60 = vld [vmem:[%s15240_s0 + $0x279] sm:$0xff] }
 0x415   :  { %9777 = vmatmul.mubr.msk.bf16.gmra.mrb[236].mxu1 %vm192_vm1, %v12700_v59 }
 0x416   :  { %9780 = vmatprep.mubr.msk.bf16.mxu1 %vm10450_vm2, %v15395_v19  ;;  %15464 = vst [vmem:[#allocation39_spill] sm:$0xff] %v13099_v6 }
 0x418   :  { %v13074_v53 = vpop.f32.mrb[132].mxu1 }
 0x419   :  { %9619 = vmatmul.mubr.msk.bf16.gmra.mrb[172].mxu0 %vm192_vm1, %v13052_v5  ;;  %v9554_v8 = vpop.f32.mrb[133].mxu1 }
 0x41a   :  { %9622 = vmatprep.mubr.msk.bf16.mxu0 %vm10450_vm2, %v15395_v19  ;;  %v13076_v4 = vpop.f32.mrb[134].mxu1  ;;  %v13112_v8 = vld [vmem:[%s15240_s0 + $0x1c1] sm:$0xff] }
 0x41b   :  { %v9555_v63 = vpop.f32.mrb[135].mxu1 }
 0x41c   :  { %v13117_v63 = vld [vmem:[%s15240_s0 + $0x1c9] sm:$0xff] }
 0x41d   :  { %9781 = vmatmul.mubr.msk.bf16.gmra.mrb[240].mxu1 %vm192_vm1, %v12712_v32  ;;  %v13125_v18 = vpack.c.bf16 %v13117_v63, %v13112_v8 }
 0x41e   :  { %9808 = vmatprep.mubr.msk.bf16.mxu1 %vm10450_vm2, %v15395_v19 }
 0x41f   :  { %15466 = vst [vmem:[#allocation41_spill] sm:$0xff] %v13125_v18 }
 0x420   :  { %v13091_v22 = vpop.f32.mrb[136].mxu1 }
 0x421   :  { %9623 = vmatmul.mubr.msk.bf16.gmra.mrb[176].mxu0 %vm192_vm1, %v13072_v20  ;;  %15463 = vst [vmem:[#allocation38_spill] sm:$0xff] %v13091_v22  ;;  %v9558_v39 = vpop.f32.mrb[137].mxu1 }
 0x422   :  { %9626 = vmatprep.mubr.msk.bf16.mxu0 %vm10450_vm2, %v15395_v19  ;;  %v13101_v25 = vpop.f32.mrb[138].mxu1  ;;  %v8051_v39 = vld [vmem:[%s15240_s0 + $0x281] sm:$0xff] }
 0x423   :  { %15465 = vst [vmem:[#allocation40_spill] sm:$0xff] %v13101_v25  ;;  %v9559_v2 = vpop.f32.mrb[139].mxu1 }
 0x424   :  { %v13135_v2 = vpack.c.bf16 %v8051_v39, %v8050_v60  ;;  %v8052_v60 = vld [vmem:[%s15240_s0 + $0x289] sm:$0xff]  ;;  %v8053_v39 = vld [vmem:[%s15240_s0 + $0x291] sm:$0xff] }
 0x425   :  { %9809 = vmatmul.mubr.msk.bf16.vlgmr.msra.gmra.mrb[244].mxu1 %vm192_vm1, %v13099_v6  ;;  %v13169_v13 = vpack.c.bf16 %v8053_v39, %v8052_v60  ;;  %v8054_v39 = vld [vmem:[%s15240_s0 + $0x299] sm:$0xff] }
 0x426   :  { %9812 = vmatprep.mubr.msk.bf16.mxu1 %vm10450_vm2, %v15395_v19  ;;  %9851 = vmatpush3.bf16.msra.mxu1 %v15423_v54  ;;  %15468 = vst [vmem:[#allocation43_spill] sm:$0xff] %v13135_v2 }
 0x427   :  { %9894 = vmatprep.subr.bf16.mxu1 %v15395_v19  ;;  %15471 = vst [vmem:[#allocation46_spill] sm:$0xff] %v13169_v13 }
 0x428   :  { %v13127_v24 = vpop.f32.mrb[140].mxu1 }
 0x429   :  { %9627 = vmatmul.mubr.msk.bf16.gmra.mrb[180].mxu0 %vm192_vm1, %v13089_v11  ;;  %15467 = vst [vmem:[#allocation42_spill] sm:$0xff] %v13127_v24  ;;  %v9562_v6 = vpop.f32.mrb[141].mxu1 }
 0x42a   :  { %9654 = vmatprep.mubr.msk.bf16.mxu0 %vm10450_vm2, %v15395_v19  ;;  %v4214_v54 = vpop.f32.mrb[142].mxu1 }
 0x42b   :  { %v9563_v9 = vpop.f32.mrb[143].mxu1  ;;  %v13152_v54 = vld [vmem:[%s15240_s0 + $0x1d9] sm:$0xff] }
 0x42c   :  { %v13159_v9 = vpack.c.bf16 %v13152_v54, %v13147_v35 }
 0x42d   :  { %9813 = vmatmul.mubr.msk.bf16.gmra.mrb[248].mxu1 %vm192_vm1, %v13135_v2 }
 0x42e   :  { %9816 = vmatprep.mubr.msk.bf16.mxu1 %vm10450_vm2, %v15395_v19  ;;  %15469 = vst [vmem:[#allocation44_spill] sm:$0xff] %v13159_v9 }
 0x430   :  { %v13161_v6 = vpop.f32.mrb[144].mxu1 }
 0x431   :  { %9655 = vmatmul.mubr.msk.bf16.vlgmr.msra.gmra.mrb[184].mxu0 %vm192_vm1, %v13125_v18  ;;  %15470 = vst [vmem:[#allocation45_spill] sm:$0xff] %v13161_v6  ;;  %v9590_v2 = vpop.f32.mrb[145].mxu1 }
 0x432   :  { %9697 = vmatpush3.bf16.msra.mxu0 %v15431_v40  ;;  %9658 = vmatprep.mubr.msk.bf16.mxu0 %vm10450_vm2, %v15395_v19  ;;  %v13171_v31 = vpop.f32.mrb[146].mxu1  ;;  %v13187_v2 = vld [vmem:[%s15240_s0 + $0x1e9] sm:$0xff] }
 0x433   :  { %9740 = vmatprep.subr.bf16.mxu0 %v15395_v19  ;;  %15472 = vst [vmem:[#allocation47_spill] sm:$0xff] %v13171_v31  ;;  %v9591_v57 = vpop.f32.mrb[147].mxu1  ;;  %v13193_v60 = vpack.c.bf16 %v13187_v2, %v13182_v27 }
 0x435   :  { %9817 = vmatmul.mubr.msk.bf16.gmra.mrb[252].mxu1 %vm192_vm1, %v13169_v13  ;;  %15473 = vst [vmem:[#allocation48_spill] sm:$0xff] %v13193_v60  ;;  %v8055_v13 = vld [vmem:[%s15240_s0 + $0x2a1] sm:$0xff] }
 0x436   :  { %9820 = vmatprep.mubr.msk.bf16.mxu1 %vm10450_vm2, %v15395_v19  ;;  %v13203_v37 = vpack.c.bf16 %v8055_v13, %v8054_v39  ;;  %v13221_v13 = vld [vmem:[%s15240_s0 + $0x1f9] sm:$0xff]  ;;  %v8056_v39 = vld [vmem:[%s15240_s0 + $0x2a9] sm:$0xff] }
 0x437   :  { %v13234_v48 = vpack.c.bf16 %v8056_v39, %v8056_v39 }
 0x438   :  { %v13195_v57 = vpop.f32.mrb[148].mxu1  ;;  %15475 = vst [vmem:[#allocation50_spill] sm:$0xff] %v13203_v37 }
 0x439   :  { %9659 = vmatmul.mubr.msk.bf16.gmra.mrb[188].mxu0 %vm192_vm1, %v13159_v9  ;;  %15474 = vst [vmem:[#allocation49_spill] sm:$0xff] %v13195_v57  ;;  %v9594_v26 = vpop.f32.mrb[149].mxu1  ;;  %15479 = vst [vmem:[#allocation54_spill] sm:$0xff] %v13234_v48 }
 0x43a   :  { %9662 = vmatprep.mubr.msk.bf16.mxu0 %vm10450_vm2, %v15395_v19  ;;  %v13205_v55 = vpop.f32.mrb[150].mxu1  ;;  %v13227_v26 = vpack.c.bf16 %v13221_v13, %v13216_v14 }
 0x43b   :  { %15476 = vst [vmem:[#allocation51_spill] sm:$0xff] %v13205_v55  ;;  %v9595_v49 = vpop.f32.mrb[151].mxu1 }
 0x43c   :  { %15477 = vst [vmem:[#allocation52_spill] sm:$0xff] %v13227_v26 }
 0x43d   :  { %9821 = vmatmul.mubr.msk.bf16.gmra.mrb[0].mxu1 %vm192_vm1, %v13203_v37 }
 0x43e   :  { %9824 = vmatprep.mubr.msk.bf16.mxu1 %vm10450_vm2, %v15395_v19 }
 0x440   :  { %v13229_v49 = vpop.f32.mrb[152].mxu1 }
 0x441   :  { %9663 = vmatmul.mubr.msk.bf16.gmra.mrb[192].mxu0 %vm192_vm1, %v13193_v60  ;;  %15478 = vst [vmem:[#allocation53_spill] sm:$0xff] %v13229_v49  ;;  %v9598_v37 = vpop.f32.mrb[153].mxu1 }
 0x442   :  { %9666 = vmatprep.mubr.msk.bf16.mxu0 %vm10450_vm2, %v15395_v19  ;;  %v13236_v33 = vpop.f32.mrb[154].mxu1  ;;  %v13249_v37 = vpack.c.bf16 %v7994_v29, %v7994_v29 }
 0x443   :  { %15480 = vst [vmem:[#allocation55_spill] sm:$0xff] %v13236_v33  ;;  %v9599_v60 = vpop.f32.mrb[155].mxu1 }
 0x444   :  { %15481 = vst [vmem:[#allocation56_spill] sm:$0xff] %v13249_v37 }
 0x445   :  { %9825 = vmatmul.mubr.msk.bf16.gmra.mrb[4].mxu1 %vm192_vm1, %v13234_v48  ;;  %v64_v48 = vlaneseq }
 0x446   :  { %9852 = vmatprep.mubr.msk.bf16.mxu1 %vm10450_vm2, %v15395_v19 }
 0x447   :  { %v13265_v29 = vshrl.u32 %v64_v48, 7 }
 0x448   :  { %v13251_v39 = vpop.f32.mrb[156].mxu1 }
 0x449   :  { %9667 = vmatmul.mubr.msk.bf16.gmra.mrb[196].mxu0 %vm192_vm1, %v13227_v26  ;;  %15482 = vst [vmem:[#allocation57_spill] sm:$0xff] %v13251_v39  ;;  %v9602_v9 = vpop.f32.mrb[157].mxu1  ;;  %v74_v48 = vcvt.s32.f32 %v13265_v29  ;;  %v13295_v39 = vadd.s32 16, %v13265_v29 }
 0x44a   :  { %9670 = vmatprep.mubr.msk.bf16.mxu0 %vm10450_vm2, %v15395_v19  ;;  %v13253_v26 = vpop.f32.mrb[158].mxu1 }
 0x44b   :  { %15483 = vst [vmem:[#allocation58_spill] sm:$0xff] %v13253_v26  ;;  %v9603_v60 = vpop.f32.mrb[159].mxu1 }
 0x44d   :  { %9853 = vmatmul.mubr.msk.bf16.vlgmr.msra.gmra.mrb[8].mxu1 %vm192_vm1, %v12804_v16  ;;  %v13274_v16 = vadd.s32 8, %v13265_v29 }
 0x44e   :  { %9856 = vmatprep.mubr.msk.bf16.mxu1 %vm10450_vm2, %v15395_v19  ;;  %9895 = vmatpush3.bf16.msra.mxu1 %v15431_v40 }
 0x44f   :  { %9938 = vmatprep.subr.bf16.mxu1 %v15395_v19 }
 0x450   :  { %v13267_v9 = vpop.f32.mrb[160].mxu1 }
 0x451   :  { %9671 = vmatmul.mubr.msk.bf16.gmra.mrb[200].mxu0 %vm192_vm1, %v13249_v37  ;;  %15484 = vst [vmem:[#allocation59_spill] sm:$0xff] %v13267_v9  ;;  %v9606_v37 = vpop.f32.mrb[161].mxu1 }
 0x452   :  { %9698 = vmatprep.mubr.msk.bf16.mxu0 %vm10450_vm2, %v15395_v19  ;;  %v4436_v26 = vpop.f32.mrb[162].mxu1 }
 0x453   :  { %v9607_v60 = vpop.f32.mrb[163].mxu1 }
 0x454   :  { %v83_v60 = vadd.f32 0.5, %v74_v48 }
 0x455   :  { %9857 = vmatmul.mubr.msk.bf16.gmra.mrb[12].mxu1 %vm192_vm1, %v12826_v34 }
 0x456   :  { %9860 = vmatprep.mubr.msk.bf16.mxu1 %vm10450_vm2, %v15395_v19 }
 0x458   :  { %v13284_v26 = vpop.f32.mrb[164].mxu1 }
 0x459   :  { %9699 = vmatmul.mubr.msk.bf16.vlgmr.msra.gmra.mrb[204].mxu0 %vm192_vm1, %v12536_v42  ;;  %v15318_v42 = vcvt.s32.f32 %v13274_v16  ;;  %15485 = vst [vmem:[#allocation60_spill] sm:$0xff] %v13284_v26  ;;  %v9634_v37 = vpop.f32.mrb[165].mxu1  ;;  %v15325_v26 = vcvt.s32.f32 %v13295_v39 }
 0x45a   :  { %9741 = vmatpush3.bf16.msra.mxu0 %v15437_v30  ;;  %9702 = vmatprep.mubr.msk.bf16.mxu0 %vm10450_vm2, %v15395_v19  ;;  %v13286_v40 = vpop.f32.mrb[166].mxu1  ;;  %v13300_v37 = vld [vmem:[%s15244_s4] ss:$0 sm:$0xff] }
 0x45b   :  { %9784 = vmatprep.subr.bf16.mxu0 %v15395_v19  ;;  %15486 = vst [vmem:[#allocation61_spill] sm:$0xff] %v13286_v40  ;;  %v9635_v34 = vpop.f32.mrb[167].mxu1  ;;  %v84_v9 = vadd.f32 0.5, %v15318_v42 }
 0x45d   :  { %9861 = vmatmul.mubr.msk.bf16.gmra.mrb[16].mxu1 %vm192_vm1, %v12849_v28  ;;  %v13309_v40 = vmul.f32 0.11111111, %v84_v9 }
 0x45e   :  { %9864 = vmatprep.mubr.msk.bf16.mxu1 %vm10450_vm2, %v15395_v19 }
 0x460   :  { %v13312_v33 = vpop.f32.mrb[168].mxu1 }
 0x461   :  { %9703 = vmatmul.mubr.msk.bf16.gmra.mrb[208].mxu0 %vm192_vm1, %v12562_v41  ;;  %v13306_v41 = vmul.f32 0.11111111, %v83_v60  ;;  %15487 = vst [vmem:[#allocation62_spill] sm:$0xff] %v13312_v33  ;;  %v9638_v57 = vpop.f32.mrb[169].mxu1  ;;  %v13317_v60 = vadd.s32 24, %v13265_v29 }
 0x462   :  { %9706 = vmatprep.mubr.msk.bf16.mxu0 %vm10450_vm2, %v15395_v19  ;;  %v13319_v31 = vpop.f32.mrb[170].mxu1 }
 0x463   :  { %v101_v20 = vfloor.f32 %v13306_v41  ;;  %15488 = vst [vmem:[#allocation63_spill] sm:$0xff] %v13319_v31  ;;  %v15490_v5 = vcvt.s32.f32 %v13317_v60 }
 0x464   :  { %v3773_v34 = vpop.f32.mrb[104].mxu0 }
 0x465   :  { %v3774_v28 = vadd.f32 %v13300_v37, %v3773_v34  ;;  %v9480_v42 = vpop.f32.mrb[105].mxu0  ;;  %9865 = vmatmul.mubr.msk.bf16.gmra.mrb[20].mxu1 %vm192_vm1, %v12870_v46  ;;  %v86_v24 = vadd.f32 0.5, %v15490_v5 }
 0x466   :  { %v3776_v18 = vpop.f32.mrb[106].mxu0  ;;  %9868 = vmatprep.mubr.msk.bf16.mxu1 %vm10450_vm2, %v15395_v19 }
 0x467   :  { %v3811_v49 = vmul.f32 1.442695, %v3774_v28  ;;  %v3777_v11 = vadd.f32 %v13300_v37, %v3776_v18  ;;  %v9481_v55 = vpop.f32.mrb[107].mxu0  ;;  %v9639_v28 = vpop.f32.mrb[171].mxu1  ;;  %v15330_v18 = vfloor.f32 %v13309_v40 }
 0x468   :  { %v85_v55 = vadd.f32 0.5, %v15325_v26  ;;  %v13341_v46 = vpop.f32.mrb[172].mxu1 }
 0x469   :  { %10340 = vpow2.f32 %v3811_v49  ;;  %v3813_v9 = vmul.f32 1.442695, %v3777_v11  ;;  %9707 = vmatmul.mubr.msk.bf16.gmra.mrb[212].mxu0 %vm192_vm1, %v12586_v47  ;;  %v110_v11 = vmul.f32 9.0, %v101_v20  ;;  %v13334_v49 = vadd.s32 32, %v13265_v29  ;;  %15489 = vst [vmem:[#allocation64_spill] sm:$0xff] %v13341_v46  ;;  %v9642_v57 = vpop.f32.mrb[173].mxu1 }
 0x46a   :  { %9710 = vmatprep.mubr.msk.bf16.mxu0 %vm10450_vm2, %v15395_v19  ;;  %v111_v34 = vmul.f32 9.0, %v15330_v18  ;;  %v13339_v28 = vmul.f32 0.11111111, %v85_v55  ;;  %v13346_v3 = vpop.f32.mrb[174].mxu1  ;;  %v13354_v55 = vld [vmem:[%s15245_s5 + $0x2] ss:$0 sm:$0xff] }
 0x46b   :  { %10342 = vpow2.f32 %v3813_v9  ;;  %v119_v6 = vsub.f32 %v74_v48, %v110_v11  ;;  %15491 = vst [vmem:[#allocation65_spill] sm:$0xff] %v13346_v3  ;;  %v9643_v5 = vpop.f32.mrb[175].mxu1 }
 0x46c   :  { %v3781_v47 = vpop.f32.mrb[108].mxu0 }
 0x46d   :  { %v3782_v42 = vadd.f32 %v13300_v37, %v3781_v47  ;;  %v9484_v41 = vpop.f32.mrb[109].mxu0  ;;  %v26_v47 = vld [vmem:[%s15245_s5 + $0x1] sm:$0x1]  ;;  %9869 = vmatmul.mubr.msk.bf16.gmra.mrb[24].mxu1 %vm192_vm1, %v12888_v58 }
 0x46e   :  { %v3784_v26 = vpop.f32.mrb[110].mxu0  ;;  %9896 = vmatprep.mubr.msk.bf16.mxu1 %vm10450_vm2, %v15395_v19  ;;  %v132_v41 = vmul.f32 %v13354_v55, %v119_v6  ;;  %vm3887_vm11 = vcmp.gt.f32.partialorder %v26_v47, 0.0 }
 0x46f   :  { %v3815_v31 = vmul.f32 1.442695, %v3782_v42  ;;  %v3785_v9 = vadd.f32 %v13300_v37, %v3784_v26  ;;  %v9485_v33 = vpop.f32.mrb[111].mxu0  ;;  %v15335_v42 = vcvt.s32.f32 %v13334_v49  ;;  %v15492_v26 = vcvt.s32.f32 %v13274_v16 }
 0x470   :  { %v13358_v33 = vadd.s32 40, %v13265_v29  ;;  %v13379_v16 = vmul.f32 0.11111111, %v86_v24  ;;  %v15493_v24 = vfloor.f32 %v13339_v28  ;;  %v13393_v25 = vpop.f32.mrb[176].mxu1 }
 0x471   :  { %10344 = vpow2.f32 %v3815_v31  ;;  %v3817_v48 = vmul.f32 1.442695, %v3785_v9  ;;  %9711 = vmatmul.mubr.msk.bf16.gmra.mrb[216].mxu0 %vm192_vm1, %v12610_v52  ;;  %v120_v11 = vsub.f32 %v15492_v26, %v111_v34  ;;  %v13374_v31 = vld [vmem:[%s15245_s5 + $0x3] ss:$0 sm:$0xff]  ;;  %v87_v5 = vadd.f32 0.5, %v15335_v42  ;;  %15494 = vst [vmem:[#allocation66_spill] sm:$0xff] %v13393_v25 }
 0x472   :  { %9714 = vmatprep.mubr.msk.bf16.mxu0 %vm10450_vm2, %v15395_v19  ;;  %v112_v3 = vmul.f32 9.0, %v15493_v24  ;;  %v3891_v42 = vsub.s32 0, %v13265_v29  ;;  %v13397_v26 = vadd.s32 48, %v13265_v29  ;;  %v9646_v24 = vpop.f32.mrb[177].mxu1  ;;  %v15338_v61 = vfloor.f32 %v13379_v16 }
 0x473   :  { %v13376_v52 = vpop.eup %10340  ;;  %10346 = vpow2.f32 %v3817_v48  ;;  %v145_v48 = vmul.f32 %v13374_v31, %v101_v20  ;;  %v133_v6 = vmul.f32 %v13354_v55, %v120_v11  ;;  %v8024_v11 = vld [vmem:[%s15240_s0 + $0x1b9] sm:$0xff]  ;;  %v13405_v25 = vpop.f32.mrb[178].mxu1  ;;  %v13407_v7 = vmul.f32 0.11111111, %v87_v5 }
 0x474   :  { %v3829_v34 = vadd.f32 1.0, %v13376_v52  ;;  %v3789_v9 = vpop.f32.mrb[112].mxu0  ;;  %15495 = vst [vmem:[#allocation67_spill] sm:$0xff] %v13405_v25  ;;  %v9647_v47 = vpop.f32.mrb[179].mxu1  ;;  %v15498_v24 = vcvt.s32.f32 %v13295_v39 }
 0x475   :  { %v13385_v18 = vpop.eup %10342  ;;  %v3790_v57 = vadd.f32 %v13300_v37, %v3789_v9  ;;  %v9488_v58 = vpop.f32.mrb[113].mxu0  ;;  %9897 = vmatmul.mubr.msk.bf16.vlgmr.msra.gmra.mrb[28].mxu1 %vm192_vm1, %v12644_v62 }
 0x476   :  { %10348 = vrcp.f32 %v3829_v34  ;;  %v3830_v46 = vadd.f32 1.0, %v13385_v18  ;;  %v3792_v10 = vpop.f32.mrb[114].mxu0  ;;  %v10451_v34 = vmov 0   ;;  %9900 = vmatprep.mubr.msk.bf16.mxu1 %vm10450_vm2, %v15395_v19  ;;  %9939 = vmatpush3.bf16.msra.mxu1 %v15437_v30 }
 0x477   :  { %v3819_v9 = vmul.f32 1.442695, %v3790_v57  ;;  %v3793_v58 = vadd.f32 %v13300_v37, %v3792_v10  ;;  %v9489_v20 = vpop.f32.mrb[115].mxu0  ;;  %v3888_v22 = vsel %vm3887_vm11, 1, %v10451_v34  ;;  %v15496_v57 = vcvt.s32.f32 %v13358_v33  ;;  %9982 = vmatprep.subr.bf16.mxu1 %v15395_v19 }
 0x478   :  { %10350 = vrcp.f32 %v3830_v46  ;;  %v13412_v10 = vadd.s32 56, %v13265_v29  ;;  %v15497_v46 = vfloor.f32 %v13309_v40  ;;  %v121_v34 = vsub.f32 %v15498_v24, %v112_v3 }
 0x479   :  { %v88_v44 = vadd.f32 0.5, %v15496_v57  ;;  %10352 = vpow2.f32 %v3819_v9  ;;  %v3821_v20 = vmul.f32 1.442695, %v3793_v58  ;;  %9715 = vmatmul.mubr.msk.bf16.gmra.mrb[220].mxu0 %vm192_vm1, %v12626_v38  ;;  %v5077_v9 = vpack.c.bf16 %v13112_v8, %v8024_v11  ;;  %v13454_v38 = vpop.f32.mrb[180].mxu1 }
 0x47a   :  { %v146_v5 = vmul.f32 %v13374_v31, %v15497_v46  ;;  %9742 = vmatprep.mubr.msk.bf16.mxu0 %vm10450_vm2, %v15395_v19  ;;  %v13432_v40 = vadd.f32 %v145_v48, %v132_v41  ;;  %v13434_v57 = vrot.slane %v3888_v22, %v3891_v42  ;;  %v113_v3 = vmul.f32 9.0, %v15338_v61  ;;  %15503 = vst [vmem:[#allocation71_spill] sm:$0xff] %v13454_v38 }
 0x47b   :  { %v13429_v58 = vpop.eup %10344  ;;  %10354 = vpow2.f32 %v3821_v20  ;;  %v13441_v47 = vmul.f32 0.11111111, %v88_v44  ;;  %v134_v48 = vmul.f32 %v13354_v55, %v121_v34  ;;  %v15502_v24 = vfloor.f32 %v13339_v28 }
 0x47c   :  { %15499 = vst [vmem:[#allocation68_spill] sm:$0xff] %v13432_v40  ;;  %15500 = vst [vmem:[#allocation69_spill] sm:$0xff] %v13434_v57  ;;  %v3831_v39 = vadd.f32 1.0, %v13429_v58  ;;  %v3797_v8 = vpop.f32.mrb[116].mxu0  ;;  %v13447_v42 = vadd.f32 %v146_v5, %v133_v6  ;;  %v15504_v20 = vcvt.s32.f32 %v13397_v26  ;;  %vm3893_vm12 = vcmp.eq.s32.totalorder %v13434_v57, 1 }
 0x47d   :  { %v13444_v46 = vpop.eup %10346  ;;  %v3798_v41 = vadd.f32 %v13300_v37, %v3797_v8  ;;  %v9492_v22 = vpop.f32.mrb[117].mxu0  ;;  %v147_v61 = vmul.f32 %v13374_v31, %v15502_v24  ;;  %v13459_v8 = vadd.s32 64, %v13265_v29  ;;  %v15505_v28 = vcvt.s32.f32 %v13317_v60  ;;  %9901 = vmatmul.mubr.msk.bf16.gmra.mrb[32].mxu1 %vm192_vm1, %v12664_v23 }
 0x47e   :  { %15501 = vst [vmem:[#allocation70_spill] sm:$0xff] %v13447_v42  ;;  %10356 = vrcp.f32 %v3831_v39  ;;  %v3832_v11 = vadd.f32 1.0, %v13444_v46  ;;  %v3800_v44 = vpop.f32.mrb[118].mxu0  ;;  %v89_v30 = vadd.f32 0.5, %v15504_v20  ;;  %v9650_v22 = vpop.f32.mrb[181].mxu1  ;;  %v15506_v38 = vfloor.f32 %v13407_v7  ;;  %9904 = vmatprep.mubr.msk.bf16.mxu1 %vm10450_vm2, %v15395_v19 }
 0x47f   :  { %v3823_v6 = vmul.f32 1.442695, %v3798_v41  ;;  %v3801_v5 = vadd.f32 %v13300_v37, %v3800_v44  ;;  %v9493_v34 = vpop.f32.mrb[119].mxu0  ;;  %v122_v39 = vsub.f32 %v15505_v28, %v113_v3  ;;  %v4656_v62 = vpop.f32.mrb[182].mxu1  ;;  %v15341_v20 = vfloor.f32 %v13441_v47 }
 0x480   :  { %v10349_v24 = vpop.eup %10348  ;;  %10358 = vrcp.f32 %v3832_v11  ;;  %v114_v25 = vmul.f32 9.0, %v15506_v38  ;;  %v15507_v29 = vcvt.s32.f32 %v13412_v10  ;;  %v5078_v60 = vpack.c.bf16 %v13147_v35, %v13117_v63  ;;  %v9651_v62 = vpop.f32.mrb[183].mxu1  ;;  %v13479_v38 = vld [vmem:[%s15245_s5] ss:$0 sm:$0xff] }
 0x481   :  { %v3847_v44 = vmul.f32 %v10349_v24, %v13376_v52  ;;  %10360 = vpow2.f32 %v3823_v6  ;;  %v3825_v34 = vmul.f32 1.442695, %v3801_v5  ;;  %9743 = vmatmul.mubr.msk.bf16.vlgmr.msra.gmra.mrb[224].mxu0 %vm192_vm1, %v5077_v9  ;;  %v13484_v11 = vadd.f32 %v147_v61, %v134_v48 }
 0x482   :  { %v90_v41 = vadd.f32 0.5, %v15507_v29  ;;  %v10351_v3 = vpop.eup %10350  ;;  %9785 = vmatpush3.bf16.msra.mxu0 %v10697_v56  ;;  %9746 = vmatprep.mubr.msk.bf16.mxu0 %vm10450_vm2, %v15395_v19  ;;  %v15509_v9 = vfloor.f32 %v13379_v16  ;;  %v13489_v63 = vmul.f32 0.11111111, %v89_v30  ;;  %v135_v16 = vmul.f32 %v13354_v55, %v122_v39 }
 0x483   :  { %15508 = vst [vmem:[#allocation72_spill] sm:$0xff] %v13484_v11  ;;  %v13492_v5 = vpop.eup %10352  ;;  %v3848_v22 = vmul.f32 %v10351_v3, %v13385_v18  ;;  %10362 = vpow2.f32 %v3825_v34  ;;  %9828 = vmatprep.subr.bf16.mxu0 %v15395_v19  ;;  %v3856_v61 = vadd.f32 %v3847_v44, %v13432_v40  ;;  %v15510_v28 = vcvt.s32.f32 %v13334_v49 }
 0x484   :  { %v148_v35 = vmul.f32 %v13374_v31, %v15509_v9  ;;  %v3833_v48 = vadd.f32 1.0, %v13492_v5  ;;  %v3805_v30 = vpop.f32.mrb[120].mxu0  ;;  %v115_v29 = vmul.f32 9.0, %v15341_v20  ;;  %v13505_v62 = vmul.f32 0.11111111, %v90_v41 }
 0x485   :  { %v123_v24 = vsub.f32 %v15510_v28, %v114_v25  ;;  %v13507_v34 = vpop.eup %10354  ;;  %v3878_v3 = vmul.f32 %v13376_v52, %v13479_v38  ;;  %v3806_v44 = vadd.f32 %v13300_v37, %v3805_v30  ;;  %v9496_v9 = vpop.f32.mrb[121].mxu0  ;;  %v3869_v39 = vmul.f32 %v13479_v38, %v3856_v61  ;;  %9905 = vmatmul.mubr.msk.bf16.gmra.mrb[36].mxu1 %vm192_vm1, %v12682_v21 }
 0x486   :  { %v3857_v6 = vadd.f32 %v3848_v22, %v13447_v42  ;;  %10364 = vrcp.f32 %v3833_v48  ;;  %v3834_v25 = vadd.f32 1.0, %v13507_v34  ;;  %v3808_v49 = vpop.f32.mrb[122].mxu0  ;;  %v13515_v28 = vpop.f32.mrb[184].mxu1  ;;  %v15511_v20 = vcvt.s32.f32 %v13459_v8  ;;  %9908 = vmatprep.mubr.msk.bf16.mxu1 %vm10450_vm2, %v15395_v19 }
 0x487   :  { %v3879_v52 = vmul.f32 %v13385_v18, %v13479_v38  ;;  %v3827_v37 = vmul.f32 1.442695, %v3806_v44  ;;  %v9497_v30 = vpop.f32.mrb[123].mxu0  ;;  %v9678_v9 = vpop.f32.mrb[185].mxu1  ;;  %v3894_v22 = vsel %vm3893_vm12, %v3878_v3, %v3869_v39  ;;  %v15512_v41 = vcvt.s32.f32 %v13358_v33 }
 0x488   :  { %v91_v40 = vadd.f32 0.5, %v15511_v20  ;;  %v3870_v61 = vmul.f32 %v13479_v38, %v3857_v6  ;;  %v10357_v48 = vpop.eup %10356  ;;  %10366 = vrcp.f32 %v3834_v25  ;;  %v13525_v49 = vpop.f32.mrb[186].mxu1  ;;  %3903 = vst [vmem:[#allocation2] sm:$0xff] %v3894_v22  ;;  %v108_v20 = vfloor.f32 %v13505_v62 }
 0x489   :  { %v124_v42 = vsub.f32 %v15512_v41, %v115_v29  ;;  %v3849_v18 = vmul.f32 %v10357_v48, %v13429_v58  ;;  %10368 = vpow2.f32 %v3827_v37  ;;  %9747 = vmatmul.mubr.msk.bf16.gmra.mrb[228].mxu0 %vm192_vm1, %v5078_v60  ;;  %v9679_v3 = vpop.f32.mrb[187].mxu1  ;;  %v13536_v44 = vadd.f32 %v148_v35, %v135_v16 }
 0x48a   :  { %v3895_v6 = vsel %vm3893_vm12, %v3879_v52, %v3870_v61  ;;  %v10359_v39 = vpop.eup %10358  ;;  %9750 = vmatprep.mubr.msk.bf16.mxu0 %vm10450_vm2, %v15395_v19  ;;  %v136_v33 = vmul.f32 %v13354_v55, %v123_v24  ;;  %v15514_v60 = vfloor.f32 %v13407_v7  ;;  %v13546_v25 = vmul.f32 0.11111111, %v91_v40 }
 0x48b   :  { %15513 = vst [vmem:[#allocation73_spill] sm:$0xff] %v13536_v44  ;;  %3904 = vst [vmem:[#allocation2 + $0x8] sm:$0xff] %v3895_v6  ;;  %v13548_v41 = vpop.eup %10360  ;;  %v3850_v35 = vmul.f32 %v10359_v39, %v13444_v46  ;;  %v5079_v16 = vpack.c.bf16 %v13182_v27, %v13152_v54  ;;  %v3858_v52 = vadd.f32 %v3849_v18, %v13484_v11  ;;  %v15515_v37 = vfloor.f32 %v13489_v63  ;;  %v13571_v39 = vpop.f32.mrb[188].mxu1 }
 0x48c   :  { %v149_v29 = vmul.f32 %v13374_v31, %v15514_v60  ;;  %v3835_v24 = vadd.f32 1.0, %v13548_v41  ;;  %v4078_v9 = vpop.f32.mrb[124].mxu0  ;;  %v137_v7 = vmul.f32 %v13354_v55, %v124_v42  ;;  %v15516_v40 = vfloor.f32 %v13441_v47 }
 0x48d   :  { %v116_v30 = vmul.f32 9.0, %v15515_v37  ;;  %v117_v61 = vmul.f32 9.0, %v108_v20  ;;  %v13563_v48 = vpop.eup %10362  ;;  %v3880_v27 = vmul.f32 %v13429_v58, %v13479_v38  ;;  %v4079_v54 = vadd.f32 %v4078_v9, %v12976_v50  ;;  %v9524_v18 = vpop.f32.mrb[125].mxu0  ;;  %9909 = vmatmul.mubr.msk.bf16.gmra.mrb[40].mxu1 %vm192_vm1, %v12700_v59 }
 0x48e   :  { %v150_v22 = vmul.f32 %v13374_v31, %v15516_v40  ;;  %v3871_v3 = vmul.f32 %v13479_v38, %v3858_v52  ;;  %v3859_v6 = vadd.f32 %v3850_v35, %v13536_v44  ;;  %10370 = vrcp.f32 %v3835_v24  ;;  %v4081_v42 = vpop.f32.mrb[126].mxu0  ;;  %v9682_v9 = vpop.f32.mrb[189].mxu1  ;;  %9912 = vmatprep.mubr.msk.bf16.mxu1 %vm10450_vm2, %v15395_v19 }
 0x48f   :  { %v3836_v47 = vadd.f32 1.0, %v13563_v48  ;;  %v13573_v60 = vadd.f32 %v149_v29, %v136_v33  ;;  %v109_v37 = vfloor.f32 %v13546_v25  ;;  %v4082_v40 = vadd.f32 %v4081_v42, %v12980_v17  ;;  %v9525_v50 = vpop.f32.mrb[127].mxu0  ;;  %v13586_v29 = vpop.f32.mrb[190].mxu1 }
 0x490   :  { %v13578_v58 = vadd.f32 %v13034_v0, %v4079_v54  ;;  %v3896_v35 = vsel %vm3893_vm12, %v3880_v27, %v3871_v3  ;;  %v15518_v52 = vcvt.s32.f32 %v13397_v26  ;;  %v10365_v18 = vpop.eup %10364  ;;  %v3881_v33 = vmul.f32 %v13444_v46, %v13479_v38  ;;  %v9683_v26 = vpop.f32.mrb[191].mxu1 }
 0x491   :  { %15517 = vst [vmem:[#allocation74_spill] sm:$0xff] %v13573_v60  ;;  %10372 = vrcp.f32 %v3836_v47  ;;  %3905 = vst [vmem:[#allocation2 + $0x10] sm:$0xff] %v3896_v35  ;;  %v3872_v17 = vmul.f32 %v13479_v38, %v3859_v6  ;;  %v15519_v0 = vcvt.s32.f32 %v13412_v10  ;;  %v3851_v42 = vmul.f32 %v10365_v18, %v13492_v5  ;;  %9751 = vmatmul.mubr.msk.bf16.gmra.mrb[232].mxu0 %vm192_vm1, %v5079_v16 }
 0x492   :  { %v125_v24 = vsub.f32 %v15518_v52, %v116_v30  ;;  %v13593_v27 = vadd.f32 %v13036_v51, %v4082_v40  ;;  %v13598_v46 = vadd.f32 %v150_v22, %v137_v7  ;;  %v10367_v30 = vpop.eup %10366  ;;  %9754 = vmatprep.mubr.msk.bf16.mxu0 %vm10450_vm2, %v15395_v19  ;;  %v118_v51 = vmul.f32 9.0, %v109_v37 }
 0x493   :  { %v126_v54 = vsub.f32 %v15519_v0, %v117_v61  ;;  %v3897_v10 = vsel %vm3893_vm12, %v3881_v33, %v3872_v17  ;;  %v13608_v16 = vpop.eup %10368  ;;  %v3852_v61 = vmul.f32 %v10367_v30, %v13507_v34  ;;  %v3860_v7 = vadd.f32 %v3851_v42, %v13573_v60  ;;  %v13628_v0 = vpop.f32.mrb[192].mxu1 }
 0x494   :  { %15520 = vst [vmem:[#allocation75_spill] sm:$0xff] %v13598_v46  ;;  %3906 = vst [vmem:[#allocation2 + $0x18] sm:$0xff] %v3897_v10  ;;  %v138_v22 = vmul.f32 %v13354_v55, %v125_v24  ;;  %v15521_v3 = vfloor.f32 %v13489_v63  ;;  %v3837_v47 = vadd.f32 1.0, %v13608_v16  ;;  %v4086_v40 = vpop.f32.mrb[128].mxu0  ;;  %v5080_v50 = vpack.c.bf16 %v13216_v14, %v13187_v2 }
 0x495   :  { %v139_v9 = vmul.f32 %v13354_v55, %v126_v54  ;;  %v152_v35 = vmul.f32 %v13374_v31, %v108_v20  ;;  %v3882_v52 = vmul.f32 %v13492_v5, %v13479_v38  ;;  %v4087_v24 = vadd.f32 %v4086_v40, %v12984_v12  ;;  %v9528_v63 = vpop.f32.mrb[129].mxu0  ;;  %v9686_v54 = vpop.f32.mrb[193].mxu1  ;;  %9913 = vmatmul.mubr.msk.bf16.gmra.mrb[44].mxu1 %vm192_vm1, %v12712_v32 }
 0x496   :  { %v151_v6 = vmul.f32 %v13374_v31, %v15521_v3  ;;  %v3873_v18 = vmul.f32 %v13479_v38, %v3860_v7  ;;  %v3861_v33 = vadd.f32 %v3852_v61, %v13598_v46  ;;  %10374 = vrcp.f32 %v3837_v47  ;;  %v4089_v17 = vpop.f32.mrb[130].mxu0  ;;  %v13642_v10 = vpop.f32.mrb[194].mxu1  ;;  %9940 = vmatprep.mubr.msk.bf16.mxu1 %vm10450_vm2, %v15395_v19  ;;  %v15555_v46 = vld [vmem:[#allocation63_spill] sm:$0xff] }
 0x497   :  { %v15522_v14 = vcvt.s32.f32 %v13459_v8  ;;  %v4090_v62 = vadd.f32 %v4089_v17, %v12986_v43  ;;  %v13634_v20 = vadd.f32 %v13054_v36, %v4087_v24  ;;  %v9529_v5 = vpop.f32.mrb[131].mxu0  ;;  %v3883_v30 = vmul.f32 %v13507_v34, %v13479_v38 }
 0x498   :  { %v3898_v12 = vsel %vm3893_vm12, %v3882_v52, %v3873_v18  ;;  %v13638_v42 = vadd.f32 %v151_v6, %v138_v22  ;;  %v10371_v26 = vpop.eup %10370  ;;  %v3874_v8 = vmul.f32 %v13479_v38, %v3861_v33  ;;  %v13652_v61 = vadd.f32 %v152_v35, %v139_v9 }
 0x499   :  { %v127_v2 = vsub.f32 %v15522_v14, %v118_v51  ;;  %3907 = vst [vmem:[#allocation2 + $0x20] sm:$0xff] %v3898_v12  ;;  %v3853_v43 = vmul.f32 %v10371_v26, %v13548_v41  ;;  %v13647_v36 = vadd.f32 %v13056_v1, %v4090_v62  ;;  %9755 = vmatmul.mubr.msk.bf16.gmra.mrb[236].mxu0 %vm192_vm1, %v5080_v50  ;;  %v9687_v51 = vpop.f32.mrb[195].mxu1  ;;  %v15527_v12 = vld [vmem:[#allocation31_spill] sm:$0xff] }
 0x49a   :  { %15523 = vst [vmem:[#allocation76_spill] sm:$0xff] %v13638_v42  ;;  %15524 = vst [vmem:[#allocation77_spill] sm:$0xff] %v13652_v61  ;;  %9758 = vmatprep.mubr.msk.bf16.mxu0 %vm10450_vm2, %v15395_v19  ;;  %v3899_v34 = vsel %vm3893_vm12, %v3883_v30, %v3874_v8  ;;  %v153_v22 = vmul.f32 %v13374_v31, %v109_v37  ;;  %v5081_v40 = vpack.c.bf16 %v13221_v13, %v13221_v13  ;;  %v13675_v52 = vpop.f32.mrb[196].mxu1 }
 0x49b   :  { %v10373_v7 = vpop.eup %10372  ;;  %v140_v1 = vmul.f32 %v13354_v55, %v127_v2  ;;  %3908 = vst [vmem:[#allocation2 + $0x28] sm:$0xff] %v3899_v34  ;;  %v3862_v6 = vadd.f32 %v3853_v43, %v13638_v42  ;;  %v3884_v50 = vmul.f32 %v13548_v41, %v13479_v38  ;;  %v3885_v31 = vmul.f32 %v13563_v48, %v13479_v38 }
 0x49c   :  { %v3854_v3 = vmul.f32 %v10373_v7, %v13563_v48  ;;  %v4094_v47 = vpop.f32.mrb[132].mxu0  ;;  %v3886_v54 = vmul.f32 %v13608_v16, %v13479_v38  ;;  %v15528_v7 = vld [vmem:[#allocation32_spill] sm:$0xff] }
 0x49d   :  { %v4095_v9 = vadd.f32 %v4094_v47, %v13000_v15  ;;  %v9532_v35 = vpop.f32.mrb[133].mxu0  ;;  %v3875_v55 = vmul.f32 %v13479_v38, %v3862_v6  ;;  %v13677_v24 = vadd.f32 %v153_v22, %v140_v1  ;;  %v9690_v15 = vpop.f32.mrb[197].mxu1  ;;  %v15529_v1 = vld [vmem:[#allocation38_spill] sm:$0xff] }
 0x49e   :  { %v3863_v25 = vadd.f32 %v3854_v3, %v13652_v61  ;;  %v4097_v37 = vpop.f32.mrb[134].mxu0  ;;  %v13686_v14 = vpop.f32.mrb[198].mxu1  ;;  %v15532_v35 = vld [vmem:[#allocation11_spill] sm:$0xff] }
 0x49f   :  { %15525 = vst [vmem:[#allocation78_spill] sm:$0xff] %v13677_v24  ;;  %v4098_v13 = vadd.f32 %v4097_v37, %v13005_v45  ;;  %v13681_v63 = vadd.f32 %v13074_v53, %v4095_v9  ;;  %v9533_v41 = vpop.f32.mrb[135].mxu0  ;;  %v3900_v18 = vsel %vm3893_vm12, %v3884_v50, %v3875_v55  ;;  %v15526_v45 = vld [vmem:[#allocation18_spill] sm:$0xff]  ;;  %v9691_v53 = vpop.f32.mrb[199].mxu1 }
 0x4a0   :  { %v3876_v33 = vmul.f32 %v13479_v38, %v3863_v25  ;;  %v10375_v17 = vpop.eup %10374  ;;  %3909 = vst [vmem:[#allocation2 + $0x30] sm:$0xff] %v3900_v18  ;;  %9941 = vmatmul.mubr.msk.bf16.vlgmr.msra.gmra.mrb[48].mxu1 %vm192_vm1, %v15526_v45  ;;  %v13708_v51 = vpop.f32.mrb[200].mxu1 }
 0x4a1   :  { %v3855_v48 = vmul.f32 %v10375_v17, %v13608_v16  ;;  %v13690_v2 = vadd.f32 %v13076_v4, %v4098_v13  ;;  %9759 = vmatmul.mubr.msk.bf16.gmra.mrb[240].mxu0 %vm192_vm1, %v5081_v40  ;;  %9944 = vmatprep.mubr.msk.bf16.mxu1 %vm10450_vm2, %v15395_v19  ;;  %v9694_v6 = vpop.f32.mrb[201].mxu1  ;;  %v15530_v16 = vld [vmem:[#allocation40_spill] sm:$0xff] }
 0x4a2   :  { %v3901_v62 = vsel %vm3893_vm12, %v3885_v31, %v3876_v33  ;;  %9786 = vmatprep.mubr.msk.bf16.mxu0 %vm10450_vm2, %v15395_v19  ;;  %9983 = vmatpush3.bf16.msra.mxu1 %v10697_v56  ;;  %v4876_v40 = vpop.f32.mrb[202].mxu1  ;;  %v15533_v31 = vld [vmem:[#allocation33_spill] sm:$0xff]  ;;  %v15534_v33 = vld [vmem:[#allocation42_spill] sm:$0xff]  ;;  %v15537_v6 = vld [vmem:[#allocation47_spill] sm:$0xff] }
 0x4a3   :  { %3910 = vst [vmem:[#allocation2 + $0x38] sm:$0xff] %v3901_v62  ;;  %v3864_v4 = vadd.f32 %v3855_v48, %v13677_v24  ;;  %10026 = vmatprep.subr.bf16.mxu1 %v15395_v19  ;;  %v9695_v9 = vpop.f32.mrb[203].mxu1  ;;  %v15535_v62 = vld [vmem:[#allocation35_spill] sm:$0xff]  ;;  %v15538_v40 = vld [vmem:[#allocation36_spill] sm:$0xff]  ;;  %v15552_v24 = vld [vmem:[#allocation61_spill] sm:$0xff] }
 0x4a4   :  { %v4102_v5 = vpop.f32.mrb[136].mxu0 }
 0x4a5   :  { %v4103_v26 = vadd.f32 %v4102_v5, %v15527_v12  ;;  %v9536_v30 = vpop.f32.mrb[137].mxu0  ;;  %v3877_v8 = vmul.f32 %v13479_v38, %v3864_v4  ;;  %v15531_v38 = vld [vmem:[#allocation34_spill] sm:$0xff] }
 0x4a6   :  { %v4105_v43 = vpop.f32.mrb[138].mxu0 }
 0x4a7   :  { %v4106_v34 = vadd.f32 %v4105_v43, %v15528_v7  ;;  %v13712_v22 = vadd.f32 %v15529_v1, %v4103_v26  ;;  %v9537_v3 = vpop.f32.mrb[139].mxu0  ;;  %v3902_v47 = vsel %vm3893_vm12, %v3886_v54, %v3877_v8  ;;  %v15536_v7 = vld [vmem:[#allocation45_spill] sm:$0xff] }
 0x4a8   :  { %3911 = vst [vmem:[#allocation2 + $0x40] sm:$0xff] %v3902_v47  ;;  %9945 = vmatmul.mubr.msk.bf16.gmra.mrb[52].mxu1 %vm192_vm1, %v15531_v38  ;;  %v13729_v25 = vpop.f32.mrb[204].mxu1 }
 0x4a9   :  { %v13717_v50 = vadd.f32 %v15530_v16, %v4106_v34  ;;  %9787 = vmatmul.mubr.msk.bf16.vlgmr.msra.gmra.mrb[244].mxu0 %vm192_vm1, %v15526_v45  ;;  %9948 = vmatprep.mubr.msk.bf16.mxu1 %vm10450_vm2, %v15395_v19  ;;  %v9722_v41 = vpop.f32.mrb[205].mxu1 }
 0x4aa   :  { %9829 = vmatpush3.bf16.msra.mxu0 %v15532_v35  ;;  %9790 = vmatprep.mubr.msk.bf16.mxu0 %vm10450_vm2, %v15395_v19  ;;  %v13732_v18 = vpop.f32.mrb[206].mxu1  ;;  %v15539_v41 = vld [vmem:[#allocation49_spill] sm:$0xff] }
 0x4ab   :  { %9872 = vmatprep.subr.bf16.mxu0 %v15395_v19  ;;  %v9723_v53 = vpop.f32.mrb[207].mxu1 }
 0x4ac   :  { %v4110_v55 = vpop.f32.mrb[140].mxu0  ;;  %v15540_v53 = vld [vmem:[#allocation51_spill] sm:$0xff] }
 0x4ad   :  { %v4111_v37 = vadd.f32 %v4110_v55, %v15533_v31  ;;  %v9540_v13 = vpop.f32.mrb[141].mxu0 }
 0x4ae   :  { %v4113_v15 = vpop.f32.mrb[142].mxu0 }
 0x4af   :  { %v13735_v17 = vadd.f32 %v15534_v33, %v4111_v37  ;;  %v9541_v48 = vpop.f32.mrb[143].mxu0 }
 0x4b0   :  { %9949 = vmatmul.mubr.msk.bf16.gmra.mrb[56].mxu1 %vm192_vm1, %v15535_v62  ;;  %v13745_v5 = vpop.f32.mrb[208].mxu1 }
 0x4b1   :  { %9791 = vmatmul.mubr.msk.bf16.gmra.mrb[248].mxu0 %vm192_vm1, %v15531_v38  ;;  %9952 = vmatprep.mubr.msk.bf16.mxu1 %vm10450_vm2, %v15395_v19  ;;  %v9726_v26 = vpop.f32.mrb[209].mxu1 }
 0x4b2   :  { %9794 = vmatprep.mubr.msk.bf16.mxu0 %vm10450_vm2, %v15395_v19  ;;  %v13748_v8 = vpop.f32.mrb[210].mxu1 }
 0x4b3   :  { %v9727_v3 = vpop.f32.mrb[211].mxu1 }
 0x4b4   :  { %v4290_v4 = vpop.f32.mrb[144].mxu0  ;;  %v15542_v3 = vld [vmem:[#allocation53_spill] sm:$0xff] }
 0x4b5   :  { %v4328_v54 = vadd.f32 %v4290_v4, %v13578_v58  ;;  %v9568_v12 = vpop.f32.mrb[145].mxu0 }
 0x4b6   :  { %v4293_v30 = vpop.f32.mrb[146].mxu0 }
 0x4b7   :  { %v4329_v43 = vadd.f32 %v4293_v30, %v13593_v27  ;;  %v13752_v34 = vadd.f32 %v15536_v7, %v4328_v54  ;;  %v9569_v1 = vpop.f32.mrb[147].mxu0  ;;  %v15541_v54 = vld [vmem:[#allocation37_spill] sm:$0xff] }
 0x4b8   :  { %9953 = vmatmul.mubr.msk.bf16.gmra.mrb[60].mxu1 %vm192_vm1, %v15538_v40  ;;  %v13765_v27 = vpop.f32.mrb[212].mxu1 }
 0x4b9   :  { %v13755_v47 = vadd.f32 %v15537_v6, %v4329_v43  ;;  %9795 = vmatmul.mubr.msk.bf16.gmra.mrb[252].mxu0 %vm192_vm1, %v15535_v62  ;;  %9956 = vmatprep.mubr.msk.bf16.mxu1 %vm10450_vm2, %v15395_v19  ;;  %v9730_v55 = vpop.f32.mrb[213].mxu1 }
 0x4ba   :  { %9798 = vmatprep.mubr.msk.bf16.mxu0 %vm10450_vm2, %v15395_v19  ;;  %v13768_v37 = vpop.f32.mrb[214].mxu1 }
 0x4bb   :  { %v9731_v48 = vpop.f32.mrb[215].mxu1 }
 0x4bc   :  { %v4298_v58 = vpop.f32.mrb[148].mxu0 }
 0x4bd   :  { %v4330_v16 = vadd.f32 %v4298_v58, %v13634_v20  ;;  %v9572_v9 = vpop.f32.mrb[149].mxu0 }
 0x4be   :  { %v4301_v31 = vpop.f32.mrb[150].mxu0  ;;  %v15543_v9 = vld [vmem:[#allocation55_spill] sm:$0xff] }
 0x4bf   :  { %v4331_v13 = vadd.f32 %v4301_v31, %v13647_v36  ;;  %v13772_v15 = vadd.f32 %v15539_v41, %v4330_v16  ;;  %v9573_v33 = vpop.f32.mrb[151].mxu0  ;;  %v15544_v31 = vld [vmem:[#allocation41_spill] sm:$0xff] }
 0x4c0   :  { %9957 = vmatmul.mubr.msk.bf16.gmra.mrb[64].mxu1 %vm192_vm1, %v15541_v54  ;;  %v13785_v36 = vpop.f32.mrb[216].mxu1 }
 0x4c1   :  { %v13775_v4 = vadd.f32 %v15540_v53, %v4331_v13  ;;  %9799 = vmatmul.mubr.msk.bf16.gmra.mrb[0].mxu0 %vm192_vm1, %v15538_v40  ;;  %9984 = vmatprep.mubr.msk.bf16.mxu1 %vm10450_vm2, %v15395_v19  ;;  %v9734_v30 = vpop.f32.mrb[217].mxu1  ;;  %v15561_v40 = vld [vmem:[#allocation6_spill] sm:$0xff] }
 0x4c2   :  { %9802 = vmatprep.mubr.msk.bf16.mxu0 %vm10450_vm2, %v15395_v19  ;;  %v13788_v7 = vpop.f32.mrb[218].mxu1 }
 0x4c3   :  { %v9735_v16 = vpop.f32.mrb[219].mxu1 }
 0x4c4   :  { %v4306_v20 = vpop.f32.mrb[152].mxu0 }
 0x4c5   :  { %v4332_v12 = vadd.f32 %v4306_v20, %v13681_v63  ;;  %v9576_v26 = vpop.f32.mrb[153].mxu0 }
 0x4c6   :  { %v4309_v43 = vpop.f32.mrb[154].mxu0 }
 0x4c7   :  { %v4333_v1 = vadd.f32 %v4309_v43, %v13690_v2  ;;  %v13792_v6 = vadd.f32 %v15542_v3, %v4332_v12  ;;  %v9577_v58 = vpop.f32.mrb[155].mxu0  ;;  %v15545_v12 = vld [vmem:[#allocation57_spill] sm:$0xff] }
 0x4c8   :  { %9985 = vmatmul.mubr.msk.bf16.vlgmr.msra.gmra.mrb[68].mxu1 %vm192_vm1, %v15544_v31  ;;  %v13806_v2 = vpop.f32.mrb[220].mxu1  ;;  %v15547_v58 = vld [vmem:[#allocation44_spill] sm:$0xff] }
 0x4c9   :  { %v13795_v55 = vadd.f32 %v15543_v9, %v4333_v1  ;;  %9803 = vmatmul.mubr.msk.bf16.gmra.mrb[4].mxu0 %vm192_vm1, %v15541_v54  ;;  %9988 = vmatprep.mubr.msk.bf16.mxu1 %vm10450_vm2, %v15395_v19  ;;  %v9738_v33 = vpop.f32.mrb[221].mxu1  ;;  %v15546_v1 = vld [vmem:[#allocation58_spill] sm:$0xff] }
 0x4ca   :  { %9830 = vmatprep.mubr.msk.bf16.mxu0 %vm10450_vm2, %v15395_v19  ;;  %10027 = vmatpush3.bf16.msra.mxu1 %v15532_v35  ;;  %v5065_v53 = vpop.f32.mrb[222].mxu1 }
 0x4cb   :  { %10070 = vmatprep.subr.bf16.mxu1 %v15395_v19  ;;  %v9739_v43 = vpop.f32.mrb[223].mxu1 }
 0x4cc   :  { %v4314_v63 = vpop.f32.mrb[156].mxu0 }
 0x4cd   :  { %v4334_v13 = vadd.f32 %v4314_v63, %v13712_v22  ;;  %v9580_v41 = vpop.f32.mrb[157].mxu0  ;;  %v15548_v22 = vld [vmem:[#allocation13_spill] sm:$0xff] }
 0x4ce   :  { %v4317_v48 = vpop.f32.mrb[158].mxu0  ;;  %v15549_v41 = vld [vmem:[#allocation59_spill] sm:$0xff] }
 0x4cf   :  { %v4335_v20 = vadd.f32 %v4317_v48, %v13717_v50  ;;  %v13812_v26 = vadd.f32 %v15545_v12, %v4334_v13  ;;  %v9581_v30 = vpop.f32.mrb[159].mxu0  ;;  %v15550_v12 = vld [vmem:[#allocation48_spill] sm:$0xff] }
 0x4d0   :  { %9989 = vmatmul.mubr.msk.bf16.gmra.mrb[72].mxu1 %vm192_vm1, %v15547_v58  ;;  %v13828_v13 = vpop.f32.mrb[224].mxu1 }
 0x4d1   :  { %v13815_v3 = vadd.f32 %v15546_v1, %v4335_v20  ;;  %9831 = vmatmul.mubr.msk.bf16.vlgmr.msra.gmra.mrb[8].mxu0 %vm192_vm1, %v15544_v31  ;;  %9992 = vmatprep.mubr.msk.bf16.mxu1 %vm10450_vm2, %v15395_v19  ;;  %v9766_v53 = vpop.f32.mrb[225].mxu1 }
 0x4d2   :  { %9873 = vmatpush3.bf16.msra.mxu0 %v15548_v22  ;;  %9834 = vmatprep.mubr.msk.bf16.mxu0 %vm10450_vm2, %v15395_v19  ;;  %v13833_v20 = vpop.f32.mrb[226].mxu1 }
 0x4d3   :  { %9916 = vmatprep.subr.bf16.mxu0 %v15395_v19  ;;  %v9767_v30 = vpop.f32.mrb[227].mxu1 }
 0x4d4   :  { %v4322_v50 = vpop.f32.mrb[160].mxu0 }
 0x4d5   :  { %v4336_v16 = vadd.f32 %v4322_v50, %v13735_v17  ;;  %v9584_v9 = vpop.f32.mrb[161].mxu0 }
 0x4d6   :  { %v4325_v63 = vpop.f32.mrb[162].mxu0 }
 0x4d7   :  { %v13831_v33 = vadd.f32 %v15549_v41, %v4336_v16  ;;  %v9585_v48 = vpop.f32.mrb[163].mxu0  ;;  %v15551_v63 = vld [vmem:[#allocation60_spill] sm:$0xff] }
 0x4d8   :  { %9993 = vmatmul.mubr.msk.bf16.gmra.mrb[76].mxu1 %vm192_vm1, %v15550_v12  ;;  %v13844_v16 = vpop.f32.mrb[228].mxu1 }
 0x4d9   :  { %9835 = vmatmul.mubr.msk.bf16.gmra.mrb[12].mxu0 %vm192_vm1, %v15547_v58  ;;  %9996 = vmatprep.mubr.msk.bf16.mxu1 %vm10450_vm2, %v15395_v19  ;;  %v9770_v53 = vpop.f32.mrb[229].mxu1 }
 0x4da   :  { %9838 = vmatprep.mubr.msk.bf16.mxu0 %vm10450_vm2, %v15395_v19  ;;  %v13850_v30 = vpop.f32.mrb[230].mxu1 }
 0x4dc   :  { %v4511_v17 = vpop.f32.mrb[164].mxu0 }
 0x4dd   :  { %v4549_v43 = vadd.f32 %v4511_v17, %v13752_v34  ;;  %v9612_v1 = vpop.f32.mrb[165].mxu0  ;;  %v15553_v34 = vld [vmem:[#allocation52_spill] sm:$0xff]  ;;  %v9771_v17 = vpop.f32.mrb[231].mxu1 }
 0x4de   :  { %v4514_v50 = vpop.f32.mrb[166].mxu0 }
 0x4df   :  { %v4550_v9 = vadd.f32 %v4514_v50, %v13755_v47  ;;  %v13848_v41 = vadd.f32 %v15551_v63, %v4549_v43  ;;  %v9613_v48 = vpop.f32.mrb[167].mxu0  ;;  %v15554_v63 = vld [vmem:[#allocation62_spill] sm:$0xff] }
 0x4e0   :  { %9997 = vmatmul.mubr.msk.bf16.gmra.mrb[80].mxu1 %vm192_vm1, %v15553_v34 }
 0x4e1   :  { %v13853_v61 = vadd.f32 %v15552_v24, %v4550_v9  ;;  %9839 = vmatmul.mubr.msk.bf16.gmra.mrb[16].mxu0 %vm192_vm1, %v15550_v12  ;;  %10000 = vmatprep.mubr.msk.bf16.mxu1 %vm10450_vm2, %v15395_v19  ;;  %v13864_v24 = vpop.f32.mrb[232].mxu1 }
 0x4e2   :  { %9842 = vmatprep.mubr.msk.bf16.mxu0 %vm10450_vm2, %v15395_v19  ;;  %v9774_v17 = vpop.f32.mrb[233].mxu1 }
 0x4e3   :  { %v13870_v42 = vpop.f32.mrb[234].mxu1  ;;  %v15557_v17 = vld [vmem:[#allocation64_spill] sm:$0xff] }
 0x4e4   :  { %v4519_v47 = vpop.f32.mrb[168].mxu0 }
 0x4e5   :  { %v4551_v43 = vadd.f32 %v4519_v47, %v13772_v15  ;;  %v9616_v1 = vpop.f32.mrb[169].mxu0  ;;  %v15556_v15 = vld [vmem:[#allocation56_spill] sm:$0xff]  ;;  %v9775_v47 = vpop.f32.mrb[235].mxu1 }
 0x4e6   :  { %v4522_v50 = vpop.f32.mrb[170].mxu0 }
 0x4e7   :  { %v4552_v9 = vadd.f32 %v4522_v50, %v13775_v4  ;;  %v13868_v48 = vadd.f32 %v15554_v63, %v4551_v43  ;;  %v9617_v53 = vpop.f32.mrb[171].mxu0  ;;  %v8117_v63 = vld [vmem:[%s15240_s0 + $0x221] sm:$0xff] }
 0x4e8   :  { %10001 = vmatmul.mubr.msk.bf16.gmra.mrb[84].mxu1 %vm192_vm1, %v15556_v15 }
 0x4e9   :  { %v13873_v60 = vadd.f32 %v15555_v46, %v4552_v9  ;;  %9843 = vmatmul.mubr.msk.bf16.gmra.mrb[20].mxu0 %vm192_vm1, %v15553_v34  ;;  %10028 = vmatprep.mubr.msk.bf16.mxu1 %vm10450_vm2, %v15395_v19  ;;  %v13884_v46 = vpop.f32.mrb[236].mxu1  ;;  %v8116_v9 = vld [vmem:[%s15240_s0 + $0x219] sm:$0xff] }
 0x4ea   :  { %9846 = vmatprep.mubr.msk.bf16.mxu0 %vm10450_vm2, %v15395_v19  ;;  %v9778_v11 = vpop.f32.mrb[237].mxu1 }
 0x4eb   :  { %v8073_v11 = vld [vmem:[%s15240_s0 + $0x1ca] sm:$0xff] }
 0x4ec   :  { %v4527_v4 = vpop.f32.mrb[172].mxu0 }
 0x4ed   :  { %v4553_v43 = vadd.f32 %v4527_v4, %v13792_v6  ;;  %v9620_v1 = vpop.f32.mrb[173].mxu0  ;;  %v6244_v6 = vpack.c.bf16 %v8117_v63, %v8116_v9  ;;  %v13896_v4 = vpop.f32.mrb[238].mxu1 }
 0x4ee   :  { %v4530_v50 = vpop.f32.mrb[174].mxu0  ;;  %v15558_v1 = vld [vmem:[#allocation65_spill] sm:$0xff]  ;;  %v9779_v35 = vpop.f32.mrb[239].mxu1 }
 0x4ef   :  { %v4554_v53 = vadd.f32 %v4530_v50, %v13795_v55  ;;  %v13894_v47 = vadd.f32 %v15557_v17, %v4553_v43  ;;  %v9621_v44 = vpop.f32.mrb[175].mxu0  ;;  %v8119_v17 = vld [vmem:[%s15240_s0 + $0x231] sm:$0xff] }
 0x4f0   :  { %10029 = vmatmul.mubr.msk.bf16.vlgmr.msra.gmra.mrb[88].mxu1 %vm192_vm1, %v6244_v6  ;;  %v8072_v44 = vld [vmem:[%s15240_s0 + $0x1c2] sm:$0xff]  ;;  %v13919_v63 = vpop.f32.mrb[240].mxu1 }
 0x4f1   :  { %v13899_v57 = vadd.f32 %v15558_v1, %v4554_v53  ;;  %9847 = vmatmul.mubr.msk.bf16.gmra.mrb[24].mxu0 %vm192_vm1, %v15556_v15  ;;  %10032 = vmatprep.mubr.msk.bf16.mxu1 %vm10450_vm2, %v15395_v19  ;;  %v13917_v50 = vpack.c.bf16 %v8073_v11, %v8072_v44  ;;  %v8118_v53 = vld [vmem:[%s15240_s0 + $0x229] sm:$0xff]  ;;  %v15559_v1 = vld [vmem:[#allocation66_spill] sm:$0xff]  ;;  %v9782_v44 = vpop.f32.mrb[241].mxu1 }
 0x4f2   :  { %9874 = vmatprep.mubr.msk.bf16.mxu0 %vm10450_vm2, %v15395_v19  ;;  %10071 = vmatpush3.bf16.msra.mxu1 %v15548_v22  ;;  %v5247_v11 = vpop.f32.mrb[242].mxu1  ;;  %v15562_v44 = vld [vmem:[#allocation71_spill] sm:$0xff] }
 0x4f3   :  { %10114 = vmatprep.subr.bf16.mxu1 %v15395_v19  ;;  %v9783_v54 = vpop.f32.mrb[243].mxu1 }
 0x4f4   :  { %v4535_v55 = vpop.f32.mrb[176].mxu0 }
 0x4f5   :  { %v4555_v35 = vadd.f32 %v4535_v55, %v13812_v26  ;;  %v9624_v43 = vpop.f32.mrb[177].mxu0  ;;  %v6245_v55 = vpack.c.bf16 %v8119_v17, %v8118_v53 }
 0x4f6   :  { %v4538_v9 = vpop.f32.mrb[178].mxu0  ;;  %v15560_v43 = vld [vmem:[#allocation67_spill] sm:$0xff] }
 0x4f7   :  { %v4556_v6 = vadd.f32 %v4538_v9, %v13815_v3  ;;  %v13929_v22 = vadd.f32 %v15559_v1, %v4555_v35  ;;  %v9625_v26 = vpop.f32.mrb[179].mxu0  ;;  %v8074_v3 = vld [vmem:[%s15240_s0 + $0x1d2] sm:$0xff]  ;;  %v8075_v35 = vld [vmem:[%s15240_s0 + $0x1da] sm:$0xff] }
 0x4f8   :  { %10033 = vmatmul.mubr.msk.bf16.gmra.mrb[92].mxu1 %vm192_vm1, %v6245_v55  ;;  %v13950_v17 = vpack.c.bf16 %v8075_v35, %v8074_v3  ;;  %v13952_v1 = vpop.f32.mrb[244].mxu1  ;;  %v8120_v26 = vld [vmem:[%s15240_s0 + $0x239] sm:$0xff]  ;;  %v8121_v55 = vld [vmem:[%s15240_s0 + $0x241] sm:$0xff] }
 0x4f9   :  { %v13932_v56 = vadd.f32 %v15560_v43, %v4556_v6  ;;  %9875 = vmatmul.mubr.msk.bf16.vlgmr.msra.gmra.mrb[28].mxu0 %vm192_vm1, %v13917_v50  ;;  %10036 = vmatprep.mubr.msk.bf16.mxu1 %vm10450_vm2, %v15395_v19  ;;  %v9810_v62 = vpop.f32.mrb[245].mxu1  ;;  %v8076_v35 = vld [vmem:[%s15240_s0 + $0x1e2] sm:$0xff] }
 0x4fa   :  { %9917 = vmatpush3.bf16.msra.mxu0 %v15561_v40  ;;  %9878 = vmatprep.mubr.msk.bf16.mxu0 %vm10450_vm2, %v15395_v19  ;;  %v8077_v62 = vld [vmem:[%s15240_s0 + $0x1ea] sm:$0xff] }
 0x4fb   :  { %9960 = vmatprep.subr.bf16.mxu0 %v15395_v19 }
 0x4fc   :  { %v4543_v9 = vpop.f32.mrb[180].mxu0 }
 0x4fd   :  { %v4557_v54 = vadd.f32 %v4543_v9, %v13831_v33  ;;  %v9628_v53 = vpop.f32.mrb[181].mxu0  ;;  %v6246_v33 = vpack.c.bf16 %v8121_v55, %v8120_v26  ;;  %v13963_v9 = vpop.f32.mrb[246].mxu1  ;;  %v13979_v26 = vpack.c.bf16 %v8077_v62, %v8076_v35 }
 0x4fe   :  { %v4546_v6 = vpop.f32.mrb[182].mxu0  ;;  %v9811_v3 = vpop.f32.mrb[247].mxu1 }
 0x4ff   :  { %v13961_v11 = vadd.f32 %v15562_v44, %v4557_v54  ;;  %v9629_v43 = vpop.f32.mrb[183].mxu0  ;;  %15563 = vst [vmem:[#allocation31_spill] sm:$0xff] %v13979_v26 }
 0x500   :  { %10037 = vmatmul.mubr.msk.bf16.gmra.mrb[96].mxu1 %vm192_vm1, %v6246_v33  ;;  %v13981_v44 = vpop.f32.mrb[248].mxu1  ;;  %v8122_v43 = vld [vmem:[%s15240_s0 + $0x249] sm:$0xff]  ;;  %v8123_v33 = vld [vmem:[%s15240_s0 + $0x251] sm:$0xff] }
 0x501   :  { %9879 = vmatmul.mubr.msk.bf16.gmra.mrb[32].mxu0 %vm192_vm1, %v13950_v17  ;;  %10040 = vmatprep.mubr.msk.bf16.mxu1 %vm10450_vm2, %v15395_v19  ;;  %v6247_v35 = vpack.c.bf16 %v8123_v33, %v8122_v43 }
 0x502   :  { %9882 = vmatprep.mubr.msk.bf16.mxu0 %vm10450_vm2, %v15395_v19 }
 0x504   :  { %v4731_v54 = vpop.f32.mrb[184].mxu0 }
 0x505   :  { %v4769_v53 = vadd.f32 %v4731_v54, %v13848_v41  ;;  %v9656_v6 = vpop.f32.mrb[185].mxu0  ;;  %v9814_v54 = vpop.f32.mrb[249].mxu1 }
 0x506   :  { %v4734_v55 = vpop.f32.mrb[186].mxu0  ;;  %v13993_v62 = vpop.f32.mrb[250].mxu1 }
 0x507   :  { %v4770_v3 = vadd.f32 %v4734_v55, %v13853_v61  ;;  %v13991_v38 = vadd.f32 %v13515_v28, %v4769_v53  ;;  %v9657_v41 = vpop.f32.mrb[187].mxu0  ;;  %v9815_v45 = vpop.f32.mrb[251].mxu1  ;;  %v8078_v28 = vld [vmem:[%s15240_s0 + $0x1f2] sm:$0xff]  ;;  %v8079_v61 = vld [vmem:[%s15240_s0 + $0x1fa] sm:$0xff] }
 0x508   :  { %10041 = vmatmul.mubr.msk.bf16.gmra.mrb[100].mxu1 %vm192_vm1, %v6247_v35  ;;  %v14012_v43 = vpack.c.bf16 %v8079_v61, %v8078_v28  ;;  %v14014_v33 = vpop.f32.mrb[252].mxu1 }
 0x509   :  { %15564 = vst [vmem:[#allocation32_spill] sm:$0xff] %v13991_v38  ;;  %v13996_v6 = vadd.f32 %v13525_v49, %v4770_v3  ;;  %9883 = vmatmul.mubr.msk.bf16.gmra.mrb[36].mxu0 %vm192_vm1, %v13979_v26  ;;  %10044 = vmatprep.mubr.msk.bf16.mxu1 %vm10450_vm2, %v15395_v19  ;;  %v8124_v3 = vld [vmem:[%s15240_s0 + $0x259] sm:$0xff] }
 0x50a   :  { %9886 = vmatprep.mubr.msk.bf16.mxu0 %vm10450_vm2, %v15395_v19  ;;  %v6248_v38 = vpack.c.bf16 %v8124_v3, %v8124_v3 }
 0x50b   :  { %15565 = vst [vmem:[#allocation38_spill] sm:$0xff] %v13996_v6  ;;  %v9818_v6 = vpop.f32.mrb[253].mxu1 }
 0x50c   :  { %v4739_v49 = vpop.f32.mrb[188].mxu0  ;;  %v14023_v26 = vpop.f32.mrb[254].mxu1 }
 0x50d   :  { %v4771_v53 = vadd.f32 %v4739_v49, %v13868_v48  ;;  %v9660_v55 = vpop.f32.mrb[189].mxu0  ;;  %v9819_v28 = vpop.f32.mrb[255].mxu1 }
 0x50e   :  { %v4742_v45 = vpop.f32.mrb[190].mxu0 }
 0x50f   :  { %v4772_v41 = vadd.f32 %v4742_v45, %v13873_v60  ;;  %v14021_v54 = vadd.f32 %v13571_v39, %v4771_v53  ;;  %v9661_v35 = vpop.f32.mrb[191].mxu0  ;;  %v8080_v39 = vld [vmem:[%s15240_s0 + $0x202] sm:$0xff] }
 0x510   :  { %10045 = vmatmul.mubr.msk.bf16.gmra.mrb[104].mxu1 %vm192_vm1, %v6248_v38  ;;  %v14039_v61 = vpack.c.bf16 %v8080_v39, %v8080_v39  ;;  %v14041_v53 = vpop.f32.mrb[0].mxu1  ;;  %v8144_v38 = vld [vmem:[%s15240_s0 + $0x21a] sm:$0xff] }
 0x511   :  { %15566 = vst [vmem:[#allocation40_spill] sm:$0xff] %v14021_v54  ;;  %v14026_v48 = vadd.f32 %v13586_v29, %v4772_v41  ;;  %9887 = vmatmul.mubr.msk.bf16.gmra.mrb[40].mxu0 %vm192_vm1, %v14012_v43  ;;  %10072 = vmatprep.mubr.msk.bf16.mxu1 %vm10450_vm2, %v15395_v19  ;;  %v9822_v41 = vpop.f32.mrb[1].mxu1 }
 0x512   :  { %9890 = vmatprep.mubr.msk.bf16.mxu0 %vm10450_vm2, %v15395_v19  ;;  %v14053_v35 = vpop.f32.mrb[2].mxu1 }
 0x513   :  { %15567 = vst [vmem:[#allocation33_spill] sm:$0xff] %v14026_v48  ;;  %v15580_v48 = vld [vmem:[#allocation30_spill] sm:$0xff] }
 0x514   :  { %v4747_v60 = vpop.f32.mrb[192].mxu0 }
 0x515   :  { %v4773_v29 = vadd.f32 %v4747_v60, %v13894_v47  ;;  %v9664_v6 = vpop.f32.mrb[193].mxu0  ;;  %v8145_v47 = vld [vmem:[%s15240_s0 + $0x222] sm:$0xff] }
 0x516   :  { %v4750_v49 = vpop.f32.mrb[194].mxu0  ;;  %v14055_v28 = vpack.c.bf16 %v8145_v47, %v8144_v38 }
 0x517   :  { %v4774_v55 = vadd.f32 %v4750_v49, %v13899_v57  ;;  %v14048_v45 = vadd.f32 %v13628_v0, %v4773_v29  ;;  %v9665_v3 = vpop.f32.mrb[195].mxu0  ;;  %v9823_v57 = vpop.f32.mrb[3].mxu1  ;;  %v8146_v49 = vld [vmem:[%s15240_s0 + $0x22a] sm:$0xff] }
 0x518   :  { %10073 = vmatmul.mubr.msk.bf16.vlgmr.msra.gmra.mrb[108].mxu1 %vm192_vm1, %v14055_v28  ;;  %v14071_v6 = vpop.f32.mrb[4].mxu1 }
 0x519   :  { %15568 = vst [vmem:[#allocation42_spill] sm:$0xff] %v14048_v45  ;;  %v14058_v39 = vadd.f32 %v13642_v10, %v4774_v55  ;;  %9891 = vmatmul.mubr.msk.bf16.gmra.mrb[44].mxu0 %vm192_vm1, %v14039_v61  ;;  %10076 = vmatprep.mubr.msk.bf16.mxu1 %vm10450_vm2, %v15395_v19  ;;  %v9826_v41 = vpop.f32.mrb[5].mxu1 }
 0x51a   :  { %9918 = vmatprep.mubr.msk.bf16.mxu0 %vm10450_vm2, %v15395_v19  ;;  %10115 = vmatpush3.bf16.msra.mxu1 %v15561_v40  ;;  %v8147_v40 = vld [vmem:[%s15240_s0 + $0x232] sm:$0xff]  ;;  %v5438_v47 = vpop.f32.mrb[6].mxu1 }
 0x51b   :  { %15569 = vst [vmem:[#allocation45_spill] sm:$0xff] %v14058_v39  ;;  %10158 = vmatprep.subr.bf16.mxu1 %v15395_v19  ;;  %v8149_v47 = vld [vmem:[%s15240_s0 + $0x242] sm:$0xff] }
 0x51c   :  { %v4755_v0 = vpop.f32.mrb[196].mxu0 }
 0x51d   :  { %v4775_v10 = vadd.f32 %v4755_v0, %v13929_v22  ;;  %v9668_v60 = vpop.f32.mrb[197].mxu0  ;;  %v14083_v22 = vpack.c.bf16 %v8147_v40, %v8146_v49  ;;  %v15572_v0 = vld [vmem:[#allocation15_spill] sm:$0xff] }
 0x51e   :  { %v4758_v29 = vpop.f32.mrb[198].mxu0  ;;  %v9827_v60 = vpop.f32.mrb[7].mxu1 }
 0x51f   :  { %v4776_v38 = vadd.f32 %v4758_v29, %v13932_v56  ;;  %v14078_v55 = vadd.f32 %v13675_v52, %v4775_v10  ;;  %v9669_v3 = vpop.f32.mrb[199].mxu0  ;;  %v15573_v56 = vld [vmem:[#allocation8_spill] sm:$0xff] }
 0x520   :  { %10077 = vmatmul.mubr.msk.bf16.gmra.mrb[112].mxu1 %vm192_vm1, %v14083_v22  ;;  %v14099_v49 = vpop.f32.mrb[8].mxu1  ;;  %v15575_v60 = vld [vmem:[#allocation28_spill] sm:$0xff] }
 0x521   :  { %15570 = vst [vmem:[#allocation47_spill] sm:$0xff] %v14078_v55  ;;  %v14086_v57 = vadd.f32 %v13686_v14, %v4776_v38  ;;  %9919 = vmatmul.mubr.msk.bf16.vlgmr.msra.gmra.mrb[48].mxu0 %vm192_vm1, %v15572_v0  ;;  %10080 = vmatprep.mubr.msk.bf16.mxu1 %vm10450_vm2, %v15395_v19  ;;  %v8148_v38 = vld [vmem:[%s15240_s0 + $0x23a] sm:$0xff]  ;;  %v9854_v41 = vpop.f32.mrb[9].mxu1 }
 0x522   :  { %9961 = vmatpush3.bf16.msra.mxu0 %v15573_v56  ;;  %9922 = vmatprep.mubr.msk.bf16.mxu0 %vm10450_vm2, %v15395_v19  ;;  %v14110_v0 = vpop.f32.mrb[10].mxu1 }
 0x523   :  { %15571 = vst [vmem:[#allocation49_spill] sm:$0xff] %v14086_v57  ;;  %10004 = vmatprep.subr.bf16.mxu0 %v15395_v19 }
 0x524   :  { %v4763_v52 = vpop.f32.mrb[200].mxu0 }
 0x525   :  { %v4777_v14 = vadd.f32 %v4763_v52, %v13961_v11  ;;  %v9672_v10 = vpop.f32.mrb[201].mxu0  ;;  %v14112_v11 = vpack.c.bf16 %v8149_v47, %v8148_v38  ;;  %v9855_v52 = vpop.f32.mrb[11].mxu1 }
 0x526   :  { %v4766_v29 = vpop.f32.mrb[202].mxu0  ;;  %v8151_v52 = vld [vmem:[%s15240_s0 + $0x252] sm:$0xff] }
 0x527   :  { %v14105_v3 = vadd.f32 %v13708_v51, %v4777_v14  ;;  %v9673_v40 = vpop.f32.mrb[203].mxu0 }
 0x528   :  { %10081 = vmatmul.mubr.msk.bf16.gmra.mrb[116].mxu1 %vm192_vm1, %v14112_v11  ;;  %v14125_v38 = vpop.f32.mrb[12].mxu1  ;;  %v8150_v40 = vld [vmem:[%s15240_s0 + $0x24a] sm:$0xff] }
 0x529   :  { %15574 = vst [vmem:[#allocation51_spill] sm:$0xff] %v14105_v3  ;;  %9923 = vmatmul.mubr.msk.bf16.gmra.mrb[52].mxu0 %vm192_vm1, %v15575_v60  ;;  %10084 = vmatprep.mubr.msk.bf16.mxu1 %vm10450_vm2, %v15395_v19  ;;  %v9858_v60 = vpop.f32.mrb[13].mxu1 }
 0x52a   :  { %9926 = vmatprep.mubr.msk.bf16.mxu0 %vm10450_vm2, %v15395_v19  ;;  %v14136_v3 = vpop.f32.mrb[14].mxu1 }
 0x52c   :  { %v4958_v51 = vpop.f32.mrb[204].mxu0 }
 0x52d   :  { %v14123_v14 = vadd.f32 %v13729_v25, %v4958_v51  ;;  %v9700_v10 = vpop.f32.mrb[205].mxu0  ;;  %v14138_v25 = vpack.c.bf16 %v8151_v52, %v8150_v40  ;;  %v15577_v51 = vld [vmem:[#allocation16_spill] sm:$0xff]  ;;  %v8152_v52 = vld [vmem:[%s15240_s0 + $0x25a] sm:$0xff] }
 0x52e   :  { %v4961_v29 = vpop.f32.mrb[206].mxu0  ;;  %v9859_v10 = vpop.f32.mrb[15].mxu1  ;;  %v14159_v55 = vpack.c.bf16 %v8152_v52, %v8152_v52 }
 0x52f   :  { %v14131_v41 = vadd.f32 %v13732_v18, %v4961_v29  ;;  %v9701_v47 = vpop.f32.mrb[207].mxu0  ;;  %15576 = vst [vmem:[#allocation53_spill] sm:$0xff] %v14138_v25 }
 0x530   :  { %10085 = vmatmul.mubr.msk.bf16.gmra.mrb[120].mxu1 %vm192_vm1, %v14138_v25  ;;  %v14151_v60 = vpop.f32.mrb[16].mxu1  ;;  %15578 = vst [vmem:[#allocation55_spill] sm:$0xff] %v14159_v55  ;;  %v15582_v25 = vld [vmem:[#allocation21_spill] sm:$0xff] }
 0x531   :  { %9927 = vmatmul.mubr.msk.bf16.gmra.mrb[56].mxu0 %vm192_vm1, %v15577_v51  ;;  %10088 = vmatprep.mubr.msk.bf16.mxu1 %vm10450_vm2, %v15395_v19  ;;  %v9862_v57 = vpop.f32.mrb[17].mxu1 }
 0x532   :  { %9930 = vmatprep.mubr.msk.bf16.mxu0 %vm10450_vm2, %v15395_v19  ;;  %v14161_v39 = vpop.f32.mrb[18].mxu1 }
 0x534   :  { %v4966_v18 = vpop.f32.mrb[208].mxu0 }
 0x535   :  { %v9704_v29 = vpop.f32.mrb[209].mxu0  ;;  %v14149_v47 = vadd.f32 %v13745_v5, %v4966_v18  ;;  %v9863_v5 = vpop.f32.mrb[19].mxu1 }
 0x536   :  { %v4969_v40 = vpop.f32.mrb[210].mxu0  ;;  %v15579_v29 = vld [vmem:[#allocation29_spill] sm:$0xff] }
 0x537   :  { %v9705_v51 = vpop.f32.mrb[211].mxu0  ;;  %v14157_v10 = vadd.f32 %v13748_v8, %v4969_v40 }
 0x538   :  { %10089 = vmatmul.mubr.msk.bf16.gmra.mrb[124].mxu1 %vm192_vm1, %v14159_v55  ;;  %v14174_v52 = vpop.f32.mrb[20].mxu1 }
 0x539   :  { %9931 = vmatmul.mubr.msk.bf16.gmra.mrb[60].mxu0 %vm192_vm1, %v15579_v29  ;;  %10116 = vmatprep.mubr.msk.bf16.mxu1 %vm10450_vm2, %v15395_v19  ;;  %v9866_v5 = vpop.f32.mrb[21].mxu1 }
 0x53a   :  { %9934 = vmatprep.mubr.msk.bf16.mxu0 %vm10450_vm2, %v15395_v19  ;;  %v14179_v45 = vpop.f32.mrb[22].mxu1 }
 0x53b   :  { %v9867_v55 = vpop.f32.mrb[23].mxu1 }
 0x53c   :  { %v4974_v18 = vpop.f32.mrb[212].mxu0 }
 0x53d   :  { %v9708_v8 = vpop.f32.mrb[213].mxu0  ;;  %v14172_v57 = vadd.f32 %v13765_v27, %v4974_v18 }
 0x53e   :  { %v4977_v40 = vpop.f32.mrb[214].mxu0  ;;  %v15581_v8 = vld [vmem:[#allocation19_spill] sm:$0xff] }
 0x53f   :  { %v9709_v51 = vpop.f32.mrb[215].mxu0  ;;  %v14177_v29 = vadd.f32 %v13768_v37, %v4977_v40 }
 0x540   :  { %10117 = vmatmul.mubr.msk.bf16.vlgmr.msra.gmra.mrb[128].mxu1 %vm192_vm1, %v15581_v8  ;;  %v14194_v55 = vpop.f32.mrb[24].mxu1 }
 0x541   :  { %9935 = vmatmul.mubr.msk.bf16.gmra.mrb[64].mxu0 %vm192_vm1, %v15580_v48  ;;  %10120 = vmatprep.mubr.msk.bf16.mxu1 %vm10450_vm2, %v15395_v19  ;;  %v9870_v5 = vpop.f32.mrb[25].mxu1 }
 0x542   :  { %9962 = vmatprep.mubr.msk.bf16.mxu0 %vm10450_vm2, %v15395_v19  ;;  %10159 = vmatpush3.bf16.msra.mxu1 %v15573_v56  ;;  %v5600_v8 = vpop.f32.mrb[26].mxu1  ;;  %v15583_v56 = vld [vmem:[#allocation10_spill] sm:$0xff] }
 0x543   :  { %10202 = vmatprep.subr.bf16.mxu1 %v15395_v19  ;;  %v9871_v54 = vpop.f32.mrb[27].mxu1 }
 0x544   :  { %v4982_v27 = vpop.f32.mrb[216].mxu0 }
 0x545   :  { %v9712_v37 = vpop.f32.mrb[217].mxu0  ;;  %v14191_v18 = vadd.f32 %v13785_v36, %v4982_v27 }
 0x546   :  { %v4985_v48 = vpop.f32.mrb[218].mxu0  ;;  %v15584_v37 = vld [vmem:[#allocation22_spill] sm:$0xff] }
 0x547   :  { %v9713_v40 = vpop.f32.mrb[219].mxu0  ;;  %v14197_v51 = vadd.f32 %v13788_v7, %v4985_v48 }
 0x548   :  { %10121 = vmatmul.mubr.msk.bf16.gmra.mrb[132].mxu1 %vm192_vm1, %v12664_v23 }
 0x549   :  { %9963 = vmatmul.mubr.msk.bf16.vlgmr.msra.gmra.mrb[68].mxu0 %vm192_vm1, %v15582_v25  ;;  %10124 = vmatprep.mubr.msk.bf16.mxu1 %vm10450_vm2, %v15395_v19 }
 0x54a   :  { %10005 = vmatpush3.bf16.msra.mxu0 %v15583_v56  ;;  %9966 = vmatprep.mubr.msk.bf16.mxu0 %vm10450_vm2, %v15395_v19 }
 0x54b   :  { %10048 = vmatprep.subr.bf16.mxu0 %v15395_v19 }
 0x54c   :  { %v4990_v36 = vpop.f32.mrb[220].mxu0 }
 0x54d   :  { %v9716_v7 = vpop.f32.mrb[221].mxu0  ;;  %v14210_v27 = vadd.f32 %v13806_v2, %v4990_v36 }
 0x54e   :  { %v4993_v25 = vpop.f32.mrb[222].mxu0  ;;  %v15585_v7 = vld [vmem:[#allocation24_spill] sm:$0xff] }
 0x54f   :  { %v9717_v54 = vpop.f32.mrb[223].mxu0 }
 0x550   :  { %10125 = vmatmul.mubr.msk.bf16.gmra.mrb[136].mxu1 %vm192_vm1, %v12682_v21 }
 0x551   :  { %9967 = vmatmul.mubr.msk.bf16.gmra.mrb[72].mxu0 %vm192_vm1, %v15584_v37  ;;  %10128 = vmatprep.mubr.msk.bf16.mxu1 %vm10450_vm2, %v15395_v19 }
 0x552   :  { %9970 = vmatprep.mubr.msk.bf16.mxu0 %vm10450_vm2, %v15395_v19 }
 0x554   :  { %v5131_v23 = vpop.f32.mrb[224].mxu0 }
 0x555   :  { %v5169_v48 = vadd.f32 %v5131_v23, %v14123_v14  ;;  %v9744_v40 = vpop.f32.mrb[225].mxu0 }
 0x556   :  { %v5134_v2 = vpop.f32.mrb[226].mxu0 }
 0x557   :  { %v5170_v5 = vadd.f32 %v5134_v2, %v14131_v41  ;;  %v9745_v8 = vpop.f32.mrb[227].mxu0  ;;  %v14223_v36 = vadd.f32 %v13828_v13, %v5169_v48  ;;  %v15586_v48 = vld [vmem:[#allocation14_spill] sm:$0xff] }
 0x558   :  { %10129 = vmatmul.mubr.msk.bf16.gmra.mrb[140].mxu1 %vm192_vm1, %v12700_v59  ;;  %v14248_v59 = vpop.f32.mrb[28].mxu1 }
 0x559   :  { %9971 = vmatmul.mubr.msk.bf16.gmra.mrb[76].mxu0 %vm192_vm1, %v15585_v7  ;;  %v14228_v25 = vadd.f32 %v13833_v20, %v5170_v5  ;;  %10132 = vmatprep.mubr.msk.bf16.mxu1 %vm10450_vm2, %v15395_v19 }
 0x55a   :  { %9974 = vmatprep.mubr.msk.bf16.mxu0 %vm10450_vm2, %v15395_v19 }
 0x55c   :  { %v5139_v21 = vpop.f32.mrb[228].mxu0 }
 0x55d   :  { %v5171_v14 = vadd.f32 %v5139_v21, %v14149_v47  ;;  %v9748_v13 = vpop.f32.mrb[229].mxu0  ;;  %v9898_v47 = vpop.f32.mrb[29].mxu1 }
 0x55e   :  { %v5142_v41 = vpop.f32.mrb[230].mxu0  ;;  %v14252_v40 = vpop.f32.mrb[30].mxu1 }
 0x55f   :  { %v5172_v54 = vadd.f32 %v5142_v41, %v14157_v10  ;;  %v14239_v37 = vadd.f32 %v13844_v16, %v5171_v14  ;;  %v9749_v20 = vpop.f32.mrb[231].mxu0  ;;  %v9899_v2 = vpop.f32.mrb[31].mxu1 }
 0x560   :  { %10133 = vmatmul.mubr.msk.bf16.gmra.mrb[144].mxu1 %vm192_vm1, %v12712_v32  ;;  %v14257_v8 = vpop.f32.mrb[32].mxu1 }
 0x561   :  { %v14242_v23 = vadd.f32 %v13850_v30, %v5172_v54  ;;  %9975 = vmatmul.mubr.msk.bf16.gmra.mrb[80].mxu0 %vm192_vm1, %v15586_v48  ;;  %10160 = vmatprep.mubr.msk.bf16.mxu1 %vm10450_vm2, %v15395_v19  ;;  %v9902_v14 = vpop.f32.mrb[33].mxu1  ;;  %v15587_v54 = vld [vmem:[#allocation17_spill] sm:$0xff] }
 0x562   :  { %9978 = vmatprep.mubr.msk.bf16.mxu0 %vm10450_vm2, %v15395_v19  ;;  %v14263_v13 = vpop.f32.mrb[34].mxu1 }
 0x564   :  { %v5147_v10 = vpop.f32.mrb[232].mxu0 }
 0x565   :  { %v5173_v16 = vadd.f32 %v5147_v10, %v14172_v57  ;;  %v9752_v30 = vpop.f32.mrb[233].mxu0  ;;  %v9903_v57 = vpop.f32.mrb[35].mxu1 }
 0x566   :  { %v5150_v5 = vpop.f32.mrb[234].mxu0  ;;  %v14272_v20 = vpop.f32.mrb[36].mxu1 }
 0x567   :  { %v5174_v7 = vadd.f32 %v5150_v5, %v14177_v29  ;;  %v14261_v21 = vadd.f32 %v13864_v24, %v5173_v16  ;;  %v9753_v32 = vpop.f32.mrb[235].mxu0  ;;  %v9906_v29 = vpop.f32.mrb[37].mxu1 }
 0x568   :  { %10161 = vmatmul.mubr.msk.bf16.vlgmr.msra.gmra.mrb[148].mxu1 %vm192_vm1, %v15544_v31  ;;  %v14276_v48 = vpop.f32.mrb[38].mxu1 }
 0x569   :  { %v14266_v41 = vadd.f32 %v13870_v42, %v5174_v7  ;;  %9979 = vmatmul.mubr.msk.bf16.gmra.mrb[84].mxu0 %vm192_vm1, %v15587_v54  ;;  %10164 = vmatprep.mubr.msk.bf16.mxu1 %vm10450_vm2, %v15395_v19  ;;  %v9907_v10 = vpop.f32.mrb[39].mxu1  ;;  %v15589_v54 = vld [vmem:[#allocation12_spill] sm:$0xff] }
 0x56a   :  { %10006 = vmatprep.mubr.msk.bf16.mxu0 %vm10450_vm2, %v15395_v19  ;;  %10203 = vmatpush3.bf16.msra.mxu1 %v15583_v56  ;;  %v14283_v30 = vpop.f32.mrb[40].mxu1 }
 0x56b   :  { %10246 = vmatprep.subr.bf16.mxu1 %v15395_v19  ;;  %v9910_v7 = vpop.f32.mrb[41].mxu1 }
 0x56c   :  { %v5155_v24 = vpop.f32.mrb[236].mxu0  ;;  %v14289_v32 = vpop.f32.mrb[42].mxu1 }
 0x56d   :  { %v5175_v42 = vadd.f32 %v5155_v24, %v14191_v18  ;;  %v9756_v47 = vpop.f32.mrb[237].mxu0  ;;  %v15588_v18 = vld [vmem:[#allocation20_spill] sm:$0xff]  ;;  %v9911_v14 = vpop.f32.mrb[43].mxu1 }
 0x56e   :  { %v5158_v16 = vpop.f32.mrb[238].mxu0 }
 0x56f   :  { %v5176_v2 = vadd.f32 %v5158_v16, %v14197_v51  ;;  %v14287_v31 = vadd.f32 %v13884_v46, %v5175_v42  ;;  %v9757_v5 = vpop.f32.mrb[239].mxu0  ;;  %v14299_v51 = vpop.f32.mrb[44].mxu1 }
 0x570   :  { %v9914_v46 = vpop.f32.mrb[45].mxu1  ;;  %10165 = vmatmul.mubr.msk.bf16.gmra.mrb[152].mxu1 %vm192_vm1, %v15547_v58  ;;  %v15590_v58 = vld [vmem:[#allocation23_spill] sm:$0xff] }
 0x571   :  { %v14292_v56 = vadd.f32 %v13896_v4, %v5176_v2  ;;  %10007 = vmatmul.mubr.msk.bf16.vlgmr.msra.gmra.mrb[88].mxu0 %vm192_vm1, %v15588_v18  ;;  %v5836_v4 = vpop.f32.mrb[46].mxu1  ;;  %10168 = vmatprep.mubr.msk.bf16.mxu1 %vm10450_vm2, %v15395_v19 }
 0x572   :  { %10049 = vmatpush3.bf16.msra.mxu0 %v15589_v54  ;;  %10010 = vmatprep.mubr.msk.bf16.mxu0 %vm10450_vm2, %v15395_v19  ;;  %v9915_v42 = vpop.f32.mrb[47].mxu1 }
 0x573   :  { %10092 = vmatprep.subr.bf16.mxu0 %v15395_v19  ;;  %v14307_v10 = vpop.f32.mrb[48].mxu1 }
 0x574   :  { %v5163_v57 = vpop.f32.mrb[240].mxu0  ;;  %v9942_v5 = vpop.f32.mrb[49].mxu1 }
 0x575   :  { %v5177_v29 = vadd.f32 %v5163_v57, %v14210_v27  ;;  %v9760_v24 = vpop.f32.mrb[241].mxu0  ;;  %v14312_v7 = vpop.f32.mrb[50].mxu1  ;;  %v15591_v5 = vld [vmem:[#allocation25_spill] sm:$0xff] }
 0x576   :  { %v5166_v47 = vpop.f32.mrb[242].mxu0  ;;  %v9943_v14 = vpop.f32.mrb[51].mxu1 }
 0x577   :  { %v14310_v16 = vadd.f32 %v13919_v63, %v5177_v29  ;;  %v9761_v2 = vpop.f32.mrb[243].mxu0 }
 0x578   :  { %10169 = vmatmul.mubr.msk.bf16.gmra.mrb[156].mxu1 %vm192_vm1, %v15550_v12 }
 0x579   :  { %10011 = vmatmul.mubr.msk.bf16.gmra.mrb[92].mxu0 %vm192_vm1, %v15590_v58  ;;  %10172 = vmatprep.mubr.msk.bf16.mxu1 %vm10450_vm2, %v15395_v19 }
 0x57a   :  { %10014 = vmatprep.mubr.msk.bf16.mxu0 %vm10450_vm2, %v15395_v19 }
 0x57b   :  { %v14323_v4 = vpop.f32.mrb[52].mxu1 }
 0x57c   :  { %v5293_v27 = vpop.f32.mrb[244].mxu0  ;;  %v9946_v47 = vpop.f32.mrb[53].mxu1 }
 0x57d   :  { %v5331_v63 = vadd.f32 %v5293_v27, %v14223_v36  ;;  %v9788_v46 = vpop.f32.mrb[245].mxu0  ;;  %v14329_v2 = vpop.f32.mrb[54].mxu1  ;;  %v15592_v47 = vld [vmem:[#allocation26_spill] sm:$0xff] }
 0x57e   :  { %v5296_v57 = vpop.f32.mrb[246].mxu0  ;;  %v9947_v36 = vpop.f32.mrb[55].mxu1 }
 0x57f   :  { %v5332_v29 = vadd.f32 %v5296_v57, %v14228_v25  ;;  %v14327_v24 = vadd.f32 %v13952_v1, %v5331_v63  ;;  %v9789_v42 = vpop.f32.mrb[247].mxu0 }
 0x580   :  { %10173 = vmatmul.mubr.msk.bf16.gmra.mrb[160].mxu1 %vm192_vm1, %v15553_v34 }
 0x581   :  { %v14332_v12 = vadd.f32 %v13963_v9, %v5332_v29  ;;  %10015 = vmatmul.mubr.msk.bf16.gmra.mrb[96].mxu0 %vm192_vm1, %v15591_v5  ;;  %10176 = vmatprep.mubr.msk.bf16.mxu1 %vm10450_vm2, %v15395_v19 }
 0x582   :  { %10018 = vmatprep.mubr.msk.bf16.mxu0 %vm10450_vm2, %v15395_v19 }
 0x583   :  { %v14343_v9 = vpop.f32.mrb[56].mxu1 }
 0x584   :  { %v5301_v25 = vpop.f32.mrb[248].mxu0  ;;  %v9950_v29 = vpop.f32.mrb[57].mxu1 }
 0x585   :  { %v5333_v1 = vadd.f32 %v5301_v25, %v14239_v37  ;;  %v9792_v14 = vpop.f32.mrb[249].mxu0  ;;  %v14349_v42 = vpop.f32.mrb[58].mxu1  ;;  %v15593_v29 = vld [vmem:[#allocation27_spill] sm:$0xff] }
 0x586   :  { %v5304_v27 = vpop.f32.mrb[250].mxu0  ;;  %v9951_v37 = vpop.f32.mrb[59].mxu1 }
 0x587   :  { %v5334_v63 = vadd.f32 %v5304_v27, %v14242_v23  ;;  %v14347_v46 = vadd.f32 %v13981_v44, %v5333_v1  ;;  %v9793_v57 = vpop.f32.mrb[251].mxu0 }
 0x588   :  { %10177 = vmatmul.mubr.msk.bf16.gmra.mrb[164].mxu1 %vm192_vm1, %v15556_v15 }
 0x589   :  { %v14352_v34 = vadd.f32 %v13993_v62, %v5334_v63  ;;  %10019 = vmatmul.mubr.msk.bf16.gmra.mrb[100].mxu0 %vm192_vm1, %v15592_v47  ;;  %10204 = vmatprep.mubr.msk.bf16.mxu1 %vm10450_vm2, %v15395_v19 }
 0x58a   :  { %10022 = vmatprep.mubr.msk.bf16.mxu0 %vm10450_vm2, %v15395_v19 }
 0x58b   :  { %v14363_v62 = vpop.f32.mrb[60].mxu1 }
 0x58c   :  { %v5309_v23 = vpop.f32.mrb[252].mxu0  ;;  %v9954_v63 = vpop.f32.mrb[61].mxu1 }
 0x58d   :  { %v5335_v44 = vadd.f32 %v5309_v23, %v14261_v21  ;;  %v9796_v36 = vpop.f32.mrb[253].mxu0  ;;  %v14369_v57 = vpop.f32.mrb[62].mxu1 }
 0x58e   :  { %v5312_v25 = vpop.f32.mrb[254].mxu0  ;;  %v9955_v21 = vpop.f32.mrb[63].mxu1 }
 0x58f   :  { %v5336_v1 = vadd.f32 %v5312_v25, %v14266_v41  ;;  %v14367_v14 = vadd.f32 %v14014_v33, %v5335_v44  ;;  %v9797_v27 = vpop.f32.mrb[255].mxu0  ;;  %v8130_v41 = vld [vmem:[%s15240_s0 + $0x271] sm:$0xff]  ;;  %v8131_v33 = vld [vmem:[%s15240_s0 + $0x279] sm:$0xff] }
 0x590   :  { %10205 = vmatmul.mubr.msk.bf16.vlgmr.msra.gmra.mrb[168].mxu1 %vm192_vm1, %v13917_v50  ;;  %v14390_v44 = vpack.c.bf16 %v8131_v33, %v8130_v41  ;;  %v15594_v41 = vld [vmem:[#allocation5_spill] sm:$0xff] }
 0x591   :  { %v14372_v15 = vadd.f32 %v14023_v26, %v5336_v1  ;;  %10023 = vmatmul.mubr.msk.bf16.gmra.mrb[104].mxu0 %vm192_vm1, %v15593_v29  ;;  %10208 = vmatprep.mubr.msk.bf16.mxu1 %vm10450_vm2, %v15395_v19 }
 0x592   :  { %10050 = vmatprep.mubr.msk.bf16.mxu0 %vm10450_vm2, %v15395_v19  ;;  %10247 = vmatpush3.bf16.msra.mxu1 %v15589_v54 }
 0x593   :  { %10290 = vmatprep.subr.bf16.mxu1 %v15395_v19  ;;  %v14393_v25 = vpop.f32.mrb[64].mxu1 }
 0x594   :  { %v5317_v26 = vpop.f32.mrb[0].mxu0  ;;  %v9958_v63 = vpop.f32.mrb[65].mxu1 }
 0x595   :  { %v5337_v37 = vadd.f32 %v5317_v26, %v14287_v31  ;;  %v9800_v23 = vpop.f32.mrb[1].mxu0  ;;  %v5980_v21 = vpop.f32.mrb[66].mxu1 }
 0x596   :  { %v5320_v36 = vpop.f32.mrb[2].mxu0  ;;  %v9959_v31 = vpop.f32.mrb[67].mxu1 }
 0x597   :  { %v5338_v1 = vadd.f32 %v5320_v36, %v14292_v56  ;;  %v14397_v50 = vadd.f32 %v14041_v53, %v5337_v37  ;;  %v9801_v27 = vpop.f32.mrb[3].mxu0  ;;  %v8132_v53 = vld [vmem:[%s15240_s0 + $0x281] sm:$0xff]  ;;  %v8133_v56 = vld [vmem:[%s15240_s0 + $0x289] sm:$0xff] }
 0x598   :  { %10209 = vmatmul.mubr.msk.bf16.gmra.mrb[172].mxu1 %vm192_vm1, %v13950_v17  ;;  %v14419_v37 = vpack.c.bf16 %v8133_v56, %v8132_v53  ;;  %v15596_v31 = vld [vmem:[#allocation31_spill] sm:$0xff] }
 0x599   :  { %v14400_v54 = vadd.f32 %v14053_v35, %v5338_v1  ;;  %10051 = vmatmul.mubr.msk.bf16.vlgmr.msra.gmra.mrb[108].mxu0 %vm192_vm1, %v14390_v44  ;;  %10212 = vmatprep.mubr.msk.bf16.mxu1 %vm10450_vm2, %v15395_v19 }
 0x59a   :  { %10093 = vmatpush3.bf16.msra.mxu0 %v15594_v41  ;;  %10054 = vmatprep.mubr.msk.bf16.mxu0 %vm10450_vm2, %v15395_v19  ;;  %15595 = vst [vmem:[#allocation41_spill] sm:$0xff] %v14419_v37 }
 0x59b   :  { %10136 = vmatprep.subr.bf16.mxu0 %v15395_v19  ;;  %v14421_v36 = vpop.f32.mrb[68].mxu1 }
 0x59c   :  { %v5325_v35 = vpop.f32.mrb[4].mxu0  ;;  %v9986_v63 = vpop.f32.mrb[69].mxu1 }
 0x59d   :  { %v5339_v33 = vadd.f32 %v5325_v35, %v14310_v16  ;;  %v9804_v26 = vpop.f32.mrb[5].mxu0  ;;  %v14426_v21 = vpop.f32.mrb[70].mxu1  ;;  %v8134_v16 = vld [vmem:[%s15240_s0 + $0x291] sm:$0xff] }
 0x59e   :  { %v5328_v23 = vpop.f32.mrb[6].mxu0  ;;  %v9987_v17 = vpop.f32.mrb[71].mxu1 }
 0x59f   :  { %v14424_v1 = vadd.f32 %v14071_v6, %v5339_v33  ;;  %v9805_v27 = vpop.f32.mrb[7].mxu0  ;;  %v8135_v6 = vld [vmem:[%s15240_s0 + $0x299] sm:$0xff] }
 0x5a0   :  { %10213 = vmatmul.mubr.msk.bf16.gmra.mrb[176].mxu1 %vm192_vm1, %v15596_v31  ;;  %v14443_v35 = vpack.c.bf16 %v8135_v6, %v8134_v16 }
 0x5a1   :  { %10055 = vmatmul.mubr.msk.bf16.gmra.mrb[112].mxu0 %vm192_vm1, %v14419_v37  ;;  %10216 = vmatprep.mubr.msk.bf16.mxu1 %vm10450_vm2, %v15395_v19 }
 0x5a2   :  { %10058 = vmatprep.mubr.msk.bf16.mxu0 %vm10450_vm2, %v15395_v19 }
 0x5a3   :  { %v14445_v26 = vpop.f32.mrb[72].mxu1 }
 0x5a4   :  { %v5484_v41 = vpop.f32.mrb[8].mxu0  ;;  %v9990_v17 = vpop.f32.mrb[73].mxu1 }
 0x5a5   :  { %v5522_v53 = vadd.f32 %v5484_v41, %v14327_v24  ;;  %v9832_v56 = vpop.f32.mrb[9].mxu0  ;;  %v14451_v31 = vpop.f32.mrb[74].mxu1 }
 0x5a6   :  { %v5487_v33 = vpop.f32.mrb[10].mxu0  ;;  %v9991_v24 = vpop.f32.mrb[75].mxu1 }
 0x5a7   :  { %v5523_v23 = vadd.f32 %v5487_v33, %v14332_v12  ;;  %v14449_v27 = vadd.f32 %v14099_v49, %v5522_v53  ;;  %v9833_v63 = vpop.f32.mrb[11].mxu0  ;;  %v8136_v12 = vld [vmem:[%s15240_s0 + $0x2a1] sm:$0xff]  ;;  %v8137_v49 = vld [vmem:[%s15240_s0 + $0x2a9] sm:$0xff] }
 0x5a8   :  { %10217 = vmatmul.mubr.msk.bf16.gmra.mrb[180].mxu1 %vm192_vm1, %v14012_v43  ;;  %v14471_v41 = vpack.c.bf16 %v8137_v49, %v8136_v12 }
 0x5a9   :  { %v14454_v37 = vadd.f32 %v14110_v0, %v5523_v23  ;;  %10059 = vmatmul.mubr.msk.bf16.gmra.mrb[116].mxu0 %vm192_vm1, %v14443_v35  ;;  %10220 = vmatprep.mubr.msk.bf16.mxu1 %vm10450_vm2, %v15395_v19 }
 0x5aa   :  { %10062 = vmatprep.mubr.msk.bf16.mxu0 %vm10450_vm2, %v15395_v19  ;;  %15597 = vst [vmem:[#allocation57_spill] sm:$0xff] %v14471_v41 }
 0x5ab   :  { %v14473_v56 = vpop.f32.mrb[76].mxu1 }
 0x5ac   :  { %v5492_v0 = vpop.f32.mrb[12].mxu0  ;;  %v9994_v17 = vpop.f32.mrb[77].mxu1 }
 0x5ad   :  { %v5524_v16 = vadd.f32 %v5492_v0, %v14347_v46  ;;  %v9836_v6 = vpop.f32.mrb[13].mxu0  ;;  %v14479_v43 = vpop.f32.mrb[78].mxu1 }
 0x5ae   :  { %v5495_v53 = vpop.f32.mrb[14].mxu0  ;;  %v9995_v46 = vpop.f32.mrb[79].mxu1 }
 0x5af   :  { %v5525_v33 = vadd.f32 %v5495_v53, %v14352_v34  ;;  %v14477_v23 = vadd.f32 %v14125_v38, %v5524_v16  ;;  %v9837_v63 = vpop.f32.mrb[15].mxu0  ;;  %v8138_v34 = vld [vmem:[%s15240_s0 + $0x2b1] sm:$0xff] }
 0x5b0   :  { %10221 = vmatmul.mubr.msk.bf16.gmra.mrb[184].mxu1 %vm192_vm1, %v14039_v61  ;;  %v14496_v49 = vpack.c.bf16 %v8138_v34, %v8138_v34 }
 0x5b1   :  { %v14482_v24 = vadd.f32 %v14136_v3, %v5525_v33  ;;  %10063 = vmatmul.mubr.msk.bf16.gmra.mrb[120].mxu0 %vm192_vm1, %v14471_v41  ;;  %10248 = vmatprep.mubr.msk.bf16.mxu1 %vm10450_vm2, %v15395_v19 }
 0x5b2   :  { %10066 = vmatprep.mubr.msk.bf16.mxu0 %vm10450_vm2, %v15395_v19  ;;  %15598 = vst [vmem:[#allocation58_spill] sm:$0xff] %v14496_v49 }
 0x5b3   :  { %v14498_v16 = vpop.f32.mrb[80].mxu1 }
 0x5b4   :  { %v5500_v38 = vpop.f32.mrb[16].mxu0  ;;  %v9998_v63 = vpop.f32.mrb[81].mxu1 }
 0x5b5   :  { %v5526_v3 = vadd.f32 %v5500_v38, %v14367_v14  ;;  %v9840_v12 = vpop.f32.mrb[17].mxu0  ;;  %v14504_v61 = vpop.f32.mrb[82].mxu1  ;;  %v15599_v63 = vld [vmem:[#allocation18_spill] sm:$0xff] }
 0x5b6   :  { %v5503_v0 = vpop.f32.mrb[18].mxu0  ;;  %v9999_v14 = vpop.f32.mrb[83].mxu1 }
 0x5b7   :  { %v5527_v6 = vadd.f32 %v5503_v0, %v14372_v15  ;;  %v14502_v53 = vadd.f32 %v14151_v60, %v5526_v3  ;;  %v9841_v33 = vpop.f32.mrb[19].mxu0  ;;  %v10413_v60 = vld [vmem:[%s15243_s3] sm:$0xff]  }
 0x5b8   :  { %10249 = vmatmul.mubr.msk.bf16.vlgmr.msra.gmra.mrb[188].mxu1 %vm192_vm1, %v14055_v28  ;;  %v10414_v33 = vld [vmem:[%s15243_s3 + $0x8] sm:$0xff]  }
 0x5b9   :  { %v14507_v17 = vadd.f32 %v14161_v39, %v5527_v6  ;;  %10067 = vmatmul.mubr.msk.bf16.gmra.mrb[124].mxu0 %vm192_vm1, %v14496_v49  ;;  %10252 = vmatprep.mubr.msk.bf16.mxu1 %vm10450_vm2, %v15395_v19 }
 0x5ba   :  { %10094 = vmatprep.mubr.msk.bf16.mxu0 %vm10450_vm2, %v15395_v19  ;;  %10291 = vmatpush3.bf16.msra.mxu1 %v10413_v60 }
 0x5bb   :  { %10292 = vmatprep.subr.bf16.mxu1 %v15395_v19  ;;  %v14522_v38 = vpop.f32.mrb[84].mxu1 }
 0x5bc   :  { %v5508_v15 = vpop.f32.mrb[20].mxu0  ;;  %v10002_v0 = vpop.f32.mrb[85].mxu1 }
 0x5bd   :  { %v5528_v39 = vadd.f32 %v5508_v15, %v14397_v50  ;;  %v9844_v46 = vpop.f32.mrb[21].mxu0  ;;  %v6142_v6 = vpop.f32.mrb[86].mxu1  ;;  %v10416_v0 = vld [vmem:[%s15243_s3 + $0x18] sm:$0xff]  }
 0x5be   :  { %v5511_v34 = vpop.f32.mrb[22].mxu0  ;;  %10293 = vmatpush3.bf16.msra.mxu1 %v10414_v33  ;;  %v10003_v14 = vpop.f32.mrb[87].mxu1  ;;  %v15601_v6 = vld [vmem:[#allocation34_spill] sm:$0xff]  ;;  %v15602_v33 = vld [vmem:[#allocation32_spill] sm:$0xff] }
 0x5bf   :  { %v5529_v3 = vadd.f32 %v5511_v34, %v14400_v54  ;;  %v14526_v28 = vadd.f32 %v14174_v52, %v5528_v39  ;;  %v9845_v12 = vpop.f32.mrb[23].mxu0  ;;  %10294 = vmatprep.subr.bf16.mxu1 %v15395_v19  ;;  %v15600_v54 = vld [vmem:[#allocation7_spill] sm:$0xff] }
 0x5c0   :  { %10253 = vmatmul.mubr.msk.bf16.gmra.mrb[192].mxu1 %vm192_vm1, %v14083_v22 }
 0x5c1   :  { %v14532_v50 = vadd.f32 %v14179_v45, %v5529_v3  ;;  %10095 = vmatmul.mubr.msk.bf16.vlgmr.msra.gmra.mrb[128].mxu0 %vm192_vm1, %v15599_v63  ;;  %10256 = vmatprep.mubr.msk.bf16.mxu1 %vm10450_vm2, %v15395_v19  ;;  %v10415_v45 = vld [vmem:[%s15243_s3 + $0x10] sm:$0xff]  }
 0x5c2   :  { %10137 = vmatpush3.bf16.msra.mxu0 %v15600_v54  ;;  %10098 = vmatprep.mubr.msk.bf16.mxu0 %vm10450_vm2, %v15395_v19  ;;  %v10418_v54 = vld [vmem:[%s15243_s3 + $0x20] sm:$0xff]  }
 0x5c3   :  { %10180 = vmatprep.subr.bf16.mxu0 %v15395_v19  ;;  %10295 = vmatpush3.bf16.msra.mxu1 %v10415_v45  ;;  %v14550_v46 = vpop.f32.mrb[88].mxu1 }
 0x5c4   :  { %v5516_v52 = vpop.f32.mrb[24].mxu0  ;;  %10296 = vmatprep.subr.bf16.mxu1 %v15395_v19  ;;  %v10030_v3 = vpop.f32.mrb[89].mxu1 }
 0x5c5   :  { %v5530_v15 = vadd.f32 %v5516_v52, %v14424_v1  ;;  %v9848_v60 = vpop.f32.mrb[25].mxu0  ;;  %v14555_v12 = vpop.f32.mrb[90].mxu1  ;;  %v15603_v52 = vld [vmem:[#allocation38_spill] sm:$0xff] }
 0x5c6   :  { %v5519_v39 = vpop.f32.mrb[26].mxu0  ;;  %v10031_v1 = vpop.f32.mrb[91].mxu1 }
 0x5c7   :  { %v14553_v34 = vadd.f32 %v14194_v55, %v5530_v15  ;;  %v9849_v22 = vpop.f32.mrb[27].mxu0  ;;  %10297 = vmatpush3.bf16.msra.mxu1 %v10416_v0  ;;  %v14568_v55 = vld [vmem:[%s15242_s2] ss:$0 sm:$0xff] }
 0x5c8   :  { %10298 = vmatprep.subr.bf16.mxu1 %v15395_v19  ;;  %v4888_v63 = vadd.f32 %v14568_v55, %v15602_v33  ;;  %10257 = vmatmul.mubr.msk.bf16.gmra.mrb[196].mxu1 %vm192_vm1, %v14112_v11  ;;  %v4889_v45 = vadd.f32 %v14568_v55, %v15603_v52 }
 0x5c9   :  { %10099 = vmatmul.mubr.msk.bf16.gmra.mrb[132].mxu0 %vm192_vm1, %v15601_v6  ;;  %10260 = vmatprep.mubr.msk.bf16.mxu1 %vm10450_vm2, %v15395_v19 }
 0x5ca   :  { %10102 = vmatprep.mubr.msk.bf16.mxu0 %vm10450_vm2, %v15395_v19  ;;  %v4906_v11 = vmul.f32 0.1, %v4888_v63  ;;  %vm4897_vm13 = vcmp.gt.f32.partialorder %v4888_v63, 0.0  ;;  %vm4898_vm15 = vcmp.gt.f32.partialorder %v4889_v45, 0.0 }
 0x5cb   :  { %10299 = vmatpush3.bf16.msra.mxu1 %v10418_v54  ;;  %v14583_v22 = vpop.f32.mrb[92].mxu1 }
 0x5cc   :  { %v5675_v14 = vpop.f32.mrb[28].mxu0  ;;  %10300 = vmatprep.subr.bf16.mxu1 %v15395_v19  ;;  %v10034_v1 = vpop.f32.mrb[93].mxu1 }
 0x5cd   :  { %v5713_v15 = vadd.f32 %v5675_v14, %v14449_v27  ;;  %v9876_v60 = vpop.f32.mrb[29].mxu0  ;;  %v14587_v33 = vpop.f32.mrb[94].mxu1  ;;  %v10419_v27 = vld [vmem:[%s15243_s3 + $0x28] sm:$0xff]   ;;  %v4907_v14 = vmul.f32 0.1, %v4889_v45 }
 0x5ce   :  { %v5678_v39 = vpop.f32.mrb[30].mxu0  ;;  %v15604_v60 = vld [vmem:[#allocation35_spill] sm:$0xff] }
 0x5cf   :  { %v5722_v3 = vadd.f32 %v14568_v55, %v5713_v15  ;;  %v5714_v0 = vadd.f32 %v5678_v39, %v14454_v37  ;;  %v9877_v6 = vpop.f32.mrb[31].mxu0  ;;  %10301 = vmatpush3.bf16.msra.mxu1 %v10419_v27  ;;  %v10035_v15 = vpop.f32.mrb[95].mxu1  ;;  %v15605_v37 = vld [vmem:[#allocation40_spill] sm:$0xff] }
 0x5d0   :  { %10302 = vmatprep.subr.bf16.mxu1 %v15395_v19  ;;  %v4890_v39 = vadd.f32 %v14568_v55, %v15605_v37  ;;  %v14600_v6 = vsel %vm4897_vm13, %v4888_v63, %v4906_v11  ;;  %v10420_v37 = vld [vmem:[%s15243_s3 + $0x30] sm:$0xff]  }
 0x5d1   :  { %vm5731_vm14 = vcmp.gt.f32.partialorder %v5722_v3, 0.0  ;;  %v5740_v54 = vmul.f32 0.1, %v5722_v3  ;;  %v5723_v52 = vadd.f32 %v14568_v55, %v5714_v0  ;;  %10103 = vmatmul.mubr.msk.bf16.gmra.mrb[136].mxu0 %vm192_vm1, %v15604_v60  ;;  %15606 = vst [vmem:[#allocation44_spill] sm:$0xff] %v14600_v6  ;;  %v15608_v0 = vld [vmem:[#allocation53_spill] sm:$0xff] }
 0x5d2   :  { %10106 = vmatprep.mubr.msk.bf16.mxu0 %vm10450_vm2, %v15395_v19  ;;  %10261 = vmatmul.mubr.msk.bf16.gmra.mrb[200].mxu1 %vm192_vm1, %v15608_v0  ;;  %v15609_v63 = vld [vmem:[#allocation33_spill] sm:$0xff]  ;;  %v4908_v60 = vmul.f32 0.1, %v4890_v39  ;;  %vm4899_vm3 = vcmp.gt.f32.partialorder %v4890_v39, 0.0 }
 0x5d3   :  { %v14602_v1 = vsel %vm5731_vm14, %v5722_v3, %v5740_v54  ;;  %vm5732_vm0 = vcmp.gt.f32.partialorder %v5723_v52, 0.0  ;;  %v5741_v27 = vmul.f32 0.1, %v5723_v52  ;;  %10264 = vmatprep.mubr.msk.bf16.mxu1 %vm10450_vm2, %v15395_v19  ;;  %10303 = vmatpush3.bf16.msra.mxu1 %v10420_v37  ;;  %v4891_v11 = vadd.f32 %v14568_v55, %v15609_v63  ;;  %v14623_v41 = vpop.f32.mrb[96].mxu1 }
 0x5d4   :  { %15607 = vst [vmem:[#allocation59_spill] sm:$0xff] %v14602_v1  ;;  %v5683_v15 = vpop.f32.mrb[32].mxu0  ;;  %v14615_v3 = vsel %vm4898_vm15, %v4889_v45, %v4907_v14  ;;  %10304 = vmatprep.subr.bf16.mxu1 %v15395_v19  ;;  %15612 = vst [vmem:[#allocation61_spill] sm:$0xff] %v14623_v41  ;;  %v15614_v1 = vld [vmem:[#allocation36_spill] sm:$0xff] }
 0x5d5   :  { %15610 = vst [vmem:[#allocation48_spill] sm:$0xff] %v14615_v3  ;;  %v14617_v54 = vsel %vm5732_vm0, %v5723_v52, %v5741_v27  ;;  %v5715_v0 = vadd.f32 %v5683_v15, %v14477_v23  ;;  %v9880_v49 = vpop.f32.mrb[33].mxu0  ;;  %v10038_v52 = vpop.f32.mrb[97].mxu1  ;;  %v10421_v23 = vld [vmem:[%s15243_s3 + $0x38] sm:$0xff]   ;;  %vm4900_vm5 = vcmp.gt.f32.partialorder %v4891_v11, 0.0 }
 0x5d6   :  { %15611 = vst [vmem:[#allocation60_spill] sm:$0xff] %v14617_v54  ;;  %v5686_v6 = vpop.f32.mrb[34].mxu0  ;;  %v14627_v27 = vpop.f32.mrb[98].mxu1  ;;  %v4909_v49 = vmul.f32 0.1, %v4891_v11  ;;  %v15618_v54 = vld [vmem:[#allocation55_spill] sm:$0xff] }
 0x5d7   :  { %v5724_v37 = vadd.f32 %v14568_v55, %v5715_v0  ;;  %v5716_v45 = vadd.f32 %v5686_v6, %v14482_v24  ;;  %v9881_v14 = vpop.f32.mrb[35].mxu0  ;;  %15613 = vst [vmem:[#allocation52_spill] sm:$0xff] %v14627_v27  ;;  %10305 = vmatpush3.bf16.msra.mxu1 %v10421_v23  ;;  %v10039_v0 = vpop.f32.mrb[99].mxu1  ;;  %v14635_v24 = vsel %vm4899_vm3, %v4890_v39, %v4908_v60  ;;  %v15616_v6 = vld [vmem:[#allocation42_spill] sm:$0xff]  ;;  %v15619_v39 = vld [vmem:[#allocation45_spill] sm:$0xff] }
 0x5d8   :  { %15615 = vst [vmem:[#allocation62_spill] sm:$0xff] %v14635_v24  ;;  %v4892_v14 = vadd.f32 %v14568_v55, %v15616_v6  ;;  %v4893_v60 = vadd.f32 %v14568_v55, %v15619_v39  ;;  %v14651_v0 = vsel %vm4900_vm5, %v4891_v11, %v4909_v49 }
 0x5d9   :  { %vm5733_vm4 = vcmp.gt.f32.partialorder %v5724_v37, 0.0  ;;  %v5742_v15 = vmul.f32 0.1, %v5724_v37  ;;  %v5725_v63 = vadd.f32 %v14568_v55, %v5716_v45  ;;  %10107 = vmatmul.mubr.msk.bf16.gmra.mrb[140].mxu0 %vm192_vm1, %v15614_v1  ;;  %15620 = vst [vmem:[#allocation56_spill] sm:$0xff] %v14651_v0 }
 0x5da   :  { %10110 = vmatprep.mubr.msk.bf16.mxu0 %vm10450_vm2, %v15395_v19  ;;  %10265 = vmatmul.mubr.msk.bf16.gmra.mrb[204].mxu1 %vm192_vm1, %v15618_v54  ;;  %v4910_v1 = vmul.f32 0.1, %v4892_v14  ;;  %vm4901_vm7 = vcmp.gt.f32.partialorder %v4892_v14, 0.0  ;;  %v4911_v49 = vmul.f32 0.1, %v4893_v60  ;;  %vm4902_vm9 = vcmp.gt.f32.partialorder %v4893_v60, 0.0 }
 0x5db   :  { %v14641_v52 = vsel %vm5733_vm4, %v5724_v37, %v5742_v15  ;;  %vm5734_vm6 = vcmp.gt.f32.partialorder %v5725_v63, 0.0  ;;  %v5743_v23 = vmul.f32 0.1, %v5725_v63  ;;  %10306 = vmatprep.mubr.msk.bf16.mxu1 %vm10450_vm2, %v15395_v19  ;;  %v14658_v27 = vpop.f32.mrb[100].mxu1  ;;  %v15626_v54 = vld [vmem:[#allocation49_spill] sm:$0xff] }
 0x5dc   :  { %15617 = vst [vmem:[#allocation63_spill] sm:$0xff] %v14641_v52  ;;  %v5691_v45 = vpop.f32.mrb[36].mxu0  ;;  %v10042_v39 = vpop.f32.mrb[101].mxu1 }
 0x5dd   :  { %v14653_v6 = vsel %vm5734_vm6, %v5725_v63, %v5743_v23  ;;  %v5717_v37 = vadd.f32 %v5691_v45, %v14502_v53  ;;  %v9884_v15 = vpop.f32.mrb[37].mxu0  ;;  %v14662_v11 = vpop.f32.mrb[102].mxu1  ;;  %v15622_v23 = vld [vmem:[#allocation37_spill] sm:$0xff] }
 0x5de   :  { %15621 = vst [vmem:[#allocation64_spill] sm:$0xff] %v14653_v6  ;;  %v5694_v3 = vpop.f32.mrb[38].mxu0  ;;  %v10043_v45 = vpop.f32.mrb[103].mxu1  ;;  %v15623_v15 = vld [vmem:[#allocation47_spill] sm:$0xff] }
 0x5df   :  { %v5726_v52 = vadd.f32 %v14568_v55, %v5717_v37  ;;  %v5718_v24 = vadd.f32 %v5694_v3, %v14507_v17  ;;  %v9885_v41 = vpop.f32.mrb[39].mxu0  ;;  %v4894_v37 = vadd.f32 %v14568_v55, %v15623_v15  ;;  %v14679_v45 = vsel %vm4902_vm9, %v4893_v60, %v4911_v49 }
 0x5e0   :  { %v14671_v41 = vsel %vm4901_vm7, %v4892_v14, %v4910_v1  ;;  %15627 = vst [vmem:[#allocation67_spill] sm:$0xff] %v14679_v45 }
 0x5e1   :  { %vm5735_vm8 = vcmp.gt.f32.partialorder %v5726_v52, 0.0  ;;  %v5744_v53 = vmul.f32 0.1, %v5726_v52  ;;  %v5727_v63 = vadd.f32 %v14568_v55, %v5718_v24  ;;  %10111 = vmatmul.mubr.msk.bf16.gmra.mrb[144].mxu0 %vm192_vm1, %v15622_v23  ;;  %15624 = vst [vmem:[#allocation65_spill] sm:$0xff] %v14671_v41  ;;  %v4895_v23 = vadd.f32 %v14568_v55, %v15626_v54 }
 0x5e2   :  { %10138 = vmatprep.mubr.msk.bf16.mxu0 %vm10450_vm2, %v15395_v19  ;;  %v4912_v14 = vmul.f32 0.1, %v4894_v37  ;;  %vm4903_vm11 = vcmp.gt.f32.partialorder %v4894_v37, 0.0 }
 0x5e3   :  { %v14673_v17 = vsel %vm5735_vm8, %v5726_v52, %v5744_v53  ;;  %vm5736_vm10 = vcmp.gt.f32.partialorder %v5727_v63, 0.0  ;;  %v5745_v3 = vmul.f32 0.1, %v5727_v63  ;;  %v14686_v53 = vpop.f32.mrb[104].mxu1  ;;  %vm4904_vm14 = vcmp.gt.f32.partialorder %v4895_v23, 0.0 }
 0x5e4   :  { %15625 = vst [vmem:[#allocation66_spill] sm:$0xff] %v14673_v17  ;;  %v5699_v39 = vpop.f32.mrb[40].mxu0  ;;  %v10046_v60 = vpop.f32.mrb[105].mxu1  ;;  %v14693_v52 = vsel %vm4903_vm11, %v4894_v37, %v4912_v14 }
 0x5e5   :  { %v14681_v6 = vsel %vm5736_vm10, %v5727_v63, %v5745_v3  ;;  %v5719_v15 = vadd.f32 %v5699_v39, %v14526_v28  ;;  %v9888_v0 = vpop.f32.mrb[41].mxu0  ;;  %v6333_v49 = vpop.f32.mrb[106].mxu1  ;;  %v4913_v63 = vmul.f32 0.1, %v4895_v23 }
 0x5e6   :  { %15628 = vst [vmem:[#allocation6_spill] sm:$0xff] %v14681_v6  ;;  %v5702_v1 = vpop.f32.mrb[42].mxu0  ;;  %v15629_v0 = vld [vmem:[#allocation39_spill] sm:$0xff]  ;;  %v10047_v39 = vpop.f32.mrb[107].mxu1  ;;  %v15630_v6 = vld [vmem:[#allocation9_spill] sm:$0xff] }
 0x5e7   :  { %v5728_v24 = vadd.f32 %v14568_v55, %v5719_v15  ;;  %v5720_v17 = vadd.f32 %v5702_v1, %v14532_v50  ;;  %v9889_v54 = vpop.f32.mrb[43].mxu0  ;;  %v15631_v50 = vld [vmem:[#allocation51_spill] sm:$0xff]  ;;  %v14705_v37 = vsel %vm4904_vm14, %v4895_v23, %v4913_v63 }
 0x5e8   :  { %v4896_v15 = vadd.f32 %v14568_v55, %v15631_v50  ;;  %v15632_v63 = vld [vmem:[#allocation43_spill] sm:$0xff] }
 0x5e9   :  { %vm5737_vm13 = vcmp.gt.f32.partialorder %v5728_v24, 0.0  ;;  %v5746_v3 = vmul.f32 0.1, %v5728_v24  ;;  %v5729_v28 = vadd.f32 %v14568_v55, %v5720_v17  ;;  %10139 = vmatmul.mubr.msk.bf16.vlgmr.msra.gmra.mrb[148].mxu0 %vm192_vm1, %v15629_v0 }
 0x5ea   :  { %10181 = vmatpush3.bf16.msra.mxu0 %v15630_v6  ;;  %10142 = vmatprep.mubr.msk.bf16.mxu0 %vm10450_vm2, %v15395_v19  ;;  %v4914_v39 = vmul.f32 0.1, %v4896_v15  ;;  %vm4905_vm0 = vcmp.gt.f32.partialorder %v4896_v15, 0.0 }
 0x5eb   :  { %v14700_v1 = vsel %vm5737_vm13, %v5728_v24, %v5746_v3  ;;  %vm5738_vm15 = vcmp.gt.f32.partialorder %v5729_v28, 0.0  ;;  %v5747_v54 = vmul.f32 0.1, %v5729_v28  ;;  %10224 = vmatprep.subr.bf16.mxu0 %v15395_v19  ;;  %v14712_v3 = vpop.f32.mrb[108].mxu1 }
 0x5ec   :  { %v5707_v60 = vpop.f32.mrb[44].mxu0  ;;  %v10074_v41 = vpop.f32.mrb[109].mxu1 }
 0x5ed   :  { %v14707_v14 = vsel %vm5738_vm15, %v5729_v28, %v5747_v54  ;;  %v5721_v6 = vadd.f32 %v5707_v60, %v14553_v34  ;;  %v9892_v49 = vpop.f32.mrb[45].mxu0  ;;  %v14715_v17 = vpop.f32.mrb[110].mxu1  ;;  %v14721_v28 = vsel %vm4905_vm0, %v4896_v15, %v4914_v39 }
 0x5ee   :  { %v5710_v24 = vpop.f32.mrb[46].mxu0  ;;  %v10075_v34 = vpop.f32.mrb[111].mxu1 }
 0x5ef   :  { %v5730_v50 = vadd.f32 %v14568_v55, %v5721_v6  ;;  %v9893_v45 = vpop.f32.mrb[47].mxu0 }
 0x5f1   :  { %vm5739_vm3 = vcmp.gt.f32.partialorder %v5730_v50, 0.0  ;;  %v5748_v23 = vmul.f32 0.1, %v5730_v50  ;;  %10143 = vmatmul.mubr.msk.bf16.gmra.mrb[152].mxu0 %vm192_vm1, %v15632_v63 }
 0x5f2   :  { %10146 = vmatprep.mubr.msk.bf16.mxu0 %vm10450_vm2, %v15395_v19 }
 0x5f3   :  { %v14723_v54 = vsel %vm5739_vm3, %v5730_v50, %v5748_v23  ;;  %v14728_v24 = vpop.f32.mrb[112].mxu1  ;;  %v15633_v23 = vld [vmem:[#allocation46_spill] sm:$0xff] }
 0x5f4   :  { %v5873_v41 = vpop.f32.mrb[48].mxu0  ;;  %v10078_v15 = vpop.f32.mrb[113].mxu1 }
 0x5f5   :  { %v5874_v60 = vadd.f32 %v5873_v41, %v14248_v59  ;;  %v9920_v6 = vpop.f32.mrb[49].mxu0  ;;  %v14734_v39 = vpop.f32.mrb[114].mxu1 }
 0x5f6   :  { %v5876_v49 = vpop.f32.mrb[50].mxu0  ;;  %v10079_v59 = vpop.f32.mrb[115].mxu1 }
 0x5f7   :  { %v5877_v63 = vadd.f32 %v5876_v49, %v14252_v40  ;;  %v14732_v34 = vadd.f32 %v14307_v10, %v5874_v60  ;;  %v9921_v0 = vpop.f32.mrb[51].mxu0  ;;  %v15634_v59 = vld [vmem:[#allocation50_spill] sm:$0xff] }
 0x5f9   :  { %v14737_v50 = vadd.f32 %v14312_v7, %v5877_v63  ;;  %10147 = vmatmul.mubr.msk.bf16.gmra.mrb[156].mxu0 %vm192_vm1, %v15633_v23 }
 0x5fa   :  { %10150 = vmatprep.mubr.msk.bf16.mxu0 %vm10450_vm2, %v15395_v19 }
 0x5fb   :  { %v14744_v60 = vpop.f32.mrb[116].mxu1 }
 0x5fc   :  { %v5881_v41 = vpop.f32.mrb[52].mxu0  ;;  %v10082_v63 = vpop.f32.mrb[117].mxu1 }
 0x5fd   :  { %v5882_v40 = vadd.f32 %v5881_v41, %v14257_v8  ;;  %v9924_v6 = vpop.f32.mrb[53].mxu0  ;;  %v14750_v15 = vpop.f32.mrb[118].mxu1 }
 0x5fe   :  { %v5884_v10 = vpop.f32.mrb[54].mxu0  ;;  %v10083_v8 = vpop.f32.mrb[119].mxu1 }
 0x5ff   :  { %v5885_v0 = vadd.f32 %v5884_v10, %v14263_v13  ;;  %v14748_v49 = vadd.f32 %v14323_v4, %v5882_v40  ;;  %v9925_v7 = vpop.f32.mrb[55].mxu0  ;;  %v15635_v8 = vld [vmem:[#allocation54_spill] sm:$0xff] }
 0x601   :  { %v14753_v23 = vadd.f32 %v14329_v2, %v5885_v0  ;;  %10151 = vmatmul.mubr.msk.bf16.gmra.mrb[160].mxu0 %vm192_vm1, %v15634_v59 }
 0x602   :  { %10154 = vmatprep.mubr.msk.bf16.mxu0 %vm10450_vm2, %v15395_v19 }
 0x603   :  { %v14760_v40 = vpop.f32.mrb[120].mxu1 }
 0x604   :  { %v5889_v41 = vpop.f32.mrb[56].mxu0  ;;  %v10086_v0 = vpop.f32.mrb[121].mxu1 }
 0x605   :  { %v5890_v13 = vadd.f32 %v5889_v41, %v14272_v20  ;;  %v9928_v6 = vpop.f32.mrb[57].mxu0  ;;  %v14766_v63 = vpop.f32.mrb[122].mxu1 }
 0x606   :  { %v5892_v4 = vpop.f32.mrb[58].mxu0  ;;  %v10087_v20 = vpop.f32.mrb[123].mxu1 }
 0x607   :  { %v5893_v10 = vadd.f32 %v5892_v4, %v14276_v48  ;;  %v14764_v7 = vadd.f32 %v14343_v9, %v5890_v13  ;;  %v9929_v2 = vpop.f32.mrb[59].mxu0 }
 0x609   :  { %v14769_v59 = vadd.f32 %v14349_v42, %v5893_v10  ;;  %10155 = vmatmul.mubr.msk.bf16.gmra.mrb[164].mxu0 %vm192_vm1, %v15635_v8 }
 0x60a   :  { %10182 = vmatprep.mubr.msk.bf16.mxu0 %vm10450_vm2, %v15395_v19 }
 0x60b   :  { %v14776_v13 = vpop.f32.mrb[124].mxu1 }
 0x60c   :  { %v5897_v41 = vpop.f32.mrb[60].mxu0  ;;  %v10090_v10 = vpop.f32.mrb[125].mxu1 }
 0x60d   :  { %v5898_v48 = vadd.f32 %v5897_v41, %v14283_v30  ;;  %v9932_v6 = vpop.f32.mrb[61].mxu0  ;;  %v6553_v0 = vpop.f32.mrb[126].mxu1  ;;  %v15636_v30 = vld [vmem:[#allocation11_spill] sm:$0xff] }
 0x60e   :  { %v5900_v9 = vpop.f32.mrb[62].mxu0  ;;  %v10091_v20 = vpop.f32.mrb[127].mxu1 }
 0x60f   :  { %v5901_v4 = vadd.f32 %v5900_v9, %v14289_v32  ;;  %v14780_v2 = vadd.f32 %v14363_v62, %v5898_v48  ;;  %v9933_v42 = vpop.f32.mrb[63].mxu0 }
 0x611   :  { %v14783_v8 = vadd.f32 %v14369_v57, %v5901_v4  ;;  %10183 = vmatmul.mubr.msk.bf16.vlgmr.msra.gmra.mrb[168].mxu0 %vm192_vm1, %v15588_v18 }
 0x612   :  { %10225 = vmatpush3.bf16.msra.mxu0 %v15636_v30  ;;  %10186 = vmatprep.mubr.msk.bf16.mxu0 %vm10450_vm2, %v15395_v19 }
 0x613   :  { %10268 = vmatprep.subr.bf16.mxu0 %v15395_v19  ;;  %v14792_v6 = vpop.f32.mrb[128].mxu1 }
 0x614   :  { %v5905_v32 = vpop.f32.mrb[64].mxu0  ;;  %v10118_v18 = vpop.f32.mrb[129].mxu1 }
 0x615   :  { %v5906_v62 = vadd.f32 %v5905_v32, %v14299_v51  ;;  %v9936_v41 = vpop.f32.mrb[65].mxu0  ;;  %v14797_v4 = vpop.f32.mrb[130].mxu1 }
 0x616   :  { %v5908_v48 = vpop.f32.mrb[66].mxu0  ;;  %v10119_v42 = vpop.f32.mrb[131].mxu1 }
 0x617   :  { %v14795_v57 = vadd.f32 %v14393_v25, %v5906_v62  ;;  %v9937_v9 = vpop.f32.mrb[67].mxu0 }
 0x619   :  { %10187 = vmatmul.mubr.msk.bf16.gmra.mrb[172].mxu0 %vm192_vm1, %v15590_v58 }
 0x61a   :  { %10190 = vmatprep.mubr.msk.bf16.mxu0 %vm10450_vm2, %v15395_v19 }
 0x61b   :  { %v14804_v30 = vpop.f32.mrb[132].mxu1 }
 0x61c   :  { %v6026_v10 = vpop.f32.mrb[68].mxu0  ;;  %v10122_v41 = vpop.f32.mrb[133].mxu1 }
 0x61d   :  { %v6064_v51 = vadd.f32 %v6026_v10, %v14732_v34  ;;  %v9964_v0 = vpop.f32.mrb[69].mxu0  ;;  %v14810_v48 = vpop.f32.mrb[134].mxu1 }
 0x61e   :  { %v6029_v20 = vpop.f32.mrb[70].mxu0  ;;  %v10123_v34 = vpop.f32.mrb[135].mxu1 }
 0x61f   :  { %v6065_v25 = vadd.f32 %v6029_v20, %v14737_v50  ;;  %v14808_v32 = vadd.f32 %v14421_v36, %v6064_v51  ;;  %v9965_v62 = vpop.f32.mrb[71].mxu0 }
 0x621   :  { %v14813_v58 = vadd.f32 %v14426_v21, %v6065_v25  ;;  %10191 = vmatmul.mubr.msk.bf16.gmra.mrb[176].mxu0 %vm192_vm1, %v15591_v5 }
 0x622   :  { %10194 = vmatprep.mubr.msk.bf16.mxu0 %vm10450_vm2, %v15395_v19 }
 0x623   :  { %v14820_v42 = vpop.f32.mrb[136].mxu1 }
 0x624   :  { %v6034_v9 = vpop.f32.mrb[72].mxu0  ;;  %v10126_v0 = vpop.f32.mrb[137].mxu1 }
 0x625   :  { %v6066_v50 = vadd.f32 %v6034_v9, %v14748_v49  ;;  %v9968_v18 = vpop.f32.mrb[73].mxu0  ;;  %v14826_v20 = vpop.f32.mrb[138].mxu1 }
 0x626   :  { %v6037_v36 = vpop.f32.mrb[74].mxu0  ;;  %v10127_v49 = vpop.f32.mrb[139].mxu1 }
 0x627   :  { %v6067_v10 = vadd.f32 %v6037_v36, %v14753_v23  ;;  %v14824_v51 = vadd.f32 %v14445_v26, %v6066_v50  ;;  %v9969_v21 = vpop.f32.mrb[75].mxu0 }
 0x629   :  { %v14829_v5 = vadd.f32 %v14451_v31, %v6067_v10  ;;  %10195 = vmatmul.mubr.msk.bf16.gmra.mrb[180].mxu0 %vm192_vm1, %v15592_v47 }
 0x62a   :  { %10198 = vmatprep.mubr.msk.bf16.mxu0 %vm10450_vm2, %v15395_v19 }
 0x62b   :  { %v14836_v41 = vpop.f32.mrb[140].mxu1 }
 0x62c   :  { %v6042_v25 = vpop.f32.mrb[76].mxu0  ;;  %v10130_v50 = vpop.f32.mrb[141].mxu1 }
 0x62d   :  { %v6068_v23 = vadd.f32 %v6042_v25, %v14764_v7  ;;  %v9972_v62 = vpop.f32.mrb[77].mxu0  ;;  %v14842_v18 = vpop.f32.mrb[142].mxu1 }
 0x62e   :  { %v6045_v26 = vpop.f32.mrb[78].mxu0  ;;  %v10131_v7 = vpop.f32.mrb[143].mxu1 }
 0x62f   :  { %v6069_v34 = vadd.f32 %v6045_v26, %v14769_v59  ;;  %v14840_v9 = vadd.f32 %v14473_v56, %v6068_v23  ;;  %v9973_v31 = vpop.f32.mrb[79].mxu0 }
 0x631   :  { %v14845_v47 = vadd.f32 %v14479_v43, %v6069_v34  ;;  %10199 = vmatmul.mubr.msk.bf16.gmra.mrb[184].mxu0 %vm192_vm1, %v15593_v29 }
 0x632   :  { %10226 = vmatprep.mubr.msk.bf16.mxu0 %vm10450_vm2, %v15395_v19 }
 0x633   :  { %v14852_v21 = vpop.f32.mrb[144].mxu1 }
 0x634   :  { %v6050_v36 = vpop.f32.mrb[80].mxu0  ;;  %v10134_v25 = vpop.f32.mrb[145].mxu1 }
 0x635   :  { %v6070_v59 = vadd.f32 %v6050_v36, %v14780_v2  ;;  %v9976_v10 = vpop.f32.mrb[81].mxu0  ;;  %v6751_v23 = vpop.f32.mrb[146].mxu1  ;;  %v15637_v2 = vld [vmem:[#allocation13_spill] sm:$0xff] }
 0x636   :  { %v6053_v56 = vpop.f32.mrb[82].mxu0  ;;  %v10135_v62 = vpop.f32.mrb[147].mxu1 }
 0x637   :  { %v6071_v0 = vadd.f32 %v6053_v56, %v14783_v8  ;;  %v14856_v49 = vadd.f32 %v14498_v16, %v6070_v59  ;;  %v9977_v43 = vpop.f32.mrb[83].mxu0 }
 0x639   :  { %v14859_v29 = vadd.f32 %v14504_v61, %v6071_v0  ;;  %10227 = vmatmul.mubr.msk.bf16.vlgmr.msra.gmra.mrb[188].mxu0 %vm192_vm1, %v14390_v44  ;;  %v15638_v44 = vld [vmem:[#allocation41_spill] sm:$0xff] }
 0x63a   :  { %10269 = vmatpush3.bf16.msra.mxu0 %v15637_v2  ;;  %10230 = vmatprep.mubr.msk.bf16.mxu0 %vm10450_vm2, %v15395_v19 }
 0x63b   :  { %v14867_v31 = vpop.f32.mrb[148].mxu1 }
 0x63c   :  { %v6058_v26 = vpop.f32.mrb[84].mxu0  ;;  %v10162_v7 = vpop.f32.mrb[149].mxu1 }
 0x63d   :  { %v6072_v8 = vadd.f32 %v6058_v26, %v14795_v57  ;;  %v9980_v16 = vpop.f32.mrb[85].mxu0  ;;  %v14872_v36 = vpop.f32.mrb[150].mxu1 }
 0x63e   :  { %v6061_v34 = vpop.f32.mrb[86].mxu0  ;;  %v10163_v59 = vpop.f32.mrb[151].mxu1 }
 0x63f   :  { %v14870_v50 = vadd.f32 %v14522_v38, %v6072_v8  ;;  %v9981_v61 = vpop.f32.mrb[87].mxu0 }
 0x641   :  { %10231 = vmatmul.mubr.msk.bf16.gmra.mrb[192].mxu0 %vm192_vm1, %v15638_v44 }
 0x642   :  { %10234 = vmatprep.mubr.msk.bf16.mxu0 %vm10450_vm2, %v15395_v19 }
 0x643   :  { %v14879_v43 = vpop.f32.mrb[152].mxu1 }
 0x644   :  { %v6188_v10 = vpop.f32.mrb[88].mxu0  ;;  %v10166_v62 = vpop.f32.mrb[153].mxu1 }
 0x645   :  { %v6226_v57 = vadd.f32 %v6188_v10, %v14808_v32  ;;  %v10008_v56 = vpop.f32.mrb[89].mxu0  ;;  %v14885_v2 = vpop.f32.mrb[154].mxu1  ;;  %v15639_v10 = vld [vmem:[#allocation57_spill] sm:$0xff] }
 0x646   :  { %v6191_v0 = vpop.f32.mrb[90].mxu0  ;;  %v10167_v32 = vpop.f32.mrb[155].mxu1 }
 0x647   :  { %v6227_v38 = vadd.f32 %v6191_v0, %v14813_v58  ;;  %v14883_v25 = vadd.f32 %v14550_v46, %v6226_v57  ;;  %v10009_v23 = vpop.f32.mrb[91].mxu0 }
 0x648   :  { %v15640_v23 = vld [vmem:[#allocation61_spill] sm:$0xff] }
 0x649   :  { %v14888_v26 = vadd.f32 %v14555_v12, %v6227_v38  ;;  %10235 = vmatmul.mubr.msk.bf16.gmra.mrb[196].mxu0 %vm192_vm1, %v14443_v35 }
 0x64a   :  { %10238 = vmatprep.mubr.msk.bf16.mxu0 %vm10450_vm2, %v15395_v19 }
 0x64b   :  { %v14895_v34 = vpop.f32.mrb[156].mxu1 }
 0x64c   :  { %v6196_v8 = vpop.f32.mrb[92].mxu0  ;;  %v10170_v44 = vpop.f32.mrb[157].mxu1 }
 0x64d   :  { %v6228_v58 = vadd.f32 %v6196_v8, %v14824_v51  ;;  %v10012_v16 = vpop.f32.mrb[93].mxu0  ;;  %v14901_v59 = vpop.f32.mrb[158].mxu1 }
 0x64e   :  { %v6199_v46 = vpop.f32.mrb[94].mxu0  ;;  %v10171_v51 = vpop.f32.mrb[159].mxu1 }
 0x64f   :  { %v6229_v61 = vadd.f32 %v6199_v46, %v14829_v5  ;;  %v14899_v7 = vadd.f32 %v14583_v22, %v6228_v58  ;;  %v10013_v12 = vpop.f32.mrb[95].mxu0  ;;  %v15641_v58 = vld [vmem:[#allocation52_spill] sm:$0xff]  ;;  %v15642_v46 = vld [vmem:[#allocation58_spill] sm:$0xff] }
 0x651   :  { %v14904_v35 = vadd.f32 %v14587_v33, %v6229_v61  ;;  %10239 = vmatmul.mubr.msk.bf16.gmra.mrb[200].mxu0 %vm192_vm1, %v15639_v10  ;;  %v8199_v61 = vld [vmem:[%s15240_s0 + $0x27a] sm:$0xff] }
 0x652   :  { %10242 = vmatprep.mubr.msk.bf16.mxu0 %vm10450_vm2, %v15395_v19 }
 0x653   :  { %v14911_v0 = vpop.f32.mrb[160].mxu1 }
 0x654   :  { %v6204_v57 = vpop.f32.mrb[96].mxu0  ;;  %v10174_v32 = vpop.f32.mrb[161].mxu1 }
 0x655   :  { %v6230_v5 = vadd.f32 %v6204_v57, %v14840_v9  ;;  %v10016_v56 = vpop.f32.mrb[97].mxu0  ;;  %v14917_v8 = vpop.f32.mrb[162].mxu1 }
 0x656   :  { %v6207_v22 = vpop.f32.mrb[98].mxu0  ;;  %v10175_v9 = vpop.f32.mrb[163].mxu1 }
 0x657   :  { %v6231_v38 = vadd.f32 %v6207_v22, %v14845_v47  ;;  %v14915_v62 = vadd.f32 %v15640_v23, %v6230_v5  ;;  %v10017_v33 = vpop.f32.mrb[99].mxu0  ;;  %v8198_v47 = vld [vmem:[%s15240_s0 + $0x272] sm:$0xff] }
 0x658   :  { %v7249_v51 = vpack.c.bf16 %v8199_v61, %v8198_v47 }
 0x659   :  { %v14920_v16 = vadd.f32 %v15641_v58, %v6231_v38  ;;  %10243 = vmatmul.mubr.msk.bf16.gmra.mrb[204].mxu0 %vm192_vm1, %v15642_v46 }
 0x65a   :  { %10270 = vmatprep.mubr.msk.bf16.mxu0 %vm10450_vm2, %v15395_v19 }
 0x65b   :  { %v14933_v5 = vpop.f32.mrb[164].mxu1 }
 0x65c   :  { %v6212_v12 = vpop.f32.mrb[100].mxu0  ;;  %v10178_v23 = vpop.f32.mrb[165].mxu1 }
 0x65d   :  { %v6232_v44 = vadd.f32 %v6212_v12, %v14856_v49  ;;  %v10020_v10 = vpop.f32.mrb[101].mxu0  ;;  %v6904_v33 = vpop.f32.mrb[166].mxu1  ;;  %v8200_v49 = vld [vmem:[%s15240_s0 + $0x282] sm:$0xff] }
 0x65e   :  { %v6215_v57 = vpop.f32.mrb[102].mxu0  ;;  %v10179_v58 = vpop.f32.mrb[167].mxu1 }
 0x65f   :  { %v6233_v56 = vadd.f32 %v6215_v57, %v14859_v29  ;;  %v14937_v22 = vadd.f32 %v14658_v27, %v6232_v44  ;;  %v10021_v38 = vpop.f32.mrb[103].mxu0  ;;  %v8201_v27 = vld [vmem:[%s15240_s0 + $0x28a] sm:$0xff] }
 0x661   :  { %v14940_v32 = vadd.f32 %v14662_v11, %v6233_v56  ;;  %10271 = vmatmul.mubr.msk.bf16.vlgmr.msra.gmra.mrb[208].mxu0 %vm192_vm1, %v7249_v51  ;;  %v7250_v11 = vpack.c.bf16 %v8201_v27, %v8200_v49  ;;  %v8203_v56 = vld [vmem:[%s15240_s0 + $0x29a] sm:$0xff] }
 0x662   :  { %10274 = vmatprep.mubr.msk.bf16.mxu0 %vm10450_vm2, %v15395_v19 }
 0x663   :  { %v14952_v61 = vpop.f32.mrb[168].mxu1 }
 0x664   :  { %v6220_v29 = vpop.f32.mrb[104].mxu0  ;;  %v10206_v10 = vpop.f32.mrb[169].mxu1 }
 0x665   :  { %v6234_v46 = vadd.f32 %v6220_v29, %v14870_v50  ;;  %v10024_v9 = vpop.f32.mrb[105].mxu0  ;;  %v14957_v51 = vpop.f32.mrb[170].mxu1  ;;  %v8202_v50 = vld [vmem:[%s15240_s0 + $0x292] sm:$0xff] }
 0x666   :  { %v6223_v47 = vpop.f32.mrb[106].mxu0  ;;  %v10207_v57 = vpop.f32.mrb[171].mxu1  ;;  %v7251_v33 = vpack.c.bf16 %v8203_v56, %v8202_v50 }
 0x667   :  { %v14955_v12 = vadd.f32 %v14686_v53, %v6234_v46  ;;  %v10025_v44 = vpop.f32.mrb[107].mxu0 }
 0x669   :  { %10275 = vmatmul.mubr.msk.bf16.gmra.mrb[212].mxu0 %vm192_vm1, %v7250_v11 }
 0x66a   :  { %10278 = vmatprep.mubr.msk.bf16.mxu0 %vm10450_vm2, %v15395_v19 }
 0x66b   :  { %v14969_v49 = vpop.f32.mrb[172].mxu1 }
 0x66c   :  { %v6408_v53 = vpop.f32.mrb[108].mxu0  ;;  %v10210_v9 = vpop.f32.mrb[173].mxu1 }
 0x66d   :  { %v6446_v38 = vadd.f32 %v6408_v53, %v14883_v25  ;;  %v10052_v23 = vpop.f32.mrb[109].mxu0  ;;  %v14973_v11 = vpop.f32.mrb[174].mxu1  ;;  %v8204_v25 = vld [vmem:[%s15240_s0 + $0x2a2] sm:$0xff] }
 0x66e   :  { %v6411_v58 = vpop.f32.mrb[110].mxu0  ;;  %15643 = vst [vmem:[#allocation71_spill] sm:$0xff] %v14973_v11  ;;  %v10211_v10 = vpop.f32.mrb[175].mxu1 }
 0x66f   :  { %v6447_v27 = vadd.f32 %v6411_v58, %v14888_v26  ;;  %v6556_v29 = vadd.f32 %v14712_v3, %v6446_v38  ;;  %v10053_v46 = vpop.f32.mrb[111].mxu0  ;;  %v8205_v26 = vld [vmem:[%s15240_s0 + $0x2aa] sm:$0xff]  ;;  %v15645_v58 = vld [vmem:[#allocation59_spill] sm:$0xff] }
 0x671   :  { %v6565_v47 = vadd.f32 %v14568_v55, %v6556_v29  ;;  %v6557_v44 = vadd.f32 %v14715_v17, %v6447_v27  ;;  %10279 = vmatmul.mubr.msk.bf16.gmra.mrb[216].mxu0 %vm192_vm1, %v7251_v33  ;;  %v7252_v17 = vpack.c.bf16 %v8205_v26, %v8204_v25  ;;  %v15644_v33 = vld [vmem:[#allocation44_spill] sm:$0xff] }
 0x672   :  { %10282 = vmatprep.mubr.msk.bf16.mxu0 %vm10450_vm2, %v15395_v19  ;;  %v15646_v27 = vmax.f32 %v15644_v33, %v15645_v58  ;;  %v15647_v26 = vld [vmem:[#allocation48_spill] sm:$0xff] }
 0x673   :  { %vm6574_vm4 = vcmp.gt.f32.partialorder %v6565_v47, 0.0  ;;  %v6583_v3 = vmul.f32 0.1, %v6565_v47  ;;  %v6566_v57 = vadd.f32 %v14568_v55, %v6557_v44  ;;  %v14993_v9 = vpop.f32.mrb[176].mxu1 }
 0x674   :  { %v6416_v50 = vpop.f32.mrb[112].mxu0 }
 0x675   :  { %v6592_v56 = vsel %vm6574_vm4, %v6565_v47, %v6583_v3  ;;  %vm6575_vm5 = vcmp.gt.f32.partialorder %v6566_v57, 0.0  ;;  %v6584_v53 = vmul.f32 0.1, %v6566_v57  ;;  %v6448_v38 = vadd.f32 %v6416_v50, %v14899_v7  ;;  %v10056_v23 = vpop.f32.mrb[113].mxu0  ;;  %v10214_v47 = vpop.f32.mrb[177].mxu1  ;;  %v15648_v3 = vld [vmem:[#allocation60_spill] sm:$0xff] }
 0x676   :  { %v14991_v29 = vmax.f32 %v15646_v27, %v6592_v56  ;;  %v6419_v46 = vpop.f32.mrb[114].mxu0  ;;  %v15649_v11 = vmax.f32 %v15647_v26, %v15648_v3  ;;  %v15002_v50 = vpop.f32.mrb[178].mxu1  ;;  %v15651_v27 = vld [vmem:[#allocation63_spill] sm:$0xff] }
 0x677   :  { %v6593_v10 = vsel %vm6575_vm5, %v6566_v57, %v6584_v53  ;;  %v6449_v45 = vadd.f32 %v6419_v46, %v14904_v35  ;;  %v6558_v44 = vadd.f32 %v14728_v24, %v6448_v38  ;;  %v10057_v25 = vpop.f32.mrb[115].mxu0  ;;  %v8206_v35 = vld [vmem:[%s15240_s0 + $0x2b2] sm:$0xff]  ;;  %v10215_v24 = vpop.f32.mrb[179].mxu1 }
 0x678   :  { %v15000_v7 = vmax.f32 %v15649_v11, %v6593_v10  ;;  %v7253_v38 = vpack.c.bf16 %v8206_v35, %v8206_v35  ;;  %v15653_v35 = vld [vmem:[#allocation56_spill] sm:$0xff] }
 0x679   :  { %v6567_v56 = vadd.f32 %v14568_v55, %v6558_v44  ;;  %v6559_v23 = vadd.f32 %v14734_v39, %v6449_v45  ;;  %10283 = vmatmul.mubr.msk.bf16.gmra.mrb[220].mxu0 %vm192_vm1, %v7252_v17  ;;  %v15650_v17 = vld [vmem:[#allocation62_spill] sm:$0xff]  ;;  %v15654_v24 = vld [vmem:[#allocation64_spill] sm:$0xff] }
 0x67a   :  { %10286 = vmatprep.mubr.msk.bf16.mxu0 %vm10450_vm2, %v15395_v19  ;;  %v15652_v46 = vmax.f32 %v15650_v17, %v15651_v27 }
 0x67b   :  { %vm6576_vm6 = vcmp.gt.f32.partialorder %v6567_v56, 0.0  ;;  %v6585_v57 = vmul.f32 0.1, %v6567_v56  ;;  %v6568_v11 = vadd.f32 %v14568_v55, %v6559_v23  ;;  %v15019_v25 = vpop.f32.mrb[180].mxu1 }
 0x67c   :  { %v6424_v53 = vpop.f32.mrb[116].mxu0 }
 0x67d   :  { %v6594_v33 = vsel %vm6576_vm6, %v6567_v56, %v6585_v57  ;;  %vm6577_vm7 = vcmp.gt.f32.partialorder %v6568_v11, 0.0  ;;  %v6586_v58 = vmul.f32 0.1, %v6568_v11  ;;  %v6450_v45 = vadd.f32 %v6424_v53, %v14915_v62  ;;  %v10060_v39 = vpop.f32.mrb[117].mxu0  ;;  %v10218_v56 = vpop.f32.mrb[181].mxu1 }
 0x67e   :  { %v15017_v10 = vmax.f32 %v15652_v46, %v6594_v33  ;;  %v6427_v44 = vpop.f32.mrb[118].mxu0  ;;  %v15655_v57 = vmax.f32 %v15653_v35, %v15654_v24  ;;  %v15028_v53 = vpop.f32.mrb[182].mxu1 }
 0x67f   :  { %v6595_v47 = vsel %vm6577_vm7, %v6568_v11, %v6586_v58  ;;  %v6451_v26 = vadd.f32 %v6427_v44, %v14920_v16  ;;  %v6560_v3 = vadd.f32 %v14744_v60, %v6450_v45  ;;  %v10061_v23 = vpop.f32.mrb[119].mxu0  ;;  %v10219_v11 = vpop.f32.mrb[183].mxu1  ;;  %v15656_v44 = vld [vmem:[#allocation65_spill] sm:$0xff] }
 0x680   :  { %v15026_v62 = vmax.f32 %v15655_v57, %v6595_v47  ;;  %v15657_v47 = vld [vmem:[#allocation66_spill] sm:$0xff] }
 0x681   :  { %v6569_v33 = vadd.f32 %v14568_v55, %v6560_v3  ;;  %v6561_v39 = vadd.f32 %v14750_v15, %v6451_v26  ;;  %10287 = vmatmul.mubr.msk.bf16.gmra.mrb[224].mxu0 %vm192_vm1, %v7253_v38  ;;  %v15658_v23 = vmax.f32 %v15656_v44, %v15657_v47 }
 0x683   :  { %vm6578_vm8 = vcmp.gt.f32.partialorder %v6569_v33, 0.0  ;;  %v6587_v16 = vmul.f32 0.1, %v6569_v33  ;;  %v6570_v60 = vadd.f32 %v14568_v55, %v6561_v39  ;;  %v15040_v26 = vpop.f32.mrb[184].mxu1  ;;  %v15660_v39 = vld [vmem:[#allocation6_spill] sm:$0xff] }
 0x684   :  { %v6432_v58 = vpop.f32.mrb[120].mxu0  ;;  %v10222_v57 = vpop.f32.mrb[185].mxu1 }
 0x685   :  { %v6596_v45 = vsel %vm6578_vm8, %v6569_v33, %v6587_v16  ;;  %vm6579_vm9 = vcmp.gt.f32.partialorder %v6570_v60, 0.0  ;;  %v6588_v17 = vmul.f32 0.1, %v6570_v60  ;;  %v6452_v27 = vadd.f32 %v6432_v58, %v14937_v22  ;;  %v10064_v46 = vpop.f32.mrb[121].mxu0  ;;  %v15659_v33 = vld [vmem:[#allocation67_spill] sm:$0xff]  ;;  %v7066_v16 = vpop.f32.mrb[186].mxu1 }
 0x686   :  { %v15038_v3 = vmax.f32 %v15658_v23, %v6596_v45  ;;  %v6435_v15 = vpop.f32.mrb[122].mxu0  ;;  %v15661_v11 = vmax.f32 %v15659_v33, %v15660_v39  ;;  %v10223_v46 = vpop.f32.mrb[187].mxu1  ;;  %v15662_v23 = vmax.f32 %v14693_v52, %v14700_v1  ;;  %v15663_v33 = vmax.f32 %v14705_v37, %v14707_v14 }
 0x687   :  { %v6597_v38 = vsel %vm6579_vm9, %v6570_v60, %v6588_v17  ;;  %v6453_v56 = vadd.f32 %v6435_v15, %v14940_v32  ;;  %v6562_v35 = vadd.f32 %v14760_v40, %v6452_v27  ;;  %v10065_v24 = vpop.f32.mrb[123].mxu0 }
 0x688   :  { %v15047_v22 = vmax.f32 %v15661_v11, %v6597_v38 }
 0x689   :  { %v6571_v58 = vadd.f32 %v14568_v55, %v6562_v35  ;;  %v6563_v45 = vadd.f32 %v14766_v63, %v6453_v56 }
 0x68b   :  { %vm6580_vm1 = vcmp.gt.f32.partialorder %v6571_v58, 0.0  ;;  %v6589_v44 = vmul.f32 0.1, %v6571_v58  ;;  %v6572_v60 = vadd.f32 %v14568_v55, %v6563_v45  ;;  %v15058_v35 = vpop.f32.mrb[188].mxu1 }
 0x68c   :  { %v6440_v32 = vpop.f32.mrb[124].mxu0  ;;  %v10250_v57 = vpop.f32.mrb[189].mxu1 }
 0x68d   :  { %v6598_v17 = vsel %vm6580_vm1, %v6571_v58, %v6589_v44  ;;  %vm6581_vm10 = vcmp.gt.f32.partialorder %v6572_v60, 0.0  ;;  %v6590_v40 = vmul.f32 0.1, %v6572_v60  ;;  %v6454_v27 = vadd.f32 %v6440_v32, %v14955_v12  ;;  %v10068_v47 = vpop.f32.mrb[125].mxu0  ;;  %v15066_v12 = vpop.f32.mrb[190].mxu1 }
 0x68e   :  { %v15056_v15 = vmax.f32 %v15662_v23, %v6598_v17  ;;  %v6443_v38 = vpop.f32.mrb[126].mxu0  ;;  %v10251_v52 = vpop.f32.mrb[191].mxu1 }
 0x68f   :  { %v6599_v63 = vsel %vm6581_vm10, %v6572_v60, %v6590_v40  ;;  %v6564_v56 = vadd.f32 %v14776_v13, %v6454_v27  ;;  %v10069_v24 = vpop.f32.mrb[127].mxu0  ;;  %v15664_v13 = vmax.f32 %v14721_v28, %v14723_v54 }
 0x690   :  { %v15064_v39 = vmax.f32 %v15663_v33, %v6599_v63 }
 0x691   :  { %v6573_v11 = vadd.f32 %v14568_v55, %v6564_v56 }
 0x693   :  { %vm6582_vm11 = vcmp.gt.f32.partialorder %v6573_v11, 0.0  ;;  %v6591_v1 = vmul.f32 0.1, %v6573_v11  ;;  %v15075_v14 = vpop.f32.mrb[192].mxu1 }
 0x694   :  { %v6644_v16 = vpop.f32.mrb[128].mxu0  ;;  %v10254_v55 = vpop.f32.mrb[193].mxu1 }
 0x695   :  { %v6600_v58 = vsel %vm6582_vm11, %v6573_v11, %v6591_v1  ;;  %v6717_v45 = vadd.f32 %v14792_v6, %v6644_v16  ;;  %v10096_v46 = vpop.f32.mrb[129].mxu0  ;;  %v15078_v17 = vpop.f32.mrb[194].mxu1 }
 0x696   :  { %v15073_v44 = vmax.f32 %v15664_v13, %v6600_v58  ;;  %v6647_v37 = vpop.f32.mrb[130].mxu0  ;;  %v10255_v40 = vpop.f32.mrb[195].mxu1 }
 0x697   :  { %v6720_v60 = vadd.f32 %v14797_v4, %v6647_v37  ;;  %v10097_v32 = vpop.f32.mrb[131].mxu0 }
 0x69b   :  { %v15081_v38 = vpop.f32.mrb[196].mxu1 }
 0x69c   :  { %v6652_v27 = vpop.f32.mrb[132].mxu0  ;;  %v10258_v63 = vpop.f32.mrb[197].mxu1 }
 0x69d   :  { %v6725_v47 = vadd.f32 %v14804_v30, %v6652_v27  ;;  %v10100_v6 = vpop.f32.mrb[133].mxu0  ;;  %v15084_v56 = vpop.f32.mrb[198].mxu1 }
 0x69e   :  { %v6655_v23 = vpop.f32.mrb[134].mxu0  ;;  %v10259_v24 = vpop.f32.mrb[199].mxu1 }
 0x69f   :  { %v6728_v28 = vadd.f32 %v14810_v48, %v6655_v23  ;;  %v10101_v54 = vpop.f32.mrb[135].mxu0 }
 0x6a4   :  { %v6660_v4 = vpop.f32.mrb[136].mxu0 }
 0x6a5   :  { %v6733_v57 = vadd.f32 %v14820_v42, %v6660_v4  ;;  %v10104_v33 = vpop.f32.mrb[137].mxu0  ;;  %v15087_v52 = vpop.f32.mrb[200].mxu1 }
 0x6a6   :  { %v6663_v11 = vpop.f32.mrb[138].mxu0  ;;  %v10262_v16 = vpop.f32.mrb[201].mxu1 }
 0x6a7   :  { %v6736_v30 = vadd.f32 %v14826_v20, %v6663_v11  ;;  %v10105_v1 = vpop.f32.mrb[139].mxu0  ;;  %v15090_v58 = vpop.f32.mrb[202].mxu1 }
 0x6a8   :  { %v10263_v46 = vpop.f32.mrb[203].mxu1 }
 0x6ac   :  { %v6668_v48 = vpop.f32.mrb[140].mxu0 }
 0x6ad   :  { %v6741_v13 = vadd.f32 %v14836_v41, %v6668_v48  ;;  %v10108_v37 = vpop.f32.mrb[141].mxu0  ;;  %v15093_v55 = vpop.f32.mrb[204].mxu1 }
 0x6ae   :  { %v6671_v32 = vpop.f32.mrb[142].mxu0  ;;  %v10266_v27 = vpop.f32.mrb[205].mxu1 }
 0x6af   :  { %v6744_v42 = vadd.f32 %v14842_v18, %v6671_v32  ;;  %v10109_v40 = vpop.f32.mrb[143].mxu0  ;;  %v7228_v6 = vpop.f32.mrb[206].mxu1 }
 0x6b0   :  { %v10267_v23 = vpop.f32.mrb[207].mxu1 }
 0x6b4   :  { %v6676_v54 = vpop.f32.mrb[144].mxu0 }
 0x6b5   :  { %v10112_v20 = vpop.f32.mrb[145].mxu0  ;;  %v6749_v63 = vadd.f32 %v14852_v21, %v6676_v54 }
 0x6b6   :  { %v6679_v24 = vpop.f32.mrb[146].mxu0 }
 0x6b7   :  { %v10113_v4 = vpop.f32.mrb[147].mxu0 }
 0x6bc   :  { %v6788_v33 = vpop.f32.mrb[148].mxu0 }
 0x6bd   :  { %v6826_v11 = vadd.f32 %v6788_v33, %v6717_v45  ;;  %v10140_v1 = vpop.f32.mrb[149].mxu0 }
 0x6be   :  { %v6791_v41 = vpop.f32.mrb[150].mxu0 }
 0x6bf   :  { %v6827_v16 = vadd.f32 %v6791_v41, %v6720_v60  ;;  %v6907_v46 = vadd.f32 %v14867_v31, %v6826_v11  ;;  %v10141_v48 = vpop.f32.mrb[151].mxu0 }
 0x6c1   :  { %v6908_v18 = vadd.f32 %v14872_v36, %v6827_v16 }
 0x6c4   :  { %v6796_v37 = vpop.f32.mrb[152].mxu0 }
 0x6c5   :  { %v6828_v32 = vadd.f32 %v6796_v37, %v6725_v47  ;;  %v10144_v40 = vpop.f32.mrb[153].mxu0 }
 0x6c6   :  { %v6799_v27 = vpop.f32.mrb[154].mxu0 }
 0x6c7   :  { %v6829_v6 = vadd.f32 %v6799_v27, %v6728_v28  ;;  %v6909_v23 = vadd.f32 %v14879_v43, %v6828_v32  ;;  %v10145_v21 = vpop.f32.mrb[155].mxu0 }
 0x6c9   :  { %v6910_v54 = vadd.f32 %v14885_v2, %v6829_v6 }
 0x6cc   :  { %v6804_v20 = vpop.f32.mrb[156].mxu0 }
 0x6cd   :  { %v6830_v45 = vadd.f32 %v6804_v20, %v6733_v57  ;;  %v10148_v24 = vpop.f32.mrb[157].mxu0 }
 0x6ce   :  { %v6807_v4 = vpop.f32.mrb[158].mxu0 }
 0x6cf   :  { %v6831_v60 = vadd.f32 %v6807_v4, %v6736_v30  ;;  %v6911_v31 = vadd.f32 %v14895_v34, %v6830_v45  ;;  %v10149_v33 = vpop.f32.mrb[159].mxu0 }
 0x6d1   :  { %v6912_v36 = vadd.f32 %v14901_v59, %v6831_v60 }
 0x6d4   :  { %v6812_v11 = vpop.f32.mrb[160].mxu0 }
 0x6d5   :  { %v6832_v47 = vadd.f32 %v6812_v11, %v6741_v13  ;;  %v10152_v1 = vpop.f32.mrb[161].mxu0 }
 0x6d6   :  { %v6815_v41 = vpop.f32.mrb[162].mxu0 }
 0x6d7   :  { %v6833_v28 = vadd.f32 %v6815_v41, %v6744_v42  ;;  %v6913_v43 = vadd.f32 %v14911_v0, %v6832_v47  ;;  %v10153_v16 = vpop.f32.mrb[163].mxu0 }
 0x6d9   :  { %v6914_v2 = vadd.f32 %v14917_v8, %v6833_v28 }
 0x6dc   :  { %v6820_v48 = vpop.f32.mrb[164].mxu0 }
 0x6dd   :  { %v6834_v57 = vadd.f32 %v6820_v48, %v6749_v63  ;;  %v10156_v37 = vpop.f32.mrb[165].mxu0 }
 0x6de   :  { %v6823_v32 = vpop.f32.mrb[166].mxu0 }
 0x6df   :  { %v6915_v30 = vadd.f32 %v14933_v5, %v6834_v57  ;;  %v10157_v34 = vpop.f32.mrb[167].mxu0  ;;  %v15665_v5 = vld [vmem:[#allocation71_spill] sm:$0xff] }
 0x6e4   :  { %v6950_v40 = vpop.f32.mrb[168].mxu0 }
 0x6e5   :  { %v6988_v27 = vadd.f32 %v6950_v40, %v6907_v46  ;;  %v10184_v59 = vpop.f32.mrb[169].mxu0 }
 0x6e6   :  { %v6953_v6 = vpop.f32.mrb[170].mxu0 }
 0x6e7   :  { %v6989_v13 = vadd.f32 %v6953_v6, %v6908_v18  ;;  %v7069_v21 = vadd.f32 %v14952_v61, %v6988_v27  ;;  %v10185_v42 = vpop.f32.mrb[171].mxu0 }
 0x6e9   :  { %v7070_v0 = vadd.f32 %v14957_v51, %v6989_v13 }
 0x6ec   :  { %v6958_v20 = vpop.f32.mrb[172].mxu0 }
 0x6ed   :  { %v6990_v45 = vadd.f32 %v6958_v20, %v6909_v23  ;;  %v10188_v8 = vpop.f32.mrb[173].mxu0 }
 0x6ee   :  { %v6961_v24 = vpop.f32.mrb[174].mxu0 }
 0x6ef   :  { %v6991_v63 = vadd.f32 %v6961_v24, %v6910_v54  ;;  %v7071_v4 = vadd.f32 %v14969_v49, %v6990_v45  ;;  %v10189_v60 = vpop.f32.mrb[175].mxu0 }
 0x6f1   :  { %v7072_v33 = vadd.f32 %v15665_v5, %v6991_v63 }
 0x6f4   :  { %v6966_v11 = vpop.f32.mrb[176].mxu0 }
 0x6f5   :  { %v6992_v46 = vadd.f32 %v6966_v11, %v6911_v31  ;;  %v10192_v47 = vpop.f32.mrb[177].mxu0 }
 0x6f6   :  { %v6969_v1 = vpop.f32.mrb[178].mxu0 }
 0x6f7   :  { %v6993_v18 = vadd.f32 %v6969_v1, %v6912_v36  ;;  %v7073_v61 = vadd.f32 %v14993_v9, %v6992_v46  ;;  %v10193_v41 = vpop.f32.mrb[179].mxu0 }
 0x6f9   :  { %v7074_v51 = vadd.f32 %v15002_v50, %v6993_v18 }
 0x6fc   :  { %v6974_v28 = vpop.f32.mrb[180].mxu0 }
 0x6fd   :  { %v6994_v23 = vadd.f32 %v6974_v28, %v6913_v43  ;;  %v10196_v16 = vpop.f32.mrb[181].mxu0 }
 0x6fe   :  { %v6977_v48 = vpop.f32.mrb[182].mxu0 }
 0x6ff   :  { %v6995_v54 = vadd.f32 %v6977_v48, %v6914_v2  ;;  %v7075_v49 = vadd.f32 %v15019_v25, %v6994_v23  ;;  %v10197_v57 = vpop.f32.mrb[183].mxu0 }
 0x701   :  { %v7076_v37 = vadd.f32 %v15028_v53, %v6995_v54 }
 0x704   :  { %v6982_v32 = vpop.f32.mrb[184].mxu0 }
 0x705   :  { %v6996_v31 = vadd.f32 %v6982_v32, %v6915_v30  ;;  %v10200_v34 = vpop.f32.mrb[185].mxu0 }
 0x706   :  { %v6985_v40 = vpop.f32.mrb[186].mxu0 }
 0x707   :  { %v7077_v36 = vadd.f32 %v15040_v26, %v6996_v31  ;;  %v10201_v9 = vpop.f32.mrb[187].mxu0 }
 0x70c   :  { %v7112_v27 = vpop.f32.mrb[188].mxu0 }
 0x70d   :  { %v7150_v59 = vadd.f32 %v7112_v27, %v7069_v21  ;;  %v10228_v50 = vpop.f32.mrb[189].mxu0 }
 0x70e   :  { %v7115_v6 = vpop.f32.mrb[190].mxu0 }
 0x70f   :  { %v7151_v43 = vadd.f32 %v7115_v6, %v7070_v0  ;;  %v7231_v13 = vadd.f32 %v15058_v35, %v7150_v59  ;;  %v10229_v2 = vpop.f32.mrb[191].mxu0 }
 0x711   :  { %v7232_v25 = vadd.f32 %v15066_v12, %v7151_v43 }
 0x714   :  { %v7120_v42 = vpop.f32.mrb[192].mxu0 }
 0x715   :  { %v7152_v20 = vadd.f32 %v7120_v42, %v7071_v4  ;;  %v10232_v53 = vpop.f32.mrb[193].mxu0 }
 0x716   :  { %v7123_v45 = vpop.f32.mrb[194].mxu0 }
 0x717   :  { %v7153_v30 = vadd.f32 %v7123_v45, %v7072_v33  ;;  %v7233_v8 = vadd.f32 %v15075_v14, %v7152_v20  ;;  %v10233_v24 = vpop.f32.mrb[195].mxu0 }
 0x719   :  { %v7234_v26 = vadd.f32 %v15078_v17, %v7153_v30 }
 0x71c   :  { %v7128_v63 = vpop.f32.mrb[196].mxu0 }
 0x71d   :  { %v7154_v21 = vadd.f32 %v7128_v63, %v7073_v61  ;;  %v10236_v60 = vpop.f32.mrb[197].mxu0 }
 0x71e   :  { %v7131_v5 = vpop.f32.mrb[198].mxu0 }
 0x71f   :  { %v7155_v0 = vadd.f32 %v7131_v5, %v7074_v51  ;;  %v7235_v35 = vadd.f32 %v15081_v38, %v7154_v21  ;;  %v10237_v11 = vpop.f32.mrb[199].mxu0 }
 0x721   :  { %v7236_v12 = vadd.f32 %v15084_v56, %v7155_v0 }
 0x724   :  { %v7136_v46 = vpop.f32.mrb[200].mxu0 }
 0x725   :  { %v7156_v4 = vadd.f32 %v7136_v46, %v7075_v49  ;;  %v10240_v47 = vpop.f32.mrb[201].mxu0 }
 0x726   :  { %v7139_v1 = vpop.f32.mrb[202].mxu0 }
 0x727   :  { %v7157_v33 = vadd.f32 %v7139_v1, %v7076_v37  ;;  %v15122_v14 = vadd.f32 %v15087_v52, %v7156_v4  ;;  %v10241_v18 = vpop.f32.mrb[203].mxu0  ;;  %v15133_v52 = vld [vmem:[%s15242_s2] ss:$0 sm:$0xff] }
 0x729   :  { %v15125_v17 = vadd.f32 %v15090_v58, %v7157_v33 }
 0x72c   :  { %v7144_v61 = vpop.f32.mrb[204].mxu0 }
 0x72d   :  { %v7158_v41 = vadd.f32 %v7144_v61, %v7077_v36  ;;  %v10244_v51 = vpop.f32.mrb[205].mxu0 }
 0x72e   :  { %v7147_v28 = vpop.f32.mrb[206].mxu0 }
 0x72f   :  { %v15128_v38 = vadd.f32 %v15093_v55, %v7158_v41  ;;  %v10245_v56 = vpop.f32.mrb[207].mxu0 }
 0x734   :  { %v7303_v23 = vpop.f32.mrb[208].mxu0 }
 0x735   :  { %v7341_v16 = vadd.f32 %v7303_v23, %v7231_v13  ;;  %v10272_v48 = vpop.f32.mrb[209].mxu0 }
 0x736   :  { %v7306_v54 = vpop.f32.mrb[210].mxu0 }
 0x737   :  { %v7350_v58 = vadd.f32 %v15133_v52, %v7341_v16  ;;  %v7342_v49 = vadd.f32 %v7306_v54, %v7232_v25  ;;  %v10273_v57 = vpop.f32.mrb[211].mxu0 }
 0x739   :  { %vm7359_vm13 = vcmp.gt.f32.partialorder %v7350_v58, 0.0  ;;  %v7368_v37 = vmul.f32 0.1, %v7350_v58  ;;  %v7351_v32 = vadd.f32 %v15133_v52, %v7342_v49 }
 0x73b   :  { %v7377_v55 = vsel %vm7359_vm13, %v7350_v58, %v7368_v37  ;;  %vm7360_vm14 = vcmp.gt.f32.partialorder %v7351_v32, 0.0  ;;  %v7369_v31 = vmul.f32 0.1, %v7351_v32 }
 0x73c   :  { %v7386_v34 = vmax.f32 %v14991_v29, %v7377_v55  ;;  %v7311_v40 = vpop.f32.mrb[212].mxu0 }
 0x73d   :  { %v7378_v36 = vsel %vm7360_vm14, %v7351_v32, %v7369_v31  ;;  %v7343_v9 = vadd.f32 %v7311_v40, %v7233_v8  ;;  %v10276_v27 = vpop.f32.mrb[213].mxu0 }
 0x73e   :  { %v7387_v59 = vmax.f32 %v15000_v7, %v7378_v36  ;;  %v7314_v50 = vpop.f32.mrb[214].mxu0 }
 0x73f   :  { %v7352_v6 = vadd.f32 %v15133_v52, %v7343_v9  ;;  %v7344_v43 = vadd.f32 %v7314_v50, %v7234_v26  ;;  %v10277_v13 = vpop.f32.mrb[215].mxu0 }
 0x740   :  { %v7395_v2 = vpack.c.bf16 %v7387_v59, %v7386_v34 }
 0x741   :  { %vm7361_vm15 = vcmp.gt.f32.partialorder %v7352_v6, 0.0  ;;  %v7370_v25 = vmul.f32 0.1, %v7352_v6  ;;  %v7353_v42 = vadd.f32 %v15133_v52, %v7344_v43 }
 0x742   :  { %10307 = vmatmul.mubr.bf16.vlgmr.msra.gmra.mrb[208].mxu1 %v7395_v2 }
 0x743   :  { %v7379_v20 = vsel %vm7361_vm15, %v7352_v6, %v7370_v25  ;;  %vm7362_vm0 = vcmp.gt.f32.partialorder %v7353_v42, 0.0  ;;  %v7371_v29 = vmul.f32 0.1, %v7353_v42  ;;  %10310 = vmatprep.mubr.msk.bf16.mxu1 %vm10450_vm2, %v15395_v19 }
 0x744   :  { %v7388_v53 = vmax.f32 %v15017_v10, %v7379_v20  ;;  %v7319_v7 = vpop.f32.mrb[216].mxu0 }
 0x745   :  { %v7380_v45 = vsel %vm7362_vm0, %v7353_v42, %v7371_v29  ;;  %v7345_v30 = vadd.f32 %v7319_v7, %v7235_v35  ;;  %v10280_v8 = vpop.f32.mrb[217].mxu0 }
 0x746   :  { %v7389_v24 = vmax.f32 %v15026_v62, %v7380_v45  ;;  %v7322_v26 = vpop.f32.mrb[218].mxu0 }
 0x747   :  { %v7354_v63 = vadd.f32 %v15133_v52, %v7345_v30  ;;  %v7346_v21 = vadd.f32 %v7322_v26, %v7236_v12  ;;  %v10281_v60 = vpop.f32.mrb[219].mxu0 }
 0x748   :  { %v7396_v5 = vpack.c.bf16 %v7389_v24, %v7388_v53 }
 0x749   :  { %vm7363_vm3 = vcmp.gt.f32.partialorder %v7354_v63, 0.0  ;;  %v7372_v0 = vmul.f32 0.1, %v7354_v63  ;;  %v7355_v11 = vadd.f32 %v15133_v52, %v7346_v21 }
 0x74a   :  { %10311 = vmatmul.mubr.bf16.gmra.mrb[212].mxu1 %v7396_v5 }
 0x74b   :  { %v7381_v46 = vsel %vm7363_vm3, %v7354_v63, %v7372_v0  ;;  %vm7364_vm4 = vcmp.gt.f32.partialorder %v7355_v11, 0.0  ;;  %v7373_v10 = vmul.f32 0.1, %v7355_v11  ;;  %10314 = vmatprep.mubr.msk.bf16.mxu1 %vm10450_vm2, %v15395_v19 }
 0x74c   :  { %v7390_v35 = vmax.f32 %v15038_v3, %v7381_v46  ;;  %v7327_v62 = vpop.f32.mrb[220].mxu0 }
 0x74d   :  { %v7382_v4 = vsel %vm7364_vm4, %v7355_v11, %v7373_v10  ;;  %v7347_v47 = vadd.f32 %v7327_v62, %v15122_v14  ;;  %v10284_v12 = vpop.f32.mrb[221].mxu0 }
 0x74e   :  { %v7391_v1 = vmax.f32 %v15047_v22, %v7382_v4  ;;  %v7330_v33 = vpop.f32.mrb[222].mxu0 }
 0x74f   :  { %v7356_v18 = vadd.f32 %v15133_v52, %v7347_v47  ;;  %v7348_v61 = vadd.f32 %v7330_v33, %v15125_v17  ;;  %v10285_v41 = vpop.f32.mrb[223].mxu0 }
 0x750   :  { %v7397_v51 = vpack.c.bf16 %v7391_v1, %v7390_v35 }
 0x751   :  { %vm7365_vm5 = vcmp.gt.f32.partialorder %v7356_v18, 0.0  ;;  %v7374_v28 = vmul.f32 0.1, %v7356_v18  ;;  %v7357_v56 = vadd.f32 %v15133_v52, %v7348_v61 }
 0x752   :  { %10315 = vmatmul.mubr.bf16.gmra.mrb[216].mxu1 %v7397_v51  ;;  %v15666_v51 = vld [vmem:[#allocation68_spill] sm:$0xff] }
 0x753   :  { %v7383_v3 = vsel %vm7365_vm5, %v7356_v18, %v7374_v28  ;;  %vm7366_vm6 = vcmp.gt.f32.partialorder %v7357_v56, 0.0  ;;  %v7375_v23 = vmul.f32 0.1, %v7357_v56  ;;  %10318 = vmatprep.mubr.msk.bf16.mxu1 %vm10450_vm2, %v15395_v19 }
 0x754   :  { %v7392_v22 = vmax.f32 %v15056_v15, %v7383_v3  ;;  %v7335_v14 = vpop.f32.mrb[224].mxu0 }
 0x755   :  { %v7384_v16 = vsel %vm7366_vm6, %v7357_v56, %v7375_v23  ;;  %v7349_v48 = vadd.f32 %v7335_v14, %v15128_v38  ;;  %v10288_v17 = vpop.f32.mrb[225].mxu0  ;;  %v15181_v14 = vld [vmem:[%s15245_s5] ss:$0 sm:$0xff]  ;;  %s10452_s5 = smov [#allocation2]  }
 0x756   :  { %v7393_v54 = vmax.f32 %v15064_v39, %v7384_v16  ;;  %v7338_v58 = vpop.f32.mrb[226].mxu0  ;;  %v15167_v39 = vld [vmem:[%s15244_s4] ss:$0 sm:$0xff]  ;;  %v15667_v17 = vld [vmem:[#allocation70_spill] sm:$0xff]  ;;  %s7568_s15 = sshll.u32 %s10452_s5, 4  ;;  %s7569_s15 = int_to_ptr.vmem [resolvable:$true] %s7568_s15 }
 0x757   :  { %v7358_v49 = vadd.f32 %v15133_v52, %v7349_v48  ;;  %v10289_v57 = vpop.f32.mrb[227].mxu0  ;;  %s10425_s16 = scalar_lea.vmem %s7569_s15, 2304  ;;  %p10430_p1 = scmp.lt.s32.totalorder %s7569_s15, %s7569_s15 }
 0x758   :  { %v7398_v37 = vpack.c.bf16 %v7393_v54, %v7392_v22  ;;  %p10426_p0 = scmp.ne.s32.totalorder %s7569_s15, %s10425_s16  ;;  %p10431_p2 = scmp.lt.s32.totalorder %s10425_s16, %s10425_s16 }
 0x759   :  { %vm7367_vm7 = vcmp.gt.f32.partialorder %v7358_v49, 0.0  ;;  %v7376_v32 = vmul.f32 0.1, %v7358_v49 }
 0x75a   :  { %10319 = vmatmul.mubr.bf16.gmra.mrb[220].mxu1 %v7398_v37  ;;  %p10432_p3 = por %p10431_p2, %p10430_p1 }
 0x75b   :  { %v7385_v55 = vsel %vm7367_vm7, %v7358_v49, %v7376_v32  ;;  %10322 = vmatprep.mubr.msk.bf16.mxu1 %vm10450_vm2, %v15395_v19 }
 0x75c   :  { %v7394_v15 = vmax.f32 %v15073_v44, %v7385_v55  ;;  %p10433_p4 = pnand %p10432_p3, %p10426_p0 }
 0x75e   :  { %v7399_v31 = vpack.c.bf16 %v7394_v15, %v7394_v15 }
 0x762   :  { %10323 = vmatmul.mubr.bf16.gmra.mrb[224].mxu1 %v7399_v31 }
 0x815   :  { %v7434_v38 = vpop.f32.mrb[208].mxu1 }
 0x816   :  { %v7435_v52 = vadd.f32 %v15167_v39, %v7434_v38  ;;  %v10308_v34 = vpop.f32.mrb[209].mxu1 }
 0x817   :  { %v7437_v40 = vpop.f32.mrb[210].mxu1 }
 0x818   :  { %v7472_v36 = vmul.f32 1.442695, %v7435_v52  ;;  %v7438_v9 = vadd.f32 %v15167_v39, %v7437_v40  ;;  %v10309_v27 = vpop.f32.mrb[211].mxu1 }
 0x819   :  { %v15669_v27 = vld [vmem:[#allocation72_spill] sm:$0xff] }
 0x81a   :  { %10376 = vpow2.f32 %v7472_v36  ;;  %v7474_v19 = vmul.f32 1.442695, %v7438_v9 }
 0x81c   :  { %10378 = vpow2.f32 %v7474_v19 }
 0x81d   :  { %v7442_v44 = vpop.f32.mrb[212].mxu1 }
 0x81e   :  { %v7443_v59 = vadd.f32 %v15167_v39, %v7442_v44  ;;  %v10312_v50 = vpop.f32.mrb[213].mxu1 }
 0x81f   :  { %v7445_v6 = vpop.f32.mrb[214].mxu1 }
 0x820   :  { %v7476_v43 = vmul.f32 1.442695, %v7443_v59  ;;  %v7446_v13 = vadd.f32 %v15167_v39, %v7445_v6  ;;  %v10313_v2 = vpop.f32.mrb[215].mxu1 }
 0x822   :  { %10380 = vpow2.f32 %v7476_v43  ;;  %v7478_v25 = vmul.f32 1.442695, %v7446_v13  ;;  %v15670_v13 = vld [vmem:[#allocation73_spill] sm:$0xff] }
 0x824   :  { %v10377_v42 = vpop.eup %10376  ;;  %10382 = vpow2.f32 %v7478_v25 }
 0x825   :  { %v7490_v20 = vadd.f32 1.0, %v10377_v42  ;;  %v7450_v29 = vpop.f32.mrb[216].mxu1  ;;  %v7535_v48 = vmul.f32 %v15181_v14, %v10377_v42 }
 0x826   :  { %v10379_v53 = vpop.eup %10378  ;;  %v7451_v7 = vadd.f32 %v15167_v39, %v7450_v29  ;;  %v10316_v45 = vpop.f32.mrb[217].mxu1 }
 0x827   :  { %10384 = vrcp.f32 %v7490_v20  ;;  %v7491_v30 = vadd.f32 1.0, %v10379_v53  ;;  %v7453_v8 = vpop.f32.mrb[218].mxu1  ;;  %v7536_v31 = vmul.f32 %v15181_v14, %v10379_v53 }
 0x828   :  { %v7480_v24 = vmul.f32 1.442695, %v7451_v7  ;;  %v7454_v26 = vadd.f32 %v15167_v39, %v7453_v8  ;;  %v10317_v63 = vpop.f32.mrb[219].mxu1 }
 0x829   :  { %10386 = vrcp.f32 %v7491_v30 }
 0x82a   :  { %10388 = vpow2.f32 %v7480_v24  ;;  %v7482_v21 = vmul.f32 1.442695, %v7454_v26  ;;  %v15671_v24 = vld [vmem:[#allocation74_spill] sm:$0xff] }
 0x82c   :  { %v10381_v60 = vpop.eup %10380  ;;  %10390 = vpow2.f32 %v7482_v21 }
 0x82d   :  { %v7492_v5 = vadd.f32 1.0, %v10381_v60  ;;  %v7458_v0 = vpop.f32.mrb[220].mxu1  ;;  %v7537_v43 = vmul.f32 %v15181_v14, %v10381_v60 }
 0x82e   :  { %v10383_v11 = vpop.eup %10382  ;;  %v7459_v46 = vadd.f32 %v15167_v39, %v7458_v0  ;;  %v10320_v10 = vpop.f32.mrb[221].mxu1  ;;  %v15672_v0 = vld [vmem:[#allocation75_spill] sm:$0xff] }
 0x82f   :  { %10392 = vrcp.f32 %v7492_v5  ;;  %v7493_v35 = vadd.f32 1.0, %v10383_v11  ;;  %v7461_v62 = vpop.f32.mrb[222].mxu1  ;;  %v7538_v29 = vmul.f32 %v15181_v14, %v10383_v11 }
 0x830   :  { %v7484_v4 = vmul.f32 1.442695, %v7459_v46  ;;  %v7462_v47 = vadd.f32 %v15167_v39, %v7461_v62  ;;  %v10321_v12 = vpop.f32.mrb[223].mxu1 }
 0x831   :  { %v10385_v1 = vpop.eup %10384  ;;  %10394 = vrcp.f32 %v7493_v35 }
 0x832   :  { %v7508_v33 = vmul.f32 %v10385_v1, %v10377_v42  ;;  %10396 = vpow2.f32 %v7484_v4  ;;  %v7486_v18 = vmul.f32 1.442695, %v7462_v47  ;;  %v15673_v1 = vld [vmem:[#allocation76_spill] sm:$0xff] }
 0x833   :  { %v10387_v61 = vpop.eup %10386 }
 0x834   :  { %v10389_v41 = vpop.eup %10388  ;;  %v7517_v28 = vadd.f32 %v7508_v33, %v15666_v51  ;;  %v7509_v56 = vmul.f32 %v10387_v61, %v10379_v53  ;;  %10398 = vpow2.f32 %v7486_v18  ;;  %v15674_v51 = vld [vmem:[#allocation77_spill] sm:$0xff] }
 0x835   :  { %v7494_v3 = vadd.f32 1.0, %v10389_v41  ;;  %v7466_v23 = vpop.f32.mrb[224].mxu1  ;;  %v7539_v5 = vmul.f32 %v15181_v14, %v10389_v41 }
 0x836   :  { %v10391_v22 = vpop.eup %10390  ;;  %v7526_v16 = vmul.f32 %v15181_v14, %v7517_v28  ;;  %v7518_v54 = vadd.f32 %v7509_v56, %v15667_v17  ;;  %v7467_v58 = vadd.f32 %v15167_v39, %v7466_v23  ;;  %v10324_v49 = vpop.f32.mrb[225].mxu1  ;;  %v15675_v17 = vld [vmem:[#allocation78_spill] sm:$0xff] }
 0x837   :  { %10400 = vrcp.f32 %v7494_v3  ;;  %v7495_v57 = vadd.f32 1.0, %v10391_v22  ;;  %v7469_v37 = vpop.f32.mrb[226].mxu1  ;;  %v7540_v35 = vmul.f32 %v15181_v14, %v10391_v22 }
 0x838   :  { %v7544_v55 = vsel %vm3893_vm12, %v7535_v48, %v7526_v16  ;;  %v7527_v15 = vmul.f32 %v15181_v14, %v7518_v54  ;;  %v7488_v38 = vmul.f32 1.442695, %v7467_v58  ;;  %v10325_v52 = vpop.f32.mrb[227].mxu1 }
 0x839   :  { %v10393_v34 = vpop.eup %10392  ;;  %7554 = vst [vmem:[#allocation2 + $0x48] sm:$0xff] %v7544_v55  ;;  %10402 = vrcp.f32 %v7495_v57 }
 0x83a   :  { %v7545_v40 = vsel %vm3893_vm12, %v7536_v31, %v7527_v15  ;;  %v7510_v39 = vmul.f32 %v10393_v34, %v10381_v60  ;;  %10404 = vpow2.f32 %v7488_v38 }
 0x83b   :  { %v10395_v36 = vpop.eup %10394  ;;  %7555 = vst [vmem:[#allocation2 + $0x50] sm:$0xff] %v7545_v40 }
 0x83c   :  { %v10397_v9 = vpop.eup %10396  ;;  %v7519_v19 = vadd.f32 %v7510_v39, %v15669_v27  ;;  %v7511_v44 = vmul.f32 %v10395_v36, %v10383_v11 }
 0x83d   :  { %v7496_v59 = vadd.f32 1.0, %v10397_v9 }
 0x83e   :  { %v10399_v50 = vpop.eup %10398  ;;  %v7528_v6 = vmul.f32 %v15181_v14, %v7519_v19  ;;  %v7520_v2 = vadd.f32 %v7511_v44, %v15670_v13 }
 0x83f   :  { %10406 = vrcp.f32 %v7496_v59  ;;  %v7497_v25 = vadd.f32 1.0, %v10399_v50  ;;  %v7542_v23 = vmul.f32 %v15181_v14, %v10399_v50 }
 0x840   :  { %v7546_v42 = vsel %vm3893_vm12, %v7537_v43, %v7528_v6  ;;  %v7529_v20 = vmul.f32 %v15181_v14, %v7520_v2 }
 0x841   :  { %v10401_v53 = vpop.eup %10400  ;;  %7556 = vst [vmem:[#allocation2 + $0x58] sm:$0xff] %v7546_v42  ;;  %10408 = vrcp.f32 %v7497_v25 }
 0x842   :  { %v7547_v7 = vsel %vm3893_vm12, %v7538_v29, %v7529_v20  ;;  %v7512_v45 = vmul.f32 %v10401_v53, %v10389_v41  ;;  %v7541_v41 = vmul.f32 %v15181_v14, %v10397_v9 }
 0x843   :  { %v10403_v30 = vpop.eup %10402  ;;  %7557 = vst [vmem:[#allocation2 + $0x60] sm:$0xff] %v7547_v7 }
 0x844   :  { %v10405_v8 = vpop.eup %10404  ;;  %v7521_v26 = vadd.f32 %v7512_v45, %v15671_v24  ;;  %v7513_v63 = vmul.f32 %v10403_v30, %v10391_v22 }
 0x845   :  { %v7498_v21 = vadd.f32 1.0, %v10405_v8  ;;  %v7543_v49 = vmul.f32 %v15181_v14, %v10405_v8 }
 0x846   :  { %v7530_v60 = vmul.f32 %v15181_v14, %v7521_v26  ;;  %v7522_v11 = vadd.f32 %v7513_v63, %v15672_v0 }
 0x847   :  { %10410 = vrcp.f32 %v7498_v21 }
 0x848   :  { %v7548_v46 = vsel %vm3893_vm12, %v7539_v5, %v7530_v60  ;;  %v7531_v10 = vmul.f32 %v15181_v14, %v7522_v11 }
 0x849   :  { %v10407_v62 = vpop.eup %10406  ;;  %7558 = vst [vmem:[#allocation2 + $0x68] sm:$0xff] %v7548_v46 }
 0x84a   :  { %v7549_v4 = vsel %vm3893_vm12, %v7540_v35, %v7531_v10  ;;  %v7514_v47 = vmul.f32 %v10407_v62, %v10397_v9 }
 0x84b   :  { %v10409_v12 = vpop.eup %10408  ;;  %7559 = vst [vmem:[#allocation2 + $0x70] sm:$0xff] %v7549_v4 }
 0x84c   :  { %v7523_v33 = vadd.f32 %v7514_v47, %v15673_v1  ;;  %v7515_v18 = vmul.f32 %v10409_v12, %v10399_v50 }
 0x84e   :  { %v7532_v61 = vmul.f32 %v15181_v14, %v7523_v33  ;;  %v7524_v28 = vadd.f32 %v7515_v18, %v15674_v51 }
 0x850   :  { %v7550_v56 = vsel %vm3893_vm12, %v7541_v41, %v7532_v61  ;;  %v7533_v3 = vmul.f32 %v15181_v14, %v7524_v28 }
 0x851   :  { %v10411_v22 = vpop.eup %10410  ;;  %7560 = vst [vmem:[#allocation2 + $0x78] sm:$0xff] %v7550_v56 }
 0x852   :  { %v7551_v16 = vsel %vm3893_vm12, %v7542_v23, %v7533_v3  ;;  %v7516_v48 = vmul.f32 %v10411_v22, %v10405_v8 }
 0x853   :  { %7561 = vst [vmem:[#allocation2 + $0x80] sm:$0xff] %v7551_v16 }
 0x854   :  { %v7525_v54 = vadd.f32 %v7516_v48, %v15675_v17 }
 0x856   :  { %v7534_v58 = vmul.f32 %v15181_v14, %v7525_v54 }
 0x858   :  { %v7552_v57 = vsel %vm3893_vm12, %v7543_v49, %v7534_v58 }
 0x859   :  { %7562 = vst [vmem:[#allocation2 + $0x88] sm:$0xff] %v7552_v57 }
 0x85a   :  { %10436 = shalt.err (!%p10433_p4)
}
 0x85b   :  { %s10437_s19 = scalar_lea.hbm %s15246_s6, 2304 }
 0x85c   :  { %p10438_p5 = scmp.ne.s32.totalorder %s15246_s6, %s10437_s19  ;;  %p10441_p6 = scmp.lt.u32.totalorder %s10437_s19, %s15246_s6 }
 0x85e   :  { %p10443_p7 = pnand %p10441_p6, %p10438_p5 }
 0x860   :  { %10446 = shalt.err (!%p10443_p7)
}
 0x861   :  { %s10453_s23 = smov 128   ;;  %s10454_s24 = smov 8  }
 0x862   :  { %7574 = dma.vmem_to_hbm [thread:$0]  %s7569_s15, 2304, %s15246_s6, [#allocation3], %s10453_s23, %s10453_s23, %s10454_s24  }
 0x863   :  { %10447 = dma.done.wait [#allocation3], 2304  }
 0x864   :  { %10448 = vsyncadd [#allocation3], 4294964992 }
 0x865   :  { %7578 = vsyncpa [#allocation3], 1 }

</bundles_post_ra>
